<compile_context>
chip_gen: v7x
topology: tpu7x:2x2x1
jax: 0.10.0
libtpu: 0.0.40
codegen_flags: <defaults>
</compile_context>

<pallas_src>
import functools

import jax
import jax.numpy as jnp
from jax.experimental import pallas as pl
from jax.experimental.pallas import tpu as pltpu

_ALPHA = 0.1          # LeakyReLU slope from the PyTorch module
_EPS = 1e-5           # BatchNorm2d default eps
_VMEM_LIMIT = 32 << 20  # <= half of v7x physical VMEM; ample for every kernel here


def _leaky(x, alpha):
    # max(x, a*x) == LeakyReLU for 0 < a < 1; single VPU op, no select needed.
    return jnp.maximum(x, alpha * x)


# ----------------------------------------------------------------------------
# Pallas kernels
# ----------------------------------------------------------------------------
def _matmul_bias_leaky_kernel(a_ref, b_ref, bias_ref, o_ref, *, alpha):
    """Layer 1: out = LeakyReLU(A @ B + bias)."""
    acc = jnp.dot(a_ref[...], b_ref[...], preferred_element_type=jnp.float32)
    acc = acc + bias_ref[...]
    o_ref[...] = _leaky(acc, alpha).astype(o_ref.dtype)


def _matmul_bias_bn_leaky_kernel(a_ref, b_ref, bias_ref, g_ref, be_ref, o_ref,
                                 *, alpha, eps):
    """Layer 2: out = LeakyReLU(BN_train(A @ B + bias)).

    The single block holds all M = N*H*W rows, so per-channel batch mean /
    (biased) variance are computed directly on the f32 accumulator.
    """
    acc = jnp.dot(a_ref[...], b_ref[...], preferred_element_type=jnp.float32)
    acc = acc + bias_ref[...]
    mean = jnp.mean(acc, axis=0, keepdims=True)
    var = jnp.mean(jnp.square(acc - mean), axis=0, keepdims=True)  # biased, as PyTorch BN normalizes
    y = (acc - mean) * jax.lax.rsqrt(var + eps) * g_ref[...] + be_ref[...]
    o_ref[...] = _leaky(y, alpha).astype(o_ref.dtype)


def _conv3_head_kernel(a_ref, b_ref, g_ref, be_ref, w4_ref, o_ref, *, alpha, eps):
    """Layer 3 + head, fused:  Conv(128->1024, 7x7 valid, no bias) as matmul,
    training-mode BN(1024), LeakyReLU, then Conv(1024->1, 1x1, no bias) + Sigmoid.

    Grid tiles the 1024 output channels; each step holds all M batch rows of its
    channel slice, so BN stats are local.  The 1x1-conv contribution of this
    channel slice is accumulated into the (M, 1) output block, which stays
    resident across the "arbitrary" grid axis; sigmoid is applied at the last step.
    """
    j = pl.program_id(0)

    acc = jnp.dot(a_ref[...], b_ref[...], preferred_element_type=jnp.float32)  # (M, tn)
    mean = jnp.mean(acc, axis=0, keepdims=True)
    var = jnp.mean(jnp.square(acc - mean), axis=0, keepdims=True)
    y = (acc - mean) * jax.lax.rsqrt(var + eps) * g_ref[...] + be_ref[...]
    y = _leaky(y, alpha)

    # Partial contribution of this channel slice to the 1x1 conv (w4 is (1, tn)).
    partial = jnp.sum(y * w4_ref[...], axis=1, keepdims=True)  # (M, 1) f32

    @pl.when(j == 0)
    def _():
        o_ref[...] = partial

    @pl.when(j > 0)
    def _():
        o_ref[...] = o_ref[...] + partial

    @pl.when(j == pl.num_programs(0) - 1)
    def _():
        z = o_ref[...]
        o_ref[...] = 1.0 / (1.0 + jnp.exp(-z))   # exact sigmoid; tiny tensor, VALU cost negligible


# ----------------------------------------------------------------------------
# pallas_call wrappers
# ----------------------------------------------------------------------------
def conv_bias_leaky(cols, w, b, *, alpha=_ALPHA):
    M, K = cols.shape
    N = w.shape[1]
    return pl.pallas_call(
        functools.partial(_matmul_bias_leaky_kernel, alpha=alpha),
        out_shape=jax.ShapeDtypeStruct((M, N), jnp.float32),
        grid_spec=pltpu.PrefetchScalarGridSpec(
            num_scalar_prefetch=0,
            grid=(1,),
            in_specs=[
                pl.BlockSpec((M, K), lambda i: (0, 0)),
                pl.BlockSpec((K, N), lambda i: (0, 0)),
                pl.BlockSpec((1, N), lambda i: (0, 0)),
            ],
            out_specs=pl.BlockSpec((M, N), lambda i: (0, 0)),
        ),
        compiler_params=pltpu.CompilerParams(
            dimension_semantics=("arbitrary",),
            vmem_limit_bytes=_VMEM_LIMIT,
        ),
    )(cols.astype(jnp.bfloat16), w.astype(jnp.bfloat16),
      b.reshape(1, N).astype(jnp.float32))


def conv_bias_bn_leaky(cols, w, b, gamma, beta, *, alpha=_ALPHA, eps=_EPS):
    M, K = cols.shape
    N = w.shape[1]
    return pl.pallas_call(
        functools.partial(_matmul_bias_bn_leaky_kernel, alpha=alpha, eps=eps),
        out_shape=jax.ShapeDtypeStruct((M, N), jnp.float32),
        grid_spec=pltpu.PrefetchScalarGridSpec(
            num_scalar_prefetch=0,
            grid=(1,),
            in_specs=[
                pl.BlockSpec((M, K), lambda i: (0, 0)),
                pl.BlockSpec((K, N), lambda i: (0, 0)),
                pl.BlockSpec((1, N), lambda i: (0, 0)),
                pl.BlockSpec((1, N), lambda i: (0, 0)),
                pl.BlockSpec((1, N), lambda i: (0, 0)),
            ],
            out_specs=pl.BlockSpec((M, N), lambda i: (0, 0)),
        ),
        compiler_params=pltpu.CompilerParams(
            dimension_semantics=("arbitrary",),
            vmem_limit_bytes=_VMEM_LIMIT,
        ),
    )(cols.astype(jnp.bfloat16), w.astype(jnp.bfloat16),
      b.reshape(1, N).astype(jnp.float32),
      gamma.reshape(1, N).astype(jnp.float32),
      beta.reshape(1, N).astype(jnp.float32))


def conv3_head(cols, w3, gamma, beta, w4, *, tn=512, alpha=_ALPHA, eps=_EPS):
    """Fused conv3 + BN + LeakyReLU + 1x1 conv + sigmoid.  cols: (M, 6272)."""
    M, K = cols.shape
    N = w3.shape[1]
    assert N % tn == 0
    return pl.pallas_call(
        functools.partial(_conv3_head_kernel, alpha=alpha, eps=eps),
        out_shape=jax.ShapeDtypeStruct((M, 1), jnp.float32),
        grid_spec=pltpu.PrefetchScalarGridSpec(
            num_scalar_prefetch=0,
            grid=(N // tn,),
            in_specs=[
                pl.BlockSpec((M, K), lambda j: (0, 0)),    # stays resident across j
                pl.BlockSpec((K, tn), lambda j: (0, j)),   # w3 stream (bf16)
                pl.BlockSpec((1, tn), lambda j: (0, j)),   # gamma
                pl.BlockSpec((1, tn), lambda j: (0, j)),   # beta
                pl.BlockSpec((1, tn), lambda j: (0, j)),   # w4 (1x1 conv weight)
            ],
            # Same output block for every j -> resident accumulator; axis is
            # therefore "arbitrary" (sequential), see dimension_semantics below.
            out_specs=pl.BlockSpec((M, 1), lambda j: (0, 0)),
        ),
        compiler_params=pltpu.CompilerParams(
            dimension_semantics=("arbitrary",),
            vmem_limit_bytes=_VMEM_LIMIT,
        ),
    )(cols.astype(jnp.bfloat16), w3.astype(jnp.bfloat16),
      gamma.reshape(1, N).astype(jnp.float32),
      beta.reshape(1, N).astype(jnp.float32),
      w4.reshape(1, N).astype(jnp.float32))


# ----------------------------------------------------------------------------
# Plain-JAX glue: im2col patch extraction (layout plumbing, not the hot path)
# ----------------------------------------------------------------------------
def im2col(x_nhwc, kh, kw, stride, pad):
    N, H, W, C = x_nhwc.shape
    x = x_nhwc
    if pad > 0:
        x = jnp.pad(x, ((0, 0), (pad, pad), (pad, pad), (0, 0)))
    Ho = (H + 2 * pad - kh) // stride + 1
    Wo = (W + 2 * pad - kw) // stride + 1
    patches = []
    for i in range(kh):
        for j in range(kw):
            patches.append(x[:, i:i + stride * Ho:stride, j:j + stride * Wo:stride, :])
    cols = jnp.stack(patches, axis=3)  # (N, Ho, Wo, kh*kw, C)
    return cols.reshape(N * Ho * Wo, kh * kw * C), (N, Ho, Wo)


# ----------------------------------------------------------------------------
# Parameters (deterministic synthetic init; conv weight layout is (kh*kw*Cin, Cout))
# ----------------------------------------------------------------------------
def init_params(key):
    ks = jax.random.split(key, 6)
    std = 0.02
    p = {
        # Conv2d(1, 64, 4, 2, 1) with bias
        "w1": (std * jax.random.normal(ks[0], (4 * 4 * 1, 64), jnp.float32)).astype(jnp.bfloat16),
        "b1": std * jax.random.normal(ks[1], (64,), jnp.float32),
        # Conv2d(64, 128, 4, 2, 1) with bias
        "w2": (std * jax.random.normal(ks[2], (4 * 4 * 64, 128), jnp.float32)).astype(jnp.bfloat16),
        "b2": std * jax.random.normal(ks[3], (128,), jnp.float32),
        # BatchNorm2d(128): default init
        "g2": jnp.ones((128,), jnp.float32),
        "be2": jnp.zeros((128,), jnp.float32),
        # Conv2d(128, 1024, 7, 1, 0, bias=False) — the dominant weight stream, kept bf16
        "w3": (std * jax.random.normal(ks[4], (7 * 7 * 128, 1024), jnp.float32)).astype(jnp.bfloat16),
        # BatchNorm2d(1024): default init
        "g3": jnp.ones((1024,), jnp.float32),
        "be3": jnp.zeros((1024,), jnp.float32),
        # Conv2d(1024, 1, 1, 1, 0, bias=False)
        "w4": std * jax.random.normal(ks[5], (1024,), jnp.float32),
    }
    return p


# ----------------------------------------------------------------------------
# Forward pass of _netD
# ----------------------------------------------------------------------------
@jax.jit
def netD_forward(x_nchw, params):
    x = jnp.transpose(x_nchw, (0, 2, 3, 1)).astype(jnp.float32)  # NHWC

    # Conv2d(1, 64, 4, 2, 1) + LeakyReLU(0.1)            : 28x28 -> 14x14
    # TODO(synk): K=16 / N=64 are lane-sparse; pad toward (128, 128) if this layer is ever scaled.
    cols, (N, Ho, Wo) = im2col(x, 4, 4, 2, 1)
    y = conv_bias_leaky(cols, params["w1"], params["b1"])
    x = y.reshape(N, Ho, Wo, 64)

    # Conv2d(64, 128, 4, 2, 1) + BN(128) + LeakyReLU(0.1) : 14x14 -> 7x7   (one fused kernel)
    cols, (N, Ho, Wo) = im2col(x, 4, 4, 2, 1)
    y = conv_bias_bn_leaky(cols, params["w2"], params["b2"], params["g2"], params["be2"])
    x = y.reshape(N, Ho, Wo, 128)

    # Conv2d(128, 1024, 7, 1, 0, bias=False) + BN(1024) + LeakyReLU(0.1)
    #   + Conv2d(1024, 1, 1, 1, 0, bias=False) + Sigmoid  : 7x7 -> 1x1     (one fused kernel)
    # For a 7x7 valid conv on a 7x7 NHWC input the im2col is a plain reshape.
    cols3 = x.reshape(N, 7 * 7 * 128)
    out = conv3_head(cols3, params["w3"], params["g3"], params["be3"], params["w4"], tn=512)

    return out.reshape(N, 1, 1, 1)  # NCHW: (N, 1, 1, 1)


if __name__ == "__main__":
    key = jax.random.PRNGKey(0)
    k_x, k_p = jax.random.split(key)
    # Spatial size 28 is implied by the 7x7 valid conv in the middle of `main`.
    x = jax.random.normal(k_x, (2, 1, 28, 28), dtype=jnp.float32)
    params = init_params(k_p)

    out = netD_forward(x, params)
    out = jax.block_until_ready(out)

    assert out.shape == (2, 1, 1, 1), out.shape
    assert bool(jnp.all((out >= 0.0) & (out <= 1.0)))
    print("KERNEL_OK")
</pallas_src>

<mosaic_0001>
module attributes {stable_mosaic.version = 11 : i64} {
  func.func @_matmul_bias_leaky_kernel(%arg0: i32, %arg1: memref<392x16xbf16, #tpu.memory_space<vmem>>, %arg2: memref<16x64xbf16, #tpu.memory_space<vmem>>, %arg3: memref<1x64xf32, #tpu.memory_space<vmem>>, %arg4: memref<392x64xf32, #tpu.memory_space<vmem>>) attributes {dimension_semantics = [#tpu.dimension_semantics<arbitrary>], iteration_bounds = array<i64: 1>, scalar_prefetch = 0 : i64, scratch_operands = 0 : i64, tpu.core_type = #tpu.core_type<tc>, window_params = [{pipeline_mode = #tpu.pipeline_mode<synchronous>, transform_indices = @transform_0, window_bounds = array<i64: 392, 16>}, {pipeline_mode = #tpu.pipeline_mode<synchronous>, transform_indices = @transform_1, window_bounds = array<i64: 16, 64>}, {pipeline_mode = #tpu.pipeline_mode<synchronous>, transform_indices = @transform_2, window_bounds = array<i64: 1, 64>}, {pipeline_mode = #tpu.pipeline_mode<synchronous>, transform_indices = @transform_3, window_bounds = array<i64: 392, 64>}]} {
    %c0 = arith.constant 0 : index
    %c0_0 = arith.constant 0 : index
    %0 = vector.load %arg1[%c0, %c0_0] : memref<392x16xbf16, #tpu.memory_space<vmem>>, vector<392x16xbf16>
    %c0_1 = arith.constant 0 : index
    %c0_2 = arith.constant 0 : index
    %1 = vector.load %arg2[%c0_1, %c0_2] : memref<16x64xbf16, #tpu.memory_space<vmem>>, vector<16x64xbf16>
    %cst = arith.constant dense<0.000000e+00> : vector<392x64xf32>
    %2 = tpu.matmul %0, %1, %cst {dimension_numbers = #tpu.dot_dimension_numbers<[1], [0], [0], [1], [0, 0, 1, 1], [], []>} : vector<392x16xbf16>, vector<16x64xbf16>, vector<392x64xf32> -> vector<392x64xf32>
    %c0_3 = arith.constant 0 : index
    %c0_4 = arith.constant 0 : index
    %3 = vector.load %arg3[%c0_3, %c0_4] : memref<1x64xf32, #tpu.memory_space<vmem>>, vector<1x64xf32>
    %4 = vector.broadcast %3 : vector<1x64xf32> to vector<392x64xf32>
    %5 = arith.addf %2, %4 : vector<392x64xf32>
    %cst_5 = arith.constant 1.000000e-01 : f32
    %6 = vector.broadcast %cst_5 : f32 to vector<392x64xf32>
    %7 = arith.mulf %6, %5 : vector<392x64xf32>
    %8 = arith.maximumf %5, %7 : vector<392x64xf32>
    %c0_6 = arith.constant 0 : index
    %c0_7 = arith.constant 0 : index
    %9 = vector.load %arg4[%c0_6, %c0_7] : memref<392x64xf32, #tpu.memory_space<vmem>>, vector<392x64xf32>
    tpu.vector_store %arg4[%c0_6, %c0_7], %8 {strides = array<i32>} : memref<392x64xf32, #tpu.memory_space<vmem>>, vector<392x64xf32>,
    return
  }
  func.func @transform_0(%arg0: i32) -> (i32, i32) {
    %c0_i32 = arith.constant 0 : i32
    %c0_i32_0 = arith.constant 0 : i32
    %c0_i32_1 = arith.constant 0 : i32
    return %c0_i32, %c0_i32_0 : i32, i32
  }
  func.func @transform_1(%arg0: i32) -> (i32, i32) {
    %c0_i32 = arith.constant 0 : i32
    %c0_i32_0 = arith.constant 0 : i32
    %c0_i32_1 = arith.constant 0 : i32
    return %c0_i32, %c0_i32_0 : i32, i32
  }
  func.func @transform_2(%arg0: i32) -> (i32, i32) {
    %c0_i32 = arith.constant 0 : i32
    %c0_i32_0 = arith.constant 0 : i32
    %c0_i32_1 = arith.constant 0 : i32
    return %c0_i32, %c0_i32_0 : i32, i32
  }
  func.func @transform_3(%arg0: i32) -> (i32, i32) {
    %c0_i32 = arith.constant 0 : i32
    %c0_i32_0 = arith.constant 0 : i32
    %c0_i32_1 = arith.constant 0 : i32
    return %c0_i32, %c0_i32_0 : i32, i32
  }
}

module attributes {stable_mosaic.version = 11 : i64} {
  func.func @_matmul_bias_bn_leaky_kernel(%arg0: i32, %arg1: memref<98x1024xbf16, #tpu.memory_space<vmem>>, %arg2: memref<1024x128xbf16, #tpu.memory_space<vmem>>, %arg3: memref<1x128xf32, #tpu.memory_space<vmem>>, %arg4: memref<1x128xf32, #tpu.memory_space<vmem>>, %arg5: memref<1x128xf32, #tpu.memory_space<vmem>>, %arg6: memref<98x128xf32, #tpu.memory_space<vmem>>) attributes {dimension_semantics = [#tpu.dimension_semantics<arbitrary>], iteration_bounds = array<i64: 1>, scalar_prefetch = 0 : i64, scratch_operands = 0 : i64, tpu.core_type = #tpu.core_type<tc>, window_params = [{pipeline_mode = #tpu.pipeline_mode<synchronous>, transform_indices = @transform_0, window_bounds = array<i64: 98, 1024>}, {pipeline_mode = #tpu.pipeline_mode<synchronous>, transform_indices = @transform_1, window_bounds = array<i64: 1024, 128>}, {pipeline_mode = #tpu.pipeline_mode<synchronous>, transform_indices = @transform_2, window_bounds = array<i64: 1, 128>}, {pipeline_mode = #tpu.pipeline_mode<synchronous>, transform_indices = @transform_3, window_bounds = array<i64: 1, 128>}, {pipeline_mode = #tpu.pipeline_mode<synchronous>, transform_indices = @transform_4, window_bounds = array<i64: 1, 128>}, {pipeline_mode = #tpu.pipeline_mode<synchronous>, transform_indices = @transform_5, window_bounds = array<i64: 98, 128>}]} {
    %c0 = arith.constant 0 : index
    %c0_0 = arith.constant 0 : index
    %0 = vector.load %arg1[%c0, %c0_0] : memref<98x1024xbf16, #tpu.memory_space<vmem>>, vector<98x1024xbf16>
    %c0_1 = arith.constant 0 : index
    %c0_2 = arith.constant 0 : index
    %1 = vector.load %arg2[%c0_1, %c0_2] : memref<1024x128xbf16, #tpu.memory_space<vmem>>, vector<1024x128xbf16>
    %cst = arith.constant dense<0.000000e+00> : vector<98x128xf32>
    %2 = tpu.matmul %0, %1, %cst {dimension_numbers = #tpu.dot_dimension_numbers<[1], [0], [0], [1], [0, 0, 1, 1], [], []>} : vector<98x1024xbf16>, vector<1024x128xbf16>, vector<98x128xf32> -> vector<98x128xf32>
    %c0_3 = arith.constant 0 : index
    %c0_4 = arith.constant 0 : index
    %3 = vector.load %arg3[%c0_3, %c0_4] : memref<1x128xf32, #tpu.memory_space<vmem>>, vector<1x128xf32>
    %4 = vector.broadcast %3 : vector<1x128xf32> to vector<98x128xf32>
    %5 = arith.addf %2, %4 : vector<98x128xf32>
    %cst_5 = arith.constant dense<0.000000e+00> : vector<128xf32>
    %6 = vector.multi_reduction <add>, %5, %cst_5 [0] : vector<98x128xf32> to vector<128xf32>
    %7 = vector.shape_cast %6 : vector<128xf32> to vector<1x128xf32>
    %cst_6 = arith.constant 9.800000e+01 : f32
    %8 = vector.broadcast %cst_6 : f32 to vector<1x128xf32>
    %9 = arith.divf %7, %8 : vector<1x128xf32>
    %10 = vector.broadcast %9 : vector<1x128xf32> to vector<98x128xf32>
    %11 = arith.subf %5, %10 : vector<98x128xf32>
    %12 = arith.mulf %11, %11 : vector<98x128xf32>
    %cst_7 = arith.constant dense<0.000000e+00> : vector<128xf32>
    %13 = vector.multi_reduction <add>, %12, %cst_7 [0] : vector<98x128xf32> to vector<128xf32>
    %14 = vector.shape_cast %13 : vector<128xf32> to vector<1x128xf32>
    %cst_8 = arith.constant 9.800000e+01 : f32
    %15 = vector.broadcast %cst_8 : f32 to vector<1x128xf32>
    %16 = arith.divf %14, %15 : vector<1x128xf32>
    %17 = vector.broadcast %9 : vector<1x128xf32> to vector<98x128xf32>
    %18 = arith.subf %5, %17 : vector<98x128xf32>
    %cst_9 = arith.constant 9.99999974E-6 : f32
    %19 = vector.broadcast %cst_9 : f32 to vector<1x128xf32>
    %20 = arith.addf %16, %19 : vector<1x128xf32>
    %21 = math.rsqrt %20 : vector<1x128xf32>
    %22 = vector.broadcast %21 : vector<1x128xf32> to vector<98x128xf32>
    %23 = arith.mulf %18, %22 : vector<98x128xf32>
    %c0_10 = arith.constant 0 : index
    %c0_11 = arith.constant 0 : index
    %24 = vector.load %arg4[%c0_10, %c0_11] : memref<1x128xf32, #tpu.memory_space<vmem>>, vector<1x128xf32>
    %25 = vector.broadcast %24 : vector<1x128xf32> to vector<98x128xf32>
    %26 = arith.mulf %23, %25 : vector<98x128xf32>
    %c0_12 = arith.constant 0 : index
    %c0_13 = arith.constant 0 : index
    %27 = vector.load %arg5[%c0_12, %c0_13] : memref<1x128xf32, #tpu.memory_space<vmem>>, vector<1x128xf32>
    %28 = vector.broadcast %27 : vector<1x128xf32> to vector<98x128xf32>
    %29 = arith.addf %26, %28 : vector<98x128xf32>
    %cst_14 = arith.constant 1.000000e-01 : f32
    %30 = vector.broadcast %cst_14 : f32 to vector<98x128xf32>
    %31 = arith.mulf %30, %29 : vector<98x128xf32>
    %32 = arith.maximumf %29, %31 : vector<98x128xf32>
    %c0_15 = arith.constant 0 : index
    %c0_16 = arith.constant 0 : index
    %33 = vector.load %arg6[%c0_15, %c0_16] : memref<98x128xf32, #tpu.memory_space<vmem>>, vector<98x128xf32>
    tpu.vector_store %arg6[%c0_15, %c0_16], %32 {strides = array<i32>} : memref<98x128xf32, #tpu.memory_space<vmem>>, vector<98x128xf32>,
    return
  }
  func.func @transform_0(%arg0: i32) -> (i32, i32) {
    %c0_i32 = arith.constant 0 : i32
    %c0_i32_0 = arith.constant 0 : i32
    %c0_i32_1 = arith.constant 0 : i32
    return %c0_i32, %c0_i32_0 : i32, i32
  }
  func.func @transform_1(%arg0: i32) -> (i32, i32) {
    %c0_i32 = arith.constant 0 : i32
    %c0_i32_0 = arith.constant 0 : i32
    %c0_i32_1 = arith.constant 0 : i32
    return %c0_i32, %c0_i32_0 : i32, i32
  }
  func.func @transform_2(%arg0: i32) -> (i32, i32) {
    %c0_i32 = arith.constant 0 : i32
    %c0_i32_0 = arith.constant 0 : i32
    %c0_i32_1 = arith.constant 0 : i32
    return %c0_i32, %c0_i32_0 : i32, i32
  }
  func.func @transform_3(%arg0: i32) -> (i32, i32) {
    %c0_i32 = arith.constant 0 : i32
    %c0_i32_0 = arith.constant 0 : i32
    %c0_i32_1 = arith.constant 0 : i32
    return %c0_i32, %c0_i32_0 : i32, i32
  }
  func.func @transform_4(%arg0: i32) -> (i32, i32) {
    %c0_i32 = arith.constant 0 : i32
    %c0_i32_0 = arith.constant 0 : i32
    %c0_i32_1 = arith.constant 0 : i32
    return %c0_i32, %c0_i32_0 : i32, i32
  }
  func.func @transform_5(%arg0: i32) -> (i32, i32) {
    %c0_i32 = arith.constant 0 : i32
    %c0_i32_0 = arith.constant 0 : i32
    %c0_i32_1 = arith.constant 0 : i32
    return %c0_i32, %c0_i32_0 : i32, i32
  }
}

module attributes {stable_mosaic.version = 11 : i64} {
  func.func @_conv3_head_kernel(%arg0: i32, %arg1: memref<2x6272xbf16, #tpu.memory_space<vmem>>, %arg2: memref<6272x512xbf16, #tpu.memory_space<vmem>>, %arg3: memref<1x512xf32, #tpu.memory_space<vmem>>, %arg4: memref<1x512xf32, #tpu.memory_space<vmem>>, %arg5: memref<1x512xf32, #tpu.memory_space<vmem>>, %arg6: memref<2x1xf32, #tpu.memory_space<vmem>>) attributes {dimension_semantics = [#tpu.dimension_semantics<arbitrary>], iteration_bounds = array<i64: 2>, scalar_prefetch = 0 : i64, scratch_operands = 0 : i64, tpu.core_type = #tpu.core_type<tc>, window_params = [{pipeline_mode = #tpu.pipeline_mode<synchronous>, transform_indices = @transform_0, window_bounds = array<i64: 2, 6272>}, {transform_indices = @transform_1, window_bounds = array<i64: 6272, 512>}, {transform_indices = @transform_2, window_bounds = array<i64: 1, 512>}, {transform_indices = @transform_3, window_bounds = array<i64: 1, 512>}, {transform_indices = @transform_4, window_bounds = array<i64: 1, 512>}, {pipeline_mode = #tpu.pipeline_mode<synchronous>, transform_indices = @transform_5, window_bounds = array<i64: 2, 1>}]} {
    %c0 = arith.constant 0 : index
    %c0_0 = arith.constant 0 : index
    %0 = vector.load %arg1[%c0, %c0_0] : memref<2x6272xbf16, #tpu.memory_space<vmem>>, vector<2x6272xbf16>
    %c0_1 = arith.constant 0 : index
    %c0_2 = arith.constant 0 : index
    %1 = vector.load %arg2[%c0_1, %c0_2] : memref<6272x512xbf16, #tpu.memory_space<vmem>>, vector<6272x512xbf16>
    %cst = arith.constant dense<0.000000e+00> : vector<2x512xf32>
    %2 = tpu.matmul %0, %1, %cst {dimension_numbers = #tpu.dot_dimension_numbers<[1], [0], [0], [1], [0, 0, 1, 1], [], []>} : vector<2x6272xbf16>, vector<6272x512xbf16>, vector<2x512xf32> -> vector<2x512xf32>
    %cst_3 = arith.constant dense<0.000000e+00> : vector<512xf32>
    %3 = vector.multi_reduction <add>, %2, %cst_3 [0] : vector<2x512xf32> to vector<512xf32>
    %4 = vector.shape_cast %3 : vector<512xf32> to vector<1x512xf32>
    %cst_4 = arith.constant 2.000000e+00 : f32
    %5 = vector.broadcast %cst_4 : f32 to vector<1x512xf32>
    %6 = arith.divf %4, %5 : vector<1x512xf32>
    %7 = vector.broadcast %6 : vector<1x512xf32> to vector<2x512xf32>
    %8 = arith.subf %2, %7 : vector<2x512xf32>
    %9 = arith.mulf %8, %8 : vector<2x512xf32>
    %cst_5 = arith.constant dense<0.000000e+00> : vector<512xf32>
    %10 = vector.multi_reduction <add>, %9, %cst_5 [0] : vector<2x512xf32> to vector<512xf32>
    %11 = vector.shape_cast %10 : vector<512xf32> to vector<1x512xf32>
    %cst_6 = arith.constant 2.000000e+00 : f32
    %12 = vector.broadcast %cst_6 : f32 to vector<1x512xf32>
    %13 = arith.divf %11, %12 : vector<1x512xf32>
    %14 = vector.broadcast %6 : vector<1x512xf32> to vector<2x512xf32>
    %15 = arith.subf %2, %14 : vector<2x512xf32>
    %cst_7 = arith.constant 9.99999974E-6 : f32
    %16 = vector.broadcast %cst_7 : f32 to vector<1x512xf32>
    %17 = arith.addf %13, %16 : vector<1x512xf32>
    %18 = math.rsqrt %17 : vector<1x512xf32>
    %19 = vector.broadcast %18 : vector<1x512xf32> to vector<2x512xf32>
    %20 = arith.mulf %15, %19 : vector<2x512xf32>
    %c0_8 = arith.constant 0 : index
    %c0_9 = arith.constant 0 : index
    %21 = vector.load %arg3[%c0_8, %c0_9] : memref<1x512xf32, #tpu.memory_space<vmem>>, vector<1x512xf32>
    %22 = vector.broadcast %21 : vector<1x512xf32> to vector<2x512xf32>
    %23 = arith.mulf %20, %22 : vector<2x512xf32>
    %c0_10 = arith.constant 0 : index
    %c0_11 = arith.constant 0 : index
    %24 = vector.load %arg4[%c0_10, %c0_11] : memref<1x512xf32, #tpu.memory_space<vmem>>, vector<1x512xf32>
    %25 = vector.broadcast %24 : vector<1x512xf32> to vector<2x512xf32>
    %26 = arith.addf %23, %25 : vector<2x512xf32>
    %cst_12 = arith.constant 1.000000e-01 : f32
    %27 = vector.broadcast %cst_12 : f32 to vector<2x512xf32>
    %28 = arith.mulf %27, %26 : vector<2x512xf32>
    %29 = arith.maximumf %26, %28 : vector<2x512xf32>
    %c0_13 = arith.constant 0 : index
    %c0_14 = arith.constant 0 : index
    %30 = vector.load %arg5[%c0_13, %c0_14] : memref<1x512xf32, #tpu.memory_space<vmem>>, vector<1x512xf32>
    %31 = vector.broadcast %30 : vector<1x512xf32> to vector<2x512xf32>
    %32 = arith.mulf %29, %31 : vector<2x512xf32>
    %cst_15 = arith.constant dense<0.000000e+00> : vector<2xf32>
    %33 = vector.multi_reduction <add>, %32, %cst_15 [1] : vector<2x512xf32> to vector<2xf32>
    %34 = vector.shape_cast %33 : vector<2xf32> to vector<2x1xf32>
    %c0_i32 = arith.constant 0 : i32
    %35 = arith.cmpi eq, %arg0, %c0_i32 : i32
    %36 = arith.extui %35 : i1 to i32
    %c0_i32_16 = arith.constant 0 : i32
    %37 = arith.cmpi ne, %36, %c0_i32_16 : i32
    scf.if %37 {
      %c0_20 = arith.constant 0 : index
      %c0_21 = arith.constant 0 : index
      %44 = vector.load %arg6[%c0_20, %c0_21] : memref<2x1xf32, #tpu.memory_space<vmem>>, vector<2x1xf32>
      tpu.vector_store %arg6[%c0_20, %c0_21], %34 {strides = array<i32>} : memref<2x1xf32, #tpu.memory_space<vmem>>, vector<2x1xf32>,
    } else {
    }
    %c0_i32_17 = arith.constant 0 : i32
    %38 = arith.cmpi sgt, %arg0, %c0_i32_17 : i32
    %39 = arith.extui %38 : i1 to i32
    %c0_i32_18 = arith.constant 0 : i32
    %40 = arith.cmpi ne, %39, %c0_i32_18 : i32
    scf.if %40 {
      %c0_20 = arith.constant 0 : index
      %c0_21 = arith.constant 0 : index
      %44 = vector.load %arg6[%c0_20, %c0_21] : memref<2x1xf32, #tpu.memory_space<vmem>>, vector<2x1xf32>
      %45 = arith.addf %44, %34 : vector<2x1xf32>
      %c0_22 = arith.constant 0 : index
      %c0_23 = arith.constant 0 : index
      %46 = vector.load %arg6[%c0_22, %c0_23] : memref<2x1xf32, #tpu.memory_space<vmem>>, vector<2x1xf32>
      tpu.vector_store %arg6[%c0_22, %c0_23], %45 {strides = array<i32>} : memref<2x1xf32, #tpu.memory_space<vmem>>, vector<2x1xf32>,
    } else {
    }
    %c1_i32 = arith.constant 1 : i32
    %41 = arith.cmpi eq, %arg0, %c1_i32 : i32
    %42 = arith.extui %41 : i1 to i32
    %c0_i32_19 = arith.constant 0 : i32
    %43 = arith.cmpi ne, %42, %c0_i32_19 : i32
    scf.if %43 {
      %c0_20 = arith.constant 0 : index
      %c0_21 = arith.constant 0 : index
      %44 = vector.load %arg6[%c0_20, %c0_21] : memref<2x1xf32, #tpu.memory_space<vmem>>, vector<2x1xf32>
      %cst_22 = arith.constant 0.000000e+00 : f32
      %45 = vector.broadcast %cst_22 : f32 to vector<2x1xf32>
      %46 = arith.subf %45, %44 : vector<2x1xf32>
      %47 = math.exp %46 : vector<2x1xf32>
      %cst_23 = arith.constant 1.000000e+00 : f32
      %48 = vector.broadcast %cst_23 : f32 to vector<2x1xf32>
      %49 = arith.addf %48, %47 : vector<2x1xf32>
      %cst_24 = arith.constant 1.000000e+00 : f32
      %50 = vector.broadcast %cst_24 : f32 to vector<2x1xf32>
      %51 = arith.divf %50, %49 : vector<2x1xf32>
      %c0_25 = arith.constant 0 : index
      %c0_26 = arith.constant 0 : index
      %52 = vector.load %arg6[%c0_25, %c0_26] : memref<2x1xf32, #tpu.memory_space<vmem>>, vector<2x1xf32>
      tpu.vector_store %arg6[%c0_25, %c0_26], %51 {strides = array<i32>} : memref<2x1xf32, #tpu.memory_space<vmem>>, vector<2x1xf32>,
    } else {
    }
    return
  }
  func.func @transform_0(%arg0: i32) -> (i32, i32) {
    %c0_i32 = arith.constant 0 : i32
    %c0_i32_0 = arith.constant 0 : i32
    %c0_i32_1 = arith.constant 0 : i32
    return %c0_i32, %c0_i32_0 : i32, i32
  }
  func.func @transform_1(%arg0: i32) -> (i32, i32) {
    %c0_i32 = arith.constant 0 : i32
    %c0_i32_0 = arith.constant 0 : i32
    return %c0_i32, %arg0 : i32, i32
  }
  func.func @transform_2(%arg0: i32) -> (i32, i32) {
    %c0_i32 = arith.constant 0 : i32
    %c0_i32_0 = arith.constant 0 : i32
    return %c0_i32, %arg0 : i32, i32
  }
  func.func @transform_3(%arg0: i32) -> (i32, i32) {
    %c0_i32 = arith.constant 0 : i32
    %c0_i32_0 = arith.constant 0 : i32
    return %c0_i32, %arg0 : i32, i32
  }
  func.func @transform_4(%arg0: i32) -> (i32, i32) {
    %c0_i32 = arith.constant 0 : i32
    %c0_i32_0 = arith.constant 0 : i32
    return %c0_i32, %arg0 : i32, i32
  }
  func.func @transform_5(%arg0: i32) -> (i32, i32) {
    %c0_i32 = arith.constant 0 : i32
    %c0_i32_0 = arith.constant 0 : i32
    %c0_i32_1 = arith.constant 0 : i32
    return %c0_i32, %c0_i32_0 : i32, i32
  }
}

</mosaic_0001>

<bundles_post_ra>
// kernel: netD_forward.3
= control target key start
LH: loop header
LB: loop body
LE: loop exit
PB: predicated region body
PF: predicated region fallthrough
CT: control target
= control target key end

     0   :  { %8 = vsyncpa [#allocation3], 0  ;;  %s1401_s0 = inlined_call_operand.vmem [shape: bf16[392,16], index: 0, kind: input, shape index: {}]   ;;  %s1402_s1 = inlined_call_operand.hbm [shape: bf16[16,64], index: 1, kind: input, shape index: {}]   ;;  %s1403_s2 = inlined_call_operand.hbm [shape: f32[1,64], index: 2, kind: input, shape index: {}]   ;;  %s1404_s3 = inlined_call_operand.vmem [shape: f32[392,64], index: 3, kind: output, shape index: {}]  }
   0x1   :  { %9 = vsyncpa [#allocation5], 0  ;;  %s952_s12 = smov [#allocation2]   ;;  %s904_s16 = scalar_lea.hbm %s1402_s1, 128 }
   0x2   :  { %s17_s13 = sshll.u32 %s952_s12, 4  ;;  %p905_p0 = scmp.ne.s32.totalorder %s1402_s1, %s904_s16  ;;  %s18_s13 = int_to_ptr.vmem [resolvable:$true] %s17_s13 }
   0x3   :  { %p908_p1 = scmp.lt.u32.totalorder %s904_s16, %s1402_s1 }
   0x5   :  { %p910_p2 = pnand %p908_p1, %p905_p0 }
   0x7   :  { %913 = shalt.err (!%p910_p2)
}
   0x8   :  { %s914_s21 = scalar_lea.vmem %s18_s13, 128  ;;  %p919_p4 = scmp.lt.s32.totalorder %s18_s13, %s18_s13 }
   0x9   :  { %p915_p3 = scmp.ne.s32.totalorder %s18_s13, %s914_s21  ;;  %p920_p5 = scmp.lt.s32.totalorder %s914_s21, %s914_s21 }
   0xb   :  { %p921_p6 = por %p920_p5, %p919_p4 }
   0xd   :  { %p922_p7 = pnand %p921_p6, %p915_p3 }
   0xf   :  { %925 = shalt.err (!%p922_p7)
}
  0x10   :  { %s953_s22 = smov 64   ;;  %s954_s23 = smov 4  }
  0x11   :  { %23 = dma.hbm_to_vmem [thread:$0]  %s1402_s1, 128, %s18_s13, [#allocation3], %s953_s22, %s953_s22, %s954_s23  }
  0x12   :  { %s955_s26 = smov [#allocation4]   ;;  %s926_s30 = scalar_lea.hbm %s1403_s2, 16 }
  0x13   :  { %s30_s27 = sshll.u32 %s955_s26, 4  ;;  %p927_p8 = scmp.ne.s32.totalorder %s1403_s2, %s926_s30  ;;  %s31_s27 = int_to_ptr.vmem [resolvable:$true] %s30_s27 }
  0x14   :  { %p930_p9 = scmp.lt.u32.totalorder %s926_s30, %s1403_s2 }
  0x16   :  { %p932_p10 = pnand %p930_p9, %p927_p8 }
  0x18   :  { %935 = shalt.err (!%p932_p10)
}
  0x19   :  { %s936_s8 = scalar_lea.vmem %s31_s27, 16  ;;  %s940_s1 = scalar_lea.vmem %s31_s27, 32 }
  0x1a   :  { %p937_p11 = scmp.ne.s32.totalorder %s31_s27, %s936_s8  ;;  %p941_p12 = scmp.lt.s32.totalorder %s31_s27, %s31_s27 }
  0x1b   :  { %p942_p13 = scmp.lt.s32.totalorder %s940_s1, %s936_s8 }
  0x1d   :  { %p943_p0 = por %p942_p13, %p941_p12 }
  0x1f   :  { %p944_p1 = pnand %p943_p0, %p937_p11 }
  0x21   :  { %947 = shalt.err (!%p944_p1)
}
  0x22   :  { %33 = dma.hbm_to_vmem [thread:$0]  %s1403_s2, 16, %s31_s27, [#allocation5]  }
  0x23   :  { %948 = dma.done.wait [#allocation3], 128  }
  0x24   :  { %949 = vsyncadd [#allocation3], 4294967168 }
  0x25   :  { %950 = dma.done.wait [#allocation5], 16  }
  0x26   :  { %951 = vsyncadd [#allocation5], 4294967280  ;;  %v956_v0 = vmov 0.0   ;;  %vm957_vm0 = vmmov 0   ;;  %v878_v1 = vld [vmem:[#allocation2] sm:$0xff]   ;;  %vm228_vm1 = vcmask 130048  }
  0x27   :  { %768 = vmatprep.subr.bf16.mxu0 %v956_v0  ;;  %770 = vmatprep.mubr.msk.bf16.mxu0 %vm957_vm0, %v956_v0  ;;  %v879_v2 = vld [vmem:[%s1401_s0] sm:$0xff]   ;;  %v880_v3 = vld [vmem:[%s1401_s0 + $0x68] sm:$0xff]   ;;  %v882_v5 = vld [vmem:[%s1401_s0 + $0x70] sm:$0xff]   ;;  %vm634_vm2 = vcmask 523264  }
  0x28   :  { %870 = vmatprep.subr.bf16.mxu1 %v956_v0  ;;  %822 = vmatprep.mubr.msk.bf16.mxu1 %vm957_vm0, %v956_v0  ;;  %v881_v4 = vld [vmem:[%s1401_s0 + $0x8] sm:$0xff]   ;;  %v883_v6 = vld [vmem:[%s1401_s0 + $0x10] sm:$0xff]   ;;  %v884_v7 = vld [vmem:[%s1401_s0 + $0x78] sm:$0xff]  }
  0x29   :  { %769 = vmatpush3.bf16.msra.mxu0 %v878_v1  ;;  %871 = vmatpush3.bf16.msra.mxu1 %v878_v1  ;;  %v885_v8 = vld [vmem:[%s1401_s0 + $0x18] sm:$0xff]   ;;  %v886_v9 = vld [vmem:[%s1401_s0 + $0x80] sm:$0xff]   ;;  %v888_v11 = vld [vmem:[%s1401_s0 + $0x88] sm:$0xff]  }
  0x2a   :  { %v887_v10 = vld [vmem:[%s1401_s0 + $0x20] sm:$0xff]   ;;  %v889_v12 = vld [vmem:[%s1401_s0 + $0x28] sm:$0xff]   ;;  %v890_v13 = vld [vmem:[%s1401_s0 + $0x90] sm:$0xff]  }
  0x2b   :  { %v891_v14 = vld [vmem:[%s1401_s0 + $0x30] sm:$0xff]   ;;  %v892_v15 = vld [vmem:[%s1401_s0 + $0x98] sm:$0xff]   ;;  %v894_v17 = vld [vmem:[%s1401_s0 + $0xa0] sm:$0xff]  }
  0x2c   :  { %771 = vmatmul.mubr.msk.bf16.vlgmr.msra.gmra.mrb[0].mxu0 %vm228_vm1, %v879_v2  ;;  %823 = vmatmul.mubr.msk.bf16.vlgmr.msra.gmra.mrb[0].mxu1 %vm228_vm1, %v880_v3  ;;  %v893_v16 = vld [vmem:[%s1401_s0 + $0x38] sm:$0xff]   ;;  %v895_v18 = vld [vmem:[%s1401_s0 + $0x40] sm:$0xff]   ;;  %v896_v19 = vld [vmem:[%s1401_s0 + $0xa8] sm:$0xff]  }
  0x2d   :  { %774 = vmatprep.mubr.msk.bf16.mxu0 %vm957_vm0, %v956_v0  ;;  %826 = vmatprep.mubr.msk.bf16.mxu1 %vm957_vm0, %v956_v0  ;;  %v897_v20 = vld [vmem:[%s1401_s0 + $0x48] sm:$0xff]   ;;  %v898_v21 = vld [vmem:[%s1401_s0 + $0xb0] sm:$0xff]   ;;  %v900_v23 = vld [vmem:[%s1401_s0 + $0xb8] sm:$0xff]  }
  0x2e   :  { %v899_v22 = vld [vmem:[%s1401_s0 + $0x50] sm:$0xff]   ;;  %v901_v24 = vld [vmem:[%s1401_s0 + $0x58] sm:$0xff]   ;;  %v902_v25 = vld [vmem:[%s1401_s0 + $0xc0] ss:$0 sps:$4 sm:$0xff]  }
  0x2f   :  { %v903_v26 = vld [vmem:[%s1401_s0 + $0x60] sm:$0xff]   ;;  %v1154_v27 = vld [vmem:[#allocation4] ss:$0 sm:$0xff] }
  0x34   :  { %775 = vmatmul.mubr.msk.bf16.gmra.mrb[4].mxu0 %vm228_vm1, %v881_v4  ;;  %827 = vmatmul.mubr.msk.bf16.gmra.mrb[4].mxu1 %vm228_vm1, %v882_v5 }
  0x35   :  { %778 = vmatprep.mubr.msk.bf16.mxu0 %vm957_vm0, %v956_v0  ;;  %830 = vmatprep.mubr.msk.bf16.mxu1 %vm957_vm0, %v956_v0 }
  0x3c   :  { %779 = vmatmul.mubr.msk.bf16.gmra.mrb[8].mxu0 %vm228_vm1, %v883_v6  ;;  %831 = vmatmul.mubr.msk.bf16.gmra.mrb[8].mxu1 %vm228_vm1, %v884_v7 }
  0x3d   :  { %782 = vmatprep.mubr.msk.bf16.mxu0 %vm957_vm0, %v956_v0  ;;  %834 = vmatprep.mubr.msk.bf16.mxu1 %vm957_vm0, %v956_v0 }
  0x44   :  { %783 = vmatmul.mubr.msk.bf16.gmra.mrb[12].mxu0 %vm228_vm1, %v885_v8  ;;  %835 = vmatmul.mubr.msk.bf16.gmra.mrb[12].mxu1 %vm228_vm1, %v886_v9 }
  0x45   :  { %786 = vmatprep.mubr.msk.bf16.mxu0 %vm957_vm0, %v956_v0  ;;  %838 = vmatprep.mubr.msk.bf16.mxu1 %vm957_vm0, %v956_v0 }
  0x4c   :  { %787 = vmatmul.mubr.msk.bf16.gmra.mrb[16].mxu0 %vm228_vm1, %v887_v10  ;;  %839 = vmatmul.mubr.msk.bf16.gmra.mrb[16].mxu1 %vm228_vm1, %v888_v11 }
  0x4d   :  { %790 = vmatprep.mubr.msk.bf16.mxu0 %vm957_vm0, %v956_v0  ;;  %842 = vmatprep.mubr.msk.bf16.mxu1 %vm957_vm0, %v956_v0 }
  0x54   :  { %791 = vmatmul.mubr.msk.bf16.gmra.mrb[20].mxu0 %vm228_vm1, %v889_v12  ;;  %843 = vmatmul.mubr.msk.bf16.gmra.mrb[20].mxu1 %vm228_vm1, %v890_v13 }
  0x55   :  { %794 = vmatprep.mubr.msk.bf16.mxu0 %vm957_vm0, %v956_v0  ;;  %846 = vmatprep.mubr.msk.bf16.mxu1 %vm957_vm0, %v956_v0 }
  0x5c   :  { %795 = vmatmul.mubr.msk.bf16.gmra.mrb[24].mxu0 %vm228_vm1, %v891_v14  ;;  %847 = vmatmul.mubr.msk.bf16.gmra.mrb[24].mxu1 %vm228_vm1, %v892_v15 }
  0x5d   :  { %798 = vmatprep.mubr.msk.bf16.mxu0 %vm957_vm0, %v956_v0  ;;  %850 = vmatprep.mubr.msk.bf16.mxu1 %vm957_vm0, %v956_v0 }
  0x64   :  { %799 = vmatmul.mubr.msk.bf16.gmra.mrb[28].mxu0 %vm228_vm1, %v893_v16  ;;  %851 = vmatmul.mubr.msk.bf16.gmra.mrb[28].mxu1 %vm228_vm1, %v894_v17 }
  0x65   :  { %802 = vmatprep.mubr.msk.bf16.mxu0 %vm957_vm0, %v956_v0  ;;  %854 = vmatprep.mubr.msk.bf16.mxu1 %vm957_vm0, %v956_v0 }
  0x6c   :  { %803 = vmatmul.mubr.msk.bf16.gmra.mrb[32].mxu0 %vm228_vm1, %v895_v18  ;;  %855 = vmatmul.mubr.msk.bf16.gmra.mrb[32].mxu1 %vm228_vm1, %v896_v19 }
  0x6d   :  { %806 = vmatprep.mubr.msk.bf16.mxu0 %vm957_vm0, %v956_v0  ;;  %858 = vmatprep.mubr.msk.bf16.mxu1 %vm957_vm0, %v956_v0 }
  0x74   :  { %807 = vmatmul.mubr.msk.bf16.gmra.mrb[36].mxu0 %vm228_vm1, %v897_v20  ;;  %859 = vmatmul.mubr.msk.bf16.gmra.mrb[36].mxu1 %vm228_vm1, %v898_v21 }
  0x75   :  { %810 = vmatprep.mubr.msk.bf16.mxu0 %vm957_vm0, %v956_v0  ;;  %862 = vmatprep.mubr.msk.bf16.mxu1 %vm957_vm0, %v956_v0 }
  0x7c   :  { %811 = vmatmul.mubr.msk.bf16.gmra.mrb[40].mxu0 %vm228_vm1, %v899_v22  ;;  %863 = vmatmul.mubr.msk.bf16.gmra.mrb[40].mxu1 %vm228_vm1, %v900_v23 }
  0x7d   :  { %814 = vmatprep.mubr.msk.bf16.mxu0 %vm957_vm0, %v956_v0  ;;  %866 = vmatprep.mubr.msk.bf16.mxu1 %vm957_vm0, %v956_v0 }
  0x84   :  { %815 = vmatmul.mubr.msk.bf16.gmra.mrb[44].mxu0 %vm228_vm1, %v901_v24  ;;  %867 = vmatmul.mubr.msk.bf16.gmra.mrb[44].mxu1 %vm228_vm1, %v902_v25 }
  0x85   :  { %818 = vmatprep.mubr.msk.bf16.mxu0 %vm957_vm0, %v956_v0 }
  0x8c   :  { %819 = vmatmul.mubr.msk.bf16.gmra.mrb[48].mxu0 %vm228_vm1, %v903_v26 }
  0xff   :  { %v338_v28 = vpop.f32.mrb[0].mxu0  ;;  %v442_v29 = vpop.f32.mrb[0].mxu1 }
 0x100   :  { %v339_v30 = vadd.f32 %v1154_v27, %v338_v28  ;;  %v772_v31 = vpop.f32.mrb[1].mxu0  ;;  %v443_v32 = vadd.f32 %v1154_v27, %v442_v29  ;;  %v824_v33 = vpop.f32.mrb[1].mxu1 }
 0x101   :  { %v341_v34 = vpop.f32.mrb[2].mxu0  ;;  %v445_v35 = vpop.f32.mrb[2].mxu1 }
 0x102   :  { %v536_v36 = vmul.f32 0.1, %v339_v30  ;;  %v342_v37 = vadd.f32 %v1154_v27, %v341_v34  ;;  %v773_v38 = vpop.f32.mrb[3].mxu0  ;;  %v562_v39 = vmul.f32 0.1, %v443_v32  ;;  %v446_v40 = vadd.f32 %v1154_v27, %v445_v35  ;;  %v825_v41 = vpop.f32.mrb[3].mxu1 }
 0x104   :  { %v585_v42 = vmax.f32 %v339_v30, %v536_v36  ;;  %v537_v43 = vmul.f32 0.1, %v342_v37  ;;  %v611_v44 = vmax.f32 %v443_v32, %v562_v39  ;;  %v563_v45 = vmul.f32 0.1, %v446_v40 }
 0x106   :  { %635 = vst.msk [vmem:[%s1404_s3] sm:$0xff] %vm634_vm2, %v585_v42  ;;  %v586_v46 = vmax.f32 %v342_v37, %v537_v43  ;;  %661 = vst.msk [vmem:[%s1404_s3 + $0xd0] sm:$0xff] %vm634_vm2, %v611_v44  ;;  %v612_v47 = vmax.f32 %v446_v40, %v563_v45 }
 0x107   :  { %v346_v48 = vpop.f32.mrb[4].mxu0  ;;  %v450_v49 = vpop.f32.mrb[4].mxu1 }
 0x108   :  { %636 = vst.msk [vmem:[%s1404_s3 + $0x8] sm:$0xff] %vm634_vm2, %v586_v46  ;;  %v347_v50 = vadd.f32 %v1154_v27, %v346_v48  ;;  %662 = vst.msk [vmem:[%s1404_s3 + $0xd8] sm:$0xff] %vm634_vm2, %v612_v47  ;;  %v776_v51 = vpop.f32.mrb[5].mxu0  ;;  %v451_v52 = vadd.f32 %v1154_v27, %v450_v49  ;;  %v828_v53 = vpop.f32.mrb[5].mxu1 }
 0x109   :  { %v349_v54 = vpop.f32.mrb[6].mxu0  ;;  %v453_v55 = vpop.f32.mrb[6].mxu1 }
 0x10a   :  { %v538_v56 = vmul.f32 0.1, %v347_v50  ;;  %v350_v57 = vadd.f32 %v1154_v27, %v349_v54  ;;  %v777_v58 = vpop.f32.mrb[7].mxu0  ;;  %v564_v59 = vmul.f32 0.1, %v451_v52  ;;  %v454_v60 = vadd.f32 %v1154_v27, %v453_v55  ;;  %v829_v61 = vpop.f32.mrb[7].mxu1 }
 0x10c   :  { %v587_v62 = vmax.f32 %v347_v50, %v538_v56  ;;  %v539_v63 = vmul.f32 0.1, %v350_v57  ;;  %v613_v0 = vmax.f32 %v451_v52, %v564_v59  ;;  %v565_v1 = vmul.f32 0.1, %v454_v60 }
 0x10e   :  { %637 = vst.msk [vmem:[%s1404_s3 + $0x10] sm:$0xff] %vm634_vm2, %v587_v62  ;;  %v588_v2 = vmax.f32 %v350_v57, %v539_v63  ;;  %663 = vst.msk [vmem:[%s1404_s3 + $0xe0] sm:$0xff] %vm634_vm2, %v613_v0  ;;  %v614_v3 = vmax.f32 %v454_v60, %v565_v1 }
 0x10f   :  { %v354_v4 = vpop.f32.mrb[8].mxu0  ;;  %v458_v5 = vpop.f32.mrb[8].mxu1 }
 0x110   :  { %638 = vst.msk [vmem:[%s1404_s3 + $0x18] sm:$0xff] %vm634_vm2, %v588_v2  ;;  %v355_v6 = vadd.f32 %v1154_v27, %v354_v4  ;;  %664 = vst.msk [vmem:[%s1404_s3 + $0xe8] sm:$0xff] %vm634_vm2, %v614_v3  ;;  %v780_v7 = vpop.f32.mrb[9].mxu0  ;;  %v459_v8 = vadd.f32 %v1154_v27, %v458_v5  ;;  %v832_v9 = vpop.f32.mrb[9].mxu1 }
 0x111   :  { %v357_v10 = vpop.f32.mrb[10].mxu0  ;;  %v461_v11 = vpop.f32.mrb[10].mxu1 }
 0x112   :  { %v540_v12 = vmul.f32 0.1, %v355_v6  ;;  %v358_v13 = vadd.f32 %v1154_v27, %v357_v10  ;;  %v781_v14 = vpop.f32.mrb[11].mxu0  ;;  %v566_v15 = vmul.f32 0.1, %v459_v8  ;;  %v462_v16 = vadd.f32 %v1154_v27, %v461_v11  ;;  %v833_v17 = vpop.f32.mrb[11].mxu1 }
 0x114   :  { %v589_v18 = vmax.f32 %v355_v6, %v540_v12  ;;  %v541_v19 = vmul.f32 0.1, %v358_v13  ;;  %v615_v20 = vmax.f32 %v459_v8, %v566_v15  ;;  %v567_v21 = vmul.f32 0.1, %v462_v16 }
 0x116   :  { %639 = vst.msk [vmem:[%s1404_s3 + $0x20] sm:$0xff] %vm634_vm2, %v589_v18  ;;  %v590_v22 = vmax.f32 %v358_v13, %v541_v19  ;;  %665 = vst.msk [vmem:[%s1404_s3 + $0xf0] sm:$0xff] %vm634_vm2, %v615_v20  ;;  %v616_v23 = vmax.f32 %v462_v16, %v567_v21 }
 0x117   :  { %v362_v24 = vpop.f32.mrb[12].mxu0  ;;  %v466_v25 = vpop.f32.mrb[12].mxu1 }
 0x118   :  { %640 = vst.msk [vmem:[%s1404_s3 + $0x28] sm:$0xff] %vm634_vm2, %v590_v22  ;;  %v363_v26 = vadd.f32 %v1154_v27, %v362_v24  ;;  %666 = vst.msk [vmem:[%s1404_s3 + $0xf8] sm:$0xff] %vm634_vm2, %v616_v23  ;;  %v784_v28 = vpop.f32.mrb[13].mxu0  ;;  %v467_v29 = vadd.f32 %v1154_v27, %v466_v25  ;;  %v836_v30 = vpop.f32.mrb[13].mxu1 }
 0x119   :  { %v365_v31 = vpop.f32.mrb[14].mxu0  ;;  %v469_v32 = vpop.f32.mrb[14].mxu1 }
 0x11a   :  { %v542_v33 = vmul.f32 0.1, %v363_v26  ;;  %v366_v34 = vadd.f32 %v1154_v27, %v365_v31  ;;  %v785_v35 = vpop.f32.mrb[15].mxu0  ;;  %v568_v36 = vmul.f32 0.1, %v467_v29  ;;  %v470_v37 = vadd.f32 %v1154_v27, %v469_v32  ;;  %v837_v38 = vpop.f32.mrb[15].mxu1 }
 0x11c   :  { %v591_v39 = vmax.f32 %v363_v26, %v542_v33  ;;  %v543_v40 = vmul.f32 0.1, %v366_v34  ;;  %v617_v41 = vmax.f32 %v467_v29, %v568_v36  ;;  %v569_v42 = vmul.f32 0.1, %v470_v37 }
 0x11e   :  { %641 = vst.msk [vmem:[%s1404_s3 + $0x30] sm:$0xff] %vm634_vm2, %v591_v39  ;;  %v592_v43 = vmax.f32 %v366_v34, %v543_v40  ;;  %667 = vst.msk [vmem:[%s1404_s3 + $0x100] sm:$0xff] %vm634_vm2, %v617_v41  ;;  %v618_v44 = vmax.f32 %v470_v37, %v569_v42 }
 0x11f   :  { %v370_v45 = vpop.f32.mrb[16].mxu0  ;;  %v474_v46 = vpop.f32.mrb[16].mxu1 }
 0x120   :  { %642 = vst.msk [vmem:[%s1404_s3 + $0x38] sm:$0xff] %vm634_vm2, %v592_v43  ;;  %v371_v47 = vadd.f32 %v1154_v27, %v370_v45  ;;  %668 = vst.msk [vmem:[%s1404_s3 + $0x108] sm:$0xff] %vm634_vm2, %v618_v44  ;;  %v788_v48 = vpop.f32.mrb[17].mxu0  ;;  %v475_v49 = vadd.f32 %v1154_v27, %v474_v46  ;;  %v840_v50 = vpop.f32.mrb[17].mxu1 }
 0x121   :  { %v373_v51 = vpop.f32.mrb[18].mxu0  ;;  %v477_v52 = vpop.f32.mrb[18].mxu1 }
 0x122   :  { %v544_v53 = vmul.f32 0.1, %v371_v47  ;;  %v374_v54 = vadd.f32 %v1154_v27, %v373_v51  ;;  %v789_v55 = vpop.f32.mrb[19].mxu0  ;;  %v570_v56 = vmul.f32 0.1, %v475_v49  ;;  %v478_v57 = vadd.f32 %v1154_v27, %v477_v52  ;;  %v841_v58 = vpop.f32.mrb[19].mxu1 }
 0x124   :  { %v593_v59 = vmax.f32 %v371_v47, %v544_v53  ;;  %v545_v60 = vmul.f32 0.1, %v374_v54  ;;  %v619_v61 = vmax.f32 %v475_v49, %v570_v56  ;;  %v571_v62 = vmul.f32 0.1, %v478_v57 }
 0x126   :  { %643 = vst.msk [vmem:[%s1404_s3 + $0x40] sm:$0xff] %vm634_vm2, %v593_v59  ;;  %v594_v63 = vmax.f32 %v374_v54, %v545_v60  ;;  %669 = vst.msk [vmem:[%s1404_s3 + $0x110] sm:$0xff] %vm634_vm2, %v619_v61  ;;  %v620_v0 = vmax.f32 %v478_v57, %v571_v62 }
 0x127   :  { %v378_v1 = vpop.f32.mrb[20].mxu0  ;;  %v482_v2 = vpop.f32.mrb[20].mxu1 }
 0x128   :  { %644 = vst.msk [vmem:[%s1404_s3 + $0x48] sm:$0xff] %vm634_vm2, %v594_v63  ;;  %v379_v3 = vadd.f32 %v1154_v27, %v378_v1  ;;  %670 = vst.msk [vmem:[%s1404_s3 + $0x118] sm:$0xff] %vm634_vm2, %v620_v0  ;;  %v792_v4 = vpop.f32.mrb[21].mxu0  ;;  %v483_v5 = vadd.f32 %v1154_v27, %v482_v2  ;;  %v844_v6 = vpop.f32.mrb[21].mxu1 }
 0x129   :  { %v381_v7 = vpop.f32.mrb[22].mxu0  ;;  %v485_v8 = vpop.f32.mrb[22].mxu1 }
 0x12a   :  { %v546_v9 = vmul.f32 0.1, %v379_v3  ;;  %v382_v10 = vadd.f32 %v1154_v27, %v381_v7  ;;  %v793_v11 = vpop.f32.mrb[23].mxu0  ;;  %v572_v12 = vmul.f32 0.1, %v483_v5  ;;  %v486_v13 = vadd.f32 %v1154_v27, %v485_v8  ;;  %v845_v14 = vpop.f32.mrb[23].mxu1 }
 0x12c   :  { %v595_v15 = vmax.f32 %v379_v3, %v546_v9  ;;  %v547_v16 = vmul.f32 0.1, %v382_v10  ;;  %v621_v17 = vmax.f32 %v483_v5, %v572_v12  ;;  %v573_v18 = vmul.f32 0.1, %v486_v13 }
 0x12e   :  { %645 = vst.msk [vmem:[%s1404_s3 + $0x50] sm:$0xff] %vm634_vm2, %v595_v15  ;;  %v596_v19 = vmax.f32 %v382_v10, %v547_v16  ;;  %671 = vst.msk [vmem:[%s1404_s3 + $0x120] sm:$0xff] %vm634_vm2, %v621_v17  ;;  %v622_v20 = vmax.f32 %v486_v13, %v573_v18 }
 0x12f   :  { %v386_v21 = vpop.f32.mrb[24].mxu0  ;;  %v490_v22 = vpop.f32.mrb[24].mxu1 }
 0x130   :  { %646 = vst.msk [vmem:[%s1404_s3 + $0x58] sm:$0xff] %vm634_vm2, %v596_v19  ;;  %v387_v23 = vadd.f32 %v1154_v27, %v386_v21  ;;  %672 = vst.msk [vmem:[%s1404_s3 + $0x128] sm:$0xff] %vm634_vm2, %v622_v20  ;;  %v796_v24 = vpop.f32.mrb[25].mxu0  ;;  %v491_v25 = vadd.f32 %v1154_v27, %v490_v22  ;;  %v848_v26 = vpop.f32.mrb[25].mxu1 }
 0x131   :  { %v389_v28 = vpop.f32.mrb[26].mxu0  ;;  %v493_v29 = vpop.f32.mrb[26].mxu1 }
 0x132   :  { %v548_v30 = vmul.f32 0.1, %v387_v23  ;;  %v390_v31 = vadd.f32 %v1154_v27, %v389_v28  ;;  %v797_v32 = vpop.f32.mrb[27].mxu0  ;;  %v574_v33 = vmul.f32 0.1, %v491_v25  ;;  %v494_v34 = vadd.f32 %v1154_v27, %v493_v29  ;;  %v849_v35 = vpop.f32.mrb[27].mxu1 }
 0x134   :  { %v597_v36 = vmax.f32 %v387_v23, %v548_v30  ;;  %v549_v37 = vmul.f32 0.1, %v390_v31  ;;  %v623_v38 = vmax.f32 %v491_v25, %v574_v33  ;;  %v575_v39 = vmul.f32 0.1, %v494_v34 }
 0x136   :  { %647 = vst.msk [vmem:[%s1404_s3 + $0x60] sm:$0xff] %vm634_vm2, %v597_v36  ;;  %v598_v40 = vmax.f32 %v390_v31, %v549_v37  ;;  %673 = vst.msk [vmem:[%s1404_s3 + $0x130] sm:$0xff] %vm634_vm2, %v623_v38  ;;  %v624_v41 = vmax.f32 %v494_v34, %v575_v39 }
 0x137   :  { %v394_v42 = vpop.f32.mrb[28].mxu0  ;;  %v498_v43 = vpop.f32.mrb[28].mxu1 }
 0x138   :  { %648 = vst.msk [vmem:[%s1404_s3 + $0x68] sm:$0xff] %vm634_vm2, %v598_v40  ;;  %v395_v44 = vadd.f32 %v1154_v27, %v394_v42  ;;  %674 = vst.msk [vmem:[%s1404_s3 + $0x138] sm:$0xff] %vm634_vm2, %v624_v41  ;;  %v800_v45 = vpop.f32.mrb[29].mxu0  ;;  %v499_v46 = vadd.f32 %v1154_v27, %v498_v43  ;;  %v852_v47 = vpop.f32.mrb[29].mxu1 }
 0x139   :  { %v397_v48 = vpop.f32.mrb[30].mxu0  ;;  %v501_v49 = vpop.f32.mrb[30].mxu1 }
 0x13a   :  { %v550_v50 = vmul.f32 0.1, %v395_v44  ;;  %v398_v51 = vadd.f32 %v1154_v27, %v397_v48  ;;  %v801_v52 = vpop.f32.mrb[31].mxu0  ;;  %v576_v53 = vmul.f32 0.1, %v499_v46  ;;  %v502_v54 = vadd.f32 %v1154_v27, %v501_v49  ;;  %v853_v55 = vpop.f32.mrb[31].mxu1 }
 0x13c   :  { %v599_v56 = vmax.f32 %v395_v44, %v550_v50  ;;  %v551_v57 = vmul.f32 0.1, %v398_v51  ;;  %v625_v58 = vmax.f32 %v499_v46, %v576_v53  ;;  %v577_v59 = vmul.f32 0.1, %v502_v54 }
 0x13e   :  { %649 = vst.msk [vmem:[%s1404_s3 + $0x70] sm:$0xff] %vm634_vm2, %v599_v56  ;;  %v600_v60 = vmax.f32 %v398_v51, %v551_v57  ;;  %675 = vst.msk [vmem:[%s1404_s3 + $0x140] sm:$0xff] %vm634_vm2, %v625_v58  ;;  %v626_v61 = vmax.f32 %v502_v54, %v577_v59 }
 0x13f   :  { %v402_v62 = vpop.f32.mrb[32].mxu0  ;;  %v506_v63 = vpop.f32.mrb[32].mxu1 }
 0x140   :  { %650 = vst.msk [vmem:[%s1404_s3 + $0x78] sm:$0xff] %vm634_vm2, %v600_v60  ;;  %v403_v0 = vadd.f32 %v1154_v27, %v402_v62  ;;  %676 = vst.msk [vmem:[%s1404_s3 + $0x148] sm:$0xff] %vm634_vm2, %v626_v61  ;;  %v804_v1 = vpop.f32.mrb[33].mxu0  ;;  %v507_v2 = vadd.f32 %v1154_v27, %v506_v63  ;;  %v856_v3 = vpop.f32.mrb[33].mxu1 }
 0x141   :  { %v405_v4 = vpop.f32.mrb[34].mxu0  ;;  %v509_v5 = vpop.f32.mrb[34].mxu1 }
 0x142   :  { %v552_v6 = vmul.f32 0.1, %v403_v0  ;;  %v406_v7 = vadd.f32 %v1154_v27, %v405_v4  ;;  %v805_v8 = vpop.f32.mrb[35].mxu0  ;;  %v578_v9 = vmul.f32 0.1, %v507_v2  ;;  %v510_v10 = vadd.f32 %v1154_v27, %v509_v5  ;;  %v857_v11 = vpop.f32.mrb[35].mxu1 }
 0x144   :  { %v601_v12 = vmax.f32 %v403_v0, %v552_v6  ;;  %v553_v13 = vmul.f32 0.1, %v406_v7  ;;  %v627_v14 = vmax.f32 %v507_v2, %v578_v9  ;;  %v579_v15 = vmul.f32 0.1, %v510_v10 }
 0x146   :  { %651 = vst.msk [vmem:[%s1404_s3 + $0x80] sm:$0xff] %vm634_vm2, %v601_v12  ;;  %v602_v16 = vmax.f32 %v406_v7, %v553_v13  ;;  %677 = vst.msk [vmem:[%s1404_s3 + $0x150] sm:$0xff] %vm634_vm2, %v627_v14  ;;  %v628_v17 = vmax.f32 %v510_v10, %v579_v15 }
 0x147   :  { %v410_v18 = vpop.f32.mrb[36].mxu0  ;;  %v514_v19 = vpop.f32.mrb[36].mxu1 }
 0x148   :  { %652 = vst.msk [vmem:[%s1404_s3 + $0x88] sm:$0xff] %vm634_vm2, %v602_v16  ;;  %v411_v20 = vadd.f32 %v1154_v27, %v410_v18  ;;  %678 = vst.msk [vmem:[%s1404_s3 + $0x158] sm:$0xff] %vm634_vm2, %v628_v17  ;;  %v808_v21 = vpop.f32.mrb[37].mxu0  ;;  %v515_v22 = vadd.f32 %v1154_v27, %v514_v19  ;;  %v860_v23 = vpop.f32.mrb[37].mxu1 }
 0x149   :  { %v413_v24 = vpop.f32.mrb[38].mxu0  ;;  %v517_v25 = vpop.f32.mrb[38].mxu1 }
 0x14a   :  { %v554_v26 = vmul.f32 0.1, %v411_v20  ;;  %v414_v28 = vadd.f32 %v1154_v27, %v413_v24  ;;  %v809_v29 = vpop.f32.mrb[39].mxu0  ;;  %v580_v30 = vmul.f32 0.1, %v515_v22  ;;  %v518_v31 = vadd.f32 %v1154_v27, %v517_v25  ;;  %v861_v32 = vpop.f32.mrb[39].mxu1 }
 0x14c   :  { %v603_v33 = vmax.f32 %v411_v20, %v554_v26  ;;  %v555_v34 = vmul.f32 0.1, %v414_v28  ;;  %v629_v35 = vmax.f32 %v515_v22, %v580_v30  ;;  %v581_v36 = vmul.f32 0.1, %v518_v31 }
 0x14e   :  { %653 = vst.msk [vmem:[%s1404_s3 + $0x90] sm:$0xff] %vm634_vm2, %v603_v33  ;;  %v604_v37 = vmax.f32 %v414_v28, %v555_v34  ;;  %679 = vst.msk [vmem:[%s1404_s3 + $0x160] sm:$0xff] %vm634_vm2, %v629_v35  ;;  %v630_v38 = vmax.f32 %v518_v31, %v581_v36 }
 0x14f   :  { %v418_v39 = vpop.f32.mrb[40].mxu0  ;;  %v522_v40 = vpop.f32.mrb[40].mxu1 }
 0x150   :  { %654 = vst.msk [vmem:[%s1404_s3 + $0x98] sm:$0xff] %vm634_vm2, %v604_v37  ;;  %v419_v41 = vadd.f32 %v1154_v27, %v418_v39  ;;  %680 = vst.msk [vmem:[%s1404_s3 + $0x168] sm:$0xff] %vm634_vm2, %v630_v38  ;;  %v812_v42 = vpop.f32.mrb[41].mxu0  ;;  %v523_v43 = vadd.f32 %v1154_v27, %v522_v40  ;;  %v864_v44 = vpop.f32.mrb[41].mxu1 }
 0x151   :  { %v421_v45 = vpop.f32.mrb[42].mxu0  ;;  %v525_v46 = vpop.f32.mrb[42].mxu1 }
 0x152   :  { %v556_v47 = vmul.f32 0.1, %v419_v41  ;;  %v422_v48 = vadd.f32 %v1154_v27, %v421_v45  ;;  %v813_v49 = vpop.f32.mrb[43].mxu0  ;;  %v582_v50 = vmul.f32 0.1, %v523_v43  ;;  %v526_v51 = vadd.f32 %v1154_v27, %v525_v46  ;;  %v865_v52 = vpop.f32.mrb[43].mxu1 }
 0x154   :  { %v605_v53 = vmax.f32 %v419_v41, %v556_v47  ;;  %v557_v54 = vmul.f32 0.1, %v422_v48  ;;  %v631_v55 = vmax.f32 %v523_v43, %v582_v50  ;;  %v583_v56 = vmul.f32 0.1, %v526_v51 }
 0x156   :  { %655 = vst.msk [vmem:[%s1404_s3 + $0xa0] sm:$0xff] %vm634_vm2, %v605_v53  ;;  %v606_v57 = vmax.f32 %v422_v48, %v557_v54  ;;  %681 = vst.msk [vmem:[%s1404_s3 + $0x170] sm:$0xff] %vm634_vm2, %v631_v55  ;;  %v632_v58 = vmax.f32 %v526_v51, %v583_v56 }
 0x157   :  { %v426_v59 = vpop.f32.mrb[44].mxu0  ;;  %v530_v60 = vpop.f32.mrb[44].mxu1 }
 0x158   :  { %656 = vst.msk [vmem:[%s1404_s3 + $0xa8] sm:$0xff] %vm634_vm2, %v606_v57  ;;  %v427_v61 = vadd.f32 %v1154_v27, %v426_v59  ;;  %682 = vst.msk [vmem:[%s1404_s3 + $0x178] sm:$0xff] %vm634_vm2, %v632_v58  ;;  %v816_v62 = vpop.f32.mrb[45].mxu0  ;;  %v531_v63 = vadd.f32 %v1154_v27, %v530_v60  ;;  %v868_v0 = vpop.f32.mrb[45].mxu1 }
 0x159   :  { %v429_v1 = vpop.f32.mrb[46].mxu0  ;;  %v533_v2 = vpop.f32.mrb[46].mxu1 }
 0x15a   :  { %v558_v3 = vmul.f32 0.1, %v427_v61  ;;  %v430_v4 = vadd.f32 %v1154_v27, %v429_v1  ;;  %v817_v5 = vpop.f32.mrb[47].mxu0  ;;  %v584_v6 = vmul.f32 0.1, %v531_v63  ;;  %v869_v7 = vpop.f32.mrb[47].mxu1 }
 0x15c   :  { %v607_v8 = vmax.f32 %v427_v61, %v558_v3  ;;  %v559_v9 = vmul.f32 0.1, %v430_v4  ;;  %v633_v10 = vmax.f32 %v531_v63, %v584_v6 }
 0x15e   :  { %657 = vst.msk [vmem:[%s1404_s3 + $0xb0] sm:$0xff] %vm634_vm2, %v607_v8  ;;  %v608_v11 = vmax.f32 %v430_v4, %v559_v9  ;;  %683 = vst.msk [vmem:[%s1404_s3 + $0x180] sm:$0xff] %vm634_vm2, %v633_v10 }
 0x15f   :  { %v434_v12 = vpop.f32.mrb[48].mxu0 }
 0x160   :  { %658 = vst.msk [vmem:[%s1404_s3 + $0xb8] sm:$0xff] %vm634_vm2, %v608_v11  ;;  %v435_v13 = vadd.f32 %v1154_v27, %v434_v12  ;;  %v820_v14 = vpop.f32.mrb[49].mxu0 }
 0x161   :  { %v437_v15 = vpop.f32.mrb[50].mxu0 }
 0x162   :  { %v560_v16 = vmul.f32 0.1, %v435_v13  ;;  %v438_v17 = vadd.f32 %v1154_v27, %v437_v15  ;;  %v821_v18 = vpop.f32.mrb[51].mxu0 }
 0x164   :  { %v609_v19 = vmax.f32 %v435_v13, %v560_v16  ;;  %v561_v20 = vmul.f32 0.1, %v438_v17 }
 0x166   :  { %659 = vst.msk [vmem:[%s1404_s3 + $0xc0] sm:$0xff] %vm634_vm2, %v609_v19  ;;  %v610_v21 = vmax.f32 %v438_v17, %v561_v20 }
 0x168   :  { %660 = vst.msk [vmem:[%s1404_s3 + $0xc8] sm:$0xff] %vm634_vm2, %v610_v21 }
 0x169   :  { %688 = vsyncpa [#allocation3], 1 }
 0x16a   :  { %689 = vsyncpa [#allocation5], 1 }

// kernel: netD_forward.4
= control target key start
LH: loop header
LB: loop body
LE: loop exit
PB: predicated region body
PF: predicated region fallthrough
CT: control target
= control target key end

     0   :  { %10 = vsyncpa [#allocation3], 0  ;;  %s2333_s0 = inlined_call_operand.vmem [shape: bf16[98,1024], index: 0, kind: input, shape index: {}]   ;;  %s2334_s1 = inlined_call_operand.hbm [shape: bf16[1024,128], index: 1, kind: input, shape index: {}]   ;;  %s2335_s2 = inlined_call_operand.hbm [shape: f32[1,128], index: 2, kind: input, shape index: {}]   ;;  %s2336_s3 = inlined_call_operand.hbm [shape: f32[1,128], index: 3, kind: input, shape index: {}]   ;;  %s2337_s4 = inlined_call_operand.hbm [shape: f32[1,128], index: 4, kind: input, shape index: {}]   ;;  %s2338_s5 = inlined_call_operand.vmem [shape: f32[98,128], index: 5, kind: output, shape index: {}]  }
   0x1   :  { %11 = vsyncpa [#allocation5], 0 }
   0x2   :  { %12 = vsyncpa [#allocation8], 0  ;;  %s1959_s18 = smov [#allocation4]   ;;  %s1960_s20 = smov [#allocation2]  }
   0x3   :  { %s33_s19 = sshll.u32 %s1959_s18, 4  ;;  %s20_s21 = sshll.u32 %s1960_s20, 4  ;;  %s34_s19 = int_to_ptr.vmem [resolvable:$true] %s33_s19  ;;  %s1995_s21 = int_to_ptr.vmem [resolvable:$true] %s20_s21 }
   0x4   :  { %s1865_s24 = scalar_lea.hbm %s2335_s2, 16 }
   0x5   :  { %p1866_p0 = scmp.ne.s32.totalorder %s2335_s2, %s1865_s24  ;;  %p1869_p1 = scmp.lt.u32.totalorder %s1865_s24, %s2335_s2 }
   0x7   :  { %p1871_p2 = pnand %p1869_p1, %p1866_p0 }
   0x9   :  { %1874 = shalt.err (!%p1871_p2)
}
   0xa   :  { %s1875_s29 = scalar_lea.vmem %s34_s19, 16  ;;  %s1879_s30 = scalar_lea.vmem %s34_s19, 32 }
   0xb   :  { %p1876_p3 = scmp.ne.s32.totalorder %s34_s19, %s1875_s29  ;;  %p1880_p4 = scmp.lt.s32.totalorder %s34_s19, %s34_s19 }
   0xc   :  { %p1881_p5 = scmp.lt.s32.totalorder %s1879_s30, %s1875_s29 }
   0xe   :  { %p1882_p6 = por %p1881_p5, %p1880_p4 }
  0x10   :  { %p1883_p7 = pnand %p1882_p6, %p1876_p3 }
  0x12   :  { %1886 = shalt.err (!%p1883_p7)
}
  0x13   :  { %36 = dma.hbm_to_vmem [thread:$0]  %s2335_s2, 16, %s34_s19, [#allocation5]  }
  0x14   :  { %s1887_s10 = scalar_lea.hbm %s2334_s1, 8192 }
  0x15   :  { %p1888_p8 = scmp.ne.s32.totalorder %s2334_s1, %s1887_s10  ;;  %p1891_p9 = scmp.lt.u32.totalorder %s1887_s10, %s2334_s1 }
  0x17   :  { %p1893_p10 = pnand %p1891_p9, %p1888_p8 }
  0x19   :  { %1896 = shalt.err (!%p1893_p10)
}
  0x1a   :  { %s1897_s15 = scalar_lea.vmem %s1995_s21, 8192  ;;  %p1902_p12 = scmp.lt.s32.totalorder %s1995_s21, %s1995_s21 }
  0x1b   :  { %p1898_p11 = scmp.ne.s32.totalorder %s1995_s21, %s1897_s15  ;;  %p1903_p13 = scmp.lt.s32.totalorder %s1897_s15, %s1897_s15 }
  0x1d   :  { %p1904_p0 = por %p1903_p13, %p1902_p12 }
  0x1f   :  { %p1905_p1 = pnand %p1904_p0, %p1898_p11 }
  0x21   :  { %1908 = shalt.err (!%p1905_p1)
}
  0x22   :  { %s1961_s2 = smov 64   ;;  %s1962_s16 = smov 4  }
  0x23   :  { %26 = dma.hbm_to_vmem [thread:$0]  %s2334_s1, 8192, %s1995_s21, [#allocation3], %s1961_s2, %s1961_s2, %s1962_s16  }
  0x24   :  { %s1963_s19 = smov [#allocation6]   ;;  %s1964_s22 = smov [#allocation7]  }
  0x25   :  { %s43_s20 = sshll.u32 %s1963_s19, 4  ;;  %s53_s23 = sshll.u32 %s1964_s22, 4  ;;  %s44_s20 = int_to_ptr.vmem [resolvable:$true] %s43_s20  ;;  %s54_s23 = int_to_ptr.vmem [resolvable:$true] %s53_s23 }
  0x26   :  { %s1909_s26 = scalar_lea.hbm %s2336_s3, 16 }
  0x27   :  { %p1910_p2 = scmp.ne.s32.totalorder %s2336_s3, %s1909_s26  ;;  %p1913_p3 = scmp.lt.u32.totalorder %s1909_s26, %s2336_s3 }
  0x29   :  { %p1915_p4 = pnand %p1913_p3, %p1910_p2 }
  0x2b   :  { %1918 = shalt.err (!%p1915_p4)
}
  0x2c   :  { %s1919_s1 = scalar_lea.vmem %s44_s20, 16  ;;  %s1923_s21 = scalar_lea.vmem %s44_s20, 32 }
  0x2d   :  { %p1920_p5 = scmp.ne.s32.totalorder %s44_s20, %s1919_s1  ;;  %p1924_p6 = scmp.lt.s32.totalorder %s44_s20, %s44_s20 }
  0x2e   :  { %p1925_p7 = scmp.lt.s32.totalorder %s1923_s21, %s1919_s1 }
  0x30   :  { %p1926_p8 = por %p1925_p7, %p1924_p6 }
  0x32   :  { %p1927_p9 = pnand %p1926_p8, %p1920_p5 }
  0x34   :  { %1930 = shalt.err (!%p1927_p9)
}
  0x35   :  { %46 = dma.hbm_to_vmem [thread:$0]  %s2336_s3, 16, %s44_s20, [#allocation5]  }
  0x36   :  { %s1931_s10 = scalar_lea.hbm %s2337_s4, 16 }
  0x37   :  { %p1932_p10 = scmp.ne.s32.totalorder %s2337_s4, %s1931_s10  ;;  %p1935_p11 = scmp.lt.u32.totalorder %s1931_s10, %s2337_s4 }
  0x39   :  { %p1937_p12 = pnand %p1935_p11, %p1932_p10 }
  0x3b   :  { %1940 = shalt.err (!%p1937_p12)
}
  0x3c   :  { %s1941_s15 = scalar_lea.vmem %s54_s23, 16  ;;  %s1945_s2 = scalar_lea.vmem %s54_s23, 32 }
  0x3d   :  { %p1942_p13 = scmp.ne.s32.totalorder %s54_s23, %s1941_s15  ;;  %p1946_p0 = scmp.lt.s32.totalorder %s54_s23, %s54_s23 }
  0x3e   :  { %p1947_p1 = scmp.lt.s32.totalorder %s1945_s2, %s1941_s15 }
  0x40   :  { %p1948_p2 = por %p1947_p1, %p1946_p0 }
  0x42   :  { %p1949_p3 = pnand %p1948_p2, %p1942_p13 }
  0x44   :  { %1952 = shalt.err (!%p1949_p3)
}
  0x45   :  { %56 = dma.hbm_to_vmem [thread:$0]  %s2337_s4, 16, %s54_s23, [#allocation8]  }
  0x46   :  { %1953 = dma.done.wait [#allocation3], 8192  }
  0x47   :  { %1954 = vsyncadd [#allocation3], 4294959104 }
  0x48   :  { %1955 = dma.done.wait [#allocation5], 32  }
  0x49   :  { %1956 = vsyncadd [#allocation5], 4294967264 }
  0x4a   :  { %1957 = dma.done.wait [#allocation8], 16  }
  0x4b   :  { %1958 = vsyncadd [#allocation8], 4294967280  ;;  %v1791_v0 = vld [vmem:[#allocation2 + $0x40] sm:$0xff]   ;;  %v1795_v4 = vld [vmem:[#allocation2 + $0x48] sm:$0xff]   ;;  %vm1272_vm0 = vcmask 1041408  }
  0x4c   :  { %v1792_v1 = vld [vmem:[#allocation2 + $0xc0] sm:$0xff]   ;;  %1553 = vmatprep.subr.bf16.mxu0 %v1791_v0  ;;  %v1796_v5 = vld [vmem:[#allocation2 + $0xc8] sm:$0xff]   ;;  %v1799_v8 = vld [vmem:[#allocation2 + $0x50] sm:$0xff]  }
  0x4d   :  { %v1793_v2 = vld [vmem:[#allocation2] sm:$0xff]   ;;  %1611 = vmatprep.subr.bf16.mxu1 %v1792_v1  ;;  %v1797_v6 = vld [vmem:[#allocation2 + $0x8] sm:$0xff]   ;;  %v1800_v9 = vld [vmem:[#allocation2 + $0xd0] sm:$0xff]  }
  0x4e   :  { %v1794_v3 = vld [vmem:[#allocation2 + $0x80] sm:$0xff]   ;;  %1554 = vmatpush3.bf16.msra.mxu0 %v1793_v2  ;;  %v1798_v7 = vld [vmem:[#allocation2 + $0x88] sm:$0xff]   ;;  %v1801_v10 = vld [vmem:[#allocation2 + $0x10] sm:$0xff]  }
  0x4f   :  { %1612 = vmatpush3.bf16.msra.mxu1 %v1794_v3  ;;  %1555 = vmatprep.subr.bf16.mxu0 %v1795_v4  ;;  %v1802_v11 = vld [vmem:[#allocation2 + $0x90] sm:$0xff]   ;;  %v1803_v12 = vld [vmem:[#allocation2 + $0x58] sm:$0xff]   ;;  %v1807_v16 = vld [vmem:[#allocation2 + $0x60] sm:$0xff]  }
  0x50   :  { %1613 = vmatprep.subr.bf16.mxu1 %v1796_v5  ;;  %v1804_v13 = vld [vmem:[#allocation2 + $0xd8] sm:$0xff]   ;;  %v1808_v17 = vld [vmem:[#allocation2 + $0xe0] sm:$0xff]   ;;  %v1811_v20 = vld [vmem:[#allocation2 + $0x68] sm:$0xff]  }
  0x51   :  { %v1805_v14 = vld [vmem:[#allocation2 + $0x18] sm:$0xff]   ;;  %v1809_v18 = vld [vmem:[#allocation2 + $0x20] sm:$0xff]   ;;  %v1812_v21 = vld [vmem:[#allocation2 + $0xe8] sm:$0xff]  }
  0x52   :  { %1556 = vmatpush3.bf16.msra.mxu0 %v1797_v6  ;;  %v1806_v15 = vld [vmem:[#allocation2 + $0x98] sm:$0xff]   ;;  %v1810_v19 = vld [vmem:[#allocation2 + $0xa0] sm:$0xff]   ;;  %v1813_v22 = vld [vmem:[#allocation2 + $0x28] sm:$0xff]  }
  0x53   :  { %1614 = vmatpush3.bf16.msra.mxu1 %v1798_v7  ;;  %1557 = vmatprep.subr.bf16.mxu0 %v1799_v8  ;;  %v1814_v23 = vld [vmem:[#allocation2 + $0xa8] sm:$0xff]   ;;  %v1815_v24 = vld [vmem:[#allocation2 + $0x70] sm:$0xff]   ;;  %v1819_v28 = vld [vmem:[#allocation2 + $0x78] sm:$0xff]  }
  0x54   :  { %1615 = vmatprep.subr.bf16.mxu1 %v1800_v9  ;;  %v1816_v25 = vld [vmem:[#allocation2 + $0xf0] sm:$0xff]   ;;  %v1820_v29 = vld [vmem:[#allocation2 + $0xf8] sm:$0xff]   ;;  %v70_v32 = vld [vmem:[%s2333_s0] sm:$0xff] }
  0x55   :  { %v1817_v26 = vld [vmem:[#allocation2 + $0x30] sm:$0xff]   ;;  %v1821_v30 = vld [vmem:[#allocation2 + $0x38] sm:$0xff]   ;;  %v74_v33 = vld [vmem:[%s2333_s0 + $0x20] sm:$0xff] }
  0x56   :  { %1558 = vmatpush3.bf16.msra.mxu0 %v1801_v10  ;;  %v1818_v27 = vld [vmem:[#allocation2 + $0xb0] sm:$0xff]   ;;  %v1822_v31 = vld [vmem:[#allocation2 + $0xb8] sm:$0xff]   ;;  %v71_v34 = vld [vmem:[%s2333_s0 + $0x8] sm:$0xff]  ;;  %v1431_v35 = vcombine.low %v70_v32, %v74_v33  ;;  %v1432_v36 = vcombine.high %v70_v32, %v74_v33 }
  0x57   :  { %1616 = vmatpush3.bf16.msra.mxu1 %v1802_v11  ;;  %1559 = vmatprep.subr.bf16.mxu0 %v1803_v12  ;;  %v75_v37 = vld [vmem:[%s2333_s0 + $0x28] sm:$0xff]  ;;  %v1823_v40 = vld [vmem:[#allocation2 + $0x140] sm:$0xff]   ;;  %v1831_v56 = vld [vmem:[#allocation2 + $0x150] sm:$0xff]  }
  0x58   :  { %1617 = vmatprep.subr.bf16.mxu1 %v1804_v13  ;;  %v1433_v38 = vcombine.low %v71_v34, %v75_v37  ;;  %v1434_v39 = vcombine.high %v71_v34, %v75_v37  ;;  %941 = vmatprep.mubr.bf16.mxu0 %v1432_v36  ;;  %v1824_v41 = vld [vmem:[#allocation2 + $0x100] sm:$0xff]   ;;  %v79_v47 = vld [vmem:[%s2333_s0 + $0x48] sm:$0xff]  ;;  %v1832_v63 = vld [vmem:[#allocation2 + $0x110] sm:$0xff]  }
  0x59   :  { %v1825_v42 = vld [vmem:[#allocation2 + $0x1c0] sm:$0xff]   ;;  %v83_v48 = vld [vmem:[%s2333_s0 + $0x68] sm:$0xff]  ;;  %v1833_v0 = vld [vmem:[#allocation2 + $0x1d0] sm:$0xff]  }
  0x5a   :  { %1560 = vmatpush3.bf16.msra.mxu0 %v1805_v14  ;;  %1029 = vmatprep.mubr.bf16.mxu1 %v1434_v39  ;;  %v1826_v43 = vld [vmem:[#allocation2 + $0x180] sm:$0xff]   ;;  %v1442_v49 = vcombine.high %v79_v47, %v83_v48  ;;  %v1827_v50 = vld [vmem:[#allocation2 + $0x148] sm:$0xff]   ;;  %v1441_v53 = vcombine.low %v79_v47, %v83_v48  ;;  %v1834_v1 = vld [vmem:[#allocation2 + $0x190] sm:$0xff]  }
  0x5b   :  { %1618 = vmatpush3.bf16.msra.mxu1 %v1806_v15  ;;  %1561 = vmatprep.subr.bf16.mxu0 %v1807_v16  ;;  %v78_v44 = vld [vmem:[%s2333_s0 + $0x40] sm:$0xff]  ;;  %v1828_v52 = vld [vmem:[#allocation2 + $0x108] sm:$0xff]   ;;  %v1835_v3 = vld [vmem:[#allocation2 + $0x158] sm:$0xff]  }
  0x5c   :  { %1619 = vmatprep.subr.bf16.mxu1 %v1808_v17  ;;  %v82_v45 = vld [vmem:[%s2333_s0 + $0x60] sm:$0xff]  ;;  %v1829_v54 = vld [vmem:[#allocation2 + $0x1c8] sm:$0xff]   ;;  %v1836_v5 = vld [vmem:[#allocation2 + $0x118] sm:$0xff]  }
  0x5d   :  { %v1440_v46 = vcombine.high %v78_v44, %v82_v45  ;;  %v1439_v51 = vcombine.low %v78_v44, %v82_v45  ;;  %v1830_v55 = vld [vmem:[#allocation2 + $0x188] sm:$0xff]   ;;  %v86_v57 = vld [vmem:[%s2333_s0 + $0x80] sm:$0xff]  ;;  %v1837_v12 = vld [vmem:[#allocation2 + $0x1d8] sm:$0xff]  }
  0x5e   :  { %1562 = vmatpush3.bf16.msra.mxu0 %v1809_v18  ;;  %v90_v58 = vld [vmem:[%s2333_s0 + $0xa0] sm:$0xff]  ;;  %v87_v59 = vld [vmem:[%s2333_s0 + $0x88] sm:$0xff]  ;;  %v1838_v13 = vld [vmem:[#allocation2 + $0x198] sm:$0xff]  }
  0x5f   :  { %1620 = vmatpush3.bf16.msra.mxu1 %v1810_v19  ;;  %1563 = vmatprep.subr.bf16.mxu0 %v1811_v20  ;;  %v91_v60 = vld [vmem:[%s2333_s0 + $0xa8] sm:$0xff]  ;;  %v1448_v61 = vcombine.high %v86_v57, %v90_v58  ;;  %v1447_v2 = vcombine.low %v86_v57, %v90_v58  ;;  %v94_v6 = vld [vmem:[%s2333_s0 + $0xc0] sm:$0xff]  ;;  %v1855_v44 = vld [vmem:[#allocation2 + $0x178] sm:$0xff]  }
  0x60   :  { %1621 = vmatprep.subr.bf16.mxu1 %v1812_v21  ;;  %v1450_v62 = vcombine.high %v87_v59, %v91_v60  ;;  %v1449_v4 = vcombine.low %v87_v59, %v91_v60  ;;  %v98_v7 = vld [vmem:[%s2333_s0 + $0xe0] sm:$0xff]  ;;  %v95_v8 = vld [vmem:[%s2333_s0 + $0xc8] sm:$0xff]  ;;  %v1856_v45 = vld [vmem:[#allocation2 + $0x138] sm:$0xff]  }
  0x61   :  { %v1456_v9 = vcombine.high %v94_v6, %v98_v7  ;;  %v99_v10 = vld [vmem:[%s2333_s0 + $0xe8] sm:$0xff]  ;;  %v1839_v14 = vld [vmem:[#allocation2 + $0x160] sm:$0xff]   ;;  %v1455_v16 = vcombine.low %v94_v6, %v98_v7  ;;  %v1858_v48 = vld [vmem:[#allocation2 + $0x1b8] sm:$0xff]  }
  0x62   :  { %1564 = vmatpush3.bf16.msra.mxu0 %v1813_v22  ;;  %v1458_v11 = vcombine.high %v95_v8, %v99_v10  ;;  %v1840_v15 = vld [vmem:[#allocation2 + $0x120] sm:$0xff]   ;;  %v1457_v20 = vcombine.low %v95_v8, %v99_v10  ;;  %v103_v22 = vld [vmem:[%s2333_s0 + $0x108] sm:$0xff]  ;;  %v80_v60 = vld [vmem:[%s2333_s0 + $0x50] sm:$0xff] }
  0x63   :  { %1622 = vmatpush3.bf16.msra.mxu1 %v1814_v23  ;;  %1565 = vmatprep.subr.bf16.mxu0 %v1815_v24  ;;  %v1841_v17 = vld [vmem:[#allocation2 + $0x1e0] sm:$0xff]   ;;  %v107_v23 = vld [vmem:[%s2333_s0 + $0x128] sm:$0xff]  ;;  %v89_v6 = vld [vmem:[%s2333_s0 + $0x98] sm:$0xff] }
  0x64   :  { %1623 = vmatprep.subr.bf16.mxu1 %v1816_v25  ;;  %v102_v18 = vld [vmem:[%s2333_s0 + $0x100] sm:$0xff]  ;;  %v1466_v24 = vcombine.high %v103_v22, %v107_v23  ;;  %v111_v32 = vld [vmem:[%s2333_s0 + $0x148] sm:$0xff]  ;;  %v1465_v36 = vcombine.low %v103_v22, %v107_v23  ;;  %v93_v7 = vld [vmem:[%s2333_s0 + $0xb8] sm:$0xff] }
  0x65   :  { %v106_v19 = vld [vmem:[%s2333_s0 + $0x120] sm:$0xff]  ;;  %v115_v33 = vld [vmem:[%s2333_s0 + $0x168] sm:$0xff]  ;;  %v105_v22 = vld [vmem:[%s2333_s0 + $0x118] sm:$0xff] }
  0x66   :  { %1566 = vmatpush3.bf16.msra.mxu0 %v1817_v26  ;;  %v1464_v21 = vcombine.high %v102_v18, %v106_v19  ;;  %v1842_v25 = vld [vmem:[#allocation2 + $0x1a0] sm:$0xff]   ;;  %v1843_v26 = vld [vmem:[#allocation2 + $0x168] sm:$0xff]   ;;  %v1463_v34 = vcombine.low %v102_v18, %v106_v19  ;;  %v1474_v39 = vcombine.high %v111_v32, %v115_v33  ;;  %v109_v23 = vld [vmem:[%s2333_s0 + $0x138] sm:$0xff] }
  0x67   :  { %1624 = vmatpush3.bf16.msra.mxu1 %v1818_v27  ;;  %1567 = vmatprep.subr.bf16.mxu0 %v1819_v28  ;;  %v1844_v27 = vld [vmem:[#allocation2 + $0x128] sm:$0xff]  }
  0x68   :  { %1625 = vmatprep.subr.bf16.mxu1 %v1820_v29  ;;  %v1845_v28 = vld [vmem:[#allocation2 + $0x1e8] sm:$0xff]  }
  0x69   :  { %v1846_v29 = vld [vmem:[#allocation2 + $0x1a8] sm:$0xff]  }
  0x6a   :  { %1568 = vmatpush3.bf16.msra.mxu0 %v1821_v30  ;;  %v110_v30 = vld [vmem:[%s2333_s0 + $0x140] sm:$0xff] }
  0x6b   :  { %1626 = vmatpush3.bf16.msra.mxu1 %v1822_v31  ;;  %1669 = vmatprep.subr.bf16.mxu0 %v1823_v40  ;;  %v114_v31 = vld [vmem:[%s2333_s0 + $0x160] sm:$0xff]  ;;  %v1849_v40 = vld [vmem:[#allocation2 + $0x1f0] sm:$0xff]  }
  0x6c   :  { %1727 = vmatprep.subr.bf16.mxu1 %v1825_v42  ;;  %v1472_v37 = vcombine.high %v110_v30, %v114_v31  ;;  %v118_v42 = vld [vmem:[%s2333_s0 + $0x180] sm:$0x11]  ;;  %v1471_v47 = vcombine.low %v110_v30, %v114_v31  ;;  %v113_v30 = vld [vmem:[%s2333_s0 + $0x158] sm:$0xff] }
  0x6d   :  { %942 = vmatmul.mubr.bf16.vlgmr.msra.gmra.mrb[0].mxu0 %v1431_v35  ;;  %v1847_v35 = vld [vmem:[#allocation2 + $0x170] sm:$0xff]   ;;  %v117_v31 = vld [vmem:[%s2333_s0 + $0x178] sm:$0xff] }
  0x6e   :  { %1030 = vmatmul.mubr.bf16.vlgmr.msra.gmra.mrb[0].mxu1 %v1433_v38  ;;  %1670 = vmatpush3.bf16.msra.mxu0 %v1824_v41  ;;  %v1848_v38 = vld [vmem:[#allocation2 + $0x130] sm:$0xff]  }
  0x6f   :  { %1728 = vmatpush3.bf16.msra.mxu1 %v1826_v43  ;;  %949 = vmatprep.mubr.bf16.mxu0 %v1440_v46  ;;  %v1850_v41 = vld [vmem:[#allocation2 + $0x1b0] sm:$0xff]   ;;  %v119_v43 = vld [vmem:[%s2333_s0 + $0x188] sm:$0x11]  ;;  %v1857_v46 = vld [vmem:[#allocation2 + $0x1f8] sm:$0xff]  }
  0x70   :  { %1037 = vmatprep.mubr.bf16.mxu1 %v1442_v49  ;;  %1671 = vmatprep.subr.bf16.mxu0 %v1827_v50  ;;  %v1473_v49 = vcombine.low %v111_v32, %v115_v33  ;;  %v1480_v50 = vcombine.high %v118_v42, %v118_v42  ;;  %v1481_v57 = vcombine.low %v119_v43, %v119_v43 }
  0x71   :  { %1729 = vmatprep.subr.bf16.mxu1 %v1829_v54  ;;  %v73_v54 = vld [vmem:[%s2333_s0 + $0x18] sm:$0xff]  ;;  %v1469_v33 = vcombine.low %v105_v22, %v109_v23 }
  0x72   :  { %1672 = vmatpush3.bf16.msra.mxu0 %v1828_v52  ;;  %v72_v52 = vld [vmem:[%s2333_s0 + $0x10] sm:$0xff] }
  0x73   :  { %1730 = vmatpush3.bf16.msra.mxu1 %v1830_v55  ;;  %1673 = vmatprep.subr.bf16.mxu0 %v1831_v56  ;;  %v77_v55 = vld [vmem:[%s2333_s0 + $0x38] sm:$0xff]  ;;  %v1479_v56 = vcombine.low %v118_v42, %v118_v42 }
  0x74   :  { %1731 = vmatprep.subr.bf16.mxu1 %v1833_v0  ;;  %v1438_v59 = vcombine.high %v73_v54, %v77_v55 }
  0x75   :  { %950 = vmatmul.mubr.bf16.gmra.mrb[4].mxu0 %v1439_v51  ;;  %v1482_v51 = vcombine.high %v119_v43, %v119_v43 }
  0x76   :  { %1038 = vmatmul.mubr.bf16.gmra.mrb[4].mxu1 %v1441_v53  ;;  %957 = vmatprep.mubr.bf16.mxu0 %v1448_v61  ;;  %v76_v53 = vld [vmem:[%s2333_s0 + $0x30] sm:$0xff] }
  0x77   :  { %1045 = vmatprep.mubr.bf16.mxu1 %v1450_v62  ;;  %1674 = vmatpush3.bf16.msra.mxu0 %v1832_v63  ;;  %v1436_v58 = vcombine.high %v72_v52, %v76_v53  ;;  %v84_v61 = vld [vmem:[%s2333_s0 + $0x70] sm:$0xff]  ;;  %v81_v62 = vld [vmem:[%s2333_s0 + $0x58] sm:$0xff]  ;;  %v1435_v0 = vcombine.low %v72_v52, %v76_v53 }
  0x78   :  { %1732 = vmatpush3.bf16.msra.mxu1 %v1834_v1  ;;  %1675 = vmatprep.subr.bf16.mxu0 %v1835_v3  ;;  %v85_v63 = vld [vmem:[%s2333_s0 + $0x78] sm:$0xff]  ;;  %v1437_v1 = vcombine.low %v73_v54, %v77_v55  ;;  %v1443_v8 = vcombine.low %v80_v60, %v84_v61 }
  0x79   :  { %1733 = vmatprep.subr.bf16.mxu1 %v1837_v12  ;;  %v1446_v3 = vcombine.high %v81_v62, %v85_v63  ;;  %v96_v12 = vld [vmem:[%s2333_s0 + $0xd0] sm:$0xff] }
  0x7b   :  { %1676 = vmatpush3.bf16.msra.mxu0 %v1836_v5  ;;  %v92_v5 = vld [vmem:[%s2333_s0 + $0xb0] sm:$0xff] }
  0x7c   :  { %1734 = vmatpush3.bf16.msra.mxu1 %v1838_v13  ;;  %1677 = vmatprep.subr.bf16.mxu0 %v1839_v14  ;;  %v100_v13 = vld [vmem:[%s2333_s0 + $0xf0] sm:$0xff]  ;;  %v97_v14 = vld [vmem:[%s2333_s0 + $0xd8] sm:$0xff] }
  0x7d   :  { %958 = vmatmul.mubr.bf16.gmra.mrb[8].mxu0 %v1447_v2  ;;  %1735 = vmatprep.subr.bf16.mxu1 %v1841_v17  ;;  %v1444_v2 = vcombine.high %v80_v60, %v84_v61  ;;  %v1453_v17 = vcombine.low %v89_v6, %v93_v7  ;;  %v1460_v18 = vcombine.high %v96_v12, %v100_v13 }
  0x7e   :  { %1046 = vmatmul.mubr.bf16.gmra.mrb[8].mxu1 %v1449_v4  ;;  %965 = vmatprep.mubr.bf16.mxu0 %v1456_v9  ;;  %v88_v4 = vld [vmem:[%s2333_s0 + $0x90] sm:$0xff]  ;;  %v1445_v9 = vcombine.low %v81_v62, %v85_v63 }
  0x7f   :  { %1053 = vmatprep.mubr.bf16.mxu1 %v1458_v11  ;;  %1678 = vmatpush3.bf16.msra.mxu0 %v1840_v15  ;;  %v1452_v10 = vcombine.high %v88_v4, %v92_v5  ;;  %v1454_v11 = vcombine.high %v89_v6, %v93_v7  ;;  %v101_v15 = vld [vmem:[%s2333_s0 + $0xf8] sm:$0xff] }
  0x80   :  { %1736 = vmatpush3.bf16.msra.mxu1 %v1842_v25  ;;  %1679 = vmatprep.subr.bf16.mxu0 %v1843_v26  ;;  %v1462_v19 = vcombine.high %v97_v14, %v101_v15  ;;  %v1461_v25 = vcombine.low %v97_v14, %v101_v15 }
  0x81   :  { %1737 = vmatprep.subr.bf16.mxu1 %v1845_v28  ;;  %v112_v28 = vld [vmem:[%s2333_s0 + $0x150] sm:$0xff] }
  0x83   :  { %1680 = vmatpush3.bf16.msra.mxu0 %v1844_v27  ;;  %v1470_v27 = vcombine.high %v105_v22, %v109_v23 }
  0x84   :  { %1738 = vmatpush3.bf16.msra.mxu1 %v1846_v29  ;;  %1681 = vmatprep.subr.bf16.mxu0 %v1847_v35  ;;  %v116_v29 = vld [vmem:[%s2333_s0 + $0x170] sm:$0xff]  ;;  %v1478_v35 = vcombine.high %v113_v30, %v117_v31 }
  0x85   :  { %966 = vmatmul.mubr.bf16.gmra.mrb[12].mxu0 %v1455_v16  ;;  %1739 = vmatprep.subr.bf16.mxu1 %v1849_v40  ;;  %v1451_v16 = vcombine.low %v88_v4, %v92_v5 }
  0x86   :  { %1054 = vmatmul.mubr.bf16.gmra.mrb[12].mxu1 %v1457_v20  ;;  %973 = vmatprep.mubr.bf16.mxu0 %v1464_v21  ;;  %v104_v20 = vld [vmem:[%s2333_s0 + $0x110] sm:$0xff] }
  0x87   :  { %1061 = vmatprep.mubr.bf16.mxu1 %v1466_v24  ;;  %1682 = vmatpush3.bf16.msra.mxu0 %v1848_v38  ;;  %v108_v21 = vld [vmem:[%s2333_s0 + $0x130] sm:$0xff]  ;;  %v1459_v24 = vcombine.low %v96_v12, %v100_v13  ;;  %v1475_v38 = vcombine.low %v112_v28, %v116_v29 }
  0x88   :  { %1740 = vmatpush3.bf16.msra.mxu1 %v1850_v41  ;;  %1683 = vmatprep.subr.bf16.mxu0 %v1855_v44  ;;  %v1468_v26 = vcombine.high %v104_v20, %v108_v21  ;;  %v1467_v32 = vcombine.low %v104_v20, %v108_v21 }
  0x89   :  { %1741 = vmatprep.subr.bf16.mxu1 %v1857_v46  ;;  %v2206_v46 = vld [vmem:[#allocation4] ss:$0 sm:$0xff] }
  0x8b   :  { %1684 = vmatpush3.bf16.msra.mxu0 %v1856_v45 }
  0x8c   :  { %1742 = vmatpush3.bf16.msra.mxu1 %v1858_v48 }
  0x8d   :  { %974 = vmatmul.mubr.bf16.gmra.mrb[16].mxu0 %v1463_v34  ;;  %v1476_v34 = vcombine.high %v112_v28, %v116_v29 }
  0x8e   :  { %1062 = vmatmul.mubr.bf16.gmra.mrb[16].mxu1 %v1465_v36  ;;  %981 = vmatprep.mubr.bf16.mxu0 %v1472_v37  ;;  %v120_v36 = vld [vmem:[%s2333_s0 + $0x190] sm:$0x11]  ;;  %v121_v37 = vld [vmem:[%s2333_s0 + $0x198] sm:$0x11] }
  0x8f   :  { %1069 = vmatprep.mubr.bf16.mxu1 %v1474_v39  ;;  %v1477_v39 = vcombine.low %v113_v30, %v117_v31  ;;  %v1484_v40 = vcombine.high %v120_v36, %v120_v36  ;;  %v1486_v41 = vcombine.high %v121_v37, %v121_v37  ;;  %v1483_v42 = vcombine.low %v120_v36, %v120_v36 }
  0x90   :  { %v1485_v43 = vcombine.low %v121_v37, %v121_v37 }
  0x95   :  { %982 = vmatmul.mubr.bf16.gmra.mrb[20].mxu0 %v1471_v47 }
  0x96   :  { %1070 = vmatmul.mubr.bf16.gmra.mrb[20].mxu1 %v1473_v49  ;;  %989 = vmatprep.mubr.bf16.mxu0 %v1480_v50 }
  0x97   :  { %1077 = vmatprep.mubr.bf16.mxu1 %v1482_v51 }
  0x9d   :  { %990 = vmatmul.mubr.bf16.gmra.mrb[24].mxu0 %v1479_v56 }
  0x9e   :  { %1078 = vmatmul.mubr.bf16.gmra.mrb[24].mxu1 %v1481_v57  ;;  %1117 = vmatprep.mubr.bf16.mxu0 %v1436_v58 }
  0x9f   :  { %1205 = vmatprep.mubr.bf16.mxu1 %v1438_v59 }
  0xa5   :  { %1118 = vmatmul.mubr.bf16.vlgmr.msra.gmra.mrb[28].mxu0 %v1435_v0 }
  0xa6   :  { %1206 = vmatmul.mubr.bf16.vlgmr.msra.gmra.mrb[28].mxu1 %v1437_v1  ;;  %1125 = vmatprep.mubr.bf16.mxu0 %v1444_v2 }
  0xa7   :  { %1213 = vmatprep.mubr.bf16.mxu1 %v1446_v3 }
  0xad   :  { %1126 = vmatmul.mubr.bf16.gmra.mrb[32].mxu0 %v1443_v8 }
  0xae   :  { %1214 = vmatmul.mubr.bf16.gmra.mrb[32].mxu1 %v1445_v9  ;;  %1133 = vmatprep.mubr.bf16.mxu0 %v1452_v10 }
  0xaf   :  { %1221 = vmatprep.mubr.bf16.mxu1 %v1454_v11 }
  0xb5   :  { %1134 = vmatmul.mubr.bf16.gmra.mrb[36].mxu0 %v1451_v16 }
  0xb6   :  { %1222 = vmatmul.mubr.bf16.gmra.mrb[36].mxu1 %v1453_v17  ;;  %1141 = vmatprep.mubr.bf16.mxu0 %v1460_v18 }
  0xb7   :  { %1229 = vmatprep.mubr.bf16.mxu1 %v1462_v19 }
  0xbd   :  { %1142 = vmatmul.mubr.bf16.gmra.mrb[40].mxu0 %v1459_v24 }
  0xbe   :  { %1230 = vmatmul.mubr.bf16.gmra.mrb[40].mxu1 %v1461_v25  ;;  %1149 = vmatprep.mubr.bf16.mxu0 %v1468_v26 }
  0xbf   :  { %1237 = vmatprep.mubr.bf16.mxu1 %v1470_v27 }
  0xc5   :  { %1150 = vmatmul.mubr.bf16.gmra.mrb[44].mxu0 %v1467_v32 }
  0xc6   :  { %1238 = vmatmul.mubr.bf16.gmra.mrb[44].mxu1 %v1469_v33  ;;  %1157 = vmatprep.mubr.bf16.mxu0 %v1476_v34 }
  0xc7   :  { %1245 = vmatprep.mubr.bf16.mxu1 %v1478_v35 }
  0xcd   :  { %1158 = vmatmul.mubr.bf16.gmra.mrb[48].mxu0 %v1475_v38 }
  0xce   :  { %1246 = vmatmul.mubr.bf16.gmra.mrb[48].mxu1 %v1477_v39  ;;  %1165 = vmatprep.mubr.bf16.mxu0 %v1484_v40 }
  0xcf   :  { %1253 = vmatprep.mubr.bf16.mxu1 %v1486_v41 }
  0xd5   :  { %1166 = vmatmul.mubr.bf16.gmra.mrb[52].mxu0 %v1483_v42 }
  0xd6   :  { %1254 = vmatmul.mubr.bf16.gmra.mrb[52].mxu1 %v1485_v43 }
 0x140   :  { %v1569_v44 = vpop.f32.mrb[0].mxu0 }
 0x141   :  { %v1627_v45 = vpop.f32.mrb[0].mxu1  ;;  %v1570_v47 = vpop.f32.mrb[1].mxu0 }
 0x142   :  { %v1571_v48 = vadd.f32 %v1570_v47, %v1569_v44  ;;  %v1628_v49 = vpop.f32.mrb[1].mxu1  ;;  %v1572_v50 = vpop.f32.mrb[2].mxu0 }
 0x143   :  { %v1629_v51 = vadd.f32 %v1628_v49, %v1627_v45  ;;  %v1630_v52 = vpop.f32.mrb[2].mxu1  ;;  %v1573_v53 = vpop.f32.mrb[3].mxu0 }
 0x144   :  { %v944_v54 = vadd.f32 %v1571_v48, %v2206_v46  ;;  %v1574_v55 = vadd.f32 %v1573_v53, %v1572_v50  ;;  %v1631_v56 = vpop.f32.mrb[3].mxu1 }
 0x145   :  { %v1632_v57 = vadd.f32 %v1631_v56, %v1630_v52 }
 0x146   :  { %v2209_v58 = vadd.f32 %v1629_v51, %v944_v54  ;;  %v947_v59 = vadd.f32 %v1574_v55, %v2206_v46 }
 0x148   :  { %v2212_v60 = vadd.f32 %v1632_v57, %v947_v59  ;;  %v1575_v61 = vpop.f32.mrb[4].mxu0 }
 0x149   :  { %v1633_v62 = vpop.f32.mrb[4].mxu1  ;;  %v1576_v63 = vpop.f32.mrb[5].mxu0 }
 0x14a   :  { %v1577_v0 = vadd.f32 %v1576_v63, %v1575_v61  ;;  %v1634_v1 = vpop.f32.mrb[5].mxu1  ;;  %v1578_v2 = vpop.f32.mrb[6].mxu0 }
 0x14b   :  { %v1635_v3 = vadd.f32 %v1634_v1, %v1633_v62  ;;  %v1636_v4 = vpop.f32.mrb[6].mxu1  ;;  %v1579_v5 = vpop.f32.mrb[7].mxu0 }
 0x14c   :  { %v952_v6 = vadd.f32 %v1577_v0, %v2206_v46  ;;  %v1580_v7 = vadd.f32 %v1579_v5, %v1578_v2  ;;  %v1637_v8 = vpop.f32.mrb[7].mxu1 }
 0x14d   :  { %v1638_v9 = vadd.f32 %v1637_v8, %v1636_v4 }
 0x14e   :  { %v2215_v10 = vadd.f32 %v1635_v3, %v952_v6  ;;  %v955_v11 = vadd.f32 %v1580_v7, %v2206_v46 }
 0x150   :  { %v2218_v12 = vadd.f32 %v1638_v9, %v955_v11  ;;  %v1581_v13 = vpop.f32.mrb[8].mxu0 }
 0x151   :  { %v1639_v14 = vpop.f32.mrb[8].mxu1  ;;  %v1582_v15 = vpop.f32.mrb[9].mxu0 }
 0x152   :  { %v1583_v16 = vadd.f32 %v1582_v15, %v1581_v13  ;;  %v1640_v17 = vpop.f32.mrb[9].mxu1  ;;  %v1584_v18 = vpop.f32.mrb[10].mxu0 }
 0x153   :  { %v1641_v19 = vadd.f32 %v1640_v17, %v1639_v14  ;;  %v1642_v20 = vpop.f32.mrb[10].mxu1  ;;  %v1585_v21 = vpop.f32.mrb[11].mxu0 }
 0x154   :  { %v960_v22 = vadd.f32 %v1583_v16, %v2206_v46  ;;  %v1586_v23 = vadd.f32 %v1585_v21, %v1584_v18  ;;  %v1643_v24 = vpop.f32.mrb[11].mxu1 }
 0x155   :  { %v1644_v25 = vadd.f32 %v1643_v24, %v1642_v20 }
 0x156   :  { %v2221_v26 = vadd.f32 %v1641_v19, %v960_v22  ;;  %v963_v27 = vadd.f32 %v1586_v23, %v2206_v46 }
 0x158   :  { %v2224_v28 = vadd.f32 %v1644_v25, %v963_v27  ;;  %v1587_v29 = vpop.f32.mrb[12].mxu0 }
 0x159   :  { %v1645_v30 = vpop.f32.mrb[12].mxu1  ;;  %v1588_v31 = vpop.f32.mrb[13].mxu0 }
 0x15a   :  { %v1589_v32 = vadd.f32 %v1588_v31, %v1587_v29  ;;  %v1646_v33 = vpop.f32.mrb[13].mxu1  ;;  %v1590_v34 = vpop.f32.mrb[14].mxu0 }
 0x15b   :  { %v1647_v35 = vadd.f32 %v1646_v33, %v1645_v30  ;;  %v1648_v36 = vpop.f32.mrb[14].mxu1  ;;  %v1591_v37 = vpop.f32.mrb[15].mxu0 }
 0x15c   :  { %v968_v38 = vadd.f32 %v1589_v32, %v2206_v46  ;;  %v1592_v39 = vadd.f32 %v1591_v37, %v1590_v34  ;;  %v1649_v40 = vpop.f32.mrb[15].mxu1 }
 0x15d   :  { %v1650_v41 = vadd.f32 %v1649_v40, %v1648_v36 }
 0x15e   :  { %v2227_v42 = vadd.f32 %v1647_v35, %v968_v38  ;;  %v971_v43 = vadd.f32 %v1592_v39, %v2206_v46 }
 0x160   :  { %v2230_v44 = vadd.f32 %v1650_v41, %v971_v43  ;;  %v1593_v45 = vpop.f32.mrb[16].mxu0 }
 0x161   :  { %v1651_v47 = vpop.f32.mrb[16].mxu1  ;;  %v1594_v48 = vpop.f32.mrb[17].mxu0 }
 0x162   :  { %v1595_v49 = vadd.f32 %v1594_v48, %v1593_v45  ;;  %v1652_v50 = vpop.f32.mrb[17].mxu1  ;;  %v1596_v51 = vpop.f32.mrb[18].mxu0 }
 0x163   :  { %v1653_v52 = vadd.f32 %v1652_v50, %v1651_v47  ;;  %v1654_v53 = vpop.f32.mrb[18].mxu1  ;;  %v1597_v54 = vpop.f32.mrb[19].mxu0 }
 0x164   :  { %v976_v55 = vadd.f32 %v1595_v49, %v2206_v46  ;;  %v1598_v56 = vadd.f32 %v1597_v54, %v1596_v51  ;;  %v1655_v57 = vpop.f32.mrb[19].mxu1 }
 0x165   :  { %v1656_v59 = vadd.f32 %v1655_v57, %v1654_v53 }
 0x166   :  { %v2233_v61 = vadd.f32 %v1653_v52, %v976_v55  ;;  %v979_v62 = vadd.f32 %v1598_v56, %v2206_v46 }
 0x168   :  { %v2236_v63 = vadd.f32 %v1656_v59, %v979_v62  ;;  %v1599_v0 = vpop.f32.mrb[20].mxu0 }
 0x169   :  { %v1657_v1 = vpop.f32.mrb[20].mxu1  ;;  %v1600_v2 = vpop.f32.mrb[21].mxu0 }
 0x16a   :  { %v1601_v3 = vadd.f32 %v1600_v2, %v1599_v0  ;;  %v1658_v4 = vpop.f32.mrb[21].mxu1  ;;  %v1602_v5 = vpop.f32.mrb[22].mxu0 }
 0x16b   :  { %v1659_v6 = vadd.f32 %v1658_v4, %v1657_v1  ;;  %v1660_v7 = vpop.f32.mrb[22].mxu1  ;;  %v1603_v8 = vpop.f32.mrb[23].mxu0 }
 0x16c   :  { %v984_v9 = vadd.f32 %v1601_v3, %v2206_v46  ;;  %v1604_v11 = vadd.f32 %v1603_v8, %v1602_v5  ;;  %v1661_v13 = vpop.f32.mrb[23].mxu1 }
 0x16d   :  { %v1662_v14 = vadd.f32 %v1661_v13, %v1660_v7 }
 0x16e   :  { %v2239_v15 = vadd.f32 %v1659_v6, %v984_v9  ;;  %v987_v16 = vadd.f32 %v1604_v11, %v2206_v46 }
 0x170   :  { %v2242_v17 = vadd.f32 %v1662_v14, %v987_v16  ;;  %v1605_v18 = vpop.f32.mrb[24].mxu0 }
 0x171   :  { %v1663_v19 = vpop.f32.mrb[24].mxu1  ;;  %v1606_v20 = vpop.f32.mrb[25].mxu0 }
 0x172   :  { %v1607_v21 = vadd.f32 %v1606_v20, %v1605_v18  ;;  %v1664_v22 = vpop.f32.mrb[25].mxu1  ;;  %v1608_v23 = vpop.f32.mrb[26].mxu0 }
 0x173   :  { %v1665_v24 = vadd.f32 %v1664_v22, %v1663_v19  ;;  %v1666_v25 = vpop.f32.mrb[26].mxu1  ;;  %v1609_v27 = vpop.f32.mrb[27].mxu0 }
 0x174   :  { %v992_v29 = vadd.f32 %v1607_v21, %v2206_v46  ;;  %v1667_v30 = vpop.f32.mrb[27].mxu1 }
 0x176   :  { %v2245_v31 = vadd.f32 %v1665_v24, %v992_v29 }
 0x178   :  { %v1685_v32 = vpop.f32.mrb[28].mxu0 }
 0x179   :  { %v1743_v33 = vpop.f32.mrb[28].mxu1  ;;  %v1686_v34 = vpop.f32.mrb[29].mxu0 }
 0x17a   :  { %v1687_v35 = vadd.f32 %v1686_v34, %v1685_v32  ;;  %v1744_v36 = vpop.f32.mrb[29].mxu1  ;;  %v1688_v37 = vpop.f32.mrb[30].mxu0 }
 0x17b   :  { %v1745_v38 = vadd.f32 %v1744_v36, %v1743_v33  ;;  %v1746_v39 = vpop.f32.mrb[30].mxu1  ;;  %v1689_v40 = vpop.f32.mrb[31].mxu0 }
 0x17c   :  { %v1120_v41 = vadd.f32 %v1687_v35, %v2209_v58  ;;  %v1690_v43 = vadd.f32 %v1689_v40, %v1688_v37  ;;  %v1747_v45 = vpop.f32.mrb[31].mxu1 }
 0x17d   :  { %v1748_v47 = vadd.f32 %v1747_v45, %v1746_v39 }
 0x17e   :  { %v2248_v48 = vadd.f32 %v1745_v38, %v1120_v41  ;;  %v1123_v46 = vadd.f32 %v1690_v43, %v2212_v60 }
 0x180   :  { %v2251_v49 = vadd.f32 %v1748_v47, %v1123_v46  ;;  %v1691_v50 = vpop.f32.mrb[32].mxu0 }
 0x181   :  { %v1749_v51 = vpop.f32.mrb[32].mxu1  ;;  %v1692_v52 = vpop.f32.mrb[33].mxu0 }
 0x182   :  { %v1261_v53 = vadd.f32 %v2251_v49, %v2248_v48  ;;  %v1693_v54 = vadd.f32 %v1692_v52, %v1691_v50  ;;  %v1750_v55 = vpop.f32.mrb[33].mxu1  ;;  %v1694_v56 = vpop.f32.mrb[34].mxu0 }
 0x183   :  { %v1751_v57 = vadd.f32 %v1750_v55, %v1749_v51  ;;  %v1752_v58 = vpop.f32.mrb[34].mxu1  ;;  %v1695_v59 = vpop.f32.mrb[35].mxu0 }
 0x184   :  { %v1128_v62 = vadd.f32 %v1693_v54, %v2215_v10  ;;  %v1696_v0 = vadd.f32 %v1695_v59, %v1694_v56  ;;  %v1753_v1 = vpop.f32.mrb[35].mxu1 }
 0x185   :  { %v1754_v2 = vadd.f32 %v1753_v1, %v1752_v58 }
 0x186   :  { %v2256_v60 = vadd.f32 %v1751_v57, %v1128_v62  ;;  %v1131_v3 = vadd.f32 %v1696_v0, %v2218_v12 }
 0x188   :  { %v1262_v4 = vadd.f32 %v1261_v53, %v2256_v60  ;;  %v2260_v5 = vadd.f32 %v1754_v2, %v1131_v3  ;;  %v1697_v6 = vpop.f32.mrb[36].mxu0 }
 0x189   :  { %v1755_v7 = vpop.f32.mrb[36].mxu1  ;;  %v1698_v8 = vpop.f32.mrb[37].mxu0 }
 0x18a   :  { %v1263_v9 = vadd.f32 %v1262_v4, %v2260_v5  ;;  %v1699_v11 = vadd.f32 %v1698_v8, %v1697_v6  ;;  %v1756_v13 = vpop.f32.mrb[37].mxu1  ;;  %v1700_v14 = vpop.f32.mrb[38].mxu0 }
 0x18b   :  { %v1757_v10 = vadd.f32 %v1756_v13, %v1755_v7  ;;  %v1758_v16 = vpop.f32.mrb[38].mxu1  ;;  %v1701_v18 = vpop.f32.mrb[39].mxu0 }
 0x18c   :  { %v1136_v19 = vadd.f32 %v1699_v11, %v2221_v26  ;;  %v1702_v20 = vadd.f32 %v1701_v18, %v1700_v14  ;;  %v1759_v21 = vpop.f32.mrb[39].mxu1 }
 0x18d   :  { %v1760_v12 = vadd.f32 %v1759_v21, %v1758_v16 }
 0x18e   :  { %v2264_v22 = vadd.f32 %v1757_v10, %v1136_v19  ;;  %v1139_v23 = vadd.f32 %v1702_v20, %v2224_v28 }
 0x190   :  { %v1264_v24 = vadd.f32 %v1263_v9, %v2264_v22  ;;  %v2268_v25 = vadd.f32 %v1760_v12, %v1139_v23  ;;  %v1703_v27 = vpop.f32.mrb[40].mxu0 }
 0x191   :  { %v1761_v29 = vpop.f32.mrb[40].mxu1  ;;  %v1704_v30 = vpop.f32.mrb[41].mxu0 }
 0x192   :  { %v1265_v32 = vadd.f32 %v1264_v24, %v2268_v25  ;;  %v1705_v33 = vadd.f32 %v1704_v30, %v1703_v27  ;;  %v1762_v34 = vpop.f32.mrb[41].mxu1  ;;  %v1706_v35 = vpop.f32.mrb[42].mxu0 }
 0x193   :  { %v1763_v26 = vadd.f32 %v1762_v34, %v1761_v29  ;;  %v1764_v36 = vpop.f32.mrb[42].mxu1  ;;  %v1707_v37 = vpop.f32.mrb[43].mxu0 }
 0x194   :  { %v1144_v38 = vadd.f32 %v1705_v33, %v2227_v42  ;;  %v1708_v39 = vadd.f32 %v1707_v37, %v1706_v35  ;;  %v1765_v40 = vpop.f32.mrb[43].mxu1 }
 0x195   :  { %v1766_v28 = vadd.f32 %v1765_v40, %v1764_v36 }
 0x196   :  { %v2272_v41 = vadd.f32 %v1763_v26, %v1144_v38  ;;  %v1147_v43 = vadd.f32 %v1708_v39, %v2230_v44 }
 0x198   :  { %v1266_v45 = vadd.f32 %v1265_v32, %v2272_v41  ;;  %v2276_v47 = vadd.f32 %v1766_v28, %v1147_v43  ;;  %v1709_v46 = vpop.f32.mrb[44].mxu0 }
 0x199   :  { %v1767_v50 = vpop.f32.mrb[44].mxu1  ;;  %v1710_v51 = vpop.f32.mrb[45].mxu0 }
 0x19a   :  { %v1267_v52 = vadd.f32 %v1266_v45, %v2276_v47  ;;  %v1711_v53 = vadd.f32 %v1710_v51, %v1709_v46  ;;  %v1768_v54 = vpop.f32.mrb[45].mxu1  ;;  %v1712_v55 = vpop.f32.mrb[46].mxu0 }
 0x19b   :  { %v1769_v42 = vadd.f32 %v1768_v54, %v1767_v50  ;;  %v1770_v56 = vpop.f32.mrb[46].mxu1  ;;  %v1713_v57 = vpop.f32.mrb[47].mxu0 }
 0x19c   :  { %v1152_v58 = vadd.f32 %v1711_v53, %v2233_v61  ;;  %v1714_v59 = vadd.f32 %v1713_v57, %v1712_v55  ;;  %v1771_v62 = vpop.f32.mrb[47].mxu1 }
 0x19d   :  { %v1772_v44 = vadd.f32 %v1771_v62, %v1770_v56 }
 0x19e   :  { %v1240_v0 = vadd.f32 %v1769_v42, %v1152_v58  ;;  %v1155_v1 = vadd.f32 %v1714_v59, %v2236_v63 }
 0x1a0   :  { %v1268_v2 = vadd.f32 %v1267_v52, %v1240_v0  ;;  %v1243_v3 = vadd.f32 %v1772_v44, %v1155_v1  ;;  %v1715_v4 = vpop.f32.mrb[48].mxu0 }
 0x1a1   :  { %v1773_v6 = vpop.f32.mrb[48].mxu1  ;;  %v1716_v7 = vpop.f32.mrb[49].mxu0 }
 0x1a2   :  { %v1269_v8 = vadd.f32 %v1268_v2, %v1243_v3  ;;  %v1717_v9 = vadd.f32 %v1716_v7, %v1715_v4  ;;  %v1774_v11 = vpop.f32.mrb[49].mxu1  ;;  %v1718_v13 = vpop.f32.mrb[50].mxu0 }
 0x1a3   :  { %v1775_v14 = vadd.f32 %v1774_v11, %v1773_v6  ;;  %v1776_v10 = vpop.f32.mrb[50].mxu1  ;;  %v1719_v16 = vpop.f32.mrb[51].mxu0 }
 0x1a4   :  { %v1160_v61 = vadd.f32 %v1717_v9, %v2239_v15  ;;  %v1720_v18 = vadd.f32 %v1719_v16, %v1718_v13  ;;  %v1777_v19 = vpop.f32.mrb[51].mxu1 }
 0x1a5   :  { %v1778_v20 = vadd.f32 %v1777_v19, %v1776_v10 }
 0x1a6   :  { %v1248_v21 = vadd.f32 %v1775_v14, %v1160_v61  ;;  %v1163_v63 = vadd.f32 %v1720_v18, %v2242_v17 }
 0x1a8   :  { %v1270_v12 = vadd.f32 %v1269_v8, %v1248_v21  ;;  %v1251_v23 = vadd.f32 %v1778_v20, %v1163_v63  ;;  %v1721_v24 = vpop.f32.mrb[52].mxu0 }
 0x1a9   :  { %v1779_v27 = vpop.f32.mrb[52].mxu1  ;;  %v1722_v29 = vpop.f32.mrb[53].mxu0 }
 0x1aa   :  { %v1271_v30 = vadd.f32 %v1270_v12, %v1251_v23  ;;  %v1723_v32 = vadd.f32 %v1722_v29, %v1721_v24  ;;  %v1780_v33 = vpop.f32.mrb[53].mxu1  ;;  %v1724_v34 = vpop.f32.mrb[54].mxu0 }
 0x1ab   :  { %v1781_v35 = vadd.f32 %v1780_v33, %v1779_v27  ;;  %v1782_v26 = vpop.f32.mrb[54].mxu1  ;;  %v1725_v36 = vpop.f32.mrb[55].mxu0 }
 0x1ac   :  { %v1168_v15 = vadd.f32 %v1723_v32, %v2245_v31  ;;  %v1783_v37 = vpop.f32.mrb[55].mxu1 }
 0x1ae   :  { %v1256_v38 = vadd.f32 %v1781_v35, %v1168_v15  ;;  %v1551_v15 = vld [vmem:[#allocation6] ss:$0 sm:$0xff] }
 0x1b0   :  { %v1273_v39 = vsel %vm1272_vm0, %v1256_v38, 0.0 }
 0x1b1   :  { %v1274_v17 = vadd.f32 %v1273_v39, %v1271_v30 }
 0x1b3   :  { %v1275_v40 = vrot.slane %v1274_v17, 4 }
 0x1b5   :  { %v1276_v28 = vadd.f32 %v1275_v40, %v1274_v17 }
 0x1b7   :  { %v1277_v43 = vrot.slane %v1276_v28, 2 }
 0x1b9   :  { %v1278_v45 = vadd.f32 %v1277_v43, %v1276_v28 }
 0x1bb   :  { %v1279_v46 = vrot.slane %v1278_v45, 1 }
 0x1bd   :  { %v1280_v50 = vadd.f32 %v1279_v46, %v1278_v45 }
 0x1bf   :  { %v1282_v51 = vmul.f32 0.010204081, %v1280_v50 }
 0x1c1   :  { %v1283_v52 = vsub.f32 %v2248_v48, %v1282_v51  ;;  %v1284_v53 = vsub.f32 %v2251_v49, %v1282_v51  ;;  %v1285_v54 = vsub.f32 %v2256_v60, %v1282_v51  ;;  %v1286_v31 = vsub.f32 %v2260_v5, %v1282_v51 }
 0x1c2   :  { %v1287_v55 = vsub.f32 %v2264_v22, %v1282_v51  ;;  %v1288_v42 = vsub.f32 %v2268_v25, %v1282_v51  ;;  %v1289_v56 = vsub.f32 %v2272_v41, %v1282_v51  ;;  %v1290_v57 = vsub.f32 %v2276_v47, %v1282_v51 }
 0x1c3   :  { %v1291_v58 = vsub.f32 %v1240_v0, %v1282_v51  ;;  %v1292_v59 = vsub.f32 %v1243_v3, %v1282_v51  ;;  %v1293_v62 = vsub.f32 %v1248_v21, %v1282_v51  ;;  %v1294_v44 = vsub.f32 %v1251_v23, %v1282_v51 }
 0x1c4   :  { %v1295_v1 = vsub.f32 %v1256_v38, %v1282_v51  ;;  %v1296_v48 = vmul.f32 %v1283_v52, %v1283_v52  ;;  %v1297_v2 = vmul.f32 %v1284_v53, %v1284_v53  ;;  %v1298_v49 = vmul.f32 %v1285_v54, %v1285_v54 }
 0x1c5   :  { %v1299_v60 = vmul.f32 %v1286_v31, %v1286_v31  ;;  %v1300_v5 = vmul.f32 %v1287_v55, %v1287_v55  ;;  %v1301_v22 = vmul.f32 %v1288_v42, %v1288_v42  ;;  %v1302_v25 = vmul.f32 %v1289_v56, %v1289_v56 }
 0x1c6   :  { %v1309_v4 = vadd.f32 %v1297_v2, %v1296_v48  ;;  %v1303_v41 = vmul.f32 %v1290_v57, %v1290_v57  ;;  %v1304_v47 = vmul.f32 %v1291_v58, %v1291_v58  ;;  %v1305_v3 = vmul.f32 %v1292_v59, %v1292_v59  ;;  %v1552_v2 = vld [vmem:[#allocation7] ss:$0 sm:$0xff] }
 0x1c7   :  { %v1306_v14 = vmul.f32 %v1293_v62, %v1293_v62  ;;  %v1308_v16 = vmul.f32 %v1295_v1, %v1295_v1  ;;  %v1307_v61 = vmul.f32 %v1294_v44, %v1294_v44 }
 0x1c8   :  { %v1310_v6 = vadd.f32 %v1309_v4, %v1298_v49 }
 0x1c9   :  { %v1320_v20 = vsel %vm1272_vm0, %v1308_v16, 0.0 }
 0x1ca   :  { %v1311_v7 = vadd.f32 %v1310_v6, %v1299_v60 }
 0x1cc   :  { %v1312_v8 = vadd.f32 %v1311_v7, %v1300_v5 }
 0x1ce   :  { %v1313_v9 = vadd.f32 %v1312_v8, %v1301_v22 }
 0x1d0   :  { %v1314_v11 = vadd.f32 %v1313_v9, %v1302_v25 }
 0x1d2   :  { %v1315_v0 = vadd.f32 %v1314_v11, %v1303_v41 }
 0x1d4   :  { %v1316_v13 = vadd.f32 %v1315_v0, %v1304_v47 }
 0x1d6   :  { %v1317_v10 = vadd.f32 %v1316_v13, %v1305_v3 }
 0x1d8   :  { %v1318_v18 = vadd.f32 %v1317_v10, %v1306_v14 }
 0x1da   :  { %v1319_v19 = vadd.f32 %v1318_v18, %v1307_v61 }
 0x1dc   :  { %v1321_v21 = vadd.f32 %v1320_v20, %v1319_v19 }
 0x1de   :  { %v1322_v63 = vrot.slane %v1321_v21, 4 }
 0x1e0   :  { %v1323_v12 = vadd.f32 %v1322_v63, %v1321_v21 }
 0x1e2   :  { %v1324_v23 = vrot.slane %v1323_v12, 2 }
 0x1e4   :  { %v1325_v24 = vadd.f32 %v1324_v23, %v1323_v12 }
 0x1e6   :  { %v1326_v27 = vrot.slane %v1325_v24, 1 }
 0x1e8   :  { %v1327_v29 = vadd.f32 %v1326_v27, %v1325_v24 }
 0x1ea   :  { %v1328_v30 = vmul.f32 0.010204081, %v1327_v29 }
 0x1ec   :  { %v1329_v32 = vadd.f32 1e-05, %v1328_v30 }
 0x1ee   :  { %1863 = vrsqrt.f32 %v1329_v32 }
 0x1f8   :  { %v1864_v33 = vpop.eup %1863 }
 0x1f9   :  { %v1331_v34 = vmul.f32 %v1864_v33, %v1283_v52  ;;  %v1332_v35 = vmul.f32 %v1864_v33, %v1284_v53  ;;  %v1333_v26 = vmul.f32 %v1864_v33, %v1285_v54  ;;  %v1334_v36 = vmul.f32 %v1864_v33, %v1286_v31 }
 0x1fa   :  { %v1335_v37 = vmul.f32 %v1864_v33, %v1287_v55  ;;  %v1336_v38 = vmul.f32 %v1864_v33, %v1288_v42  ;;  %v1337_v39 = vmul.f32 %v1864_v33, %v1289_v56  ;;  %v1338_v17 = vmul.f32 %v1864_v33, %v1290_v57 }
 0x1fb   :  { %v1339_v40 = vmul.f32 %v1864_v33, %v1291_v58  ;;  %v1340_v28 = vmul.f32 %v1864_v33, %v1292_v59  ;;  %v1341_v43 = vmul.f32 %v1864_v33, %v1293_v62  ;;  %v1342_v45 = vmul.f32 %v1864_v33, %v1294_v44 }
 0x1fc   :  { %v1343_v46 = vmul.f32 %v1864_v33, %v1295_v1  ;;  %v1351_v50 = vmul.f32 %v1551_v15, %v1331_v34  ;;  %v1352_v51 = vmul.f32 %v1551_v15, %v1332_v35  ;;  %v1353_v48 = vmul.f32 %v1551_v15, %v1333_v26 }
 0x1fd   :  { %v1354_v49 = vmul.f32 %v1551_v15, %v1334_v36  ;;  %v1355_v4 = vmul.f32 %v1551_v15, %v1335_v37  ;;  %v1356_v52 = vmul.f32 %v1551_v15, %v1336_v38  ;;  %v1357_v53 = vmul.f32 %v1551_v15, %v1337_v39 }
 0x1fe   :  { %v1358_v54 = vmul.f32 %v1551_v15, %v1338_v17  ;;  %v1359_v31 = vmul.f32 %v1551_v15, %v1339_v40  ;;  %v1360_v60 = vmul.f32 %v1551_v15, %v1340_v28  ;;  %v1361_v55 = vmul.f32 %v1551_v15, %v1341_v43 }
 0x1ff   :  { %v1362_v42 = vmul.f32 %v1551_v15, %v1342_v45  ;;  %v1363_v56 = vmul.f32 %v1551_v15, %v1343_v46  ;;  %v1371_v57 = vadd.f32 %v1552_v2, %v1351_v50  ;;  %v1372_v58 = vadd.f32 %v1552_v2, %v1352_v51 }
 0x200   :  { %v1373_v59 = vadd.f32 %v1552_v2, %v1353_v48  ;;  %v1374_v62 = vadd.f32 %v1552_v2, %v1354_v49  ;;  %v1375_v44 = vadd.f32 %v1552_v2, %v1355_v4  ;;  %v1376_v1 = vadd.f32 %v1552_v2, %v1356_v52 }
 0x201   :  { %v1377_v6 = vadd.f32 %v1552_v2, %v1357_v53  ;;  %v1378_v5 = vadd.f32 %v1552_v2, %v1358_v54  ;;  %v1379_v7 = vadd.f32 %v1552_v2, %v1359_v31  ;;  %v1380_v22 = vadd.f32 %v1552_v2, %v1360_v60 }
 0x202   :  { %v1381_v8 = vadd.f32 %v1552_v2, %v1361_v55  ;;  %v1382_v25 = vadd.f32 %v1552_v2, %v1362_v42  ;;  %v1383_v9 = vadd.f32 %v1552_v2, %v1363_v56  ;;  %v1384_v41 = vmul.f32 0.1, %v1371_v57 }
 0x203   :  { %v1385_v11 = vmul.f32 0.1, %v1372_v58  ;;  %v1386_v47 = vmul.f32 0.1, %v1373_v59  ;;  %v1387_v0 = vmul.f32 0.1, %v1374_v62 }
 0x204   :  { %v1388_v3 = vmul.f32 0.1, %v1375_v44  ;;  %v1389_v13 = vmul.f32 0.1, %v1376_v1  ;;  %v1390_v14 = vmul.f32 0.1, %v1377_v6  ;;  %v1397_v10 = vmax.f32 %v1371_v57, %v1384_v41 }
 0x205   :  { %v1391_v16 = vmul.f32 0.1, %v1378_v5  ;;  %v1392_v61 = vmul.f32 0.1, %v1379_v7  ;;  %v1393_v18 = vmul.f32 0.1, %v1380_v22  ;;  %v1398_v19 = vmax.f32 %v1372_v58, %v1385_v11 }
 0x206   :  { %v1394_v20 = vmul.f32 0.1, %v1381_v8  ;;  %v1395_v21 = vmul.f32 0.1, %v1382_v25  ;;  %v1396_v63 = vmul.f32 0.1, %v1383_v9  ;;  %v1399_v12 = vmax.f32 %v1373_v59, %v1386_v47  ;;  %1410 = vst [vmem:[%s2338_s5] sm:$0xff] %v1397_v10 }
 0x207   :  { %v1400_v23 = vmax.f32 %v1374_v62, %v1387_v0  ;;  %v1401_v24 = vmax.f32 %v1375_v44, %v1388_v3  ;;  %v1402_v27 = vmax.f32 %v1376_v1, %v1389_v13  ;;  %v1403_v29 = vmax.f32 %v1377_v6, %v1390_v14  ;;  %1411 = vst [vmem:[%s2338_s5 + $0x8] sm:$0xff] %v1398_v19 }
 0x208   :  { %v1404_v30 = vmax.f32 %v1378_v5, %v1391_v16  ;;  %v1405_v32 = vmax.f32 %v1379_v7, %v1392_v61  ;;  %v1406_v33 = vmax.f32 %v1380_v22, %v1393_v18  ;;  %v1407_v34 = vmax.f32 %v1381_v8, %v1394_v20  ;;  %1412 = vst [vmem:[%s2338_s5 + $0x10] sm:$0xff] %v1399_v12 }
 0x209   :  { %v1408_v35 = vmax.f32 %v1382_v25, %v1395_v21  ;;  %v1409_v26 = vmax.f32 %v1383_v9, %v1396_v63  ;;  %1413 = vst [vmem:[%s2338_s5 + $0x18] sm:$0xff] %v1400_v23  ;;  %1414 = vst [vmem:[%s2338_s5 + $0x20] sm:$0xff] %v1401_v24 }
 0x20a   :  { %1415 = vst [vmem:[%s2338_s5 + $0x28] sm:$0xff] %v1402_v27  ;;  %1416 = vst [vmem:[%s2338_s5 + $0x30] sm:$0xff] %v1403_v29 }
 0x20b   :  { %1417 = vst [vmem:[%s2338_s5 + $0x38] sm:$0xff] %v1404_v30  ;;  %1418 = vst [vmem:[%s2338_s5 + $0x40] sm:$0xff] %v1405_v32 }
 0x20c   :  { %1419 = vst [vmem:[%s2338_s5 + $0x48] sm:$0xff] %v1406_v33  ;;  %1420 = vst [vmem:[%s2338_s5 + $0x50] sm:$0xff] %v1407_v34 }
 0x20d   :  { %1421 = vst [vmem:[%s2338_s5 + $0x58] sm:$0xff] %v1408_v35  ;;  %1422 = vst [vmem:[%s2338_s5 + $0x60] sm:$0x3] %v1409_v26 }
 0x20e   :  { %1427 = vsyncpa [#allocation3], 1 }
 0x20f   :  { %1428 = vsyncpa [#allocation5], 1 }
 0x210   :  { %1429 = vsyncpa [#allocation8], 1 }

// kernel: netD_forward.5
= control target key start
LH: loop header
LB: loop body
LE: loop exit
PB: predicated region body
PF: predicated region fallthrough
CT: control target
= control target key end

     0   :  { %s19030_s0 = inlined_call_operand.vmem [shape: bf16[2,6272], index: 0, kind: input, shape index: {}]   ;;  %s19031_s1 = inlined_call_operand.hbm [shape: bf16[6272,1024], index: 1, kind: input, shape index: {}]   ;;  %s19032_s2 = inlined_call_operand.hbm [shape: f32[1,1024], index: 2, kind: input, shape index: {}]   ;;  %s19033_s3 = inlined_call_operand.hbm [shape: f32[1,1024], index: 3, kind: input, shape index: {}]   ;;  %s19034_s4 = inlined_call_operand.hbm [shape: f32[1,1024], index: 4, kind: input, shape index: {}]   ;;  %s19035_s5 = inlined_call_operand.vmem [shape: f32[2,1], index: 5, kind: output, shape index: {}]  }
   0x1   :  { %19039 = sst [smem:[#allocation12_spill]] %s19031_s1 }
   0x2   :  { %19040 = sst [smem:[#allocation13_spill]] %s19032_s2 }
   0x3   :  { %10 = vsyncpa [#allocation3], 0 }
   0x4   :  { %12 = vsyncpa [#allocation3 + $0x1], 0 }
   0x5   :  { %13 = vsyncpa [#allocation5], 0 }
   0x6   :  { %15 = vsyncpa [#allocation5 + $0x1], 0 }
   0x7   :  { %16 = vsyncpa [#allocation8], 0 }
   0x8   :  { %18 = vsyncpa [#allocation8 + $0x1], 0  ;;  %s16914_s18 = smov 0   ;;  %s16916_s19 = smov 0  }
   0x9   :  { %s16918_s20 = smov 0   ;;  %s16920_s21 = smov 0  }
   0xa LB: > { %s16933_s22 = sadd.s32 4294967295, %s16873_s21   ;;  %s16936_s23 = sadd.s32 1, %s16873_s21   ;;  %s16873_s21 = sphi %s16920_s21, %s19054_s21   ;;  %s16869_s20 = sphi %s16918_s20, %s19053_s20   ;;  %s16865_s19 = sphi %s16916_s19, %s19052_s19   ;;  %s16861_s18 = sphi %s16914_s18, %s19051_s18  }
   0xb   : > { %s49_s24 = ssub.s32 %s16873_s21, %s16936_s23  ;;  %s52_s25 = sadd.s32 1, %s16869_s20 }
   0xc   : > { %p50_p0 = scmp.eq.s32.totalorder %s49_s24, 0  ;;  %p59_p1 = scmp.ne.s32.totalorder %s16869_s20, %s16865_s19 }
   0xd   : > { %p60_p2 = scmp.eq.s32.totalorder %s16873_s21, 0  ;;  %p65_p3 = scmp.ne.s32.totalorder %s16865_s19, %s16861_s18 }
   0xe   : > { %s16946_s26 = scalar_select %p50_p0, %s16869_s20, %s52_s25  }
   0xf   : > { %p61_p4 = por %p60_p2, %p59_p1  ;;  %p66_p5 = scmp.eq.s32.totalorder %s16933_s22, 0 }
  0x10   : > { %p14299_p6 = scmp.lt.s32.totalorder %s16873_s21, 2  ;;  %s16955_s28 = sand.u32 1, %s16869_s20  }
  0x11   : > { %p16950_p7 = por %p66_p5, %p65_p3  ;;  %s212_s30 = sand.u32 1, %s16873_s21  }
  0x12   : > { %p16957_p8 = pnand %p14299_p6, %p61_p4  ;;  %s16963_s6 = sshll.u32 %s16955_s28, 2 }
  0x13   : > { %s19041_s27 = scalar_select %p16950_p7, 1, 0 }
  0x14   : > { %s19042_s29 = scalar_select %p16957_p8, 1, 0 }
  0x15   : > { %s16966_s7 = sshll.u32 %s16873_s21, 6  ;;  %s216_s8 = scalar_lea.vmem [#allocation4], %s16963_s6 }
  0x16   : > { %s224_s9 = sshll.u32 %s216_s8, 4  ;;  %s19043_s2 = sld [smem:[#allocation13_spill]]  ;;  %s16975_s9 = int_to_ptr.vmem [resolvable:$true] %s224_s9 }
  0x17   : > { %s16977_s13 = scalar_lea.sflag [#allocation5], %s212_s30  ;;  %p16983_p10 = pneg %p16957_p8 }
  0x1c   : > { %s16973_s12 = scalar_lea.hbm %s19043_s2, %s16966_s7  ;;  %s16716_s18 = scalar_lea.hbm %s19043_s2, 128 }
  0x1d   : > { %s16711_s14 = scalar_lea.hbm %s16973_s12, 64  ;;  %p16717_p13 = scmp.lt.u32.totalorder %s16973_s12, %s19043_s2 }
  0x1e   : > { %p16712_p9 = scmp.ne.s32.totalorder %s16973_s12, %s16711_s14  ;;  %p16718_p0 = scmp.lt.u32.totalorder %s16716_s18, %s16711_s14 }
  0x1f   : > { %p16720_p2 = scmp.lt.u32.totalorder %s16711_s14, %s16973_s12 }
  0x20   : > { %p16714_p11 = pnand %p16983_p10, %p16712_p9  ;;  %p16719_p1 = por %p16718_p0, %p16717_p13 }
  0x22   : > { %p16715_p12 = pneg %p16714_p11  ;;  %p16721_p3 = por %p16720_p2, %p16719_p1 }
  0x24   : > { %p16722_p4 = pnand %p16721_p3, %p16715_p12 }
  0x26   : > { %16725 = shalt.err (!%p16722_p4)
}
  0x27   : > { %s16726_s30 = scalar_lea.vmem %s16975_s9, 64  ;;  %s16875_s8 = smov [#allocation4]  }
  0x28   : > { %p16727_p5 = scmp.ne.s32.totalorder %s16975_s9, %s16726_s30  ;;  %s16731_s10 = sshll.u32 %s16875_s8, 4  ;;  %s16732_s10 = int_to_ptr.vmem [resolvable:$false] %s16731_s10 }
  0x29   : > { %s16733_s11 = scalar_lea.vmem %s16732_s10, 128  ;;  %p16734_p11 = scmp.lt.s32.totalorder %s16975_s9, %s16732_s10 }
  0x2a   : > { %p16729_p6 = pnand %p16727_p5, %p16983_p10  ;;  %p16735_p7 = scmp.lt.s32.totalorder %s16733_s11, %s16726_s30 }
  0x2c   : > { %p16730_p9 = pneg %p16729_p6  ;;  %p16736_p13 = por %p16735_p7, %p16734_p11 }
  0x2e   : > { %p16737_p0 = pnand %p16736_p13, %p16730_p9 }
  0x30   : > { %16740 = shalt.err (!%p16737_p0)
}
  0x31   : > { %14292 = dma.hbm_to_vmem [thread:$0]  (!%p16957_p8), %s16973_s12, 64, %s16975_s9, %s16977_s13  }
  0x32   : > { %p12502_p12 = scmp.ge.s32.totalorder %s16873_s21, 1  ;;  %p267_p1 = scmp.lt.s32.totalorder %s16873_s21, 3 }
  0x33   : > { %s14276_s14 = smul.u32 12544, %s16955_s28  ;;  %s14080_s17 = sshll.u32 %s16873_s21, 8 }
  0x34   : > { %p17010_p2 = pnand %p12502_p12, %p267_p1  ;;  %s19046_s1 = sld [smem:[#allocation12_spill]] }
  0x35   : > { %s195_s30 = scalar_lea.vmem [#allocation2], %s14276_s14  ;;  %s192_s9 = scalar_lea.sflag [#allocation3], %s16955_s28 }
  0x36   : > { %s19045_s16 = scalar_select %p17010_p2, 1, 0 }
  0x37   : > { %s202_s8 = sshll.u32 %s195_s30, 4  ;;  %s17020_s8 = int_to_ptr.vmem [resolvable:$true] %s202_s8 }
  0x3a   : > { %s17018_s25 = scalar_lea.hbm %s19046_s1, %s14080_s17  ;;  %s16746_s11 = scalar_lea.hbm %s19046_s1, 401408 }
  0x3b   : > { %s16741_s12 = scalar_lea.hbm %s17018_s25, 200704  ;;  %p16747_p5 = scmp.lt.u32.totalorder %s17018_s25, %s19046_s1 }
  0x3c   : > { %p16742_p7 = scmp.ne.s32.totalorder %s17018_s25, %s16741_s12  ;;  %p16748_p6 = scmp.lt.u32.totalorder %s16746_s11, %s16741_s12 }
  0x3d   : > { %p16750_p11 = scmp.lt.u32.totalorder %s16741_s12, %s17018_s25 }
  0x3e   : > { %p16744_p3 = pnand %p16742_p7, %p16983_p10  ;;  %p16749_p9 = por %p16748_p6, %p16747_p5 }
  0x40   : > { %p16745_p4 = pneg %p16744_p3  ;;  %p16751_p13 = por %p16750_p11, %p16749_p9 }
  0x42   : > { %p16752_p0 = pnand %p16751_p13, %p16745_p4 }
  0x44   : > { %16755 = shalt.err (!%p16752_p0)
}
  0x45   : > { %s16756_s14 = scalar_lea.vmem %s17020_s8, 200704  ;;  %s16876_s24 = smov [#allocation2]  }
  0x46   : > { %p16757_p12 = scmp.ne.s32.totalorder %s17020_s8, %s16756_s14  ;;  %s16761_s30 = sshll.u32 %s16876_s24, 4  ;;  %s16762_s30 = int_to_ptr.vmem [resolvable:$false] %s16761_s30 }
  0x47   : > { %s16763_s21 = scalar_lea.vmem %s16762_s30, 401408  ;;  %p16764_p3 = scmp.lt.s32.totalorder %s17020_s8, %s16762_s30 }
  0x48   : > { %p16759_p1 = pnand %p16757_p12, %p16983_p10  ;;  %p16765_p2 = scmp.lt.s32.totalorder %s16763_s21, %s16756_s14 }
  0x4a   : > { %p16760_p7 = pneg %p16759_p1  ;;  %p16766_p5 = por %p16765_p2, %p16764_p3 }
  0x4c   : > { %p16767_p6 = pnand %p16766_p5, %p16760_p7 }
  0x4e   : > { %16770 = shalt.err (!%p16767_p6)
}
  0x4f   : > { %s16877_s12 = smov 512   ;;  %s16878_s10 = smov 256  }
  0x50   : > { %s16879_s11 = smov 16   ;;  %s17050_s14 = scalar_lea.hbm %s19033_s3, %s16966_s7 }
  0x51   : > { %14289 = dma.hbm_to_vmem [thread:$0]  (!%p16957_p8), %s17018_s25, 200704, %s17020_s8, %s192_s9, %s16877_s12, %s16878_s10, %s16879_s11  }
  0x52   : > { %s235_s24 = scalar_lea.vmem [#allocation6], %s16963_s6  ;;  %s16771_s21 = scalar_lea.hbm %s17050_s14, 64 }
  0x53   : > { %s243_s30 = sshll.u32 %s235_s24, 4  ;;  %p16772_p2 = scmp.ne.s32.totalorder %s17050_s14, %s16771_s21  ;;  %s244_s30 = int_to_ptr.vmem [resolvable:$true] %s243_s30 }
  0x54   : > { %s16776_s25 = scalar_lea.hbm %s19033_s3, 128  ;;  %p16777_p11 = scmp.lt.u32.totalorder %s17050_s14, %s19033_s3 }
  0x55   : > { %p16774_p4 = pnand %p16772_p2, %p16983_p10  ;;  %p16778_p13 = scmp.lt.u32.totalorder %s16776_s25, %s16771_s21 }
  0x56   : > { %p16780_p12 = scmp.lt.u32.totalorder %s16771_s21, %s17050_s14 }
  0x57   : > { %p16775_p9 = pneg %p16774_p4  ;;  %p16779_p0 = por %p16778_p13, %p16777_p11 }
  0x59   : > { %p16781_p1 = por %p16780_p12, %p16779_p0 }
  0x5b   : > { %p16782_p7 = pnand %p16781_p1, %p16775_p9 }
  0x5d   : > { %16785 = shalt.err (!%p16782_p7)
}
  0x5e   : > { %s16786_s12 = scalar_lea.vmem %s244_s30, 64  ;;  %s16880_s10 = smov [#allocation6]  }
  0x5f   : > { %p16787_p3 = scmp.ne.s32.totalorder %s244_s30, %s16786_s12  ;;  %s16791_s11 = sshll.u32 %s16880_s10, 4  ;;  %s16792_s11 = int_to_ptr.vmem [resolvable:$false] %s16791_s11 }
  0x60   : > { %s16793_s1 = scalar_lea.vmem %s16792_s11, 128  ;;  %p16794_p2 = scmp.lt.s32.totalorder %s244_s30, %s16792_s11 }
  0x61   : > { %p16789_p5 = pnand %p16787_p3, %p16983_p10  ;;  %p16795_p4 = scmp.lt.s32.totalorder %s16793_s1, %s16786_s12 }
  0x63   : > { %p16790_p6 = pneg %p16789_p5  ;;  %p16796_p8 = por %p16795_p4, %p16794_p2 }
  0x65   : > { %p16797_p11 = pnand %p16796_p8, %p16790_p6 }
  0x67   : > { %16800 = shalt.err (!%p16797_p11)
}
  0x68   : > { %p19047_p13 = scmp.ne.s32.totalorder %s19042_s29, 0  ;;  %s17075_s18 = scalar_lea.hbm %s19034_s4, %s16966_s7 }
  0x69   : > { %s254_s24 = scalar_lea.vmem [#allocation7], %s16963_s6  ;;  %s251_s25 = scalar_lea.sflag [#allocation8], %s16955_s28 }
  0x6a   : > { %14295 = dma.hbm_to_vmem [thread:$0]  (!%p19047_p13), %s17050_s14, 64, %s244_s30, %s16977_s13  }
  0x6b   : > { %s262_s21 = sshll.u32 %s254_s24, 4  ;;  %s16801_s8 = scalar_lea.hbm %s17075_s18, 64  ;;  %s263_s21 = int_to_ptr.vmem [resolvable:$true] %s262_s21 }
  0x6c   : > { %p16802_p8 = scmp.ne.s32.totalorder %s17075_s18, %s16801_s8  ;;  %s16806_s14 = scalar_lea.hbm %s19034_s4, 128 }
  0x6d   : > { %p16807_p12 = scmp.lt.u32.totalorder %s17075_s18, %s19034_s4  ;;  %p16808_p1 = scmp.lt.u32.totalorder %s16806_s14, %s16801_s8 }
  0x6e   : > { %p16804_p9 = pnand %p16802_p8, %p16983_p10  ;;  %p16810_p3 = scmp.lt.u32.totalorder %s16801_s8, %s17075_s18 }
  0x6f   : > { %p16809_p7 = por %p16808_p1, %p16807_p12 }
  0x70   : > { %p16805_p0 = pneg %p16804_p9 }
  0x71   : > { %p16811_p5 = por %p16810_p3, %p16809_p7 }
  0x73   : > { %p16812_p6 = pnand %p16811_p5, %p16805_p0 }
  0x75   : > { %16815 = shalt.err (!%p16812_p6)
}
  0x76   : > { %s16816_s28 = scalar_lea.vmem %s263_s21, 64  ;;  %s16881_s6 = smov [#allocation7]  }
  0x77   : > { %p16817_p2 = scmp.ne.s32.totalorder %s263_s21, %s16816_s28  ;;  %s16821_s12 = sshll.u32 %s16881_s6, 4  ;;  %s16822_s12 = int_to_ptr.vmem [resolvable:$false] %s16821_s12 }
  0x78   : > { %s16823_s10 = scalar_lea.vmem %s16822_s12, 128  ;;  %p16824_p8 = scmp.lt.s32.totalorder %s263_s21, %s16822_s12 }
  0x79   : > { %p16819_p4 = pnand %p16817_p2, %p16983_p10  ;;  %p16825_p9 = scmp.lt.s32.totalorder %s16823_s10, %s16816_s28 }
  0x7b   : > { %p16820_p11 = pneg %p16819_p4  ;;  %p16826_p13 = por %p16825_p9, %p16824_p8 }
  0x7d   : > { %p16827_p1 = pnand %p16826_p13, %p16820_p11 }
  0x7f   : > { %16830 = shalt.err (!%p16827_p1)
}
  0x80   : > { %p19048_p12 = scmp.ne.s32.totalorder %s19042_s29, 0  ;;  %p19049_p0 = scmp.ne.s32.totalorder %s19045_s16, 0 }
  0x81   : > { %s273_s15 = sand.u32 (!%p19049_p0), 1, %s16865_s19   ;;  %p19050_p10 = scmp.ne.s32.totalorder (!%p19049_p0), %s19041_s27, 0 }
  0x82   : > { %14298 = dma.hbm_to_vmem [thread:$0]  (!%p19048_p12), %s17075_s18, 64, %s263_s21, %s251_s25  }
  0x83   : > { %271 = sbr.rel (%p19049_p0) target bundleno = 2183 (0x887), region = 40  ;;  %s274_s1 = scalar_lea.sflag (!%p19049_p0), [#allocation3], %s273_s15 }
  0x84   : > { %s14277_s11 = smul.u32 (!%p19049_p0), 12544, %s273_s15 }
  0x86   : > { %s17099_s2 = scalar_lea.vmem (!%p19049_p0), [#allocation2], %s14277_s11 }
  0x8a   : > { %16848 = dma.done.wait (%p19050_p10), %s274_s1, 200704  }
  0x8b   : > { %16850 = vsyncadd (%p19050_p10), %s274_s1, 4294766592  ;;  %s282_s29 = sand.u32 1, %s16933_s22   ;;  %s17106_s17 = sshll.u32 %s273_s15, 2 }
  0x8c   : > { %s283_s16 = scalar_lea.sflag [#allocation5], %s282_s29  ;;  %s286_s18 = scalar_lea.vmem [#allocation4], %s17106_s17 }
  0x8d   : > { %16852 = dma.done.wait (%p19050_p10), %s283_s16, 128  }
  0x8e   : > { %16854 = vsyncadd (%p19050_p10), %s283_s16, 4294967168  ;;  %s295_s24 = scalar_lea.vmem [#allocation6], %s17106_s17  ;;  %s301_s21 = scalar_lea.sflag [#allocation8], %s273_s15 }
  0x8f   : > { %s304_s25 = scalar_lea.vmem [#allocation7], %s17106_s17 }
  0x90   : > { %16856 = dma.done.wait (%p19050_p10), %s301_s21, 64  }
  0x91   : > { %16858 = vsyncadd (%p19050_p10), %s301_s21, 4294967232  ;;  %v14337_v0 = vld [vmem:[%s17099_s2 + $0x4] ss:$16 sps:$4 sm:$0xff]   ;;  %v14339_v1 = vld [vmem:[%s17099_s2 + $0xc] ss:$16 sps:$4 sm:$0xff]   ;;  %v1932_v38 = vlaneseq  ;;  %vm12175_vm0 = vcmask 1041408  }
  0x92   : > { %10125 = vmatprep.subr.bf16.mxu0 %v14337_v0  ;;  %v14341_v2 = vld [vmem:[%s17099_s2] ss:$16 sps:$4 sm:$0xff]   ;;  %v14342_v3 = vld [vmem:[%s17099_s2 + $0x8] ss:$16 sps:$4 sm:$0xff]   ;;  %11150 = vmatprep.subr.bf16.mxu1 %v14339_v1  ;;  %v14343_v4 = vld [vmem:[%s17099_s2 + $0x24] ss:$16 sps:$4 sm:$0xff]  }
  0x93   : > { %10126 = vmatpush1.bf16.msra.mxu0 %v14341_v2  ;;  %11151 = vmatpush1.bf16.msra.mxu1 %v14342_v3  ;;  %v14345_v5 = vld [vmem:[%s17099_s2 + $0x2c] ss:$16 sps:$4 sm:$0xff]   ;;  %v14347_v6 = vld [vmem:[%s17099_s2 + $0x20] ss:$16 sps:$4 sm:$0xff]   ;;  %v14348_v7 = vld [vmem:[%s17099_s2 + $0x28] ss:$16 sps:$4 sm:$0xff]  }
  0x94   : > { %10127 = vmatprep.subr.bf16.mxu0 %v14343_v4  ;;  %11152 = vmatprep.subr.bf16.mxu1 %v14345_v5  ;;  %v14349_v8 = vld [vmem:[%s17099_s2 + $0x44] ss:$16 sps:$4 sm:$0xff]   ;;  %v14351_v9 = vld [vmem:[%s17099_s2 + $0x4c] ss:$16 sps:$4 sm:$0xff]   ;;  %v14353_v10 = vld [vmem:[%s17099_s2 + $0x40] ss:$16 sps:$4 sm:$0xff]  }
  0x95   : > { %v14354_v11 = vld [vmem:[%s17099_s2 + $0x48] ss:$16 sps:$4 sm:$0xff]   ;;  %v14355_v12 = vld [vmem:[%s17099_s2 + $0x64] ss:$16 sps:$4 sm:$0xff]   ;;  %v14357_v13 = vld [vmem:[%s17099_s2 + $0x6c] ss:$16 sps:$4 sm:$0xff]  }
  0x96   : > { %v14359_v14 = vld [vmem:[%s17099_s2 + $0x60] ss:$16 sps:$4 sm:$0xff]   ;;  %v14360_v15 = vld [vmem:[%s17099_s2 + $0x68] ss:$16 sps:$4 sm:$0xff]   ;;  %v14361_v16 = vld [vmem:[%s17099_s2 + $0x84] ss:$16 sps:$4 sm:$0xff]  }
  0x97   : > { %10128 = vmatpush1.bf16.msra.mxu0 %v14347_v6  ;;  %11153 = vmatpush1.bf16.msra.mxu1 %v14348_v7  ;;  %v14363_v17 = vld [vmem:[%s17099_s2 + $0x8c] ss:$16 sps:$4 sm:$0xff]   ;;  %v14365_v18 = vld [vmem:[%s17099_s2 + $0x80] ss:$16 sps:$4 sm:$0xff]   ;;  %v14366_v19 = vld [vmem:[%s17099_s2 + $0x88] ss:$16 sps:$4 sm:$0xff]  }
  0x98   : > { %10129 = vmatprep.subr.bf16.mxu0 %v14349_v8  ;;  %11154 = vmatprep.subr.bf16.mxu1 %v14351_v9  ;;  %v14367_v20 = vld [vmem:[%s17099_s2 + $0xa4] ss:$16 sps:$4 sm:$0xff]   ;;  %v14369_v21 = vld [vmem:[%s17099_s2 + $0xac] ss:$16 sps:$4 sm:$0xff]   ;;  %v14371_v22 = vld [vmem:[%s17099_s2 + $0xa0] ss:$16 sps:$4 sm:$0xff]  }
  0x99   : > { %v14372_v23 = vld [vmem:[%s17099_s2 + $0xa8] ss:$16 sps:$4 sm:$0xff]   ;;  %v14373_v24 = vld [vmem:[%s17099_s2 + $0xc4] ss:$16 sps:$4 sm:$0xff]   ;;  %v14375_v25 = vld [vmem:[%s17099_s2 + $0xcc] ss:$16 sps:$4 sm:$0xff]  }
  0x9a   : > { %v14377_v26 = vld [vmem:[%s17099_s2 + $0xc0] ss:$16 sps:$4 sm:$0xff]   ;;  %v14378_v27 = vld [vmem:[%s17099_s2 + $0xc8] ss:$16 sps:$4 sm:$0xff]   ;;  %v14379_v28 = vld [vmem:[%s17099_s2 + $0xe4] ss:$16 sps:$4 sm:$0xff]  }
  0x9b   : > { %10130 = vmatpush1.bf16.msra.mxu0 %v14353_v10  ;;  %11155 = vmatpush1.bf16.msra.mxu1 %v14354_v11  ;;  %v14381_v29 = vld [vmem:[%s17099_s2 + $0xec] ss:$16 sps:$4 sm:$0xff]   ;;  %v14383_v30 = vld [vmem:[%s17099_s2 + $0xe0] ss:$16 sps:$4 sm:$0xff]   ;;  %v14384_v31 = vld [vmem:[%s17099_s2 + $0xe8] ss:$16 sps:$4 sm:$0xff]  }
  0x9c   : > { %10131 = vmatprep.subr.bf16.mxu0 %v14355_v12  ;;  %11156 = vmatprep.subr.bf16.mxu1 %v14357_v13  ;;  %v14385_v32 = vld [vmem:[%s17099_s2 + $0x104] ss:$16 sps:$4 sm:$0xff]   ;;  %v14387_v33 = vld [vmem:[%s17099_s2 + $0x10c] ss:$16 sps:$4 sm:$0xff]   ;;  %v14389_v34 = vld [vmem:[%s17099_s2 + $0x100] ss:$16 sps:$4 sm:$0xff]  }
  0x9d   : > { %v14390_v35 = vld [vmem:[%s17099_s2 + $0x108] ss:$16 sps:$4 sm:$0xff]   ;;  %v16882_v36 = vmov 1966171168   ;;  %v14391_v39 = vld [vmem:[%s17099_s2 + $0x124] ss:$16 sps:$4 sm:$0xff]  }
  0x9e   : > { %v1930_v37 = vunpack.c.l.s4 %v16882_v36  ;;  %v14393_v40 = vld [vmem:[%s17099_s2 + $0x12c] ss:$16 sps:$4 sm:$0xff]   ;;  %v14395_v41 = vld [vmem:[%s17099_s2 + $0x120] ss:$16 sps:$4 sm:$0xff]   ;;  %v17158_v43 = vshrl.u32 %v1932_v38, 7  ;;  %p14075_p13 = scmp.ne.s32.totalorder %s16933_s22, 0 }
  0x9f   : > { %10132 = vmatpush1.bf16.msra.mxu0 %v14359_v14  ;;  %11157 = vmatpush1.bf16.msra.mxu1 %v14360_v15  ;;  %v14396_v44 = vld [vmem:[%s17099_s2 + $0x128] ss:$16 sps:$4 sm:$0xff]   ;;  %v14397_v45 = vld [vmem:[%s17099_s2 + $0x144] ss:$16 sps:$4 sm:$0xff]   ;;  %v14399_v46 = vld [vmem:[%s17099_s2 + $0x14c] ss:$16 sps:$4 sm:$0xff]  }
  0xa0   : > { %10133 = vmatprep.subr.bf16.mxu0 %v14361_v16  ;;  %11158 = vmatprep.subr.bf16.mxu1 %v14363_v17  ;;  %v1931_v42 = vunpack.c.0.s8 %v1930_v37  ;;  %v14401_v47 = vld [vmem:[%s17099_s2 + $0x140] ss:$16 sps:$4 sm:$0xff]   ;;  %v14402_v48 = vld [vmem:[%s17099_s2 + $0x148] ss:$16 sps:$4 sm:$0xff]   ;;  %v14403_v50 = vld [vmem:[%s17099_s2 + $0x164] ss:$16 sps:$4 sm:$0xff]  }
  0xa1   : > { %v14405_v51 = vld [vmem:[%s17099_s2 + $0x16c] ss:$16 sps:$4 sm:$0xff]   ;;  %v17173_v52 = vld [vmem:[%s19030_s0] sm:$0xff]  ;;  %v14408_v55 = vld [vmem:[%s17099_s2 + $0x168] ss:$16 sps:$4 sm:$0xff]   ;;  %vm12360_vm1 = vcmask (!%p14075_p13), 1024  }
  0xa2   : > { %v17166_v49 = vsub.s32 %v1931_v42, %v17158_v43  ;;  %v14407_v53 = vld [vmem:[%s17099_s2 + $0x160] ss:$16 sps:$4 sm:$0xff]   ;;  %v14409_v56 = vld [vmem:[%s17099_s2 + $0x184] ss:$16 sps:$4 sm:$0xff]   ;;  %v14411_v57 = vld [vmem:[%s17099_s2 + $0x18c] ss:$16 sps:$4 sm:$0xff]  }
  0xa3   : > { %10134 = vmatpush1.bf16.msra.mxu0 %v14365_v18  ;;  %11159 = vmatpush1.bf16.msra.mxu1 %v14366_v19  ;;  %v14413_v59 = vld [vmem:[%s17099_s2 + $0x180] ss:$16 sps:$4 sm:$0xff]   ;;  %v14414_v61 = vld [vmem:[%s17099_s2 + $0x188] ss:$16 sps:$4 sm:$0xff]   ;;  %v14415_v62 = vld [vmem:[%s17099_s2 + $0x1a4] ss:$16 sps:$4 sm:$0xff]  }
  0xa4   : > { %10135 = vmatprep.subr.bf16.mxu0 %v14367_v20  ;;  %11160 = vmatprep.subr.bf16.mxu1 %v14369_v21  ;;  %v1935_v54 = vrot.slane %v17173_v52, %v17166_v49  ;;  %v14417_v63 = vld [vmem:[%s17099_s2 + $0x1ac] ss:$16 sps:$4 sm:$0xff]   ;;  %v14419_v0 = vld [vmem:[%s17099_s2 + $0x1a0] ss:$16 sps:$4 sm:$0xff]   ;;  %v14420_v1 = vld [vmem:[%s17099_s2 + $0x1a8] ss:$16 sps:$4 sm:$0xff]  }
  0xa5   : > { %v14421_v2 = vld [vmem:[%s17099_s2 + $0x1c4] ss:$16 sps:$4 sm:$0xff]   ;;  %v14423_v3 = vld [vmem:[%s17099_s2 + $0x1cc] ss:$16 sps:$4 sm:$0xff]   ;;  %v14425_v4 = vld [vmem:[%s17099_s2 + $0x1c0] ss:$16 sps:$4 sm:$0xff]  }
  0xa6   : > { %v1943_v58 = vcombine.high %v1935_v54, %v1935_v54  ;;  %v14426_v5 = vld [vmem:[%s17099_s2 + $0x1c8] ss:$16 sps:$4 sm:$0xff]   ;;  %v14427_v6 = vld [vmem:[%s17099_s2 + $0x1e4] ss:$16 sps:$4 sm:$0xff]   ;;  %v14429_v7 = vld [vmem:[%s17099_s2 + $0x1ec] ss:$16 sps:$4 sm:$0xff]   ;;  %v17200_v13 = vrot.slane %v1935_v54, %v17166_v49 }
  0xa7   : > { %10136 = vmatpush1.bf16.msra.mxu0 %v14371_v22  ;;  %11161 = vmatpush1.bf16.msra.mxu1 %v14372_v23  ;;  %v14431_v8 = vld [vmem:[%s17099_s2 + $0x1e0] ss:$16 sps:$4 sm:$0xff]   ;;  %v14432_v9 = vld [vmem:[%s17099_s2 + $0x1e8] ss:$16 sps:$4 sm:$0xff]   ;;  %v14435_v10 = vld [vmem:[%s17099_s2 + $0x204] ss:$16 sps:$4 sm:$0xff]  }
  0xa8   : > { %10137 = vmatprep.subr.bf16.mxu0 %v14373_v24  ;;  %11162 = vmatprep.subr.bf16.mxu1 %v14375_v25  ;;  %v1965_v60 = vrot.slane %v1943_v58, %v17166_v49  ;;  %v14438_v11 = vld [vmem:[%s17099_s2 + $0x20c] ss:$16 sps:$4 sm:$0xff]   ;;  %v14433_v12 = vld [vmem:[%s17099_s2 + $0x200] ss:$16 sps:$4 sm:$0xff]   ;;  %v14436_v14 = vld [vmem:[%s17099_s2 + $0x208] ss:$16 sps:$4 sm:$0xff]  }
  0xa9   : > { %v14441_v15 = vld [vmem:[%s17099_s2 + $0x224] ss:$16 sps:$4 sm:$0xff]   ;;  %v14444_v16 = vld [vmem:[%s17099_s2 + $0x22c] ss:$16 sps:$4 sm:$0xff]   ;;  %v14439_v18 = vld [vmem:[%s17099_s2 + $0x220] ss:$16 sps:$4 sm:$0xff]  }
  0xaa   : > { %10157 = vmatprep.mubr.bf16.mxu0 %v1965_v60  ;;  %11182 = vmatprep.mubr.bf16.mxu1 %v1965_v60  ;;  %v1975_v17 = vcombine.high %v1965_v60, %v1965_v60  ;;  %v14442_v19 = vld [vmem:[%s17099_s2 + $0x228] ss:$16 sps:$4 sm:$0xff]   ;;  %v14447_v20 = vld [vmem:[%s17099_s2 + $0x244] ss:$16 sps:$4 sm:$0xff]   ;;  %v14450_v21 = vld [vmem:[%s17099_s2 + $0x24c] ss:$16 sps:$4 sm:$0xff]  }
  0xab   : > { %10138 = vmatpush1.bf16.msra.mxu0 %v14377_v26  ;;  %11163 = vmatpush1.bf16.msra.mxu1 %v14378_v27  ;;  %v14445_v22 = vld [vmem:[%s17099_s2 + $0x240] ss:$16 sps:$4 sm:$0xff]   ;;  %v14448_v23 = vld [vmem:[%s17099_s2 + $0x248] ss:$16 sps:$4 sm:$0xff]   ;;  %v14453_v24 = vld [vmem:[%s17099_s2 + $0x264] ss:$16 sps:$4 sm:$0xff]  }
  0xac   : > { %10139 = vmatprep.subr.bf16.mxu0 %v14379_v28  ;;  %11164 = vmatprep.subr.bf16.mxu1 %v14381_v29  ;;  %v14456_v25 = vld [vmem:[%s17099_s2 + $0x26c] ss:$16 sps:$4 sm:$0xff]   ;;  %v14451_v26 = vld [vmem:[%s17099_s2 + $0x260] ss:$16 sps:$4 sm:$0xff]   ;;  %v14454_v27 = vld [vmem:[%s17099_s2 + $0x268] ss:$16 sps:$4 sm:$0xff]  }
  0xad   : > { %v14459_v28 = vld [vmem:[%s17099_s2 + $0x284] ss:$16 sps:$4 sm:$0xff]   ;;  %v14462_v29 = vld [vmem:[%s17099_s2 + $0x28c] ss:$16 sps:$4 sm:$0xff]   ;;  %v14469_v38 = vld [vmem:[%s17099_s2 + $0x2c0] ss:$16 sps:$4 sm:$0xff]  }
  0xae   : > { %v14471_v36 = vld [vmem:[%s17099_s2 + $0x2c4] ss:$16 sps:$4 sm:$0xff]   ;;  %v14474_v37 = vld [vmem:[%s17099_s2 + $0x2cc] ss:$16 sps:$4 sm:$0xff]   ;;  %v14475_v42 = vld [vmem:[%s17099_s2 + $0x2e0] ss:$16 sps:$4 sm:$0xff]  }
  0xaf   : > { %10140 = vmatpush1.bf16.msra.mxu0 %v14383_v30  ;;  %11165 = vmatpush1.bf16.msra.mxu1 %v14384_v31  ;;  %v14457_v30 = vld [vmem:[%s17099_s2 + $0x280] ss:$16 sps:$4 sm:$0xff]   ;;  %v14460_v31 = vld [vmem:[%s17099_s2 + $0x288] ss:$16 sps:$4 sm:$0xff]   ;;  %v14504_v60 = vld [vmem:[%s17099_s2 + $0x36c] ss:$16 sps:$4 sm:$0xff]  }
  0xb0   : > { %10141 = vmatprep.subr.bf16.mxu0 %v14385_v32  ;;  %11166 = vmatprep.subr.bf16.mxu1 %v14387_v33  ;;  %v14465_v32 = vld [vmem:[%s17099_s2 + $0x2a4] ss:$16 sps:$4 sm:$0xff]   ;;  %v14468_v33 = vld [vmem:[%s17099_s2 + $0x2ac] ss:$16 sps:$4 sm:$0xff]   ;;  %v14490_v54 = vld [vmem:[%s17099_s2 + $0x328] ss:$16 sps:$4 sm:$0xff]  }
  0xb1   : > { %v14496_v58 = vld [vmem:[%s17099_s2 + $0x348] ss:$16 sps:$4 sm:$0xff]  }
  0xb3   : > { %10142 = vmatpush1.bf16.msra.mxu0 %v14389_v34  ;;  %11167 = vmatpush1.bf16.msra.mxu1 %v14390_v35  ;;  %v14463_v34 = vld [vmem:[%s17099_s2 + $0x2a0] ss:$16 sps:$4 sm:$0xff]   ;;  %v14466_v35 = vld [vmem:[%s17099_s2 + $0x2a8] ss:$16 sps:$4 sm:$0xff]  }
  0xb4   : > { %10143 = vmatprep.subr.bf16.mxu0 %v14391_v39  ;;  %11168 = vmatprep.subr.bf16.mxu1 %v14393_v40  ;;  %v14472_v39 = vld [vmem:[%s17099_s2 + $0x2c8] ss:$16 sps:$4 sm:$0xff]   ;;  %v14477_v40 = vld [vmem:[%s17099_s2 + $0x2e4] ss:$16 sps:$4 sm:$0xff]  }
  0xb7   : > { %10144 = vmatpush1.bf16.msra.mxu0 %v14395_v41  ;;  %11169 = vmatpush1.bf16.msra.mxu1 %v14396_v44  ;;  %v14480_v41 = vld [vmem:[%s17099_s2 + $0x2ec] ss:$16 sps:$4 sm:$0xff]   ;;  %v14478_v44 = vld [vmem:[%s17099_s2 + $0x2e8] ss:$16 sps:$4 sm:$0xff]  }
  0xb8   : > { %10145 = vmatprep.subr.bf16.mxu0 %v14397_v45  ;;  %11170 = vmatprep.subr.bf16.mxu1 %v14399_v46  ;;  %v14483_v45 = vld [vmem:[%s17099_s2 + $0x304] ss:$16 sps:$4 sm:$0xff]   ;;  %v14486_v46 = vld [vmem:[%s17099_s2 + $0x30c] ss:$16 sps:$4 sm:$0xff]  }
  0xbb   : > { %10146 = vmatpush1.bf16.msra.mxu0 %v14401_v47  ;;  %11171 = vmatpush1.bf16.msra.mxu1 %v14402_v48  ;;  %v14481_v47 = vld [vmem:[%s17099_s2 + $0x300] ss:$16 sps:$4 sm:$0xff]   ;;  %v14484_v48 = vld [vmem:[%s17099_s2 + $0x308] ss:$16 sps:$4 sm:$0xff]  }
  0xbc   : > { %10147 = vmatprep.subr.bf16.mxu0 %v14403_v50  ;;  %11172 = vmatprep.subr.bf16.mxu1 %v14405_v51  ;;  %v14489_v50 = vld [vmem:[%s17099_s2 + $0x324] ss:$16 sps:$4 sm:$0xff]   ;;  %v14492_v51 = vld [vmem:[%s17099_s2 + $0x32c] ss:$16 sps:$4 sm:$0xff]  }
  0xbf   : > { %10148 = vmatpush1.bf16.msra.mxu0 %v14407_v53  ;;  %11173 = vmatpush1.bf16.msra.mxu1 %v14408_v55  ;;  %v14487_v53 = vld [vmem:[%s17099_s2 + $0x320] ss:$16 sps:$4 sm:$0xff]   ;;  %v14495_v55 = vld [vmem:[%s17099_s2 + $0x344] ss:$16 sps:$4 sm:$0xff]  }
  0xc0   : > { %10149 = vmatprep.subr.bf16.mxu0 %v14409_v56  ;;  %11174 = vmatprep.subr.bf16.mxu1 %v14411_v57  ;;  %v14498_v56 = vld [vmem:[%s17099_s2 + $0x34c] ss:$16 sps:$4 sm:$0xff]   ;;  %v14493_v57 = vld [vmem:[%s17099_s2 + $0x340] ss:$16 sps:$4 sm:$0xff]  }
  0xc3   : > { %10150 = vmatpush1.bf16.msra.mxu0 %v14413_v59  ;;  %11175 = vmatpush1.bf16.msra.mxu1 %v14414_v61  ;;  %v14501_v59 = vld [vmem:[%s17099_s2 + $0x364] ss:$16 sps:$4 sm:$0xff]   ;;  %v14499_v61 = vld [vmem:[%s17099_s2 + $0x360] ss:$16 sps:$4 sm:$0xff]  }
  0xc4   : > { %10151 = vmatprep.subr.bf16.mxu0 %v14415_v62  ;;  %11176 = vmatprep.subr.bf16.mxu1 %v14417_v63  ;;  %v14502_v62 = vld [vmem:[%s17099_s2 + $0x368] ss:$16 sps:$4 sm:$0xff]   ;;  %v14507_v63 = vld [vmem:[%s17099_s2 + $0x384] ss:$16 sps:$4 sm:$0xff]  }
  0xc7   : > { %10152 = vmatpush1.bf16.msra.mxu0 %v14419_v0  ;;  %11177 = vmatpush1.bf16.msra.mxu1 %v14420_v1  ;;  %v14510_v0 = vld [vmem:[%s17099_s2 + $0x38c] ss:$16 sps:$4 sm:$0xff]   ;;  %v14505_v1 = vld [vmem:[%s17099_s2 + $0x380] ss:$16 sps:$4 sm:$0xff]  }
  0xc8   : > { %10153 = vmatprep.subr.bf16.mxu0 %v14421_v2  ;;  %11178 = vmatprep.subr.bf16.mxu1 %v14423_v3  ;;  %v14508_v2 = vld [vmem:[%s17099_s2 + $0x388] ss:$16 sps:$4 sm:$0xff]   ;;  %v14513_v3 = vld [vmem:[%s17099_s2 + $0x3a4] ss:$16 sps:$4 sm:$0xff]  }
  0xcb   : > { %10154 = vmatpush1.bf16.msra.mxu0 %v14425_v4  ;;  %11179 = vmatpush1.bf16.msra.mxu1 %v14426_v5  ;;  %v14516_v4 = vld [vmem:[%s17099_s2 + $0x3ac] ss:$16 sps:$4 sm:$0xff]   ;;  %v14511_v5 = vld [vmem:[%s17099_s2 + $0x3a0] ss:$16 sps:$4 sm:$0xff]  }
  0xcc   : > { %10155 = vmatprep.subr.bf16.mxu0 %v14427_v6  ;;  %11180 = vmatprep.subr.bf16.mxu1 %v14429_v7  ;;  %v14514_v6 = vld [vmem:[%s17099_s2 + $0x3a8] ss:$16 sps:$4 sm:$0xff]   ;;  %v14519_v7 = vld [vmem:[%s17099_s2 + $0x3c4] ss:$16 sps:$4 sm:$0xff]  }
  0xcf   : > { %10156 = vmatpush1.bf16.msra.mxu0 %v14431_v8  ;;  %11181 = vmatpush1.bf16.msra.mxu1 %v14432_v9  ;;  %v14522_v8 = vld [vmem:[%s17099_s2 + $0x3cc] ss:$16 sps:$4 sm:$0xff]   ;;  %v1928_v9 = vcombine.high %v17173_v52, %v17173_v52  ;;  %v14526_v52 = vld [vmem:[%s17099_s2 + $0x3e8] ss:$16 sps:$4 sm:$0xff]  }
  0xd0   : > { %10166 = vmatprep.subr.bf16.mxu0 %v14435_v10  ;;  %11191 = vmatprep.subr.bf16.mxu1 %v14438_v11  ;;  %v14517_v10 = vld [vmem:[%s17099_s2 + $0x3c0] ss:$16 sps:$4 sm:$0xff]   ;;  %v14520_v11 = vld [vmem:[%s17099_s2 + $0x3c8] ss:$16 sps:$4 sm:$0xff]  }
  0xd2   : > { %10158 = vmatmul.mubr.bf16.vlgmr.msra.gmra.mrb[0].mxu0 %v17200_v13  ;;  %11183 = vmatmul.mubr.bf16.vlgmr.msra.gmra.mrb[0].mxu1 %v17200_v13 }
  0xd3   : > { %10167 = vmatpush1.bf16.msra.mxu0 %v14433_v12  ;;  %11192 = vmatpush1.bf16.msra.mxu1 %v14436_v14  ;;  %v14525_v12 = vld [vmem:[%s17099_s2 + $0x3e4] ss:$16 sps:$4 sm:$0xff]   ;;  %v14528_v14 = vld [vmem:[%s17099_s2 + $0x3ec] ss:$16 sps:$4 sm:$0xff]  }
  0xd4   : > { %10168 = vmatprep.subr.bf16.mxu0 %v14441_v15  ;;  %11193 = vmatprep.subr.bf16.mxu1 %v14444_v16  ;;  %v17266_v15 = vrot.slane %v1928_v9, %v17166_v49  ;;  %v14523_v16 = vld [vmem:[%s17099_s2 + $0x3e0] ss:$16 sps:$4 sm:$0xff]   ;;  %v14604_v9 = vld [vmem:[%s17099_s2 + $0x588] ss:$16 sps:$4 sm:$0xff]  }
  0xd5   : > { %10198 = vmatprep.mubr.bf16.mxu0 %v1975_v17  ;;  %11223 = vmatprep.mubr.bf16.mxu1 %v1975_v17  ;;  %v14531_v17 = vld [vmem:[%s17099_s2 + $0x404] ss:$16 sps:$4 sm:$0xff]  }
  0xd7   : > { %10169 = vmatpush1.bf16.msra.mxu0 %v14439_v18  ;;  %11194 = vmatpush1.bf16.msra.mxu1 %v14442_v19  ;;  %v14534_v18 = vld [vmem:[%s17099_s2 + $0x40c] ss:$16 sps:$4 sm:$0xff]   ;;  %v1944_v19 = vcombine.high %v17266_v15, %v17266_v15 }
  0xd8   : > { %10170 = vmatprep.subr.bf16.mxu0 %v14447_v20  ;;  %11195 = vmatprep.subr.bf16.mxu1 %v14450_v21  ;;  %v14529_v20 = vld [vmem:[%s17099_s2 + $0x400] ss:$16 sps:$4 sm:$0xff]   ;;  %v1973_v21 = vcombine.high %v17200_v13, %v17200_v13  ;;  %v14538_v13 = vld [vmem:[%s17099_s2 + $0x428] ss:$16 sps:$4 sm:$0xff]  }
  0xdb   : > { %10171 = vmatpush1.bf16.msra.mxu0 %v14445_v22  ;;  %11196 = vmatpush1.bf16.msra.mxu1 %v14448_v23  ;;  %v14532_v22 = vld [vmem:[%s17099_s2 + $0x408] ss:$16 sps:$4 sm:$0xff]   ;;  %v14537_v23 = vld [vmem:[%s17099_s2 + $0x424] ss:$16 sps:$4 sm:$0xff]  }
  0xdc   : > { %10172 = vmatprep.subr.bf16.mxu0 %v14453_v24  ;;  %11197 = vmatprep.subr.bf16.mxu1 %v14456_v25  ;;  %v14540_v24 = vld [vmem:[%s17099_s2 + $0x42c] ss:$16 sps:$4 sm:$0xff]   ;;  %v17281_v25 = vrot.slane %v1944_v19, %v17166_v49  ;;  %v14621_v19 = vld [vmem:[%s17099_s2 + $0x5e4] ss:$16 sps:$4 sm:$0xff]  }
  0xdf   : > { %10173 = vmatpush1.bf16.msra.mxu0 %v14451_v26  ;;  %11198 = vmatpush1.bf16.msra.mxu1 %v14454_v27  ;;  %v14535_v26 = vld [vmem:[%s17099_s2 + $0x420] ss:$16 sps:$4 sm:$0xff]   ;;  %v14543_v27 = vld [vmem:[%s17099_s2 + $0x444] ss:$16 sps:$4 sm:$0xff]  }
  0xe0   : > { %10174 = vmatprep.subr.bf16.mxu0 %v14459_v28  ;;  %11199 = vmatprep.subr.bf16.mxu1 %v14462_v29  ;;  %v14546_v28 = vld [vmem:[%s17099_s2 + $0x44c] ss:$16 sps:$4 sm:$0xff]   ;;  %v14541_v29 = vld [vmem:[%s17099_s2 + $0x440] ss:$16 sps:$4 sm:$0xff]  }
  0xe3   : > { %10175 = vmatpush1.bf16.msra.mxu0 %v14457_v30  ;;  %11200 = vmatpush1.bf16.msra.mxu1 %v14460_v31  ;;  %v14544_v30 = vld [vmem:[%s17099_s2 + $0x448] ss:$16 sps:$4 sm:$0xff]   ;;  %v14549_v31 = vld [vmem:[%s17099_s2 + $0x464] ss:$16 sps:$4 sm:$0xff]  }
  0xe4   : > { %10176 = vmatprep.subr.bf16.mxu0 %v14465_v32  ;;  %11201 = vmatprep.subr.bf16.mxu1 %v14468_v33  ;;  %v14552_v32 = vld [vmem:[%s17099_s2 + $0x46c] ss:$16 sps:$4 sm:$0xff]   ;;  %v14547_v33 = vld [vmem:[%s17099_s2 + $0x460] ss:$16 sps:$4 sm:$0xff]  }
  0xe7   : > { %10177 = vmatpush1.bf16.msra.mxu0 %v14463_v34  ;;  %11202 = vmatpush1.bf16.msra.mxu1 %v14466_v35  ;;  %v14550_v34 = vld [vmem:[%s17099_s2 + $0x468] ss:$16 sps:$4 sm:$0xff]   ;;  %v14555_v35 = vld [vmem:[%s17099_s2 + $0x484] ss:$16 sps:$4 sm:$0xff]  }
  0xe8   : > { %10178 = vmatprep.subr.bf16.mxu0 %v14471_v36  ;;  %11203 = vmatprep.subr.bf16.mxu1 %v14474_v37  ;;  %v14558_v36 = vld [vmem:[%s17099_s2 + $0x48c] ss:$16 sps:$4 sm:$0xff]   ;;  %v14553_v37 = vld [vmem:[%s17099_s2 + $0x480] ss:$16 sps:$4 sm:$0xff]  }
  0xeb   : > { %10179 = vmatpush1.bf16.msra.mxu0 %v14469_v38  ;;  %11204 = vmatpush1.bf16.msra.mxu1 %v14472_v39  ;;  %v14556_v38 = vld [vmem:[%s17099_s2 + $0x488] ss:$16 sps:$4 sm:$0xff]   ;;  %v14561_v39 = vld [vmem:[%s17099_s2 + $0x4a4] ss:$16 sps:$4 sm:$0xff]  }
  0xec   : > { %10180 = vmatprep.subr.bf16.mxu0 %v14477_v40  ;;  %11205 = vmatprep.subr.bf16.mxu1 %v14480_v41  ;;  %v14564_v40 = vld [vmem:[%s17099_s2 + $0x4ac] ss:$16 sps:$4 sm:$0xff]   ;;  %v14559_v41 = vld [vmem:[%s17099_s2 + $0x4a0] ss:$16 sps:$4 sm:$0xff]  }
  0xef   : > { %10181 = vmatpush1.bf16.msra.mxu0 %v14475_v42  ;;  %11206 = vmatpush1.bf16.msra.mxu1 %v14478_v44  ;;  %v14562_v42 = vld [vmem:[%s17099_s2 + $0x4a8] ss:$16 sps:$4 sm:$0xff]   ;;  %v14567_v44 = vld [vmem:[%s17099_s2 + $0x4c4] ss:$16 sps:$4 sm:$0xff]  }
  0xf0   : > { %10182 = vmatprep.subr.bf16.mxu0 %v14483_v45  ;;  %11207 = vmatprep.subr.bf16.mxu1 %v14486_v46  ;;  %v14570_v45 = vld [vmem:[%s17099_s2 + $0x4cc] ss:$16 sps:$4 sm:$0xff]   ;;  %v14565_v46 = vld [vmem:[%s17099_s2 + $0x4c0] ss:$16 sps:$4 sm:$0xff]  }
  0xf3   : > { %10183 = vmatpush1.bf16.msra.mxu0 %v14481_v47  ;;  %11208 = vmatpush1.bf16.msra.mxu1 %v14484_v48  ;;  %v14568_v47 = vld [vmem:[%s17099_s2 + $0x4c8] ss:$16 sps:$4 sm:$0xff]   ;;  %v14573_v48 = vld [vmem:[%s17099_s2 + $0x4e4] ss:$16 sps:$4 sm:$0xff]  }
  0xf4   : > { %10184 = vmatprep.subr.bf16.mxu0 %v14489_v50  ;;  %11209 = vmatprep.subr.bf16.mxu1 %v14492_v51  ;;  %v14576_v50 = vld [vmem:[%s17099_s2 + $0x4ec] ss:$16 sps:$4 sm:$0xff]   ;;  %v14571_v51 = vld [vmem:[%s17099_s2 + $0x4e0] ss:$16 sps:$4 sm:$0xff]  }
  0xf7   : > { %10185 = vmatpush1.bf16.msra.mxu0 %v14487_v53  ;;  %11210 = vmatpush1.bf16.msra.mxu1 %v14490_v54  ;;  %v14574_v53 = vld [vmem:[%s17099_s2 + $0x4e8] ss:$16 sps:$4 sm:$0xff]   ;;  %v14579_v54 = vld [vmem:[%s17099_s2 + $0x504] ss:$16 sps:$4 sm:$0xff]  }
  0xf8   : > { %10186 = vmatprep.subr.bf16.mxu0 %v14495_v55  ;;  %11211 = vmatprep.subr.bf16.mxu1 %v14498_v56  ;;  %v14582_v55 = vld [vmem:[%s17099_s2 + $0x50c] ss:$16 sps:$4 sm:$0xff]   ;;  %v14577_v56 = vld [vmem:[%s17099_s2 + $0x500] ss:$16 sps:$4 sm:$0xff]  }
  0xfb   : > { %10187 = vmatpush1.bf16.msra.mxu0 %v14493_v57  ;;  %11212 = vmatpush1.bf16.msra.mxu1 %v14496_v58  ;;  %v14580_v57 = vld [vmem:[%s17099_s2 + $0x508] ss:$16 sps:$4 sm:$0xff]   ;;  %v14585_v58 = vld [vmem:[%s17099_s2 + $0x524] ss:$16 sps:$4 sm:$0xff]  }
  0xfc   : > { %10188 = vmatprep.subr.bf16.mxu0 %v14501_v59  ;;  %11213 = vmatprep.subr.bf16.mxu1 %v14504_v60  ;;  %v14588_v59 = vld [vmem:[%s17099_s2 + $0x52c] ss:$16 sps:$4 sm:$0xff]   ;;  %v14583_v60 = vld [vmem:[%s17099_s2 + $0x520] ss:$16 sps:$4 sm:$0xff]  }
  0xff   : > { %10189 = vmatpush1.bf16.msra.mxu0 %v14499_v61  ;;  %11214 = vmatpush1.bf16.msra.mxu1 %v14502_v62  ;;  %v14586_v61 = vld [vmem:[%s17099_s2 + $0x528] ss:$16 sps:$4 sm:$0xff]   ;;  %v14591_v62 = vld [vmem:[%s17099_s2 + $0x544] ss:$16 sps:$4 sm:$0xff]  }
 0x100   : > { %10190 = vmatprep.subr.bf16.mxu0 %v14507_v63  ;;  %11215 = vmatprep.subr.bf16.mxu1 %v14510_v0  ;;  %v14594_v63 = vld [vmem:[%s17099_s2 + $0x54c] ss:$16 sps:$4 sm:$0xff]   ;;  %v14589_v0 = vld [vmem:[%s17099_s2 + $0x540] ss:$16 sps:$4 sm:$0xff]  }
 0x103   : > { %10191 = vmatpush1.bf16.msra.mxu0 %v14505_v1  ;;  %11216 = vmatpush1.bf16.msra.mxu1 %v14508_v2  ;;  %v14592_v1 = vld [vmem:[%s17099_s2 + $0x548] ss:$16 sps:$4 sm:$0xff]   ;;  %v14597_v2 = vld [vmem:[%s17099_s2 + $0x564] ss:$16 sps:$4 sm:$0xff]  }
 0x104   : > { %10192 = vmatprep.subr.bf16.mxu0 %v14513_v3  ;;  %11217 = vmatprep.subr.bf16.mxu1 %v14516_v4  ;;  %v14600_v3 = vld [vmem:[%s17099_s2 + $0x56c] ss:$16 sps:$4 sm:$0xff]   ;;  %v14595_v4 = vld [vmem:[%s17099_s2 + $0x560] ss:$16 sps:$4 sm:$0xff]  }
 0x107   : > { %10193 = vmatpush1.bf16.msra.mxu0 %v14511_v5  ;;  %11218 = vmatpush1.bf16.msra.mxu1 %v14514_v6  ;;  %v14598_v5 = vld [vmem:[%s17099_s2 + $0x568] ss:$16 sps:$4 sm:$0xff]   ;;  %v14603_v6 = vld [vmem:[%s17099_s2 + $0x584] ss:$16 sps:$4 sm:$0xff]  }
 0x108   : > { %10194 = vmatprep.subr.bf16.mxu0 %v14519_v7  ;;  %11219 = vmatprep.subr.bf16.mxu1 %v14522_v8  ;;  %v14606_v7 = vld [vmem:[%s17099_s2 + $0x58c] ss:$16 sps:$4 sm:$0xff]   ;;  %v14601_v8 = vld [vmem:[%s17099_s2 + $0x580] ss:$16 sps:$4 sm:$0xff]  }
 0x10b   : > { %10195 = vmatpush1.bf16.msra.mxu0 %v14517_v10  ;;  %11220 = vmatpush1.bf16.msra.mxu1 %v14520_v11  ;;  %v14609_v10 = vld [vmem:[%s17099_s2 + $0x5a4] ss:$16 sps:$4 sm:$0xff]   ;;  %v14612_v11 = vld [vmem:[%s17099_s2 + $0x5ac] ss:$16 sps:$4 sm:$0xff]  }
 0x10c   : > { %10196 = vmatprep.subr.bf16.mxu0 %v14525_v12  ;;  %11221 = vmatprep.subr.bf16.mxu1 %v14528_v14  ;;  %v14607_v12 = vld [vmem:[%s17099_s2 + $0x5a0] ss:$16 sps:$4 sm:$0xff]   ;;  %v14610_v14 = vld [vmem:[%s17099_s2 + $0x5a8] ss:$16 sps:$4 sm:$0xff]  }
 0x10f   : > { %10197 = vmatpush1.bf16.msra.mxu0 %v14523_v16  ;;  %11222 = vmatpush1.bf16.msra.mxu1 %v14526_v52  ;;  %v14615_v16 = vld [vmem:[%s17099_s2 + $0x5c4] ss:$16 sps:$4 sm:$0xff]   ;;  %v14618_v52 = vld [vmem:[%s17099_s2 + $0x5cc] ss:$16 sps:$4 sm:$0xff]  }
 0x110   : > { %10207 = vmatprep.subr.bf16.mxu0 %v14531_v17  ;;  %11232 = vmatprep.subr.bf16.mxu1 %v14534_v18  ;;  %v14613_v17 = vld [vmem:[%s17099_s2 + $0x5c0] ss:$16 sps:$4 sm:$0xff]   ;;  %v14616_v18 = vld [vmem:[%s17099_s2 + $0x5c8] ss:$16 sps:$4 sm:$0xff]  }
 0x112   : > { %10199 = vmatmul.mubr.bf16.vlgmr.msra.gmra.mrb[0].mxu0 %v1973_v21  ;;  %11224 = vmatmul.mubr.bf16.vlgmr.msra.gmra.mrb[0].mxu1 %v1973_v21  ;;  %v14619_v21 = vld [vmem:[%s17099_s2 + $0x5e0] ss:$16 sps:$4 sm:$0xff]  }
 0x113   : > { %10208 = vmatpush1.bf16.msra.mxu0 %v14529_v20  ;;  %11233 = vmatpush1.bf16.msra.mxu1 %v14532_v22  ;;  %v14624_v20 = vld [vmem:[%s17099_s2 + $0x5ec] ss:$16 sps:$4 sm:$0xff]   ;;  %v14622_v22 = vld [vmem:[%s17099_s2 + $0x5e8] ss:$16 sps:$4 sm:$0xff]  }
 0x114   : > { %10209 = vmatprep.subr.bf16.mxu0 %v14537_v23  ;;  %11234 = vmatprep.subr.bf16.mxu1 %v14540_v24  ;;  %v14628_v23 = vld [vmem:[%s17099_s2 + $0x604] ss:$16 sps:$4 sm:$0xff]   ;;  %v14631_v24 = vld [vmem:[%s17099_s2 + $0x60c] ss:$16 sps:$4 sm:$0xff]  }
 0x115   : > { %10239 = vmatprep.mubr.bf16.mxu0 %v17281_v25  ;;  %11264 = vmatprep.mubr.bf16.mxu1 %v17281_v25 }
 0x117   : > { %10210 = vmatpush1.bf16.msra.mxu0 %v14535_v26  ;;  %11235 = vmatpush1.bf16.msra.mxu1 %v14538_v13  ;;  %v14626_v26 = vld [vmem:[%s17099_s2 + $0x600] ss:$16 sps:$4 sm:$0xff]   ;;  %v17348_v13 = vrot.slane %v17266_v15, %v17166_v49 }
 0x118   : > { %10211 = vmatprep.subr.bf16.mxu0 %v14543_v27  ;;  %11236 = vmatprep.subr.bf16.mxu1 %v14546_v28  ;;  %v14629_v27 = vld [vmem:[%s17099_s2 + $0x608] ss:$16 sps:$4 sm:$0xff]   ;;  %v14634_v28 = vld [vmem:[%s17099_s2 + $0x624] ss:$16 sps:$4 sm:$0xff]   ;;  %v14632_v15 = vld [vmem:[%s17099_s2 + $0x620] ss:$16 sps:$4 sm:$0xff]  }
 0x11b   : > { %10212 = vmatpush1.bf16.msra.mxu0 %v14541_v29  ;;  %11237 = vmatpush1.bf16.msra.mxu1 %v14544_v30  ;;  %v14637_v29 = vld [vmem:[%s17099_s2 + $0x62c] ss:$16 sps:$4 sm:$0xff]   ;;  %v1976_v30 = vcombine.high %v17281_v25, %v17281_v25  ;;  %v14638_v25 = vld [vmem:[%s17099_s2 + $0x640] ss:$16 sps:$4 sm:$0xff]  }
 0x11c   : > { %10213 = vmatprep.subr.bf16.mxu0 %v14549_v31  ;;  %11238 = vmatprep.subr.bf16.mxu1 %v14552_v32  ;;  %v14635_v31 = vld [vmem:[%s17099_s2 + $0x628] ss:$16 sps:$4 sm:$0xff]   ;;  %v14640_v32 = vld [vmem:[%s17099_s2 + $0x644] ss:$16 sps:$4 sm:$0xff]  }
 0x11f   : > { %10214 = vmatpush1.bf16.msra.mxu0 %v14547_v33  ;;  %11239 = vmatpush1.bf16.msra.mxu1 %v14550_v34  ;;  %v14643_v33 = vld [vmem:[%s17099_s2 + $0x64c] ss:$16 sps:$4 sm:$0xff]   ;;  %v14641_v34 = vld [vmem:[%s17099_s2 + $0x648] ss:$16 sps:$4 sm:$0xff]  }
 0x120   : > { %10215 = vmatprep.subr.bf16.mxu0 %v14555_v35  ;;  %11240 = vmatprep.subr.bf16.mxu1 %v14558_v36  ;;  %v14646_v35 = vld [vmem:[%s17099_s2 + $0x664] ss:$16 sps:$4 sm:$0xff]   ;;  %v14649_v36 = vld [vmem:[%s17099_s2 + $0x66c] ss:$16 sps:$4 sm:$0xff]  }
 0x123   : > { %10216 = vmatpush1.bf16.msra.mxu0 %v14553_v37  ;;  %11241 = vmatpush1.bf16.msra.mxu1 %v14556_v38  ;;  %v14644_v37 = vld [vmem:[%s17099_s2 + $0x660] ss:$16 sps:$4 sm:$0xff]   ;;  %v14647_v38 = vld [vmem:[%s17099_s2 + $0x668] ss:$16 sps:$4 sm:$0xff]  }
 0x124   : > { %10217 = vmatprep.subr.bf16.mxu0 %v14561_v39  ;;  %11242 = vmatprep.subr.bf16.mxu1 %v14564_v40  ;;  %v14652_v39 = vld [vmem:[%s17099_s2 + $0x684] ss:$16 sps:$4 sm:$0xff]   ;;  %v14655_v40 = vld [vmem:[%s17099_s2 + $0x68c] ss:$16 sps:$4 sm:$0xff]  }
 0x127   : > { %10218 = vmatpush1.bf16.msra.mxu0 %v14559_v41  ;;  %11243 = vmatpush1.bf16.msra.mxu1 %v14562_v42  ;;  %v14650_v41 = vld [vmem:[%s17099_s2 + $0x680] ss:$16 sps:$4 sm:$0xff]   ;;  %v14653_v42 = vld [vmem:[%s17099_s2 + $0x688] ss:$16 sps:$4 sm:$0xff]  }
 0x128   : > { %10219 = vmatprep.subr.bf16.mxu0 %v14567_v44  ;;  %11244 = vmatprep.subr.bf16.mxu1 %v14570_v45  ;;  %v14658_v44 = vld [vmem:[%s17099_s2 + $0x6a4] ss:$16 sps:$4 sm:$0xff]   ;;  %v14661_v45 = vld [vmem:[%s17099_s2 + $0x6ac] ss:$16 sps:$4 sm:$0xff]  }
 0x12b   : > { %10220 = vmatpush1.bf16.msra.mxu0 %v14565_v46  ;;  %11245 = vmatpush1.bf16.msra.mxu1 %v14568_v47  ;;  %v14656_v46 = vld [vmem:[%s17099_s2 + $0x6a0] ss:$16 sps:$4 sm:$0xff]   ;;  %v14659_v47 = vld [vmem:[%s17099_s2 + $0x6a8] ss:$16 sps:$4 sm:$0xff]  }
 0x12c   : > { %10221 = vmatprep.subr.bf16.mxu0 %v14573_v48  ;;  %11246 = vmatprep.subr.bf16.mxu1 %v14576_v50  ;;  %v14664_v48 = vld [vmem:[%s17099_s2 + $0x6c4] ss:$16 sps:$4 sm:$0xff]   ;;  %v14667_v50 = vld [vmem:[%s17099_s2 + $0x6cc] ss:$16 sps:$4 sm:$0xff]  }
 0x12f   : > { %10222 = vmatpush1.bf16.msra.mxu0 %v14571_v51  ;;  %11247 = vmatpush1.bf16.msra.mxu1 %v14574_v53  ;;  %v14662_v51 = vld [vmem:[%s17099_s2 + $0x6c0] ss:$16 sps:$4 sm:$0xff]   ;;  %v14665_v53 = vld [vmem:[%s17099_s2 + $0x6c8] ss:$16 sps:$4 sm:$0xff]  }
 0x130   : > { %10223 = vmatprep.subr.bf16.mxu0 %v14579_v54  ;;  %11248 = vmatprep.subr.bf16.mxu1 %v14582_v55  ;;  %v14670_v54 = vld [vmem:[%s17099_s2 + $0x6e4] ss:$16 sps:$4 sm:$0xff]   ;;  %v14673_v55 = vld [vmem:[%s17099_s2 + $0x6ec] ss:$16 sps:$4 sm:$0xff]  }
 0x133   : > { %10224 = vmatpush1.bf16.msra.mxu0 %v14577_v56  ;;  %11249 = vmatpush1.bf16.msra.mxu1 %v14580_v57  ;;  %v14668_v56 = vld [vmem:[%s17099_s2 + $0x6e0] ss:$16 sps:$4 sm:$0xff]   ;;  %v14671_v57 = vld [vmem:[%s17099_s2 + $0x6e8] ss:$16 sps:$4 sm:$0xff]  }
 0x134   : > { %10225 = vmatprep.subr.bf16.mxu0 %v14585_v58  ;;  %11250 = vmatprep.subr.bf16.mxu1 %v14588_v59  ;;  %v14676_v58 = vld [vmem:[%s17099_s2 + $0x704] ss:$16 sps:$4 sm:$0xff]   ;;  %v14679_v59 = vld [vmem:[%s17099_s2 + $0x70c] ss:$16 sps:$4 sm:$0xff]  }
 0x137   : > { %10226 = vmatpush1.bf16.msra.mxu0 %v14583_v60  ;;  %11251 = vmatpush1.bf16.msra.mxu1 %v14586_v61  ;;  %v14674_v60 = vld [vmem:[%s17099_s2 + $0x700] ss:$16 sps:$4 sm:$0xff]   ;;  %v14677_v61 = vld [vmem:[%s17099_s2 + $0x708] ss:$16 sps:$4 sm:$0xff]  }
 0x138   : > { %10227 = vmatprep.subr.bf16.mxu0 %v14591_v62  ;;  %11252 = vmatprep.subr.bf16.mxu1 %v14594_v63  ;;  %v14682_v62 = vld [vmem:[%s17099_s2 + $0x724] ss:$16 sps:$4 sm:$0xff]   ;;  %v14685_v63 = vld [vmem:[%s17099_s2 + $0x72c] ss:$16 sps:$4 sm:$0xff]  }
 0x13b   : > { %10228 = vmatpush1.bf16.msra.mxu0 %v14589_v0  ;;  %11253 = vmatpush1.bf16.msra.mxu1 %v14592_v1  ;;  %v14680_v0 = vld [vmem:[%s17099_s2 + $0x720] ss:$16 sps:$4 sm:$0xff]   ;;  %v14683_v1 = vld [vmem:[%s17099_s2 + $0x728] ss:$16 sps:$4 sm:$0xff]  }
 0x13c   : > { %10229 = vmatprep.subr.bf16.mxu0 %v14597_v2  ;;  %11254 = vmatprep.subr.bf16.mxu1 %v14600_v3  ;;  %v14688_v2 = vld [vmem:[%s17099_s2 + $0x744] ss:$16 sps:$4 sm:$0xff]   ;;  %v14691_v3 = vld [vmem:[%s17099_s2 + $0x74c] ss:$16 sps:$4 sm:$0xff]  }
 0x13f   : > { %10230 = vmatpush1.bf16.msra.mxu0 %v14595_v4  ;;  %11255 = vmatpush1.bf16.msra.mxu1 %v14598_v5  ;;  %v14686_v4 = vld [vmem:[%s17099_s2 + $0x740] ss:$16 sps:$4 sm:$0xff]   ;;  %v14689_v5 = vld [vmem:[%s17099_s2 + $0x748] ss:$16 sps:$4 sm:$0xff]  }
 0x140   : > { %10231 = vmatprep.subr.bf16.mxu0 %v14603_v6  ;;  %11256 = vmatprep.subr.bf16.mxu1 %v14606_v7  ;;  %v14694_v6 = vld [vmem:[%s17099_s2 + $0x764] ss:$16 sps:$4 sm:$0xff]   ;;  %v14697_v7 = vld [vmem:[%s17099_s2 + $0x76c] ss:$16 sps:$4 sm:$0xff]  }
 0x143   : > { %10232 = vmatpush1.bf16.msra.mxu0 %v14601_v8  ;;  %11257 = vmatpush1.bf16.msra.mxu1 %v14604_v9  ;;  %v14692_v8 = vld [vmem:[%s17099_s2 + $0x760] ss:$16 sps:$4 sm:$0xff]   ;;  %v14695_v9 = vld [vmem:[%s17099_s2 + $0x768] ss:$16 sps:$4 sm:$0xff]  }
 0x144   : > { %10233 = vmatprep.subr.bf16.mxu0 %v14609_v10  ;;  %11258 = vmatprep.subr.bf16.mxu1 %v14612_v11  ;;  %v14700_v10 = vld [vmem:[%s17099_s2 + $0x784] ss:$16 sps:$4 sm:$0xff]   ;;  %v14703_v11 = vld [vmem:[%s17099_s2 + $0x78c] ss:$16 sps:$4 sm:$0xff]  }
 0x147   : > { %10234 = vmatpush1.bf16.msra.mxu0 %v14607_v12  ;;  %11259 = vmatpush1.bf16.msra.mxu1 %v14610_v14  ;;  %v14698_v12 = vld [vmem:[%s17099_s2 + $0x780] ss:$16 sps:$4 sm:$0xff]   ;;  %v14701_v14 = vld [vmem:[%s17099_s2 + $0x788] ss:$16 sps:$4 sm:$0xff]  }
 0x148   : > { %10235 = vmatprep.subr.bf16.mxu0 %v14615_v16  ;;  %11260 = vmatprep.subr.bf16.mxu1 %v14618_v52  ;;  %v14706_v16 = vld [vmem:[%s17099_s2 + $0x7a4] ss:$16 sps:$4 sm:$0xff]   ;;  %v14709_v52 = vld [vmem:[%s17099_s2 + $0x7ac] ss:$16 sps:$4 sm:$0xff]  }
 0x14b   : > { %10236 = vmatpush1.bf16.msra.mxu0 %v14613_v17  ;;  %11261 = vmatpush1.bf16.msra.mxu1 %v14616_v18  ;;  %v14704_v17 = vld [vmem:[%s17099_s2 + $0x7a0] ss:$16 sps:$4 sm:$0xff]   ;;  %v14707_v18 = vld [vmem:[%s17099_s2 + $0x7a8] ss:$16 sps:$4 sm:$0xff]  }
 0x14c   : > { %10237 = vmatprep.subr.bf16.mxu0 %v14621_v19  ;;  %11262 = vmatprep.subr.bf16.mxu1 %v14624_v20  ;;  %v14712_v19 = vld [vmem:[%s17099_s2 + $0x7c4] ss:$16 sps:$4 sm:$0xff]   ;;  %v14715_v20 = vld [vmem:[%s17099_s2 + $0x7cc] ss:$16 sps:$4 sm:$0xff]  }
 0x14f   : > { %10238 = vmatpush1.bf16.msra.mxu0 %v14619_v21  ;;  %11263 = vmatpush1.bf16.msra.mxu1 %v14622_v22  ;;  %v17412_v21 = vld.sshfl [vmem:[%s19030_s0 + $0x8] sm:$0xff pattern:$0x75316420]  ;;  %v14710_v22 = vld [vmem:[%s17099_s2 + $0x7c0] ss:$16 sps:$4 sm:$0xff]  }
 0x150   : > { %10248 = vmatprep.subr.bf16.mxu0 %v14628_v23  ;;  %11273 = vmatprep.subr.bf16.mxu1 %v14631_v24  ;;  %v14713_v23 = vld [vmem:[%s17099_s2 + $0x7c8] ss:$16 sps:$4 sm:$0xff]   ;;  %v14718_v24 = vld [vmem:[%s17099_s2 + $0x7e4] ss:$16 sps:$4 sm:$0xff]  }
 0x152   : > { %10240 = vmatmul.mubr.bf16.vlgmr.msra.gmra.mrb[0].mxu0 %v17348_v13  ;;  %11265 = vmatmul.mubr.bf16.vlgmr.msra.gmra.mrb[0].mxu1 %v17348_v13 }
 0x153   : > { %10249 = vmatpush1.bf16.msra.mxu0 %v14626_v26  ;;  %11274 = vmatpush1.bf16.msra.mxu1 %v14629_v27  ;;  %v14721_v26 = vld [vmem:[%s17099_s2 + $0x7ec] ss:$16 sps:$4 sm:$0xff]   ;;  %v14716_v27 = vld [vmem:[%s17099_s2 + $0x7e0] ss:$16 sps:$4 sm:$0xff]  }
 0x154   : > { %10250 = vmatprep.subr.bf16.mxu0 %v14634_v28  ;;  %11275 = vmatprep.subr.bf16.mxu1 %v14637_v29  ;;  %v14719_v28 = vld [vmem:[%s17099_s2 + $0x7e8] ss:$16 sps:$4 sm:$0xff]   ;;  %v14724_v29 = vld [vmem:[%s17099_s2 + $0x804] ss:$16 sps:$4 sm:$0xff]  }
 0x155   : > { %10280 = vmatprep.mubr.bf16.mxu0 %v1976_v30  ;;  %11305 = vmatprep.mubr.bf16.mxu1 %v1976_v30  ;;  %v14727_v30 = vld [vmem:[%s17099_s2 + $0x80c] ss:$16 sps:$4 sm:$0xff]  }
 0x157   : > { %10251 = vmatpush1.bf16.msra.mxu0 %v14632_v15  ;;  %11276 = vmatpush1.bf16.msra.mxu1 %v14635_v31  ;;  %v1992_v15 = vcombine.high %v17412_v21, %v17412_v21  ;;  %v1974_v31 = vcombine.high %v17348_v13, %v17348_v13  ;;  %v14728_v13 = vld [vmem:[%s17099_s2 + $0x820] ss:$16 sps:$4 sm:$0xff]  }
 0x158   : > { %10252 = vmatprep.subr.bf16.mxu0 %v14640_v32  ;;  %11277 = vmatprep.subr.bf16.mxu1 %v14643_v33  ;;  %v14722_v32 = vld [vmem:[%s17099_s2 + $0x800] ss:$16 sps:$4 sm:$0xff]   ;;  %v14725_v33 = vld [vmem:[%s17099_s2 + $0x808] ss:$16 sps:$4 sm:$0xff]  }
 0x15b   : > { %10253 = vmatpush1.bf16.msra.mxu0 %v14638_v25  ;;  %11278 = vmatpush1.bf16.msra.mxu1 %v14641_v34  ;;  %v14730_v25 = vld [vmem:[%s17099_s2 + $0x824] ss:$16 sps:$4 sm:$0xff]   ;;  %v14733_v34 = vld [vmem:[%s17099_s2 + $0x82c] ss:$16 sps:$4 sm:$0xff]  }
 0x15c   : > { %10254 = vmatprep.subr.bf16.mxu0 %v14646_v35  ;;  %11279 = vmatprep.subr.bf16.mxu1 %v14649_v36  ;;  %v17431_v35 = vrot.slane %v1992_v15, %v17166_v49  ;;  %v14731_v36 = vld [vmem:[%s17099_s2 + $0x828] ss:$16 sps:$4 sm:$0xff]   ;;  %v14814_v15 = vld [vmem:[%s17099_s2 + $0x9e4] ss:$16 sps:$4 sm:$0xff]  }
 0x15f   : > { %10255 = vmatpush1.bf16.msra.mxu0 %v14644_v37  ;;  %11280 = vmatpush1.bf16.msra.mxu1 %v14647_v38  ;;  %v14736_v37 = vld [vmem:[%s17099_s2 + $0x844] ss:$16 sps:$4 sm:$0xff]   ;;  %v14739_v38 = vld [vmem:[%s17099_s2 + $0x84c] ss:$16 sps:$4 sm:$0xff]  }
 0x160   : > { %10256 = vmatprep.subr.bf16.mxu0 %v14652_v39  ;;  %11281 = vmatprep.subr.bf16.mxu1 %v14655_v40  ;;  %v14734_v39 = vld [vmem:[%s17099_s2 + $0x840] ss:$16 sps:$4 sm:$0xff]   ;;  %v14737_v40 = vld [vmem:[%s17099_s2 + $0x848] ss:$16 sps:$4 sm:$0xff]  }
 0x163   : > { %10257 = vmatpush1.bf16.msra.mxu0 %v14650_v41  ;;  %11282 = vmatpush1.bf16.msra.mxu1 %v14653_v42  ;;  %v14742_v41 = vld [vmem:[%s17099_s2 + $0x864] ss:$16 sps:$4 sm:$0xff]   ;;  %v14745_v42 = vld [vmem:[%s17099_s2 + $0x86c] ss:$16 sps:$4 sm:$0xff]  }
 0x164   : > { %10258 = vmatprep.subr.bf16.mxu0 %v14658_v44  ;;  %11283 = vmatprep.subr.bf16.mxu1 %v14661_v45  ;;  %v14740_v44 = vld [vmem:[%s17099_s2 + $0x860] ss:$16 sps:$4 sm:$0xff]   ;;  %v14743_v45 = vld [vmem:[%s17099_s2 + $0x868] ss:$16 sps:$4 sm:$0xff]  }
 0x167   : > { %10259 = vmatpush1.bf16.msra.mxu0 %v14656_v46  ;;  %11284 = vmatpush1.bf16.msra.mxu1 %v14659_v47  ;;  %v14748_v46 = vld [vmem:[%s17099_s2 + $0x884] ss:$16 sps:$4 sm:$0xff]   ;;  %v14751_v47 = vld [vmem:[%s17099_s2 + $0x88c] ss:$16 sps:$4 sm:$0xff]  }
 0x168   : > { %10260 = vmatprep.subr.bf16.mxu0 %v14664_v48  ;;  %11285 = vmatprep.subr.bf16.mxu1 %v14667_v50  ;;  %v14746_v48 = vld [vmem:[%s17099_s2 + $0x880] ss:$16 sps:$4 sm:$0xff]   ;;  %v14749_v50 = vld [vmem:[%s17099_s2 + $0x888] ss:$16 sps:$4 sm:$0xff]  }
 0x16b   : > { %10261 = vmatpush1.bf16.msra.mxu0 %v14662_v51  ;;  %11286 = vmatpush1.bf16.msra.mxu1 %v14665_v53  ;;  %v14754_v51 = vld [vmem:[%s17099_s2 + $0x8a4] ss:$16 sps:$4 sm:$0xff]   ;;  %v14757_v53 = vld [vmem:[%s17099_s2 + $0x8ac] ss:$16 sps:$4 sm:$0xff]  }
 0x16c   : > { %10262 = vmatprep.subr.bf16.mxu0 %v14670_v54  ;;  %11287 = vmatprep.subr.bf16.mxu1 %v14673_v55  ;;  %v14752_v54 = vld [vmem:[%s17099_s2 + $0x8a0] ss:$16 sps:$4 sm:$0xff]   ;;  %v14755_v55 = vld [vmem:[%s17099_s2 + $0x8a8] ss:$16 sps:$4 sm:$0xff]  }
 0x16f   : > { %10263 = vmatpush1.bf16.msra.mxu0 %v14668_v56  ;;  %11288 = vmatpush1.bf16.msra.mxu1 %v14671_v57  ;;  %v14760_v56 = vld [vmem:[%s17099_s2 + $0x8c4] ss:$16 sps:$4 sm:$0xff]   ;;  %v14763_v57 = vld [vmem:[%s17099_s2 + $0x8cc] ss:$16 sps:$4 sm:$0xff]  }
 0x170   : > { %10264 = vmatprep.subr.bf16.mxu0 %v14676_v58  ;;  %11289 = vmatprep.subr.bf16.mxu1 %v14679_v59  ;;  %v14758_v58 = vld [vmem:[%s17099_s2 + $0x8c0] ss:$16 sps:$4 sm:$0xff]   ;;  %v14761_v59 = vld [vmem:[%s17099_s2 + $0x8c8] ss:$16 sps:$4 sm:$0xff]  }
 0x173   : > { %10265 = vmatpush1.bf16.msra.mxu0 %v14674_v60  ;;  %11290 = vmatpush1.bf16.msra.mxu1 %v14677_v61  ;;  %v14766_v60 = vld [vmem:[%s17099_s2 + $0x8e4] ss:$16 sps:$4 sm:$0xff]   ;;  %v14769_v61 = vld [vmem:[%s17099_s2 + $0x8ec] ss:$16 sps:$4 sm:$0xff]  }
 0x174   : > { %10266 = vmatprep.subr.bf16.mxu0 %v14682_v62  ;;  %11291 = vmatprep.subr.bf16.mxu1 %v14685_v63  ;;  %v14764_v62 = vld [vmem:[%s17099_s2 + $0x8e0] ss:$16 sps:$4 sm:$0xff]   ;;  %v14767_v63 = vld [vmem:[%s17099_s2 + $0x8e8] ss:$16 sps:$4 sm:$0xff]  }
 0x177   : > { %10267 = vmatpush1.bf16.msra.mxu0 %v14680_v0  ;;  %11292 = vmatpush1.bf16.msra.mxu1 %v14683_v1  ;;  %v14772_v0 = vld [vmem:[%s17099_s2 + $0x904] ss:$16 sps:$4 sm:$0xff]   ;;  %v14775_v1 = vld [vmem:[%s17099_s2 + $0x90c] ss:$16 sps:$4 sm:$0xff]  }
 0x178   : > { %10268 = vmatprep.subr.bf16.mxu0 %v14688_v2  ;;  %11293 = vmatprep.subr.bf16.mxu1 %v14691_v3  ;;  %v14770_v2 = vld [vmem:[%s17099_s2 + $0x900] ss:$16 sps:$4 sm:$0xff]   ;;  %v14773_v3 = vld [vmem:[%s17099_s2 + $0x908] ss:$16 sps:$4 sm:$0xff]  }
 0x17b   : > { %10269 = vmatpush1.bf16.msra.mxu0 %v14686_v4  ;;  %11294 = vmatpush1.bf16.msra.mxu1 %v14689_v5  ;;  %v14778_v4 = vld [vmem:[%s17099_s2 + $0x924] ss:$16 sps:$4 sm:$0xff]   ;;  %v14781_v5 = vld [vmem:[%s17099_s2 + $0x92c] ss:$16 sps:$4 sm:$0xff]  }
 0x17c   : > { %10270 = vmatprep.subr.bf16.mxu0 %v14694_v6  ;;  %11295 = vmatprep.subr.bf16.mxu1 %v14697_v7  ;;  %v14776_v6 = vld [vmem:[%s17099_s2 + $0x920] ss:$16 sps:$4 sm:$0xff]   ;;  %v14779_v7 = vld [vmem:[%s17099_s2 + $0x928] ss:$16 sps:$4 sm:$0xff]  }
 0x17f   : > { %10271 = vmatpush1.bf16.msra.mxu0 %v14692_v8  ;;  %11296 = vmatpush1.bf16.msra.mxu1 %v14695_v9  ;;  %v14784_v8 = vld [vmem:[%s17099_s2 + $0x944] ss:$16 sps:$4 sm:$0xff]   ;;  %v14787_v9 = vld [vmem:[%s17099_s2 + $0x94c] ss:$16 sps:$4 sm:$0xff]  }
 0x180   : > { %10272 = vmatprep.subr.bf16.mxu0 %v14700_v10  ;;  %11297 = vmatprep.subr.bf16.mxu1 %v14703_v11  ;;  %v14782_v10 = vld [vmem:[%s17099_s2 + $0x940] ss:$16 sps:$4 sm:$0xff]   ;;  %v14785_v11 = vld [vmem:[%s17099_s2 + $0x948] ss:$16 sps:$4 sm:$0xff]  }
 0x183   : > { %10273 = vmatpush1.bf16.msra.mxu0 %v14698_v12  ;;  %11298 = vmatpush1.bf16.msra.mxu1 %v14701_v14  ;;  %v14790_v12 = vld [vmem:[%s17099_s2 + $0x964] ss:$16 sps:$4 sm:$0xff]   ;;  %v14793_v14 = vld [vmem:[%s17099_s2 + $0x96c] ss:$16 sps:$4 sm:$0xff]  }
 0x184   : > { %10274 = vmatprep.subr.bf16.mxu0 %v14706_v16  ;;  %11299 = vmatprep.subr.bf16.mxu1 %v14709_v52  ;;  %v14788_v16 = vld [vmem:[%s17099_s2 + $0x960] ss:$16 sps:$4 sm:$0xff]   ;;  %v14791_v52 = vld [vmem:[%s17099_s2 + $0x968] ss:$16 sps:$4 sm:$0xff]  }
 0x187   : > { %10275 = vmatpush1.bf16.msra.mxu0 %v14704_v17  ;;  %11300 = vmatpush1.bf16.msra.mxu1 %v14707_v18  ;;  %v14796_v17 = vld [vmem:[%s17099_s2 + $0x984] ss:$16 sps:$4 sm:$0xff]   ;;  %v14799_v18 = vld [vmem:[%s17099_s2 + $0x98c] ss:$16 sps:$4 sm:$0xff]  }
 0x188   : > { %10276 = vmatprep.subr.bf16.mxu0 %v14712_v19  ;;  %11301 = vmatprep.subr.bf16.mxu1 %v14715_v20  ;;  %v14794_v19 = vld [vmem:[%s17099_s2 + $0x980] ss:$16 sps:$4 sm:$0xff]   ;;  %v14797_v20 = vld [vmem:[%s17099_s2 + $0x988] ss:$16 sps:$4 sm:$0xff]  }
 0x18b   : > { %10277 = vmatpush1.bf16.msra.mxu0 %v14710_v22  ;;  %11302 = vmatpush1.bf16.msra.mxu1 %v14713_v23  ;;  %v14802_v22 = vld [vmem:[%s17099_s2 + $0x9a4] ss:$16 sps:$4 sm:$0xff]   ;;  %v14805_v23 = vld [vmem:[%s17099_s2 + $0x9ac] ss:$16 sps:$4 sm:$0xff]  }
 0x18c   : > { %10278 = vmatprep.subr.bf16.mxu0 %v14718_v24  ;;  %11303 = vmatprep.subr.bf16.mxu1 %v14721_v26  ;;  %v14800_v24 = vld [vmem:[%s17099_s2 + $0x9a0] ss:$16 sps:$4 sm:$0xff]   ;;  %v14803_v26 = vld [vmem:[%s17099_s2 + $0x9a8] ss:$16 sps:$4 sm:$0xff]  }
 0x18f   : > { %10279 = vmatpush1.bf16.msra.mxu0 %v14716_v27  ;;  %11304 = vmatpush1.bf16.msra.mxu1 %v14719_v28  ;;  %v14808_v27 = vld [vmem:[%s17099_s2 + $0x9c4] ss:$16 sps:$4 sm:$0xff]   ;;  %v14811_v28 = vld [vmem:[%s17099_s2 + $0x9cc] ss:$16 sps:$4 sm:$0xff]  }
 0x190   : > { %10289 = vmatprep.subr.bf16.mxu0 %v14724_v29  ;;  %11314 = vmatprep.subr.bf16.mxu1 %v14727_v30  ;;  %v14806_v29 = vld [vmem:[%s17099_s2 + $0x9c0] ss:$16 sps:$4 sm:$0xff]   ;;  %v14809_v30 = vld [vmem:[%s17099_s2 + $0x9c8] ss:$16 sps:$4 sm:$0xff]  }
 0x192   : > { %10281 = vmatmul.mubr.bf16.vlgmr.msra.gmra.mrb[0].mxu0 %v1974_v31  ;;  %11306 = vmatmul.mubr.bf16.vlgmr.msra.gmra.mrb[0].mxu1 %v1974_v31  ;;  %v14817_v31 = vld [vmem:[%s17099_s2 + $0x9ec] ss:$16 sps:$4 sm:$0xff]  }
 0x193   : > { %10290 = vmatpush1.bf16.msra.mxu0 %v14722_v32  ;;  %11315 = vmatpush1.bf16.msra.mxu1 %v14725_v33  ;;  %v14812_v32 = vld [vmem:[%s17099_s2 + $0x9e0] ss:$16 sps:$4 sm:$0xff]   ;;  %v14815_v33 = vld [vmem:[%s17099_s2 + $0x9e8] ss:$16 sps:$4 sm:$0xff]  }
 0x194   : > { %10291 = vmatprep.subr.bf16.mxu0 %v14730_v25  ;;  %11316 = vmatprep.subr.bf16.mxu1 %v14733_v34  ;;  %v14820_v25 = vld [vmem:[%s17099_s2 + $0xa04] ss:$16 sps:$4 sm:$0xff]   ;;  %v14823_v34 = vld [vmem:[%s17099_s2 + $0xa0c] ss:$16 sps:$4 sm:$0xff]  }
 0x195   : > { %10321 = vmatprep.mubr.bf16.mxu0 %v17431_v35  ;;  %11346 = vmatprep.mubr.bf16.mxu1 %v17431_v35 }
 0x197   : > { %10292 = vmatpush1.bf16.msra.mxu0 %v14728_v13  ;;  %11317 = vmatpush1.bf16.msra.mxu1 %v14731_v36  ;;  %v17497_v13 = vrot.slane %v17412_v21, %v17166_v49  ;;  %v14818_v36 = vld [vmem:[%s17099_s2 + $0xa00] ss:$16 sps:$4 sm:$0xff]  }
 0x198   : > { %10293 = vmatprep.subr.bf16.mxu0 %v14736_v37  ;;  %11318 = vmatprep.subr.bf16.mxu1 %v14739_v38  ;;  %v14821_v37 = vld [vmem:[%s17099_s2 + $0xa08] ss:$16 sps:$4 sm:$0xff]   ;;  %v14826_v38 = vld [vmem:[%s17099_s2 + $0xa24] ss:$16 sps:$4 sm:$0xff]   ;;  %v14824_v21 = vld [vmem:[%s17099_s2 + $0xa20] ss:$16 sps:$4 sm:$0xff]  }
 0x19b   : > { %10294 = vmatpush1.bf16.msra.mxu0 %v14734_v39  ;;  %11319 = vmatpush1.bf16.msra.mxu1 %v14737_v40  ;;  %v14829_v39 = vld [vmem:[%s17099_s2 + $0xa2c] ss:$16 sps:$4 sm:$0xff]   ;;  %v2024_v40 = vcombine.high %v17431_v35, %v17431_v35  ;;  %v14830_v35 = vld [vmem:[%s17099_s2 + $0xa40] ss:$16 sps:$4 sm:$0xff]  }
 0x19c   : > { %10295 = vmatprep.subr.bf16.mxu0 %v14742_v41  ;;  %11320 = vmatprep.subr.bf16.mxu1 %v14745_v42  ;;  %v14827_v41 = vld [vmem:[%s17099_s2 + $0xa28] ss:$16 sps:$4 sm:$0xff]   ;;  %v14832_v42 = vld [vmem:[%s17099_s2 + $0xa44] ss:$16 sps:$4 sm:$0xff]  }
 0x19f   : > { %10296 = vmatpush1.bf16.msra.mxu0 %v14740_v44  ;;  %11321 = vmatpush1.bf16.msra.mxu1 %v14743_v45  ;;  %v14835_v44 = vld [vmem:[%s17099_s2 + $0xa4c] ss:$16 sps:$4 sm:$0xff]   ;;  %v14833_v45 = vld [vmem:[%s17099_s2 + $0xa48] ss:$16 sps:$4 sm:$0xff]  }
 0x1a0   : > { %10297 = vmatprep.subr.bf16.mxu0 %v14748_v46  ;;  %11322 = vmatprep.subr.bf16.mxu1 %v14751_v47  ;;  %v14838_v46 = vld [vmem:[%s17099_s2 + $0xa64] ss:$16 sps:$4 sm:$0xff]   ;;  %v14841_v47 = vld [vmem:[%s17099_s2 + $0xa6c] ss:$16 sps:$4 sm:$0xff]  }
 0x1a3   : > { %10298 = vmatpush1.bf16.msra.mxu0 %v14746_v48  ;;  %11323 = vmatpush1.bf16.msra.mxu1 %v14749_v50  ;;  %v14836_v48 = vld [vmem:[%s17099_s2 + $0xa60] ss:$16 sps:$4 sm:$0xff]   ;;  %v14839_v50 = vld [vmem:[%s17099_s2 + $0xa68] ss:$16 sps:$4 sm:$0xff]  }
 0x1a4   : > { %10299 = vmatprep.subr.bf16.mxu0 %v14754_v51  ;;  %11324 = vmatprep.subr.bf16.mxu1 %v14757_v53  ;;  %v14844_v51 = vld [vmem:[%s17099_s2 + $0xa84] ss:$16 sps:$4 sm:$0xff]   ;;  %v14847_v53 = vld [vmem:[%s17099_s2 + $0xa8c] ss:$16 sps:$4 sm:$0xff]  }
 0x1a7   : > { %10300 = vmatpush1.bf16.msra.mxu0 %v14752_v54  ;;  %11325 = vmatpush1.bf16.msra.mxu1 %v14755_v55  ;;  %v14842_v54 = vld [vmem:[%s17099_s2 + $0xa80] ss:$16 sps:$4 sm:$0xff]   ;;  %v14845_v55 = vld [vmem:[%s17099_s2 + $0xa88] ss:$16 sps:$4 sm:$0xff]  }
 0x1a8   : > { %10301 = vmatprep.subr.bf16.mxu0 %v14760_v56  ;;  %11326 = vmatprep.subr.bf16.mxu1 %v14763_v57  ;;  %v14850_v56 = vld [vmem:[%s17099_s2 + $0xaa4] ss:$16 sps:$4 sm:$0xff]   ;;  %v14853_v57 = vld [vmem:[%s17099_s2 + $0xaac] ss:$16 sps:$4 sm:$0xff]  }
 0x1ab   : > { %10302 = vmatpush1.bf16.msra.mxu0 %v14758_v58  ;;  %11327 = vmatpush1.bf16.msra.mxu1 %v14761_v59  ;;  %v14848_v58 = vld [vmem:[%s17099_s2 + $0xaa0] ss:$16 sps:$4 sm:$0xff]   ;;  %v14851_v59 = vld [vmem:[%s17099_s2 + $0xaa8] ss:$16 sps:$4 sm:$0xff]  }
 0x1ac   : > { %10303 = vmatprep.subr.bf16.mxu0 %v14766_v60  ;;  %11328 = vmatprep.subr.bf16.mxu1 %v14769_v61  ;;  %v14856_v60 = vld [vmem:[%s17099_s2 + $0xac4] ss:$16 sps:$4 sm:$0xff]   ;;  %v14859_v61 = vld [vmem:[%s17099_s2 + $0xacc] ss:$16 sps:$4 sm:$0xff]  }
 0x1af   : > { %10304 = vmatpush1.bf16.msra.mxu0 %v14764_v62  ;;  %11329 = vmatpush1.bf16.msra.mxu1 %v14767_v63  ;;  %v14854_v62 = vld [vmem:[%s17099_s2 + $0xac0] ss:$16 sps:$4 sm:$0xff]   ;;  %v14857_v63 = vld [vmem:[%s17099_s2 + $0xac8] ss:$16 sps:$4 sm:$0xff]  }
 0x1b0   : > { %10305 = vmatprep.subr.bf16.mxu0 %v14772_v0  ;;  %11330 = vmatprep.subr.bf16.mxu1 %v14775_v1  ;;  %v14862_v0 = vld [vmem:[%s17099_s2 + $0xae4] ss:$16 sps:$4 sm:$0xff]   ;;  %v14865_v1 = vld [vmem:[%s17099_s2 + $0xaec] ss:$16 sps:$4 sm:$0xff]  }
 0x1b3   : > { %10306 = vmatpush1.bf16.msra.mxu0 %v14770_v2  ;;  %11331 = vmatpush1.bf16.msra.mxu1 %v14773_v3  ;;  %v14860_v2 = vld [vmem:[%s17099_s2 + $0xae0] ss:$16 sps:$4 sm:$0xff]   ;;  %v14863_v3 = vld [vmem:[%s17099_s2 + $0xae8] ss:$16 sps:$4 sm:$0xff]  }
 0x1b4   : > { %10307 = vmatprep.subr.bf16.mxu0 %v14778_v4  ;;  %11332 = vmatprep.subr.bf16.mxu1 %v14781_v5  ;;  %v14868_v4 = vld [vmem:[%s17099_s2 + $0xb04] ss:$16 sps:$4 sm:$0xff]   ;;  %v14871_v5 = vld [vmem:[%s17099_s2 + $0xb0c] ss:$16 sps:$4 sm:$0xff]  }
 0x1b7   : > { %10308 = vmatpush1.bf16.msra.mxu0 %v14776_v6  ;;  %11333 = vmatpush1.bf16.msra.mxu1 %v14779_v7  ;;  %v14866_v6 = vld [vmem:[%s17099_s2 + $0xb00] ss:$16 sps:$4 sm:$0xff]   ;;  %v14869_v7 = vld [vmem:[%s17099_s2 + $0xb08] ss:$16 sps:$4 sm:$0xff]  }
 0x1b8   : > { %10309 = vmatprep.subr.bf16.mxu0 %v14784_v8  ;;  %11334 = vmatprep.subr.bf16.mxu1 %v14787_v9  ;;  %v14874_v8 = vld [vmem:[%s17099_s2 + $0xb24] ss:$16 sps:$4 sm:$0xff]   ;;  %v14877_v9 = vld [vmem:[%s17099_s2 + $0xb2c] ss:$16 sps:$4 sm:$0xff]  }
 0x1bb   : > { %10310 = vmatpush1.bf16.msra.mxu0 %v14782_v10  ;;  %11335 = vmatpush1.bf16.msra.mxu1 %v14785_v11  ;;  %v14872_v10 = vld [vmem:[%s17099_s2 + $0xb20] ss:$16 sps:$4 sm:$0xff]   ;;  %v14875_v11 = vld [vmem:[%s17099_s2 + $0xb28] ss:$16 sps:$4 sm:$0xff]  }
 0x1bc   : > { %10311 = vmatprep.subr.bf16.mxu0 %v14790_v12  ;;  %11336 = vmatprep.subr.bf16.mxu1 %v14793_v14  ;;  %v14880_v12 = vld [vmem:[%s17099_s2 + $0xb44] ss:$16 sps:$4 sm:$0xff]   ;;  %v14883_v14 = vld [vmem:[%s17099_s2 + $0xb4c] ss:$16 sps:$4 sm:$0xff]  }
 0x1bf   : > { %10312 = vmatpush1.bf16.msra.mxu0 %v14788_v16  ;;  %11337 = vmatpush1.bf16.msra.mxu1 %v14791_v52  ;;  %v14878_v16 = vld [vmem:[%s17099_s2 + $0xb40] ss:$16 sps:$4 sm:$0xff]   ;;  %v14881_v52 = vld [vmem:[%s17099_s2 + $0xb48] ss:$16 sps:$4 sm:$0xff]  }
 0x1c0   : > { %10313 = vmatprep.subr.bf16.mxu0 %v14796_v17  ;;  %11338 = vmatprep.subr.bf16.mxu1 %v14799_v18  ;;  %v14886_v17 = vld [vmem:[%s17099_s2 + $0xb64] ss:$16 sps:$4 sm:$0xff]   ;;  %v14889_v18 = vld [vmem:[%s17099_s2 + $0xb6c] ss:$16 sps:$4 sm:$0xff]  }
 0x1c3   : > { %10314 = vmatpush1.bf16.msra.mxu0 %v14794_v19  ;;  %11339 = vmatpush1.bf16.msra.mxu1 %v14797_v20  ;;  %v14884_v19 = vld [vmem:[%s17099_s2 + $0xb60] ss:$16 sps:$4 sm:$0xff]   ;;  %v14887_v20 = vld [vmem:[%s17099_s2 + $0xb68] ss:$16 sps:$4 sm:$0xff]  }
 0x1c4   : > { %10315 = vmatprep.subr.bf16.mxu0 %v14802_v22  ;;  %11340 = vmatprep.subr.bf16.mxu1 %v14805_v23  ;;  %v14892_v22 = vld [vmem:[%s17099_s2 + $0xb84] ss:$16 sps:$4 sm:$0xff]   ;;  %v14895_v23 = vld [vmem:[%s17099_s2 + $0xb8c] ss:$16 sps:$4 sm:$0xff]  }
 0x1c7   : > { %10316 = vmatpush1.bf16.msra.mxu0 %v14800_v24  ;;  %11341 = vmatpush1.bf16.msra.mxu1 %v14803_v26  ;;  %v14890_v24 = vld [vmem:[%s17099_s2 + $0xb80] ss:$16 sps:$4 sm:$0xff]   ;;  %v14893_v26 = vld [vmem:[%s17099_s2 + $0xb88] ss:$16 sps:$4 sm:$0xff]  }
 0x1c8   : > { %10317 = vmatprep.subr.bf16.mxu0 %v14808_v27  ;;  %11342 = vmatprep.subr.bf16.mxu1 %v14811_v28  ;;  %v14898_v27 = vld [vmem:[%s17099_s2 + $0xba4] ss:$16 sps:$4 sm:$0xff]   ;;  %v14901_v28 = vld [vmem:[%s17099_s2 + $0xbac] ss:$16 sps:$4 sm:$0xff]  }
 0x1cb   : > { %10318 = vmatpush1.bf16.msra.mxu0 %v14806_v29  ;;  %11343 = vmatpush1.bf16.msra.mxu1 %v14809_v30  ;;  %v14896_v29 = vld [vmem:[%s17099_s2 + $0xba0] ss:$16 sps:$4 sm:$0xff]   ;;  %v14899_v30 = vld [vmem:[%s17099_s2 + $0xba8] ss:$16 sps:$4 sm:$0xff]  }
 0x1cc   : > { %10319 = vmatprep.subr.bf16.mxu0 %v14814_v15  ;;  %11344 = vmatprep.subr.bf16.mxu1 %v14817_v31  ;;  %v14904_v15 = vld [vmem:[%s17099_s2 + $0xbc4] ss:$16 sps:$4 sm:$0xff]   ;;  %v14907_v31 = vld [vmem:[%s17099_s2 + $0xbcc] ss:$16 sps:$4 sm:$0xff]  }
 0x1cf   : > { %10320 = vmatpush1.bf16.msra.mxu0 %v14812_v32  ;;  %11345 = vmatpush1.bf16.msra.mxu1 %v14815_v33  ;;  %v16703_v32 = vld [vmem:[%s19030_s0 + $0x8] sm:$0xff] }
 0x1d0   : > { %10330 = vmatprep.subr.bf16.mxu0 %v14820_v25  ;;  %11355 = vmatprep.subr.bf16.mxu1 %v14823_v34  ;;  %v1977_v33 = vcombine.high %v16703_v32, %v16703_v32  ;;  %v14902_v25 = vld [vmem:[%s17099_s2 + $0xbc0] ss:$16 sps:$4 sm:$0xff]   ;;  %v14905_v34 = vld [vmem:[%s17099_s2 + $0xbc8] ss:$16 sps:$4 sm:$0xff]  }
 0x1d1   : > { %v14986_v32 = vld [vmem:[%s17099_s2 + $0xd80] ss:$16 sps:$4 sm:$0xff]  }
 0x1d2   : > { %10322 = vmatmul.mubr.bf16.vlgmr.msra.gmra.mrb[0].mxu0 %v17497_v13  ;;  %11347 = vmatmul.mubr.bf16.vlgmr.msra.gmra.mrb[0].mxu1 %v17497_v13 }
 0x1d3   : > { %10331 = vmatpush1.bf16.msra.mxu0 %v14818_v36  ;;  %11356 = vmatpush1.bf16.msra.mxu1 %v14821_v37  ;;  %v14910_v36 = vld [vmem:[%s17099_s2 + $0xbe4] ss:$16 sps:$4 sm:$0xff]   ;;  %v14913_v37 = vld [vmem:[%s17099_s2 + $0xbec] ss:$16 sps:$4 sm:$0xff]  }
 0x1d4   : > { %10332 = vmatprep.subr.bf16.mxu0 %v14826_v38  ;;  %11357 = vmatprep.subr.bf16.mxu1 %v14829_v39  ;;  %v17567_v38 = vrot.slane %v1977_v33, %v17166_v49  ;;  %v14908_v39 = vld [vmem:[%s17099_s2 + $0xbe0] ss:$16 sps:$4 sm:$0xff]   ;;  %v14989_v33 = vld [vmem:[%s17099_s2 + $0xd88] ss:$16 sps:$4 sm:$0xff]  }
 0x1d5   : > { %10362 = vmatprep.mubr.bf16.mxu0 %v2024_v40  ;;  %11387 = vmatprep.mubr.bf16.mxu1 %v2024_v40  ;;  %v14911_v40 = vld [vmem:[%s17099_s2 + $0xbe8] ss:$16 sps:$4 sm:$0xff]  }
 0x1d7   : > { %10333 = vmatpush1.bf16.msra.mxu0 %v14824_v21  ;;  %11358 = vmatpush1.bf16.msra.mxu1 %v14827_v41  ;;  %v14916_v21 = vld [vmem:[%s17099_s2 + $0xc04] ss:$16 sps:$4 sm:$0xff]   ;;  %v14919_v41 = vld [vmem:[%s17099_s2 + $0xc0c] ss:$16 sps:$4 sm:$0xff]  }
 0x1d8   : > { %10334 = vmatprep.subr.bf16.mxu0 %v14832_v42  ;;  %11359 = vmatprep.subr.bf16.mxu1 %v14835_v44  ;;  %v1993_v42 = vcombine.high %v17567_v38, %v17567_v38  ;;  %v2022_v44 = vcombine.high %v17497_v13, %v17497_v13  ;;  %v14920_v13 = vld [vmem:[%s17099_s2 + $0xc20] ss:$16 sps:$4 sm:$0xff]  }
 0x1db   : > { %10335 = vmatpush1.bf16.msra.mxu0 %v14830_v35  ;;  %11360 = vmatpush1.bf16.msra.mxu1 %v14833_v45  ;;  %v14914_v35 = vld [vmem:[%s17099_s2 + $0xc00] ss:$16 sps:$4 sm:$0xff]   ;;  %v14917_v45 = vld [vmem:[%s17099_s2 + $0xc08] ss:$16 sps:$4 sm:$0xff]  }
 0x1dc   : > { %10336 = vmatprep.subr.bf16.mxu0 %v14838_v46  ;;  %11361 = vmatprep.subr.bf16.mxu1 %v14841_v47  ;;  %v14922_v46 = vld [vmem:[%s17099_s2 + $0xc24] ss:$16 sps:$4 sm:$0xff]   ;;  %v14925_v47 = vld [vmem:[%s17099_s2 + $0xc2c] ss:$16 sps:$4 sm:$0xff]  }
 0x1df   : > { %10337 = vmatpush1.bf16.msra.mxu0 %v14836_v48  ;;  %11362 = vmatpush1.bf16.msra.mxu1 %v14839_v50  ;;  %v17582_v48 = vrot.slane %v1993_v42, %v17166_v49  ;;  %v14923_v50 = vld [vmem:[%s17099_s2 + $0xc28] ss:$16 sps:$4 sm:$0xff]   ;;  %v15006_v42 = vld [vmem:[%s17099_s2 + $0xde4] ss:$16 sps:$4 sm:$0xff]  }
 0x1e0   : > { %10338 = vmatprep.subr.bf16.mxu0 %v14844_v51  ;;  %11363 = vmatprep.subr.bf16.mxu1 %v14847_v53  ;;  %v14928_v51 = vld [vmem:[%s17099_s2 + $0xc44] ss:$16 sps:$4 sm:$0xff]   ;;  %v14931_v53 = vld [vmem:[%s17099_s2 + $0xc4c] ss:$16 sps:$4 sm:$0xff]  }
 0x1e3   : > { %10339 = vmatpush1.bf16.msra.mxu0 %v14842_v54  ;;  %11364 = vmatpush1.bf16.msra.mxu1 %v14845_v55  ;;  %v14926_v54 = vld [vmem:[%s17099_s2 + $0xc40] ss:$16 sps:$4 sm:$0xff]   ;;  %v14929_v55 = vld [vmem:[%s17099_s2 + $0xc48] ss:$16 sps:$4 sm:$0xff]  }
 0x1e4   : > { %10340 = vmatprep.subr.bf16.mxu0 %v14850_v56  ;;  %11365 = vmatprep.subr.bf16.mxu1 %v14853_v57  ;;  %v14934_v56 = vld [vmem:[%s17099_s2 + $0xc64] ss:$16 sps:$4 sm:$0xff]   ;;  %v14937_v57 = vld [vmem:[%s17099_s2 + $0xc6c] ss:$16 sps:$4 sm:$0xff]  }
 0x1e7   : > { %10341 = vmatpush1.bf16.msra.mxu0 %v14848_v58  ;;  %11366 = vmatpush1.bf16.msra.mxu1 %v14851_v59  ;;  %v14932_v58 = vld [vmem:[%s17099_s2 + $0xc60] ss:$16 sps:$4 sm:$0xff]   ;;  %v14935_v59 = vld [vmem:[%s17099_s2 + $0xc68] ss:$16 sps:$4 sm:$0xff]  }
 0x1e8   : > { %10342 = vmatprep.subr.bf16.mxu0 %v14856_v60  ;;  %11367 = vmatprep.subr.bf16.mxu1 %v14859_v61  ;;  %v14940_v60 = vld [vmem:[%s17099_s2 + $0xc84] ss:$16 sps:$4 sm:$0xff]   ;;  %v14943_v61 = vld [vmem:[%s17099_s2 + $0xc8c] ss:$16 sps:$4 sm:$0xff]  }
 0x1eb   : > { %10343 = vmatpush1.bf16.msra.mxu0 %v14854_v62  ;;  %11368 = vmatpush1.bf16.msra.mxu1 %v14857_v63  ;;  %v14938_v62 = vld [vmem:[%s17099_s2 + $0xc80] ss:$16 sps:$4 sm:$0xff]   ;;  %v14941_v63 = vld [vmem:[%s17099_s2 + $0xc88] ss:$16 sps:$4 sm:$0xff]  }
 0x1ec   : > { %10344 = vmatprep.subr.bf16.mxu0 %v14862_v0  ;;  %11369 = vmatprep.subr.bf16.mxu1 %v14865_v1  ;;  %v14946_v0 = vld [vmem:[%s17099_s2 + $0xca4] ss:$16 sps:$4 sm:$0xff]   ;;  %v14949_v1 = vld [vmem:[%s17099_s2 + $0xcac] ss:$16 sps:$4 sm:$0xff]  }
 0x1ef   : > { %10345 = vmatpush1.bf16.msra.mxu0 %v14860_v2  ;;  %11370 = vmatpush1.bf16.msra.mxu1 %v14863_v3  ;;  %v14944_v2 = vld [vmem:[%s17099_s2 + $0xca0] ss:$16 sps:$4 sm:$0xff]   ;;  %v14947_v3 = vld [vmem:[%s17099_s2 + $0xca8] ss:$16 sps:$4 sm:$0xff]  }
 0x1f0   : > { %10346 = vmatprep.subr.bf16.mxu0 %v14868_v4  ;;  %11371 = vmatprep.subr.bf16.mxu1 %v14871_v5  ;;  %v14952_v4 = vld [vmem:[%s17099_s2 + $0xcc4] ss:$16 sps:$4 sm:$0xff]   ;;  %v14955_v5 = vld [vmem:[%s17099_s2 + $0xccc] ss:$16 sps:$4 sm:$0xff]  }
 0x1f3   : > { %10347 = vmatpush1.bf16.msra.mxu0 %v14866_v6  ;;  %11372 = vmatpush1.bf16.msra.mxu1 %v14869_v7  ;;  %v14950_v6 = vld [vmem:[%s17099_s2 + $0xcc0] ss:$16 sps:$4 sm:$0xff]   ;;  %v14953_v7 = vld [vmem:[%s17099_s2 + $0xcc8] ss:$16 sps:$4 sm:$0xff]  }
 0x1f4   : > { %10348 = vmatprep.subr.bf16.mxu0 %v14874_v8  ;;  %11373 = vmatprep.subr.bf16.mxu1 %v14877_v9  ;;  %v14958_v8 = vld [vmem:[%s17099_s2 + $0xce4] ss:$16 sps:$4 sm:$0xff]   ;;  %v14961_v9 = vld [vmem:[%s17099_s2 + $0xcec] ss:$16 sps:$4 sm:$0xff]  }
 0x1f7   : > { %10349 = vmatpush1.bf16.msra.mxu0 %v14872_v10  ;;  %11374 = vmatpush1.bf16.msra.mxu1 %v14875_v11  ;;  %v14956_v10 = vld [vmem:[%s17099_s2 + $0xce0] ss:$16 sps:$4 sm:$0xff]   ;;  %v14959_v11 = vld [vmem:[%s17099_s2 + $0xce8] ss:$16 sps:$4 sm:$0xff]  }
 0x1f8   : > { %10350 = vmatprep.subr.bf16.mxu0 %v14880_v12  ;;  %11375 = vmatprep.subr.bf16.mxu1 %v14883_v14  ;;  %v14964_v12 = vld [vmem:[%s17099_s2 + $0xd04] ss:$16 sps:$4 sm:$0xff]   ;;  %v14967_v14 = vld [vmem:[%s17099_s2 + $0xd0c] ss:$16 sps:$4 sm:$0xff]  }
 0x1fb   : > { %10351 = vmatpush1.bf16.msra.mxu0 %v14878_v16  ;;  %11376 = vmatpush1.bf16.msra.mxu1 %v14881_v52  ;;  %v14962_v16 = vld [vmem:[%s17099_s2 + $0xd00] ss:$16 sps:$4 sm:$0xff]   ;;  %v14965_v52 = vld [vmem:[%s17099_s2 + $0xd08] ss:$16 sps:$4 sm:$0xff]  }
 0x1fc   : > { %10352 = vmatprep.subr.bf16.mxu0 %v14886_v17  ;;  %11377 = vmatprep.subr.bf16.mxu1 %v14889_v18  ;;  %v14970_v17 = vld [vmem:[%s17099_s2 + $0xd24] ss:$16 sps:$4 sm:$0xff]   ;;  %v14973_v18 = vld [vmem:[%s17099_s2 + $0xd2c] ss:$16 sps:$4 sm:$0xff]  }
 0x1ff   : > { %10353 = vmatpush1.bf16.msra.mxu0 %v14884_v19  ;;  %11378 = vmatpush1.bf16.msra.mxu1 %v14887_v20  ;;  %v14968_v19 = vld [vmem:[%s17099_s2 + $0xd20] ss:$16 sps:$4 sm:$0xff]   ;;  %v14971_v20 = vld [vmem:[%s17099_s2 + $0xd28] ss:$16 sps:$4 sm:$0xff]  }
 0x200   : > { %10354 = vmatprep.subr.bf16.mxu0 %v14892_v22  ;;  %11379 = vmatprep.subr.bf16.mxu1 %v14895_v23  ;;  %v14976_v22 = vld [vmem:[%s17099_s2 + $0xd44] ss:$16 sps:$4 sm:$0xff]   ;;  %v14979_v23 = vld [vmem:[%s17099_s2 + $0xd4c] ss:$16 sps:$4 sm:$0xff]  }
 0x203   : > { %10355 = vmatpush1.bf16.msra.mxu0 %v14890_v24  ;;  %11380 = vmatpush1.bf16.msra.mxu1 %v14893_v26  ;;  %v14974_v24 = vld [vmem:[%s17099_s2 + $0xd40] ss:$16 sps:$4 sm:$0xff]   ;;  %v14977_v26 = vld [vmem:[%s17099_s2 + $0xd48] ss:$16 sps:$4 sm:$0xff]  }
 0x204   : > { %10356 = vmatprep.subr.bf16.mxu0 %v14898_v27  ;;  %11381 = vmatprep.subr.bf16.mxu1 %v14901_v28  ;;  %v14982_v27 = vld [vmem:[%s17099_s2 + $0xd64] ss:$16 sps:$4 sm:$0xff]   ;;  %v14985_v28 = vld [vmem:[%s17099_s2 + $0xd6c] ss:$16 sps:$4 sm:$0xff]  }
 0x207   : > { %10357 = vmatpush1.bf16.msra.mxu0 %v14896_v29  ;;  %11382 = vmatpush1.bf16.msra.mxu1 %v14899_v30  ;;  %v14980_v29 = vld [vmem:[%s17099_s2 + $0xd60] ss:$16 sps:$4 sm:$0xff]   ;;  %v14983_v30 = vld [vmem:[%s17099_s2 + $0xd68] ss:$16 sps:$4 sm:$0xff]  }
 0x208   : > { %10358 = vmatprep.subr.bf16.mxu0 %v14904_v15  ;;  %11383 = vmatprep.subr.bf16.mxu1 %v14907_v31  ;;  %v14988_v15 = vld [vmem:[%s17099_s2 + $0xd84] ss:$16 sps:$4 sm:$0xff]   ;;  %v14991_v31 = vld [vmem:[%s17099_s2 + $0xd8c] ss:$16 sps:$4 sm:$0xff]  }
 0x20b   : > { %10359 = vmatpush1.bf16.msra.mxu0 %v14902_v25  ;;  %11384 = vmatpush1.bf16.msra.mxu1 %v14905_v34  ;;  %v14994_v25 = vld [vmem:[%s17099_s2 + $0xda4] ss:$16 sps:$4 sm:$0xff]   ;;  %v14997_v34 = vld [vmem:[%s17099_s2 + $0xdac] ss:$16 sps:$4 sm:$0xff]  }
 0x20c   : > { %10360 = vmatprep.subr.bf16.mxu0 %v14910_v36  ;;  %11385 = vmatprep.subr.bf16.mxu1 %v14913_v37  ;;  %v14992_v36 = vld [vmem:[%s17099_s2 + $0xda0] ss:$16 sps:$4 sm:$0xff]   ;;  %v14995_v37 = vld [vmem:[%s17099_s2 + $0xda8] ss:$16 sps:$4 sm:$0xff]  }
 0x20f   : > { %10361 = vmatpush1.bf16.msra.mxu0 %v14908_v39  ;;  %11386 = vmatpush1.bf16.msra.mxu1 %v14911_v40  ;;  %v15000_v39 = vld [vmem:[%s17099_s2 + $0xdc4] ss:$16 sps:$4 sm:$0xff]   ;;  %v15003_v40 = vld [vmem:[%s17099_s2 + $0xdcc] ss:$16 sps:$4 sm:$0xff]  }
 0x210   : > { %10371 = vmatprep.subr.bf16.mxu0 %v14916_v21  ;;  %11396 = vmatprep.subr.bf16.mxu1 %v14919_v41  ;;  %v14998_v21 = vld [vmem:[%s17099_s2 + $0xdc0] ss:$16 sps:$4 sm:$0xff]   ;;  %v15001_v41 = vld [vmem:[%s17099_s2 + $0xdc8] ss:$16 sps:$4 sm:$0xff]  }
 0x212   : > { %10363 = vmatmul.mubr.bf16.vlgmr.msra.gmra.mrb[0].mxu0 %v2022_v44  ;;  %11388 = vmatmul.mubr.bf16.vlgmr.msra.gmra.mrb[0].mxu1 %v2022_v44  ;;  %v15009_v44 = vld [vmem:[%s17099_s2 + $0xdec] ss:$16 sps:$4 sm:$0xff]  }
 0x213   : > { %10372 = vmatpush1.bf16.msra.mxu0 %v14914_v35  ;;  %11397 = vmatpush1.bf16.msra.mxu1 %v14917_v45  ;;  %v15004_v35 = vld [vmem:[%s17099_s2 + $0xde0] ss:$16 sps:$4 sm:$0xff]   ;;  %v15007_v45 = vld [vmem:[%s17099_s2 + $0xde8] ss:$16 sps:$4 sm:$0xff]  }
 0x214   : > { %10373 = vmatprep.subr.bf16.mxu0 %v14922_v46  ;;  %11398 = vmatprep.subr.bf16.mxu1 %v14925_v47  ;;  %v15013_v46 = vld [vmem:[%s17099_s2 + $0xe04] ss:$16 sps:$4 sm:$0xff]   ;;  %v15016_v47 = vld [vmem:[%s17099_s2 + $0xe0c] ss:$16 sps:$4 sm:$0xff]  }
 0x215   : > { %10403 = vmatprep.mubr.bf16.mxu0 %v17582_v48  ;;  %11428 = vmatprep.mubr.bf16.mxu1 %v17582_v48 }
 0x217   : > { %10374 = vmatpush1.bf16.msra.mxu0 %v14920_v13  ;;  %11399 = vmatpush1.bf16.msra.mxu1 %v14923_v50  ;;  %v17648_v13 = vrot.slane %v17567_v38, %v17166_v49  ;;  %v15011_v50 = vld [vmem:[%s17099_s2 + $0xe00] ss:$16 sps:$4 sm:$0xff]  }
 0x218   : > { %10375 = vmatprep.subr.bf16.mxu0 %v14928_v51  ;;  %11400 = vmatprep.subr.bf16.mxu1 %v14931_v53  ;;  %v15014_v51 = vld [vmem:[%s17099_s2 + $0xe08] ss:$16 sps:$4 sm:$0xff]   ;;  %v15019_v53 = vld [vmem:[%s17099_s2 + $0xe24] ss:$16 sps:$4 sm:$0xff]   ;;  %v15017_v38 = vld [vmem:[%s17099_s2 + $0xe20] ss:$16 sps:$4 sm:$0xff]  }
 0x21b   : > { %10376 = vmatpush1.bf16.msra.mxu0 %v14926_v54  ;;  %11401 = vmatpush1.bf16.msra.mxu1 %v14929_v55  ;;  %v15022_v54 = vld [vmem:[%s17099_s2 + $0xe2c] ss:$16 sps:$4 sm:$0xff]   ;;  %v2025_v55 = vcombine.high %v17582_v48, %v17582_v48  ;;  %v15023_v48 = vld [vmem:[%s17099_s2 + $0xe40] ss:$16 sps:$4 sm:$0xff]  }
 0x21c   : > { %10377 = vmatprep.subr.bf16.mxu0 %v14934_v56  ;;  %11402 = vmatprep.subr.bf16.mxu1 %v14937_v57  ;;  %v15020_v56 = vld [vmem:[%s17099_s2 + $0xe28] ss:$16 sps:$4 sm:$0xff]   ;;  %v15025_v57 = vld [vmem:[%s17099_s2 + $0xe44] ss:$16 sps:$4 sm:$0xff]  }
 0x21f   : > { %10378 = vmatpush1.bf16.msra.mxu0 %v14932_v58  ;;  %11403 = vmatpush1.bf16.msra.mxu1 %v14935_v59  ;;  %v15028_v58 = vld [vmem:[%s17099_s2 + $0xe4c] ss:$16 sps:$4 sm:$0xff]   ;;  %v15026_v59 = vld [vmem:[%s17099_s2 + $0xe48] ss:$16 sps:$4 sm:$0xff]  }
 0x220   : > { %10379 = vmatprep.subr.bf16.mxu0 %v14940_v60  ;;  %11404 = vmatprep.subr.bf16.mxu1 %v14943_v61  ;;  %v15031_v60 = vld [vmem:[%s17099_s2 + $0xe64] ss:$16 sps:$4 sm:$0xff]   ;;  %v15034_v61 = vld [vmem:[%s17099_s2 + $0xe6c] ss:$16 sps:$4 sm:$0xff]  }
 0x223   : > { %10380 = vmatpush1.bf16.msra.mxu0 %v14938_v62  ;;  %11405 = vmatpush1.bf16.msra.mxu1 %v14941_v63  ;;  %v15029_v62 = vld [vmem:[%s17099_s2 + $0xe60] ss:$16 sps:$4 sm:$0xff]   ;;  %v15032_v63 = vld [vmem:[%s17099_s2 + $0xe68] ss:$16 sps:$4 sm:$0xff]  }
 0x224   : > { %10381 = vmatprep.subr.bf16.mxu0 %v14946_v0  ;;  %11406 = vmatprep.subr.bf16.mxu1 %v14949_v1  ;;  %v15037_v0 = vld [vmem:[%s17099_s2 + $0xe84] ss:$16 sps:$4 sm:$0xff]   ;;  %v15040_v1 = vld [vmem:[%s17099_s2 + $0xe8c] ss:$16 sps:$4 sm:$0xff]  }
 0x227   : > { %10382 = vmatpush1.bf16.msra.mxu0 %v14944_v2  ;;  %11407 = vmatpush1.bf16.msra.mxu1 %v14947_v3  ;;  %v15035_v2 = vld [vmem:[%s17099_s2 + $0xe80] ss:$16 sps:$4 sm:$0xff]   ;;  %v15038_v3 = vld [vmem:[%s17099_s2 + $0xe88] ss:$16 sps:$4 sm:$0xff]  }
 0x228   : > { %10383 = vmatprep.subr.bf16.mxu0 %v14952_v4  ;;  %11408 = vmatprep.subr.bf16.mxu1 %v14955_v5  ;;  %v15043_v4 = vld [vmem:[%s17099_s2 + $0xea4] ss:$16 sps:$4 sm:$0xff]   ;;  %v15046_v5 = vld [vmem:[%s17099_s2 + $0xeac] ss:$16 sps:$4 sm:$0xff]  }
 0x22b   : > { %10384 = vmatpush1.bf16.msra.mxu0 %v14950_v6  ;;  %11409 = vmatpush1.bf16.msra.mxu1 %v14953_v7  ;;  %v15041_v6 = vld [vmem:[%s17099_s2 + $0xea0] ss:$16 sps:$4 sm:$0xff]   ;;  %v15044_v7 = vld [vmem:[%s17099_s2 + $0xea8] ss:$16 sps:$4 sm:$0xff]  }
 0x22c   : > { %10385 = vmatprep.subr.bf16.mxu0 %v14958_v8  ;;  %11410 = vmatprep.subr.bf16.mxu1 %v14961_v9  ;;  %v15049_v8 = vld [vmem:[%s17099_s2 + $0xec4] ss:$16 sps:$4 sm:$0xff]   ;;  %v15052_v9 = vld [vmem:[%s17099_s2 + $0xecc] ss:$16 sps:$4 sm:$0xff]  }
 0x22f   : > { %10386 = vmatpush1.bf16.msra.mxu0 %v14956_v10  ;;  %11411 = vmatpush1.bf16.msra.mxu1 %v14959_v11  ;;  %v15047_v10 = vld [vmem:[%s17099_s2 + $0xec0] ss:$16 sps:$4 sm:$0xff]   ;;  %v15050_v11 = vld [vmem:[%s17099_s2 + $0xec8] ss:$16 sps:$4 sm:$0xff]  }
 0x230   : > { %10387 = vmatprep.subr.bf16.mxu0 %v14964_v12  ;;  %11412 = vmatprep.subr.bf16.mxu1 %v14967_v14  ;;  %v15055_v12 = vld [vmem:[%s17099_s2 + $0xee4] ss:$16 sps:$4 sm:$0xff]   ;;  %v15058_v14 = vld [vmem:[%s17099_s2 + $0xeec] ss:$16 sps:$4 sm:$0xff]  }
 0x233   : > { %10388 = vmatpush1.bf16.msra.mxu0 %v14962_v16  ;;  %11413 = vmatpush1.bf16.msra.mxu1 %v14965_v52  ;;  %v15053_v16 = vld [vmem:[%s17099_s2 + $0xee0] ss:$16 sps:$4 sm:$0xff]   ;;  %v15056_v52 = vld [vmem:[%s17099_s2 + $0xee8] ss:$16 sps:$4 sm:$0xff]  }
 0x234   : > { %10389 = vmatprep.subr.bf16.mxu0 %v14970_v17  ;;  %11414 = vmatprep.subr.bf16.mxu1 %v14973_v18  ;;  %v15061_v17 = vld [vmem:[%s17099_s2 + $0xf04] ss:$16 sps:$4 sm:$0xff]   ;;  %v15064_v18 = vld [vmem:[%s17099_s2 + $0xf0c] ss:$16 sps:$4 sm:$0xff]  }
 0x237   : > { %10390 = vmatpush1.bf16.msra.mxu0 %v14968_v19  ;;  %11415 = vmatpush1.bf16.msra.mxu1 %v14971_v20  ;;  %v15059_v19 = vld [vmem:[%s17099_s2 + $0xf00] ss:$16 sps:$4 sm:$0xff]   ;;  %v15062_v20 = vld [vmem:[%s17099_s2 + $0xf08] ss:$16 sps:$4 sm:$0xff]  }
 0x238   : > { %10391 = vmatprep.subr.bf16.mxu0 %v14976_v22  ;;  %11416 = vmatprep.subr.bf16.mxu1 %v14979_v23  ;;  %v15067_v22 = vld [vmem:[%s17099_s2 + $0xf24] ss:$16 sps:$4 sm:$0xff]   ;;  %v15070_v23 = vld [vmem:[%s17099_s2 + $0xf2c] ss:$16 sps:$4 sm:$0xff]  }
 0x23b   : > { %10392 = vmatpush1.bf16.msra.mxu0 %v14974_v24  ;;  %11417 = vmatpush1.bf16.msra.mxu1 %v14977_v26  ;;  %v15065_v24 = vld [vmem:[%s17099_s2 + $0xf20] ss:$16 sps:$4 sm:$0xff]   ;;  %v15068_v26 = vld [vmem:[%s17099_s2 + $0xf28] ss:$16 sps:$4 sm:$0xff]  }
 0x23c   : > { %10393 = vmatprep.subr.bf16.mxu0 %v14982_v27  ;;  %11418 = vmatprep.subr.bf16.mxu1 %v14985_v28  ;;  %v15073_v27 = vld [vmem:[%s17099_s2 + $0xf44] ss:$16 sps:$4 sm:$0xff]   ;;  %v15076_v28 = vld [vmem:[%s17099_s2 + $0xf4c] ss:$16 sps:$4 sm:$0xff]  }
 0x23f   : > { %10394 = vmatpush1.bf16.msra.mxu0 %v14980_v29  ;;  %11419 = vmatpush1.bf16.msra.mxu1 %v14983_v30  ;;  %v15071_v29 = vld [vmem:[%s17099_s2 + $0xf40] ss:$16 sps:$4 sm:$0xff]   ;;  %v15074_v30 = vld [vmem:[%s17099_s2 + $0xf48] ss:$16 sps:$4 sm:$0xff]  }
 0x240   : > { %10395 = vmatprep.subr.bf16.mxu0 %v14988_v15  ;;  %11420 = vmatprep.subr.bf16.mxu1 %v14991_v31  ;;  %v15079_v15 = vld [vmem:[%s17099_s2 + $0xf64] ss:$16 sps:$4 sm:$0xff]   ;;  %v15082_v31 = vld [vmem:[%s17099_s2 + $0xf6c] ss:$16 sps:$4 sm:$0xff]  }
 0x243   : > { %10396 = vmatpush1.bf16.msra.mxu0 %v14986_v32  ;;  %11421 = vmatpush1.bf16.msra.mxu1 %v14989_v33  ;;  %v15077_v32 = vld [vmem:[%s17099_s2 + $0xf60] ss:$16 sps:$4 sm:$0xff]   ;;  %v15080_v33 = vld [vmem:[%s17099_s2 + $0xf68] ss:$16 sps:$4 sm:$0xff]  }
 0x244   : > { %10397 = vmatprep.subr.bf16.mxu0 %v14994_v25  ;;  %11422 = vmatprep.subr.bf16.mxu1 %v14997_v34  ;;  %v15085_v25 = vld [vmem:[%s17099_s2 + $0xf84] ss:$16 sps:$4 sm:$0xff]   ;;  %v15088_v34 = vld [vmem:[%s17099_s2 + $0xf8c] ss:$16 sps:$4 sm:$0xff]  }
 0x247   : > { %10398 = vmatpush1.bf16.msra.mxu0 %v14992_v36  ;;  %11423 = vmatpush1.bf16.msra.mxu1 %v14995_v37  ;;  %v15083_v36 = vld [vmem:[%s17099_s2 + $0xf80] ss:$16 sps:$4 sm:$0xff]   ;;  %v15086_v37 = vld [vmem:[%s17099_s2 + $0xf88] ss:$16 sps:$4 sm:$0xff]  }
 0x248   : > { %10399 = vmatprep.subr.bf16.mxu0 %v15000_v39  ;;  %11424 = vmatprep.subr.bf16.mxu1 %v15003_v40  ;;  %v15091_v39 = vld [vmem:[%s17099_s2 + $0xfa4] ss:$16 sps:$4 sm:$0xff]   ;;  %v15094_v40 = vld [vmem:[%s17099_s2 + $0xfac] ss:$16 sps:$4 sm:$0xff]  }
 0x24b   : > { %10400 = vmatpush1.bf16.msra.mxu0 %v14998_v21  ;;  %11425 = vmatpush1.bf16.msra.mxu1 %v15001_v41  ;;  %v15089_v21 = vld [vmem:[%s17099_s2 + $0xfa0] ss:$16 sps:$4 sm:$0xff]   ;;  %v15092_v41 = vld [vmem:[%s17099_s2 + $0xfa8] ss:$16 sps:$4 sm:$0xff]  }
 0x24c   : > { %10401 = vmatprep.subr.bf16.mxu0 %v15006_v42  ;;  %11426 = vmatprep.subr.bf16.mxu1 %v15009_v44  ;;  %v15097_v42 = vld [vmem:[%s17099_s2 + $0xfc4] ss:$16 sps:$4 sm:$0xff]   ;;  %v15100_v44 = vld [vmem:[%s17099_s2 + $0xfcc] ss:$16 sps:$4 sm:$0xff]  }
 0x24f   : > { %10402 = vmatpush1.bf16.msra.mxu0 %v15004_v35  ;;  %11427 = vmatpush1.bf16.msra.mxu1 %v15007_v45  ;;  %v17713_v35 = vld.sshfl [vmem:[%s19030_s0 + $0x10] sm:$0xff pattern:$0x75316420] }
 0x250   : > { %10412 = vmatprep.subr.bf16.mxu0 %v15013_v46  ;;  %11437 = vmatprep.subr.bf16.mxu1 %v15016_v47  ;;  %v15095_v45 = vld [vmem:[%s17099_s2 + $0xfc0] ss:$16 sps:$4 sm:$0xff]   ;;  %v15098_v46 = vld [vmem:[%s17099_s2 + $0xfc8] ss:$16 sps:$4 sm:$0xff]   ;;  %v15103_v47 = vld [vmem:[%s17099_s2 + $0xfe4] ss:$16 sps:$4 sm:$0xff]  }
 0x252   : > { %10404 = vmatmul.mubr.bf16.vlgmr.msra.gmra.mrb[0].mxu0 %v17648_v13  ;;  %11429 = vmatmul.mubr.bf16.vlgmr.msra.gmra.mrb[0].mxu1 %v17648_v13 }
 0x253   : > { %10413 = vmatpush1.bf16.msra.mxu0 %v15011_v50  ;;  %11438 = vmatpush1.bf16.msra.mxu1 %v15014_v51  ;;  %v15106_v50 = vld [vmem:[%s17099_s2 + $0xfec] ss:$16 sps:$4 sm:$0xff]   ;;  %v15101_v51 = vld [vmem:[%s17099_s2 + $0xfe0] ss:$16 sps:$4 sm:$0xff]  }
 0x254   : > { %10414 = vmatprep.subr.bf16.mxu0 %v15019_v53  ;;  %11439 = vmatprep.subr.bf16.mxu1 %v15022_v54  ;;  %v15104_v53 = vld [vmem:[%s17099_s2 + $0xfe8] ss:$16 sps:$4 sm:$0xff]   ;;  %v15109_v54 = vld [vmem:[%s17099_s2 + $0x1004] ss:$16 sps:$4 sm:$0xff]  }
 0x255   : > { %10444 = vmatprep.mubr.bf16.mxu0 %v2025_v55  ;;  %11469 = vmatprep.mubr.bf16.mxu1 %v2025_v55  ;;  %v15112_v55 = vld [vmem:[%s17099_s2 + $0x100c] ss:$16 sps:$4 sm:$0xff]  }
 0x257   : > { %10415 = vmatpush1.bf16.msra.mxu0 %v15017_v38  ;;  %11440 = vmatpush1.bf16.msra.mxu1 %v15020_v56  ;;  %v2041_v38 = vcombine.high %v17713_v35, %v17713_v35  ;;  %v2023_v56 = vcombine.high %v17648_v13, %v17648_v13  ;;  %v15113_v13 = vld [vmem:[%s17099_s2 + $0x1020] ss:$16 sps:$4 sm:$0xff]  }
 0x258   : > { %10416 = vmatprep.subr.bf16.mxu0 %v15025_v57  ;;  %11441 = vmatprep.subr.bf16.mxu1 %v15028_v58  ;;  %v15107_v57 = vld [vmem:[%s17099_s2 + $0x1000] ss:$16 sps:$4 sm:$0xff]   ;;  %v15110_v58 = vld [vmem:[%s17099_s2 + $0x1008] ss:$16 sps:$4 sm:$0xff]  }
 0x25b   : > { %10417 = vmatpush1.bf16.msra.mxu0 %v15023_v48  ;;  %11442 = vmatpush1.bf16.msra.mxu1 %v15026_v59  ;;  %v15115_v48 = vld [vmem:[%s17099_s2 + $0x1024] ss:$16 sps:$4 sm:$0xff]   ;;  %v15118_v59 = vld [vmem:[%s17099_s2 + $0x102c] ss:$16 sps:$4 sm:$0xff]  }
 0x25c   : > { %10418 = vmatprep.subr.bf16.mxu0 %v15031_v60  ;;  %11443 = vmatprep.subr.bf16.mxu1 %v15034_v61  ;;  %v17732_v60 = vrot.slane %v2041_v38, %v17166_v49  ;;  %v15116_v61 = vld [vmem:[%s17099_s2 + $0x1028] ss:$16 sps:$4 sm:$0xff]   ;;  %v15199_v38 = vld [vmem:[%s17099_s2 + $0x11e4] ss:$16 sps:$4 sm:$0xff]  }
 0x25f   : > { %10419 = vmatpush1.bf16.msra.mxu0 %v15029_v62  ;;  %11444 = vmatpush1.bf16.msra.mxu1 %v15032_v63  ;;  %v15121_v62 = vld [vmem:[%s17099_s2 + $0x1044] ss:$16 sps:$4 sm:$0xff]   ;;  %v15124_v63 = vld [vmem:[%s17099_s2 + $0x104c] ss:$16 sps:$4 sm:$0xff]  }
 0x260   : > { %10420 = vmatprep.subr.bf16.mxu0 %v15037_v0  ;;  %11445 = vmatprep.subr.bf16.mxu1 %v15040_v1  ;;  %v15119_v0 = vld [vmem:[%s17099_s2 + $0x1040] ss:$16 sps:$4 sm:$0xff]   ;;  %v15122_v1 = vld [vmem:[%s17099_s2 + $0x1048] ss:$16 sps:$4 sm:$0xff]  }
 0x263   : > { %10421 = vmatpush1.bf16.msra.mxu0 %v15035_v2  ;;  %11446 = vmatpush1.bf16.msra.mxu1 %v15038_v3  ;;  %v15127_v2 = vld [vmem:[%s17099_s2 + $0x1064] ss:$16 sps:$4 sm:$0xff]   ;;  %v15130_v3 = vld [vmem:[%s17099_s2 + $0x106c] ss:$16 sps:$4 sm:$0xff]  }
 0x264   : > { %10422 = vmatprep.subr.bf16.mxu0 %v15043_v4  ;;  %11447 = vmatprep.subr.bf16.mxu1 %v15046_v5  ;;  %v15125_v4 = vld [vmem:[%s17099_s2 + $0x1060] ss:$16 sps:$4 sm:$0xff]   ;;  %v15128_v5 = vld [vmem:[%s17099_s2 + $0x1068] ss:$16 sps:$4 sm:$0xff]  }
 0x267   : > { %10423 = vmatpush1.bf16.msra.mxu0 %v15041_v6  ;;  %11448 = vmatpush1.bf16.msra.mxu1 %v15044_v7  ;;  %v15133_v6 = vld [vmem:[%s17099_s2 + $0x1084] ss:$16 sps:$4 sm:$0xff]   ;;  %v15136_v7 = vld [vmem:[%s17099_s2 + $0x108c] ss:$16 sps:$4 sm:$0xff]  }
 0x268   : > { %10424 = vmatprep.subr.bf16.mxu0 %v15049_v8  ;;  %11449 = vmatprep.subr.bf16.mxu1 %v15052_v9  ;;  %v15131_v8 = vld [vmem:[%s17099_s2 + $0x1080] ss:$16 sps:$4 sm:$0xff]   ;;  %v15134_v9 = vld [vmem:[%s17099_s2 + $0x1088] ss:$16 sps:$4 sm:$0xff]  }
 0x26b   : > { %10425 = vmatpush1.bf16.msra.mxu0 %v15047_v10  ;;  %11450 = vmatpush1.bf16.msra.mxu1 %v15050_v11  ;;  %v15139_v10 = vld [vmem:[%s17099_s2 + $0x10a4] ss:$16 sps:$4 sm:$0xff]   ;;  %v15142_v11 = vld [vmem:[%s17099_s2 + $0x10ac] ss:$16 sps:$4 sm:$0xff]  }
 0x26c   : > { %10426 = vmatprep.subr.bf16.mxu0 %v15055_v12  ;;  %11451 = vmatprep.subr.bf16.mxu1 %v15058_v14  ;;  %v15137_v12 = vld [vmem:[%s17099_s2 + $0x10a0] ss:$16 sps:$4 sm:$0xff]   ;;  %v15140_v14 = vld [vmem:[%s17099_s2 + $0x10a8] ss:$16 sps:$4 sm:$0xff]  }
 0x26f   : > { %10427 = vmatpush1.bf16.msra.mxu0 %v15053_v16  ;;  %11452 = vmatpush1.bf16.msra.mxu1 %v15056_v52  ;;  %v15145_v16 = vld [vmem:[%s17099_s2 + $0x10c4] ss:$16 sps:$4 sm:$0xff]   ;;  %v15148_v52 = vld [vmem:[%s17099_s2 + $0x10cc] ss:$16 sps:$4 sm:$0xff]  }
 0x270   : > { %10428 = vmatprep.subr.bf16.mxu0 %v15061_v17  ;;  %11453 = vmatprep.subr.bf16.mxu1 %v15064_v18  ;;  %v15143_v17 = vld [vmem:[%s17099_s2 + $0x10c0] ss:$16 sps:$4 sm:$0xff]   ;;  %v15146_v18 = vld [vmem:[%s17099_s2 + $0x10c8] ss:$16 sps:$4 sm:$0xff]  }
 0x273   : > { %10429 = vmatpush1.bf16.msra.mxu0 %v15059_v19  ;;  %11454 = vmatpush1.bf16.msra.mxu1 %v15062_v20  ;;  %v15151_v19 = vld [vmem:[%s17099_s2 + $0x10e4] ss:$16 sps:$4 sm:$0xff]   ;;  %v15154_v20 = vld [vmem:[%s17099_s2 + $0x10ec] ss:$16 sps:$4 sm:$0xff]  }
 0x274   : > { %10430 = vmatprep.subr.bf16.mxu0 %v15067_v22  ;;  %11455 = vmatprep.subr.bf16.mxu1 %v15070_v23  ;;  %v15149_v22 = vld [vmem:[%s17099_s2 + $0x10e0] ss:$16 sps:$4 sm:$0xff]   ;;  %v15152_v23 = vld [vmem:[%s17099_s2 + $0x10e8] ss:$16 sps:$4 sm:$0xff]  }
 0x277   : > { %10431 = vmatpush1.bf16.msra.mxu0 %v15065_v24  ;;  %11456 = vmatpush1.bf16.msra.mxu1 %v15068_v26  ;;  %v15157_v24 = vld [vmem:[%s17099_s2 + $0x1104] ss:$16 sps:$4 sm:$0xff]   ;;  %v15160_v26 = vld [vmem:[%s17099_s2 + $0x110c] ss:$16 sps:$4 sm:$0xff]  }
 0x278   : > { %10432 = vmatprep.subr.bf16.mxu0 %v15073_v27  ;;  %11457 = vmatprep.subr.bf16.mxu1 %v15076_v28  ;;  %v15155_v27 = vld [vmem:[%s17099_s2 + $0x1100] ss:$16 sps:$4 sm:$0xff]   ;;  %v15158_v28 = vld [vmem:[%s17099_s2 + $0x1108] ss:$16 sps:$4 sm:$0xff]  }
 0x27b   : > { %10433 = vmatpush1.bf16.msra.mxu0 %v15071_v29  ;;  %11458 = vmatpush1.bf16.msra.mxu1 %v15074_v30  ;;  %v15163_v29 = vld [vmem:[%s17099_s2 + $0x1124] ss:$16 sps:$4 sm:$0xff]   ;;  %v15166_v30 = vld [vmem:[%s17099_s2 + $0x112c] ss:$16 sps:$4 sm:$0xff]  }
 0x27c   : > { %10434 = vmatprep.subr.bf16.mxu0 %v15079_v15  ;;  %11459 = vmatprep.subr.bf16.mxu1 %v15082_v31  ;;  %v15161_v15 = vld [vmem:[%s17099_s2 + $0x1120] ss:$16 sps:$4 sm:$0xff]   ;;  %v15164_v31 = vld [vmem:[%s17099_s2 + $0x1128] ss:$16 sps:$4 sm:$0xff]  }
 0x27f   : > { %10435 = vmatpush1.bf16.msra.mxu0 %v15077_v32  ;;  %11460 = vmatpush1.bf16.msra.mxu1 %v15080_v33  ;;  %v15169_v32 = vld [vmem:[%s17099_s2 + $0x1144] ss:$16 sps:$4 sm:$0xff]   ;;  %v15172_v33 = vld [vmem:[%s17099_s2 + $0x114c] ss:$16 sps:$4 sm:$0xff]  }
 0x280   : > { %10436 = vmatprep.subr.bf16.mxu0 %v15085_v25  ;;  %11461 = vmatprep.subr.bf16.mxu1 %v15088_v34  ;;  %v15167_v25 = vld [vmem:[%s17099_s2 + $0x1140] ss:$16 sps:$4 sm:$0xff]   ;;  %v15170_v34 = vld [vmem:[%s17099_s2 + $0x1148] ss:$16 sps:$4 sm:$0xff]  }
 0x283   : > { %10437 = vmatpush1.bf16.msra.mxu0 %v15083_v36  ;;  %11462 = vmatpush1.bf16.msra.mxu1 %v15086_v37  ;;  %v15175_v36 = vld [vmem:[%s17099_s2 + $0x1164] ss:$16 sps:$4 sm:$0xff]   ;;  %v15178_v37 = vld [vmem:[%s17099_s2 + $0x116c] ss:$16 sps:$4 sm:$0xff]  }
 0x284   : > { %10438 = vmatprep.subr.bf16.mxu0 %v15091_v39  ;;  %11463 = vmatprep.subr.bf16.mxu1 %v15094_v40  ;;  %v15173_v39 = vld [vmem:[%s17099_s2 + $0x1160] ss:$16 sps:$4 sm:$0xff]   ;;  %v15176_v40 = vld [vmem:[%s17099_s2 + $0x1168] ss:$16 sps:$4 sm:$0xff]  }
 0x287   : > { %10439 = vmatpush1.bf16.msra.mxu0 %v15089_v21  ;;  %11464 = vmatpush1.bf16.msra.mxu1 %v15092_v41  ;;  %v15181_v21 = vld [vmem:[%s17099_s2 + $0x1184] ss:$16 sps:$4 sm:$0xff]   ;;  %v15184_v41 = vld [vmem:[%s17099_s2 + $0x118c] ss:$16 sps:$4 sm:$0xff]  }
 0x288   : > { %10440 = vmatprep.subr.bf16.mxu0 %v15097_v42  ;;  %11465 = vmatprep.subr.bf16.mxu1 %v15100_v44  ;;  %v15179_v42 = vld [vmem:[%s17099_s2 + $0x1180] ss:$16 sps:$4 sm:$0xff]   ;;  %v15182_v44 = vld [vmem:[%s17099_s2 + $0x1188] ss:$16 sps:$4 sm:$0xff]  }
 0x28b   : > { %10441 = vmatpush1.bf16.msra.mxu0 %v15095_v45  ;;  %11466 = vmatpush1.bf16.msra.mxu1 %v15098_v46  ;;  %v15187_v45 = vld [vmem:[%s17099_s2 + $0x11a4] ss:$16 sps:$4 sm:$0xff]   ;;  %v15190_v46 = vld [vmem:[%s17099_s2 + $0x11ac] ss:$16 sps:$4 sm:$0xff]  }
 0x28c   : > { %10442 = vmatprep.subr.bf16.mxu0 %v15103_v47  ;;  %11467 = vmatprep.subr.bf16.mxu1 %v15106_v50  ;;  %v15185_v47 = vld [vmem:[%s17099_s2 + $0x11a0] ss:$16 sps:$4 sm:$0xff]   ;;  %v15188_v50 = vld [vmem:[%s17099_s2 + $0x11a8] ss:$16 sps:$4 sm:$0xff]  }
 0x28f   : > { %10443 = vmatpush1.bf16.msra.mxu0 %v15101_v51  ;;  %11468 = vmatpush1.bf16.msra.mxu1 %v15104_v53  ;;  %v15193_v51 = vld [vmem:[%s17099_s2 + $0x11c4] ss:$16 sps:$4 sm:$0xff]   ;;  %v15196_v53 = vld [vmem:[%s17099_s2 + $0x11cc] ss:$16 sps:$4 sm:$0xff]  }
 0x290   : > { %10453 = vmatprep.subr.bf16.mxu0 %v15109_v54  ;;  %11478 = vmatprep.subr.bf16.mxu1 %v15112_v55  ;;  %v15191_v54 = vld [vmem:[%s17099_s2 + $0x11c0] ss:$16 sps:$4 sm:$0xff]   ;;  %v15194_v55 = vld [vmem:[%s17099_s2 + $0x11c8] ss:$16 sps:$4 sm:$0xff]  }
 0x292   : > { %10445 = vmatmul.mubr.bf16.vlgmr.msra.gmra.mrb[0].mxu0 %v2023_v56  ;;  %11470 = vmatmul.mubr.bf16.vlgmr.msra.gmra.mrb[0].mxu1 %v2023_v56  ;;  %v15202_v56 = vld [vmem:[%s17099_s2 + $0x11ec] ss:$16 sps:$4 sm:$0xff]  }
 0x293   : > { %10454 = vmatpush1.bf16.msra.mxu0 %v15107_v57  ;;  %11479 = vmatpush1.bf16.msra.mxu1 %v15110_v58  ;;  %v15197_v57 = vld [vmem:[%s17099_s2 + $0x11e0] ss:$16 sps:$4 sm:$0xff]   ;;  %v15200_v58 = vld [vmem:[%s17099_s2 + $0x11e8] ss:$16 sps:$4 sm:$0xff]  }
 0x294   : > { %10455 = vmatprep.subr.bf16.mxu0 %v15115_v48  ;;  %11480 = vmatprep.subr.bf16.mxu1 %v15118_v59  ;;  %v15205_v48 = vld [vmem:[%s17099_s2 + $0x1204] ss:$16 sps:$4 sm:$0xff]   ;;  %v15208_v59 = vld [vmem:[%s17099_s2 + $0x120c] ss:$16 sps:$4 sm:$0xff]  }
 0x295   : > { %10485 = vmatprep.mubr.bf16.mxu0 %v17732_v60  ;;  %11510 = vmatprep.mubr.bf16.mxu1 %v17732_v60 }
 0x297   : > { %10456 = vmatpush1.bf16.msra.mxu0 %v15113_v13  ;;  %11481 = vmatpush1.bf16.msra.mxu1 %v15116_v61  ;;  %v17798_v13 = vrot.slane %v17713_v35, %v17166_v49  ;;  %v15203_v61 = vld [vmem:[%s17099_s2 + $0x1200] ss:$16 sps:$4 sm:$0xff]  }
 0x298   : > { %10457 = vmatprep.subr.bf16.mxu0 %v15121_v62  ;;  %11482 = vmatprep.subr.bf16.mxu1 %v15124_v63  ;;  %v15206_v62 = vld [vmem:[%s17099_s2 + $0x1208] ss:$16 sps:$4 sm:$0xff]   ;;  %v15211_v63 = vld [vmem:[%s17099_s2 + $0x1224] ss:$16 sps:$4 sm:$0xff]   ;;  %v15209_v35 = vld [vmem:[%s17099_s2 + $0x1220] ss:$16 sps:$4 sm:$0xff]  }
 0x29b   : > { %10458 = vmatpush1.bf16.msra.mxu0 %v15119_v0  ;;  %11483 = vmatpush1.bf16.msra.mxu1 %v15122_v1  ;;  %v15214_v0 = vld [vmem:[%s17099_s2 + $0x122c] ss:$16 sps:$4 sm:$0xff]   ;;  %v2073_v1 = vcombine.high %v17732_v60, %v17732_v60  ;;  %v15215_v60 = vld [vmem:[%s17099_s2 + $0x1240] ss:$16 sps:$4 sm:$0xff]  }
 0x29c   : > { %10459 = vmatprep.subr.bf16.mxu0 %v15127_v2  ;;  %11484 = vmatprep.subr.bf16.mxu1 %v15130_v3  ;;  %v15212_v2 = vld [vmem:[%s17099_s2 + $0x1228] ss:$16 sps:$4 sm:$0xff]   ;;  %v15217_v3 = vld [vmem:[%s17099_s2 + $0x1244] ss:$16 sps:$4 sm:$0xff]  }
 0x29f   : > { %10460 = vmatpush1.bf16.msra.mxu0 %v15125_v4  ;;  %11485 = vmatpush1.bf16.msra.mxu1 %v15128_v5  ;;  %v15220_v4 = vld [vmem:[%s17099_s2 + $0x124c] ss:$16 sps:$4 sm:$0xff]   ;;  %v15218_v5 = vld [vmem:[%s17099_s2 + $0x1248] ss:$16 sps:$4 sm:$0xff]  }
 0x2a0   : > { %10461 = vmatprep.subr.bf16.mxu0 %v15133_v6  ;;  %11486 = vmatprep.subr.bf16.mxu1 %v15136_v7  ;;  %v15223_v6 = vld [vmem:[%s17099_s2 + $0x1264] ss:$16 sps:$4 sm:$0xff]   ;;  %v15226_v7 = vld [vmem:[%s17099_s2 + $0x126c] ss:$16 sps:$4 sm:$0xff]  }
 0x2a3   : > { %10462 = vmatpush1.bf16.msra.mxu0 %v15131_v8  ;;  %11487 = vmatpush1.bf16.msra.mxu1 %v15134_v9  ;;  %v15221_v8 = vld [vmem:[%s17099_s2 + $0x1260] ss:$16 sps:$4 sm:$0xff]   ;;  %v15224_v9 = vld [vmem:[%s17099_s2 + $0x1268] ss:$16 sps:$4 sm:$0xff]  }
 0x2a4   : > { %10463 = vmatprep.subr.bf16.mxu0 %v15139_v10  ;;  %11488 = vmatprep.subr.bf16.mxu1 %v15142_v11  ;;  %v15229_v10 = vld [vmem:[%s17099_s2 + $0x1284] ss:$16 sps:$4 sm:$0xff]   ;;  %v15232_v11 = vld [vmem:[%s17099_s2 + $0x128c] ss:$16 sps:$4 sm:$0xff]  }
 0x2a7   : > { %10464 = vmatpush1.bf16.msra.mxu0 %v15137_v12  ;;  %11489 = vmatpush1.bf16.msra.mxu1 %v15140_v14  ;;  %v15227_v12 = vld [vmem:[%s17099_s2 + $0x1280] ss:$16 sps:$4 sm:$0xff]   ;;  %v15230_v14 = vld [vmem:[%s17099_s2 + $0x1288] ss:$16 sps:$4 sm:$0xff]  }
 0x2a8   : > { %10465 = vmatprep.subr.bf16.mxu0 %v15145_v16  ;;  %11490 = vmatprep.subr.bf16.mxu1 %v15148_v52  ;;  %v15235_v16 = vld [vmem:[%s17099_s2 + $0x12a4] ss:$16 sps:$4 sm:$0xff]   ;;  %v15238_v52 = vld [vmem:[%s17099_s2 + $0x12ac] ss:$16 sps:$4 sm:$0xff]  }
 0x2ab   : > { %10466 = vmatpush1.bf16.msra.mxu0 %v15143_v17  ;;  %11491 = vmatpush1.bf16.msra.mxu1 %v15146_v18  ;;  %v15233_v17 = vld [vmem:[%s17099_s2 + $0x12a0] ss:$16 sps:$4 sm:$0xff]   ;;  %v15236_v18 = vld [vmem:[%s17099_s2 + $0x12a8] ss:$16 sps:$4 sm:$0xff]  }
 0x2ac   : > { %10467 = vmatprep.subr.bf16.mxu0 %v15151_v19  ;;  %11492 = vmatprep.subr.bf16.mxu1 %v15154_v20  ;;  %v15241_v19 = vld [vmem:[%s17099_s2 + $0x12c4] ss:$16 sps:$4 sm:$0xff]   ;;  %v15244_v20 = vld [vmem:[%s17099_s2 + $0x12cc] ss:$16 sps:$4 sm:$0xff]  }
 0x2af   : > { %10468 = vmatpush1.bf16.msra.mxu0 %v15149_v22  ;;  %11493 = vmatpush1.bf16.msra.mxu1 %v15152_v23  ;;  %v15239_v22 = vld [vmem:[%s17099_s2 + $0x12c0] ss:$16 sps:$4 sm:$0xff]   ;;  %v15242_v23 = vld [vmem:[%s17099_s2 + $0x12c8] ss:$16 sps:$4 sm:$0xff]  }
 0x2b0   : > { %10469 = vmatprep.subr.bf16.mxu0 %v15157_v24  ;;  %11494 = vmatprep.subr.bf16.mxu1 %v15160_v26  ;;  %v15247_v24 = vld [vmem:[%s17099_s2 + $0x12e4] ss:$16 sps:$4 sm:$0xff]   ;;  %v15250_v26 = vld [vmem:[%s17099_s2 + $0x12ec] ss:$16 sps:$4 sm:$0xff]  }
 0x2b3   : > { %10470 = vmatpush1.bf16.msra.mxu0 %v15155_v27  ;;  %11495 = vmatpush1.bf16.msra.mxu1 %v15158_v28  ;;  %v15245_v27 = vld [vmem:[%s17099_s2 + $0x12e0] ss:$16 sps:$4 sm:$0xff]   ;;  %v15248_v28 = vld [vmem:[%s17099_s2 + $0x12e8] ss:$16 sps:$4 sm:$0xff]  }
 0x2b4   : > { %10471 = vmatprep.subr.bf16.mxu0 %v15163_v29  ;;  %11496 = vmatprep.subr.bf16.mxu1 %v15166_v30  ;;  %v15253_v29 = vld [vmem:[%s17099_s2 + $0x1304] ss:$16 sps:$4 sm:$0xff]   ;;  %v15256_v30 = vld [vmem:[%s17099_s2 + $0x130c] ss:$16 sps:$4 sm:$0xff]  }
 0x2b7   : > { %10472 = vmatpush1.bf16.msra.mxu0 %v15161_v15  ;;  %11497 = vmatpush1.bf16.msra.mxu1 %v15164_v31  ;;  %v15251_v15 = vld [vmem:[%s17099_s2 + $0x1300] ss:$16 sps:$4 sm:$0xff]   ;;  %v15254_v31 = vld [vmem:[%s17099_s2 + $0x1308] ss:$16 sps:$4 sm:$0xff]  }
 0x2b8   : > { %10473 = vmatprep.subr.bf16.mxu0 %v15169_v32  ;;  %11498 = vmatprep.subr.bf16.mxu1 %v15172_v33  ;;  %v15259_v32 = vld [vmem:[%s17099_s2 + $0x1324] ss:$16 sps:$4 sm:$0xff]   ;;  %v15262_v33 = vld [vmem:[%s17099_s2 + $0x132c] ss:$16 sps:$4 sm:$0xff]  }
 0x2bb   : > { %10474 = vmatpush1.bf16.msra.mxu0 %v15167_v25  ;;  %11499 = vmatpush1.bf16.msra.mxu1 %v15170_v34  ;;  %v15257_v25 = vld [vmem:[%s17099_s2 + $0x1320] ss:$16 sps:$4 sm:$0xff]   ;;  %v15260_v34 = vld [vmem:[%s17099_s2 + $0x1328] ss:$16 sps:$4 sm:$0xff]  }
 0x2bc   : > { %10475 = vmatprep.subr.bf16.mxu0 %v15175_v36  ;;  %11500 = vmatprep.subr.bf16.mxu1 %v15178_v37  ;;  %v15265_v36 = vld [vmem:[%s17099_s2 + $0x1344] ss:$16 sps:$4 sm:$0xff]   ;;  %v15268_v37 = vld [vmem:[%s17099_s2 + $0x134c] ss:$16 sps:$4 sm:$0xff]  }
 0x2bf   : > { %10476 = vmatpush1.bf16.msra.mxu0 %v15173_v39  ;;  %11501 = vmatpush1.bf16.msra.mxu1 %v15176_v40  ;;  %v15263_v39 = vld [vmem:[%s17099_s2 + $0x1340] ss:$16 sps:$4 sm:$0xff]   ;;  %v15266_v40 = vld [vmem:[%s17099_s2 + $0x1348] ss:$16 sps:$4 sm:$0xff]  }
 0x2c0   : > { %10477 = vmatprep.subr.bf16.mxu0 %v15181_v21  ;;  %11502 = vmatprep.subr.bf16.mxu1 %v15184_v41  ;;  %v15271_v21 = vld [vmem:[%s17099_s2 + $0x1364] ss:$16 sps:$4 sm:$0xff]   ;;  %v15274_v41 = vld [vmem:[%s17099_s2 + $0x136c] ss:$16 sps:$4 sm:$0xff]  }
 0x2c3   : > { %10478 = vmatpush1.bf16.msra.mxu0 %v15179_v42  ;;  %11503 = vmatpush1.bf16.msra.mxu1 %v15182_v44  ;;  %v15269_v42 = vld [vmem:[%s17099_s2 + $0x1360] ss:$16 sps:$4 sm:$0xff]   ;;  %v15272_v44 = vld [vmem:[%s17099_s2 + $0x1368] ss:$16 sps:$4 sm:$0xff]  }
 0x2c4   : > { %10479 = vmatprep.subr.bf16.mxu0 %v15187_v45  ;;  %11504 = vmatprep.subr.bf16.mxu1 %v15190_v46  ;;  %v15277_v45 = vld [vmem:[%s17099_s2 + $0x1384] ss:$16 sps:$4 sm:$0xff]   ;;  %v15280_v46 = vld [vmem:[%s17099_s2 + $0x138c] ss:$16 sps:$4 sm:$0xff]  }
 0x2c7   : > { %10480 = vmatpush1.bf16.msra.mxu0 %v15185_v47  ;;  %11505 = vmatpush1.bf16.msra.mxu1 %v15188_v50  ;;  %v15275_v47 = vld [vmem:[%s17099_s2 + $0x1380] ss:$16 sps:$4 sm:$0xff]   ;;  %v15278_v50 = vld [vmem:[%s17099_s2 + $0x1388] ss:$16 sps:$4 sm:$0xff]  }
 0x2c8   : > { %10481 = vmatprep.subr.bf16.mxu0 %v15193_v51  ;;  %11506 = vmatprep.subr.bf16.mxu1 %v15196_v53  ;;  %v15283_v51 = vld [vmem:[%s17099_s2 + $0x13a4] ss:$16 sps:$4 sm:$0xff]   ;;  %v15286_v53 = vld [vmem:[%s17099_s2 + $0x13ac] ss:$16 sps:$4 sm:$0xff]  }
 0x2cb   : > { %10482 = vmatpush1.bf16.msra.mxu0 %v15191_v54  ;;  %11507 = vmatpush1.bf16.msra.mxu1 %v15194_v55  ;;  %v15281_v54 = vld [vmem:[%s17099_s2 + $0x13a0] ss:$16 sps:$4 sm:$0xff]   ;;  %v15284_v55 = vld [vmem:[%s17099_s2 + $0x13a8] ss:$16 sps:$4 sm:$0xff]  }
 0x2cc   : > { %10483 = vmatprep.subr.bf16.mxu0 %v15199_v38  ;;  %11508 = vmatprep.subr.bf16.mxu1 %v15202_v56  ;;  %v15289_v38 = vld [vmem:[%s17099_s2 + $0x13c4] ss:$16 sps:$4 sm:$0xff]   ;;  %v15292_v56 = vld [vmem:[%s17099_s2 + $0x13cc] ss:$16 sps:$4 sm:$0xff]  }
 0x2cf   : > { %10484 = vmatpush1.bf16.msra.mxu0 %v15197_v57  ;;  %11509 = vmatpush1.bf16.msra.mxu1 %v15200_v58  ;;  %v16704_v57 = vld [vmem:[%s19030_s0 + $0x10] sm:$0xff] }
 0x2d0   : > { %10494 = vmatprep.subr.bf16.mxu0 %v15205_v48  ;;  %11519 = vmatprep.subr.bf16.mxu1 %v15208_v59  ;;  %v2026_v58 = vcombine.high %v16704_v57, %v16704_v57  ;;  %v15287_v48 = vld [vmem:[%s17099_s2 + $0x13c0] ss:$16 sps:$4 sm:$0xff]   ;;  %v15290_v59 = vld [vmem:[%s17099_s2 + $0x13c8] ss:$16 sps:$4 sm:$0xff]  }
 0x2d1   : > { %v15371_v57 = vld [vmem:[%s17099_s2 + $0x1580] ss:$16 sps:$4 sm:$0xff]  }
 0x2d2   : > { %10486 = vmatmul.mubr.bf16.vlgmr.msra.gmra.mrb[0].mxu0 %v17798_v13  ;;  %11511 = vmatmul.mubr.bf16.vlgmr.msra.gmra.mrb[0].mxu1 %v17798_v13 }
 0x2d3   : > { %10495 = vmatpush1.bf16.msra.mxu0 %v15203_v61  ;;  %11520 = vmatpush1.bf16.msra.mxu1 %v15206_v62  ;;  %v15295_v61 = vld [vmem:[%s17099_s2 + $0x13e4] ss:$16 sps:$4 sm:$0xff]   ;;  %v15298_v62 = vld [vmem:[%s17099_s2 + $0x13ec] ss:$16 sps:$4 sm:$0xff]  }
 0x2d4   : > { %10496 = vmatprep.subr.bf16.mxu0 %v15211_v63  ;;  %11521 = vmatprep.subr.bf16.mxu1 %v15214_v0  ;;  %v17868_v63 = vrot.slane %v2026_v58, %v17166_v49  ;;  %v15293_v0 = vld [vmem:[%s17099_s2 + $0x13e0] ss:$16 sps:$4 sm:$0xff]   ;;  %v15374_v58 = vld [vmem:[%s17099_s2 + $0x1588] ss:$16 sps:$4 sm:$0xff]  }
 0x2d5   : > { %10526 = vmatprep.mubr.bf16.mxu0 %v2073_v1  ;;  %11551 = vmatprep.mubr.bf16.mxu1 %v2073_v1  ;;  %v15296_v1 = vld [vmem:[%s17099_s2 + $0x13e8] ss:$16 sps:$4 sm:$0xff]  }
 0x2d7   : > { %10497 = vmatpush1.bf16.msra.mxu0 %v15209_v35  ;;  %11522 = vmatpush1.bf16.msra.mxu1 %v15212_v2  ;;  %v15301_v35 = vld [vmem:[%s17099_s2 + $0x1404] ss:$16 sps:$4 sm:$0xff]   ;;  %v15304_v2 = vld [vmem:[%s17099_s2 + $0x140c] ss:$16 sps:$4 sm:$0xff]  }
 0x2d8   : > { %10498 = vmatprep.subr.bf16.mxu0 %v15217_v3  ;;  %11523 = vmatprep.subr.bf16.mxu1 %v15220_v4  ;;  %v2042_v3 = vcombine.high %v17868_v63, %v17868_v63  ;;  %v2071_v4 = vcombine.high %v17798_v13, %v17798_v13  ;;  %v15305_v13 = vld [vmem:[%s17099_s2 + $0x1420] ss:$16 sps:$4 sm:$0xff]  }
 0x2db   : > { %10499 = vmatpush1.bf16.msra.mxu0 %v15215_v60  ;;  %11524 = vmatpush1.bf16.msra.mxu1 %v15218_v5  ;;  %v15299_v60 = vld [vmem:[%s17099_s2 + $0x1400] ss:$16 sps:$4 sm:$0xff]   ;;  %v15302_v5 = vld [vmem:[%s17099_s2 + $0x1408] ss:$16 sps:$4 sm:$0xff]  }
 0x2dc   : > { %10500 = vmatprep.subr.bf16.mxu0 %v15223_v6  ;;  %11525 = vmatprep.subr.bf16.mxu1 %v15226_v7  ;;  %v15307_v6 = vld [vmem:[%s17099_s2 + $0x1424] ss:$16 sps:$4 sm:$0xff]   ;;  %v15310_v7 = vld [vmem:[%s17099_s2 + $0x142c] ss:$16 sps:$4 sm:$0xff]  }
 0x2df   : > { %10501 = vmatpush1.bf16.msra.mxu0 %v15221_v8  ;;  %11526 = vmatpush1.bf16.msra.mxu1 %v15224_v9  ;;  %v17883_v8 = vrot.slane %v2042_v3, %v17166_v49  ;;  %v15308_v9 = vld [vmem:[%s17099_s2 + $0x1428] ss:$16 sps:$4 sm:$0xff]   ;;  %v15391_v3 = vld [vmem:[%s17099_s2 + $0x15e4] ss:$16 sps:$4 sm:$0xff]  }
 0x2e0   : > { %10502 = vmatprep.subr.bf16.mxu0 %v15229_v10  ;;  %11527 = vmatprep.subr.bf16.mxu1 %v15232_v11  ;;  %v15313_v10 = vld [vmem:[%s17099_s2 + $0x1444] ss:$16 sps:$4 sm:$0xff]   ;;  %v15316_v11 = vld [vmem:[%s17099_s2 + $0x144c] ss:$16 sps:$4 sm:$0xff]  }
 0x2e3   : > { %10503 = vmatpush1.bf16.msra.mxu0 %v15227_v12  ;;  %11528 = vmatpush1.bf16.msra.mxu1 %v15230_v14  ;;  %v15311_v12 = vld [vmem:[%s17099_s2 + $0x1440] ss:$16 sps:$4 sm:$0xff]   ;;  %v15314_v14 = vld [vmem:[%s17099_s2 + $0x1448] ss:$16 sps:$4 sm:$0xff]  }
 0x2e4   : > { %10504 = vmatprep.subr.bf16.mxu0 %v15235_v16  ;;  %11529 = vmatprep.subr.bf16.mxu1 %v15238_v52  ;;  %v15319_v16 = vld [vmem:[%s17099_s2 + $0x1464] ss:$16 sps:$4 sm:$0xff]   ;;  %v15322_v52 = vld [vmem:[%s17099_s2 + $0x146c] ss:$16 sps:$4 sm:$0xff]  }
 0x2e7   : > { %10505 = vmatpush1.bf16.msra.mxu0 %v15233_v17  ;;  %11530 = vmatpush1.bf16.msra.mxu1 %v15236_v18  ;;  %v15317_v17 = vld [vmem:[%s17099_s2 + $0x1460] ss:$16 sps:$4 sm:$0xff]   ;;  %v15320_v18 = vld [vmem:[%s17099_s2 + $0x1468] ss:$16 sps:$4 sm:$0xff]  }
 0x2e8   : > { %10506 = vmatprep.subr.bf16.mxu0 %v15241_v19  ;;  %11531 = vmatprep.subr.bf16.mxu1 %v15244_v20  ;;  %v15325_v19 = vld [vmem:[%s17099_s2 + $0x1484] ss:$16 sps:$4 sm:$0xff]   ;;  %v15328_v20 = vld [vmem:[%s17099_s2 + $0x148c] ss:$16 sps:$4 sm:$0xff]  }
 0x2eb   : > { %10507 = vmatpush1.bf16.msra.mxu0 %v15239_v22  ;;  %11532 = vmatpush1.bf16.msra.mxu1 %v15242_v23  ;;  %v15323_v22 = vld [vmem:[%s17099_s2 + $0x1480] ss:$16 sps:$4 sm:$0xff]   ;;  %v15326_v23 = vld [vmem:[%s17099_s2 + $0x1488] ss:$16 sps:$4 sm:$0xff]  }
 0x2ec   : > { %10508 = vmatprep.subr.bf16.mxu0 %v15247_v24  ;;  %11533 = vmatprep.subr.bf16.mxu1 %v15250_v26  ;;  %v15331_v24 = vld [vmem:[%s17099_s2 + $0x14a4] ss:$16 sps:$4 sm:$0xff]   ;;  %v15334_v26 = vld [vmem:[%s17099_s2 + $0x14ac] ss:$16 sps:$4 sm:$0xff]  }
 0x2ef   : > { %10509 = vmatpush1.bf16.msra.mxu0 %v15245_v27  ;;  %11534 = vmatpush1.bf16.msra.mxu1 %v15248_v28  ;;  %v15329_v27 = vld [vmem:[%s17099_s2 + $0x14a0] ss:$16 sps:$4 sm:$0xff]   ;;  %v15332_v28 = vld [vmem:[%s17099_s2 + $0x14a8] ss:$16 sps:$4 sm:$0xff]  }
 0x2f0   : > { %10510 = vmatprep.subr.bf16.mxu0 %v15253_v29  ;;  %11535 = vmatprep.subr.bf16.mxu1 %v15256_v30  ;;  %v15337_v29 = vld [vmem:[%s17099_s2 + $0x14c4] ss:$16 sps:$4 sm:$0xff]   ;;  %v15340_v30 = vld [vmem:[%s17099_s2 + $0x14cc] ss:$16 sps:$4 sm:$0xff]  }
 0x2f3   : > { %10511 = vmatpush1.bf16.msra.mxu0 %v15251_v15  ;;  %11536 = vmatpush1.bf16.msra.mxu1 %v15254_v31  ;;  %v15335_v15 = vld [vmem:[%s17099_s2 + $0x14c0] ss:$16 sps:$4 sm:$0xff]   ;;  %v15338_v31 = vld [vmem:[%s17099_s2 + $0x14c8] ss:$16 sps:$4 sm:$0xff]  }
 0x2f4   : > { %10512 = vmatprep.subr.bf16.mxu0 %v15259_v32  ;;  %11537 = vmatprep.subr.bf16.mxu1 %v15262_v33  ;;  %v15343_v32 = vld [vmem:[%s17099_s2 + $0x14e4] ss:$16 sps:$4 sm:$0xff]   ;;  %v15346_v33 = vld [vmem:[%s17099_s2 + $0x14ec] ss:$16 sps:$4 sm:$0xff]  }
 0x2f7   : > { %10513 = vmatpush1.bf16.msra.mxu0 %v15257_v25  ;;  %11538 = vmatpush1.bf16.msra.mxu1 %v15260_v34  ;;  %v15341_v25 = vld [vmem:[%s17099_s2 + $0x14e0] ss:$16 sps:$4 sm:$0xff]   ;;  %v15344_v34 = vld [vmem:[%s17099_s2 + $0x14e8] ss:$16 sps:$4 sm:$0xff]  }
 0x2f8   : > { %10514 = vmatprep.subr.bf16.mxu0 %v15265_v36  ;;  %11539 = vmatprep.subr.bf16.mxu1 %v15268_v37  ;;  %v15349_v36 = vld [vmem:[%s17099_s2 + $0x1504] ss:$16 sps:$4 sm:$0xff]   ;;  %v15352_v37 = vld [vmem:[%s17099_s2 + $0x150c] ss:$16 sps:$4 sm:$0xff]  }
 0x2fb   : > { %10515 = vmatpush1.bf16.msra.mxu0 %v15263_v39  ;;  %11540 = vmatpush1.bf16.msra.mxu1 %v15266_v40  ;;  %v15347_v39 = vld [vmem:[%s17099_s2 + $0x1500] ss:$16 sps:$4 sm:$0xff]   ;;  %v15350_v40 = vld [vmem:[%s17099_s2 + $0x1508] ss:$16 sps:$4 sm:$0xff]  }
 0x2fc   : > { %10516 = vmatprep.subr.bf16.mxu0 %v15271_v21  ;;  %11541 = vmatprep.subr.bf16.mxu1 %v15274_v41  ;;  %v15355_v21 = vld [vmem:[%s17099_s2 + $0x1524] ss:$16 sps:$4 sm:$0xff]   ;;  %v15358_v41 = vld [vmem:[%s17099_s2 + $0x152c] ss:$16 sps:$4 sm:$0xff]  }
 0x2ff   : > { %10517 = vmatpush1.bf16.msra.mxu0 %v15269_v42  ;;  %11542 = vmatpush1.bf16.msra.mxu1 %v15272_v44  ;;  %v15353_v42 = vld [vmem:[%s17099_s2 + $0x1520] ss:$16 sps:$4 sm:$0xff]   ;;  %v15356_v44 = vld [vmem:[%s17099_s2 + $0x1528] ss:$16 sps:$4 sm:$0xff]  }
 0x300   : > { %10518 = vmatprep.subr.bf16.mxu0 %v15277_v45  ;;  %11543 = vmatprep.subr.bf16.mxu1 %v15280_v46  ;;  %v15361_v45 = vld [vmem:[%s17099_s2 + $0x1544] ss:$16 sps:$4 sm:$0xff]   ;;  %v15364_v46 = vld [vmem:[%s17099_s2 + $0x154c] ss:$16 sps:$4 sm:$0xff]  }
 0x303   : > { %10519 = vmatpush1.bf16.msra.mxu0 %v15275_v47  ;;  %11544 = vmatpush1.bf16.msra.mxu1 %v15278_v50  ;;  %v15359_v47 = vld [vmem:[%s17099_s2 + $0x1540] ss:$16 sps:$4 sm:$0xff]   ;;  %v15362_v50 = vld [vmem:[%s17099_s2 + $0x1548] ss:$16 sps:$4 sm:$0xff]  }
 0x304   : > { %10520 = vmatprep.subr.bf16.mxu0 %v15283_v51  ;;  %11545 = vmatprep.subr.bf16.mxu1 %v15286_v53  ;;  %v15367_v51 = vld [vmem:[%s17099_s2 + $0x1564] ss:$16 sps:$4 sm:$0xff]   ;;  %v15370_v53 = vld [vmem:[%s17099_s2 + $0x156c] ss:$16 sps:$4 sm:$0xff]  }
 0x307   : > { %10521 = vmatpush1.bf16.msra.mxu0 %v15281_v54  ;;  %11546 = vmatpush1.bf16.msra.mxu1 %v15284_v55  ;;  %v15365_v54 = vld [vmem:[%s17099_s2 + $0x1560] ss:$16 sps:$4 sm:$0xff]   ;;  %v15368_v55 = vld [vmem:[%s17099_s2 + $0x1568] ss:$16 sps:$4 sm:$0xff]  }
 0x308   : > { %10522 = vmatprep.subr.bf16.mxu0 %v15289_v38  ;;  %11547 = vmatprep.subr.bf16.mxu1 %v15292_v56  ;;  %v15373_v38 = vld [vmem:[%s17099_s2 + $0x1584] ss:$16 sps:$4 sm:$0xff]   ;;  %v15376_v56 = vld [vmem:[%s17099_s2 + $0x158c] ss:$16 sps:$4 sm:$0xff]  }
 0x30b   : > { %10523 = vmatpush1.bf16.msra.mxu0 %v15287_v48  ;;  %11548 = vmatpush1.bf16.msra.mxu1 %v15290_v59  ;;  %v15379_v48 = vld [vmem:[%s17099_s2 + $0x15a4] ss:$16 sps:$4 sm:$0xff]   ;;  %v15382_v59 = vld [vmem:[%s17099_s2 + $0x15ac] ss:$16 sps:$4 sm:$0xff]  }
 0x30c   : > { %10524 = vmatprep.subr.bf16.mxu0 %v15295_v61  ;;  %11549 = vmatprep.subr.bf16.mxu1 %v15298_v62  ;;  %v15377_v61 = vld [vmem:[%s17099_s2 + $0x15a0] ss:$16 sps:$4 sm:$0xff]   ;;  %v15380_v62 = vld [vmem:[%s17099_s2 + $0x15a8] ss:$16 sps:$4 sm:$0xff]  }
 0x30f   : > { %10525 = vmatpush1.bf16.msra.mxu0 %v15293_v0  ;;  %11550 = vmatpush1.bf16.msra.mxu1 %v15296_v1  ;;  %v15385_v0 = vld [vmem:[%s17099_s2 + $0x15c4] ss:$16 sps:$4 sm:$0xff]   ;;  %v15388_v1 = vld [vmem:[%s17099_s2 + $0x15cc] ss:$16 sps:$4 sm:$0xff]  }
 0x310   : > { %10535 = vmatprep.subr.bf16.mxu0 %v15301_v35  ;;  %11560 = vmatprep.subr.bf16.mxu1 %v15304_v2  ;;  %v15383_v35 = vld [vmem:[%s17099_s2 + $0x15c0] ss:$16 sps:$4 sm:$0xff]   ;;  %v15386_v2 = vld [vmem:[%s17099_s2 + $0x15c8] ss:$16 sps:$4 sm:$0xff]  }
 0x312   : > { %10527 = vmatmul.mubr.bf16.vlgmr.msra.gmra.mrb[0].mxu0 %v2071_v4  ;;  %11552 = vmatmul.mubr.bf16.vlgmr.msra.gmra.mrb[0].mxu1 %v2071_v4  ;;  %v15394_v4 = vld [vmem:[%s17099_s2 + $0x15ec] ss:$16 sps:$4 sm:$0xff]  }
 0x313   : > { %10536 = vmatpush1.bf16.msra.mxu0 %v15299_v60  ;;  %11561 = vmatpush1.bf16.msra.mxu1 %v15302_v5  ;;  %v15389_v60 = vld [vmem:[%s17099_s2 + $0x15e0] ss:$16 sps:$4 sm:$0xff]   ;;  %v15392_v5 = vld [vmem:[%s17099_s2 + $0x15e8] ss:$16 sps:$4 sm:$0xff]  }
 0x314   : > { %10537 = vmatprep.subr.bf16.mxu0 %v15307_v6  ;;  %11562 = vmatprep.subr.bf16.mxu1 %v15310_v7  ;;  %v15398_v6 = vld [vmem:[%s17099_s2 + $0x1604] ss:$16 sps:$4 sm:$0xff]   ;;  %v15401_v7 = vld [vmem:[%s17099_s2 + $0x160c] ss:$16 sps:$4 sm:$0xff]  }
 0x315   : > { %10567 = vmatprep.mubr.bf16.mxu0 %v17883_v8  ;;  %11592 = vmatprep.mubr.bf16.mxu1 %v17883_v8 }
 0x317   : > { %10538 = vmatpush1.bf16.msra.mxu0 %v15305_v13  ;;  %11563 = vmatpush1.bf16.msra.mxu1 %v15308_v9  ;;  %v17949_v13 = vrot.slane %v17868_v63, %v17166_v49  ;;  %v15396_v9 = vld [vmem:[%s17099_s2 + $0x1600] ss:$16 sps:$4 sm:$0xff]  }
 0x318   : > { %10539 = vmatprep.subr.bf16.mxu0 %v15313_v10  ;;  %11564 = vmatprep.subr.bf16.mxu1 %v15316_v11  ;;  %v15399_v10 = vld [vmem:[%s17099_s2 + $0x1608] ss:$16 sps:$4 sm:$0xff]   ;;  %v15404_v11 = vld [vmem:[%s17099_s2 + $0x1624] ss:$16 sps:$4 sm:$0xff]   ;;  %v15402_v63 = vld [vmem:[%s17099_s2 + $0x1620] ss:$16 sps:$4 sm:$0xff]  }
 0x31b   : > { %10540 = vmatpush1.bf16.msra.mxu0 %v15311_v12  ;;  %11565 = vmatpush1.bf16.msra.mxu1 %v15314_v14  ;;  %v15407_v12 = vld [vmem:[%s17099_s2 + $0x162c] ss:$16 sps:$4 sm:$0xff]   ;;  %v2074_v14 = vcombine.high %v17883_v8, %v17883_v8  ;;  %v15408_v8 = vld [vmem:[%s17099_s2 + $0x1640] ss:$16 sps:$4 sm:$0xff]  }
 0x31c   : > { %10541 = vmatprep.subr.bf16.mxu0 %v15319_v16  ;;  %11566 = vmatprep.subr.bf16.mxu1 %v15322_v52  ;;  %v15405_v16 = vld [vmem:[%s17099_s2 + $0x1628] ss:$16 sps:$4 sm:$0xff]   ;;  %v15410_v52 = vld [vmem:[%s17099_s2 + $0x1644] ss:$16 sps:$4 sm:$0xff]  }
 0x31f   : > { %10542 = vmatpush1.bf16.msra.mxu0 %v15317_v17  ;;  %11567 = vmatpush1.bf16.msra.mxu1 %v15320_v18  ;;  %v15413_v17 = vld [vmem:[%s17099_s2 + $0x164c] ss:$16 sps:$4 sm:$0xff]   ;;  %v15411_v18 = vld [vmem:[%s17099_s2 + $0x1648] ss:$16 sps:$4 sm:$0xff]  }
 0x320   : > { %10543 = vmatprep.subr.bf16.mxu0 %v15325_v19  ;;  %11568 = vmatprep.subr.bf16.mxu1 %v15328_v20  ;;  %v15416_v19 = vld [vmem:[%s17099_s2 + $0x1664] ss:$16 sps:$4 sm:$0xff]   ;;  %v15419_v20 = vld [vmem:[%s17099_s2 + $0x166c] ss:$16 sps:$4 sm:$0xff]  }
 0x323   : > { %10544 = vmatpush1.bf16.msra.mxu0 %v15323_v22  ;;  %11569 = vmatpush1.bf16.msra.mxu1 %v15326_v23  ;;  %v15414_v22 = vld [vmem:[%s17099_s2 + $0x1660] ss:$16 sps:$4 sm:$0xff]   ;;  %v15417_v23 = vld [vmem:[%s17099_s2 + $0x1668] ss:$16 sps:$4 sm:$0xff]  }
 0x324   : > { %10545 = vmatprep.subr.bf16.mxu0 %v15331_v24  ;;  %11570 = vmatprep.subr.bf16.mxu1 %v15334_v26  ;;  %v15422_v24 = vld [vmem:[%s17099_s2 + $0x1684] ss:$16 sps:$4 sm:$0xff]   ;;  %v15425_v26 = vld [vmem:[%s17099_s2 + $0x168c] ss:$16 sps:$4 sm:$0xff]  }
 0x327   : > { %10546 = vmatpush1.bf16.msra.mxu0 %v15329_v27  ;;  %11571 = vmatpush1.bf16.msra.mxu1 %v15332_v28  ;;  %v15420_v27 = vld [vmem:[%s17099_s2 + $0x1680] ss:$16 sps:$4 sm:$0xff]   ;;  %v15423_v28 = vld [vmem:[%s17099_s2 + $0x1688] ss:$16 sps:$4 sm:$0xff]  }
 0x328   : > { %10547 = vmatprep.subr.bf16.mxu0 %v15337_v29  ;;  %11572 = vmatprep.subr.bf16.mxu1 %v15340_v30  ;;  %v15428_v29 = vld [vmem:[%s17099_s2 + $0x16a4] ss:$16 sps:$4 sm:$0xff]   ;;  %v15431_v30 = vld [vmem:[%s17099_s2 + $0x16ac] ss:$16 sps:$4 sm:$0xff]  }
 0x32b   : > { %10548 = vmatpush1.bf16.msra.mxu0 %v15335_v15  ;;  %11573 = vmatpush1.bf16.msra.mxu1 %v15338_v31  ;;  %v15426_v15 = vld [vmem:[%s17099_s2 + $0x16a0] ss:$16 sps:$4 sm:$0xff]   ;;  %v15429_v31 = vld [vmem:[%s17099_s2 + $0x16a8] ss:$16 sps:$4 sm:$0xff]  }
 0x32c   : > { %10549 = vmatprep.subr.bf16.mxu0 %v15343_v32  ;;  %11574 = vmatprep.subr.bf16.mxu1 %v15346_v33  ;;  %v15434_v32 = vld [vmem:[%s17099_s2 + $0x16c4] ss:$16 sps:$4 sm:$0xff]   ;;  %v15437_v33 = vld [vmem:[%s17099_s2 + $0x16cc] ss:$16 sps:$4 sm:$0xff]  }
 0x32f   : > { %10550 = vmatpush1.bf16.msra.mxu0 %v15341_v25  ;;  %11575 = vmatpush1.bf16.msra.mxu1 %v15344_v34  ;;  %v15432_v25 = vld [vmem:[%s17099_s2 + $0x16c0] ss:$16 sps:$4 sm:$0xff]   ;;  %v15435_v34 = vld [vmem:[%s17099_s2 + $0x16c8] ss:$16 sps:$4 sm:$0xff]  }
 0x330   : > { %10551 = vmatprep.subr.bf16.mxu0 %v15349_v36  ;;  %11576 = vmatprep.subr.bf16.mxu1 %v15352_v37  ;;  %v15440_v36 = vld [vmem:[%s17099_s2 + $0x16e4] ss:$16 sps:$4 sm:$0xff]   ;;  %v15443_v37 = vld [vmem:[%s17099_s2 + $0x16ec] ss:$16 sps:$4 sm:$0xff]  }
 0x333   : > { %10552 = vmatpush1.bf16.msra.mxu0 %v15347_v39  ;;  %11577 = vmatpush1.bf16.msra.mxu1 %v15350_v40  ;;  %v15438_v39 = vld [vmem:[%s17099_s2 + $0x16e0] ss:$16 sps:$4 sm:$0xff]   ;;  %v15441_v40 = vld [vmem:[%s17099_s2 + $0x16e8] ss:$16 sps:$4 sm:$0xff]  }
 0x334   : > { %10553 = vmatprep.subr.bf16.mxu0 %v15355_v21  ;;  %11578 = vmatprep.subr.bf16.mxu1 %v15358_v41  ;;  %v15446_v21 = vld [vmem:[%s17099_s2 + $0x1704] ss:$16 sps:$4 sm:$0xff]   ;;  %v15449_v41 = vld [vmem:[%s17099_s2 + $0x170c] ss:$16 sps:$4 sm:$0xff]  }
 0x337   : > { %10554 = vmatpush1.bf16.msra.mxu0 %v15353_v42  ;;  %11579 = vmatpush1.bf16.msra.mxu1 %v15356_v44  ;;  %v15444_v42 = vld [vmem:[%s17099_s2 + $0x1700] ss:$16 sps:$4 sm:$0xff]   ;;  %v15447_v44 = vld [vmem:[%s17099_s2 + $0x1708] ss:$16 sps:$4 sm:$0xff]  }
 0x338   : > { %10555 = vmatprep.subr.bf16.mxu0 %v15361_v45  ;;  %11580 = vmatprep.subr.bf16.mxu1 %v15364_v46  ;;  %v15452_v45 = vld [vmem:[%s17099_s2 + $0x1724] ss:$16 sps:$4 sm:$0xff]   ;;  %v15455_v46 = vld [vmem:[%s17099_s2 + $0x172c] ss:$16 sps:$4 sm:$0xff]  }
 0x33b   : > { %10556 = vmatpush1.bf16.msra.mxu0 %v15359_v47  ;;  %11581 = vmatpush1.bf16.msra.mxu1 %v15362_v50  ;;  %v15450_v47 = vld [vmem:[%s17099_s2 + $0x1720] ss:$16 sps:$4 sm:$0xff]   ;;  %v15453_v50 = vld [vmem:[%s17099_s2 + $0x1728] ss:$16 sps:$4 sm:$0xff]  }
 0x33c   : > { %10557 = vmatprep.subr.bf16.mxu0 %v15367_v51  ;;  %11582 = vmatprep.subr.bf16.mxu1 %v15370_v53  ;;  %v15458_v51 = vld [vmem:[%s17099_s2 + $0x1744] ss:$16 sps:$4 sm:$0xff]   ;;  %v15461_v53 = vld [vmem:[%s17099_s2 + $0x174c] ss:$16 sps:$4 sm:$0xff]  }
 0x33f   : > { %10558 = vmatpush1.bf16.msra.mxu0 %v15365_v54  ;;  %11583 = vmatpush1.bf16.msra.mxu1 %v15368_v55  ;;  %v15456_v54 = vld [vmem:[%s17099_s2 + $0x1740] ss:$16 sps:$4 sm:$0xff]   ;;  %v15459_v55 = vld [vmem:[%s17099_s2 + $0x1748] ss:$16 sps:$4 sm:$0xff]  }
 0x340   : > { %10559 = vmatprep.subr.bf16.mxu0 %v15373_v38  ;;  %11584 = vmatprep.subr.bf16.mxu1 %v15376_v56  ;;  %v15464_v38 = vld [vmem:[%s17099_s2 + $0x1764] ss:$16 sps:$4 sm:$0xff]   ;;  %v15467_v56 = vld [vmem:[%s17099_s2 + $0x176c] ss:$16 sps:$4 sm:$0xff]  }
 0x343   : > { %10560 = vmatpush1.bf16.msra.mxu0 %v15371_v57  ;;  %11585 = vmatpush1.bf16.msra.mxu1 %v15374_v58  ;;  %v15462_v57 = vld [vmem:[%s17099_s2 + $0x1760] ss:$16 sps:$4 sm:$0xff]   ;;  %v15465_v58 = vld [vmem:[%s17099_s2 + $0x1768] ss:$16 sps:$4 sm:$0xff]  }
 0x344   : > { %10561 = vmatprep.subr.bf16.mxu0 %v15379_v48  ;;  %11586 = vmatprep.subr.bf16.mxu1 %v15382_v59  ;;  %v15470_v48 = vld [vmem:[%s17099_s2 + $0x1784] ss:$16 sps:$4 sm:$0xff]   ;;  %v15473_v59 = vld [vmem:[%s17099_s2 + $0x178c] ss:$16 sps:$4 sm:$0xff]  }
 0x347   : > { %10562 = vmatpush1.bf16.msra.mxu0 %v15377_v61  ;;  %11587 = vmatpush1.bf16.msra.mxu1 %v15380_v62  ;;  %v15468_v61 = vld [vmem:[%s17099_s2 + $0x1780] ss:$16 sps:$4 sm:$0xff]   ;;  %v15471_v62 = vld [vmem:[%s17099_s2 + $0x1788] ss:$16 sps:$4 sm:$0xff]  }
 0x348   : > { %10563 = vmatprep.subr.bf16.mxu0 %v15385_v0  ;;  %11588 = vmatprep.subr.bf16.mxu1 %v15388_v1  ;;  %v15476_v0 = vld [vmem:[%s17099_s2 + $0x17a4] ss:$16 sps:$4 sm:$0xff]   ;;  %v15479_v1 = vld [vmem:[%s17099_s2 + $0x17ac] ss:$16 sps:$4 sm:$0xff]  }
 0x34b   : > { %10564 = vmatpush1.bf16.msra.mxu0 %v15383_v35  ;;  %11589 = vmatpush1.bf16.msra.mxu1 %v15386_v2  ;;  %v15474_v35 = vld [vmem:[%s17099_s2 + $0x17a0] ss:$16 sps:$4 sm:$0xff]   ;;  %v15477_v2 = vld [vmem:[%s17099_s2 + $0x17a8] ss:$16 sps:$4 sm:$0xff]  }
 0x34c   : > { %10565 = vmatprep.subr.bf16.mxu0 %v15391_v3  ;;  %11590 = vmatprep.subr.bf16.mxu1 %v15394_v4  ;;  %v15482_v3 = vld [vmem:[%s17099_s2 + $0x17c4] ss:$16 sps:$4 sm:$0xff]   ;;  %v15485_v4 = vld [vmem:[%s17099_s2 + $0x17cc] ss:$16 sps:$4 sm:$0xff]  }
 0x34f   : > { %10566 = vmatpush1.bf16.msra.mxu0 %v15389_v60  ;;  %11591 = vmatpush1.bf16.msra.mxu1 %v15392_v5  ;;  %v18014_v60 = vld [vmem:[%s19030_s0 + $0x18] sm:$0xff]  ;;  %v15480_v5 = vld [vmem:[%s17099_s2 + $0x17c0] ss:$16 sps:$4 sm:$0xff]  }
 0x350   : > { %10576 = vmatprep.subr.bf16.mxu0 %v15398_v6  ;;  %11601 = vmatprep.subr.bf16.mxu1 %v15401_v7  ;;  %v15483_v6 = vld [vmem:[%s17099_s2 + $0x17c8] ss:$16 sps:$4 sm:$0xff]   ;;  %v15488_v7 = vld [vmem:[%s17099_s2 + $0x17e4] ss:$16 sps:$4 sm:$0xff]  }
 0x352   : > { %10568 = vmatmul.mubr.bf16.vlgmr.msra.gmra.mrb[0].mxu0 %v17949_v13  ;;  %11593 = vmatmul.mubr.bf16.vlgmr.msra.gmra.mrb[0].mxu1 %v17949_v13 }
 0x353   : > { %10577 = vmatpush1.bf16.msra.mxu0 %v15396_v9  ;;  %11602 = vmatpush1.bf16.msra.mxu1 %v15399_v10  ;;  %v15491_v9 = vld [vmem:[%s17099_s2 + $0x17ec] ss:$16 sps:$4 sm:$0xff]   ;;  %v18022_v10 = vrot.slane %v18014_v60, %v17166_v49 }
 0x354   : > { %10578 = vmatprep.subr.bf16.mxu0 %v15404_v11  ;;  %11603 = vmatprep.subr.bf16.mxu1 %v15407_v12  ;;  %v15486_v11 = vld [vmem:[%s17099_s2 + $0x17e0] ss:$16 sps:$4 sm:$0xff]   ;;  %v15489_v12 = vld [vmem:[%s17099_s2 + $0x17e8] ss:$16 sps:$4 sm:$0xff]  }
 0x355   : > { %10608 = vmatprep.mubr.bf16.mxu0 %v2074_v14  ;;  %11633 = vmatprep.mubr.bf16.mxu1 %v2074_v14  ;;  %v15494_v14 = vld [vmem:[%s17099_s2 + $0x1804] ss:$16 sps:$4 sm:$0xff]  }
 0x357   : > { %10579 = vmatpush1.bf16.msra.mxu0 %v15402_v63  ;;  %11604 = vmatpush1.bf16.msra.mxu1 %v15405_v16  ;;  %v15497_v63 = vld [vmem:[%s17099_s2 + $0x180c] ss:$16 sps:$4 sm:$0xff]   ;;  %v2090_v16 = vcombine.high %v18022_v10, %v18022_v10 }
 0x358   : > { %10580 = vmatprep.subr.bf16.mxu0 %v15410_v52  ;;  %11605 = vmatprep.subr.bf16.mxu1 %v15413_v17  ;;  %v2072_v52 = vcombine.high %v17949_v13, %v17949_v13  ;;  %v15492_v17 = vld [vmem:[%s17099_s2 + $0x1800] ss:$16 sps:$4 sm:$0xff]  }
 0x359   : > { %v15498_v13 = vld [vmem:[%s17099_s2 + $0x1820] ss:$16 sps:$4 sm:$0xff]  }
 0x35b   : > { %10581 = vmatpush1.bf16.msra.mxu0 %v15408_v8  ;;  %11606 = vmatpush1.bf16.msra.mxu1 %v15411_v18  ;;  %v15495_v8 = vld [vmem:[%s17099_s2 + $0x1808] ss:$16 sps:$4 sm:$0xff]   ;;  %v15500_v18 = vld [vmem:[%s17099_s2 + $0x1824] ss:$16 sps:$4 sm:$0xff]  }
 0x35c   : > { %10582 = vmatprep.subr.bf16.mxu0 %v15416_v19  ;;  %11607 = vmatprep.subr.bf16.mxu1 %v15419_v20  ;;  %v15503_v19 = vld [vmem:[%s17099_s2 + $0x182c] ss:$16 sps:$4 sm:$0xff]   ;;  %v18037_v20 = vrot.slane %v2090_v16, %v17166_v49  ;;  %v15579_v16 = vld [vmem:[%s17099_s2 + $0x19c8] ss:$16 sps:$4 sm:$0xff]  }
 0x35f   : > { %10583 = vmatpush1.bf16.msra.mxu0 %v15414_v22  ;;  %11608 = vmatpush1.bf16.msra.mxu1 %v15417_v23  ;;  %v15501_v22 = vld [vmem:[%s17099_s2 + $0x1828] ss:$16 sps:$4 sm:$0xff]   ;;  %v15506_v23 = vld [vmem:[%s17099_s2 + $0x1844] ss:$16 sps:$4 sm:$0xff]  }
 0x360   : > { %10584 = vmatprep.subr.bf16.mxu0 %v15422_v24  ;;  %11609 = vmatprep.subr.bf16.mxu1 %v15425_v26  ;;  %v15509_v24 = vld [vmem:[%s17099_s2 + $0x184c] ss:$16 sps:$4 sm:$0xff]   ;;  %v15504_v26 = vld [vmem:[%s17099_s2 + $0x1840] ss:$16 sps:$4 sm:$0xff]  }
 0x363   : > { %10585 = vmatpush1.bf16.msra.mxu0 %v15420_v27  ;;  %11610 = vmatpush1.bf16.msra.mxu1 %v15423_v28  ;;  %v15507_v27 = vld [vmem:[%s17099_s2 + $0x1848] ss:$16 sps:$4 sm:$0xff]   ;;  %v15512_v28 = vld [vmem:[%s17099_s2 + $0x1864] ss:$16 sps:$4 sm:$0xff]  }
 0x364   : > { %10586 = vmatprep.subr.bf16.mxu0 %v15428_v29  ;;  %11611 = vmatprep.subr.bf16.mxu1 %v15431_v30  ;;  %v15515_v29 = vld [vmem:[%s17099_s2 + $0x186c] ss:$16 sps:$4 sm:$0xff]   ;;  %v15510_v30 = vld [vmem:[%s17099_s2 + $0x1860] ss:$16 sps:$4 sm:$0xff]  }
 0x367   : > { %10587 = vmatpush1.bf16.msra.mxu0 %v15426_v15  ;;  %11612 = vmatpush1.bf16.msra.mxu1 %v15429_v31  ;;  %v15513_v15 = vld [vmem:[%s17099_s2 + $0x1868] ss:$16 sps:$4 sm:$0xff]   ;;  %v15518_v31 = vld [vmem:[%s17099_s2 + $0x1884] ss:$16 sps:$4 sm:$0xff]  }
 0x368   : > { %10588 = vmatprep.subr.bf16.mxu0 %v15434_v32  ;;  %11613 = vmatprep.subr.bf16.mxu1 %v15437_v33  ;;  %v15521_v32 = vld [vmem:[%s17099_s2 + $0x188c] ss:$16 sps:$4 sm:$0xff]   ;;  %v15516_v33 = vld [vmem:[%s17099_s2 + $0x1880] ss:$16 sps:$4 sm:$0xff]  }
 0x36b   : > { %10589 = vmatpush1.bf16.msra.mxu0 %v15432_v25  ;;  %11614 = vmatpush1.bf16.msra.mxu1 %v15435_v34  ;;  %v15519_v25 = vld [vmem:[%s17099_s2 + $0x1888] ss:$16 sps:$4 sm:$0xff]   ;;  %v15524_v34 = vld [vmem:[%s17099_s2 + $0x18a4] ss:$16 sps:$4 sm:$0xff]  }
 0x36c   : > { %10590 = vmatprep.subr.bf16.mxu0 %v15440_v36  ;;  %11615 = vmatprep.subr.bf16.mxu1 %v15443_v37  ;;  %v15527_v36 = vld [vmem:[%s17099_s2 + $0x18ac] ss:$16 sps:$4 sm:$0xff]   ;;  %v15522_v37 = vld [vmem:[%s17099_s2 + $0x18a0] ss:$16 sps:$4 sm:$0xff]  }
 0x36f   : > { %10591 = vmatpush1.bf16.msra.mxu0 %v15438_v39  ;;  %11616 = vmatpush1.bf16.msra.mxu1 %v15441_v40  ;;  %v15525_v39 = vld [vmem:[%s17099_s2 + $0x18a8] ss:$16 sps:$4 sm:$0xff]   ;;  %v15530_v40 = vld [vmem:[%s17099_s2 + $0x18c4] ss:$16 sps:$4 sm:$0xff]  }
 0x370   : > { %10592 = vmatprep.subr.bf16.mxu0 %v15446_v21  ;;  %11617 = vmatprep.subr.bf16.mxu1 %v15449_v41  ;;  %v15533_v21 = vld [vmem:[%s17099_s2 + $0x18cc] ss:$16 sps:$4 sm:$0xff]   ;;  %v15528_v41 = vld [vmem:[%s17099_s2 + $0x18c0] ss:$16 sps:$4 sm:$0xff]  }
 0x373   : > { %10593 = vmatpush1.bf16.msra.mxu0 %v15444_v42  ;;  %11618 = vmatpush1.bf16.msra.mxu1 %v15447_v44  ;;  %v15531_v42 = vld [vmem:[%s17099_s2 + $0x18c8] ss:$16 sps:$4 sm:$0xff]   ;;  %v15536_v44 = vld [vmem:[%s17099_s2 + $0x18e4] ss:$16 sps:$4 sm:$0xff]  }
 0x374   : > { %10594 = vmatprep.subr.bf16.mxu0 %v15452_v45  ;;  %11619 = vmatprep.subr.bf16.mxu1 %v15455_v46  ;;  %v15539_v45 = vld [vmem:[%s17099_s2 + $0x18ec] ss:$16 sps:$4 sm:$0xff]   ;;  %v15534_v46 = vld [vmem:[%s17099_s2 + $0x18e0] ss:$16 sps:$4 sm:$0xff]  }
 0x377   : > { %10595 = vmatpush1.bf16.msra.mxu0 %v15450_v47  ;;  %11620 = vmatpush1.bf16.msra.mxu1 %v15453_v50  ;;  %v15537_v47 = vld [vmem:[%s17099_s2 + $0x18e8] ss:$16 sps:$4 sm:$0xff]   ;;  %v15542_v50 = vld [vmem:[%s17099_s2 + $0x1904] ss:$16 sps:$4 sm:$0xff]  }
 0x378   : > { %10596 = vmatprep.subr.bf16.mxu0 %v15458_v51  ;;  %11621 = vmatprep.subr.bf16.mxu1 %v15461_v53  ;;  %v15545_v51 = vld [vmem:[%s17099_s2 + $0x190c] ss:$16 sps:$4 sm:$0xff]   ;;  %v15540_v53 = vld [vmem:[%s17099_s2 + $0x1900] ss:$16 sps:$4 sm:$0xff]  }
 0x37b   : > { %10597 = vmatpush1.bf16.msra.mxu0 %v15456_v54  ;;  %11622 = vmatpush1.bf16.msra.mxu1 %v15459_v55  ;;  %v15543_v54 = vld [vmem:[%s17099_s2 + $0x1908] ss:$16 sps:$4 sm:$0xff]   ;;  %v15548_v55 = vld [vmem:[%s17099_s2 + $0x1924] ss:$16 sps:$4 sm:$0xff]  }
 0x37c   : > { %10598 = vmatprep.subr.bf16.mxu0 %v15464_v38  ;;  %11623 = vmatprep.subr.bf16.mxu1 %v15467_v56  ;;  %v15551_v38 = vld [vmem:[%s17099_s2 + $0x192c] ss:$16 sps:$4 sm:$0xff]   ;;  %v15546_v56 = vld [vmem:[%s17099_s2 + $0x1920] ss:$16 sps:$4 sm:$0xff]  }
 0x37f   : > { %10599 = vmatpush1.bf16.msra.mxu0 %v15462_v57  ;;  %11624 = vmatpush1.bf16.msra.mxu1 %v15465_v58  ;;  %v15549_v57 = vld [vmem:[%s17099_s2 + $0x1928] ss:$16 sps:$4 sm:$0xff]   ;;  %v15554_v58 = vld [vmem:[%s17099_s2 + $0x1944] ss:$16 sps:$4 sm:$0xff]  }
 0x380   : > { %10600 = vmatprep.subr.bf16.mxu0 %v15470_v48  ;;  %11625 = vmatprep.subr.bf16.mxu1 %v15473_v59  ;;  %v15557_v48 = vld [vmem:[%s17099_s2 + $0x194c] ss:$16 sps:$4 sm:$0xff]   ;;  %v15552_v59 = vld [vmem:[%s17099_s2 + $0x1940] ss:$16 sps:$4 sm:$0xff]  }
 0x383   : > { %10601 = vmatpush1.bf16.msra.mxu0 %v15468_v61  ;;  %11626 = vmatpush1.bf16.msra.mxu1 %v15471_v62  ;;  %v15555_v61 = vld [vmem:[%s17099_s2 + $0x1948] ss:$16 sps:$4 sm:$0xff]   ;;  %v15560_v62 = vld [vmem:[%s17099_s2 + $0x1964] ss:$16 sps:$4 sm:$0xff]  }
 0x384   : > { %10602 = vmatprep.subr.bf16.mxu0 %v15476_v0  ;;  %11627 = vmatprep.subr.bf16.mxu1 %v15479_v1  ;;  %v15563_v0 = vld [vmem:[%s17099_s2 + $0x196c] ss:$16 sps:$4 sm:$0xff]   ;;  %v15558_v1 = vld [vmem:[%s17099_s2 + $0x1960] ss:$16 sps:$4 sm:$0xff]  }
 0x387   : > { %10603 = vmatpush1.bf16.msra.mxu0 %v15474_v35  ;;  %11628 = vmatpush1.bf16.msra.mxu1 %v15477_v2  ;;  %v15561_v35 = vld [vmem:[%s17099_s2 + $0x1968] ss:$16 sps:$4 sm:$0xff]   ;;  %v15566_v2 = vld [vmem:[%s17099_s2 + $0x1984] ss:$16 sps:$4 sm:$0xff]  }
 0x388   : > { %10604 = vmatprep.subr.bf16.mxu0 %v15482_v3  ;;  %11629 = vmatprep.subr.bf16.mxu1 %v15485_v4  ;;  %v15569_v3 = vld [vmem:[%s17099_s2 + $0x198c] ss:$16 sps:$4 sm:$0xff]   ;;  %v15564_v4 = vld [vmem:[%s17099_s2 + $0x1980] ss:$16 sps:$4 sm:$0xff]  }
 0x38b   : > { %10605 = vmatpush1.bf16.msra.mxu0 %v15480_v5  ;;  %11630 = vmatpush1.bf16.msra.mxu1 %v15483_v6  ;;  %v15567_v5 = vld [vmem:[%s17099_s2 + $0x1988] ss:$16 sps:$4 sm:$0xff]   ;;  %v15572_v6 = vld [vmem:[%s17099_s2 + $0x19a4] ss:$16 sps:$4 sm:$0xff]  }
 0x38c   : > { %10606 = vmatprep.subr.bf16.mxu0 %v15488_v7  ;;  %11631 = vmatprep.subr.bf16.mxu1 %v15491_v9  ;;  %v15575_v7 = vld [vmem:[%s17099_s2 + $0x19ac] ss:$16 sps:$4 sm:$0xff]   ;;  %v15570_v9 = vld [vmem:[%s17099_s2 + $0x19a0] ss:$16 sps:$4 sm:$0xff]  }
 0x38f   : > { %10607 = vmatpush1.bf16.msra.mxu0 %v15486_v11  ;;  %11632 = vmatpush1.bf16.msra.mxu1 %v15489_v12  ;;  %v15573_v11 = vld [vmem:[%s17099_s2 + $0x19a8] ss:$16 sps:$4 sm:$0xff]   ;;  %v15578_v12 = vld [vmem:[%s17099_s2 + $0x19c4] ss:$16 sps:$4 sm:$0xff]  }
 0x390   : > { %10617 = vmatprep.subr.bf16.mxu0 %v15494_v14  ;;  %11642 = vmatprep.subr.bf16.mxu1 %v15497_v63  ;;  %v15581_v14 = vld [vmem:[%s17099_s2 + $0x19cc] ss:$16 sps:$4 sm:$0xff]   ;;  %v15576_v63 = vld [vmem:[%s17099_s2 + $0x19c0] ss:$16 sps:$4 sm:$0xff]  }
 0x392   : > { %10609 = vmatmul.mubr.bf16.vlgmr.msra.gmra.mrb[0].mxu0 %v2072_v52  ;;  %11634 = vmatmul.mubr.bf16.vlgmr.msra.gmra.mrb[0].mxu1 %v2072_v52  ;;  %v15584_v52 = vld [vmem:[%s17099_s2 + $0x19e4] ss:$16 sps:$4 sm:$0xff]  }
 0x393   : > { %10618 = vmatpush1.bf16.msra.mxu0 %v15492_v17  ;;  %11643 = vmatpush1.bf16.msra.mxu1 %v15495_v8  ;;  %v15587_v17 = vld [vmem:[%s17099_s2 + $0x19ec] ss:$16 sps:$4 sm:$0xff]   ;;  %v15582_v8 = vld [vmem:[%s17099_s2 + $0x19e0] ss:$16 sps:$4 sm:$0xff]  }
 0x394   : > { %10619 = vmatprep.subr.bf16.mxu0 %v15500_v18  ;;  %11644 = vmatprep.subr.bf16.mxu1 %v15503_v19  ;;  %v15585_v18 = vld [vmem:[%s17099_s2 + $0x19e8] ss:$16 sps:$4 sm:$0xff]   ;;  %v15590_v19 = vld [vmem:[%s17099_s2 + $0x1a04] ss:$16 sps:$4 sm:$0xff]  }
 0x395   : > { %10649 = vmatprep.mubr.bf16.mxu0 %v18037_v20  ;;  %11674 = vmatprep.mubr.bf16.mxu1 %v18037_v20 }
 0x397   : > { %10620 = vmatpush1.bf16.msra.mxu0 %v15498_v13  ;;  %11645 = vmatpush1.bf16.msra.mxu1 %v15501_v22  ;;  %v15593_v13 = vld [vmem:[%s17099_s2 + $0x1a0c] ss:$16 sps:$4 sm:$0xff]   ;;  %v18103_v22 = vrot.slane %v18022_v10, %v17166_v49  ;;  %v15594_v10 = vld [vmem:[%s17099_s2 + $0x1a20] ss:$16 sps:$4 sm:$0xff]  }
 0x398   : > { %10621 = vmatprep.subr.bf16.mxu0 %v15506_v23  ;;  %11646 = vmatprep.subr.bf16.mxu1 %v15509_v24  ;;  %v15588_v23 = vld [vmem:[%s17099_s2 + $0x1a00] ss:$16 sps:$4 sm:$0xff]   ;;  %v15591_v24 = vld [vmem:[%s17099_s2 + $0x1a08] ss:$16 sps:$4 sm:$0xff]  }
 0x39b   : > { %10622 = vmatpush1.bf16.msra.mxu0 %v15504_v26  ;;  %11647 = vmatpush1.bf16.msra.mxu1 %v15507_v27  ;;  %v15596_v26 = vld [vmem:[%s17099_s2 + $0x1a24] ss:$16 sps:$4 sm:$0xff]   ;;  %v15599_v27 = vld [vmem:[%s17099_s2 + $0x1a2c] ss:$16 sps:$4 sm:$0xff]  }
 0x39c   : > { %10623 = vmatprep.subr.bf16.mxu0 %v15512_v28  ;;  %11648 = vmatprep.subr.bf16.mxu1 %v15515_v29  ;;  %v2122_v28 = vcombine.high %v18037_v20, %v18037_v20  ;;  %v15597_v29 = vld [vmem:[%s17099_s2 + $0x1a28] ss:$16 sps:$4 sm:$0xff]   ;;  %v15600_v20 = vld [vmem:[%s17099_s2 + $0x1a40] ss:$16 sps:$4 sm:$0xff]  }
 0x39f   : > { %10624 = vmatpush1.bf16.msra.mxu0 %v15510_v30  ;;  %11649 = vmatpush1.bf16.msra.mxu1 %v15513_v15  ;;  %v15602_v30 = vld [vmem:[%s17099_s2 + $0x1a44] ss:$16 sps:$4 sm:$0xff]   ;;  %v15605_v15 = vld [vmem:[%s17099_s2 + $0x1a4c] ss:$16 sps:$4 sm:$0xff]  }
 0x3a0   : > { %10625 = vmatprep.subr.bf16.mxu0 %v15518_v31  ;;  %11650 = vmatprep.subr.bf16.mxu1 %v15521_v32  ;;  %v15603_v31 = vld [vmem:[%s17099_s2 + $0x1a48] ss:$16 sps:$4 sm:$0xff]   ;;  %v15608_v32 = vld [vmem:[%s17099_s2 + $0x1a64] ss:$16 sps:$4 sm:$0xff]  }
 0x3a3   : > { %10626 = vmatpush1.bf16.msra.mxu0 %v15516_v33  ;;  %11651 = vmatpush1.bf16.msra.mxu1 %v15519_v25  ;;  %v15611_v33 = vld [vmem:[%s17099_s2 + $0x1a6c] ss:$16 sps:$4 sm:$0xff]   ;;  %v15606_v25 = vld [vmem:[%s17099_s2 + $0x1a60] ss:$16 sps:$4 sm:$0xff]  }
 0x3a4   : > { %10627 = vmatprep.subr.bf16.mxu0 %v15524_v34  ;;  %11652 = vmatprep.subr.bf16.mxu1 %v15527_v36  ;;  %v15609_v34 = vld [vmem:[%s17099_s2 + $0x1a68] ss:$16 sps:$4 sm:$0xff]   ;;  %v15614_v36 = vld [vmem:[%s17099_s2 + $0x1a84] ss:$16 sps:$4 sm:$0xff]  }
 0x3a7   : > { %10628 = vmatpush1.bf16.msra.mxu0 %v15522_v37  ;;  %11653 = vmatpush1.bf16.msra.mxu1 %v15525_v39  ;;  %v15617_v37 = vld [vmem:[%s17099_s2 + $0x1a8c] ss:$16 sps:$4 sm:$0xff]   ;;  %v15612_v39 = vld [vmem:[%s17099_s2 + $0x1a80] ss:$16 sps:$4 sm:$0xff]  }
 0x3a8   : > { %10629 = vmatprep.subr.bf16.mxu0 %v15530_v40  ;;  %11654 = vmatprep.subr.bf16.mxu1 %v15533_v21  ;;  %v15615_v40 = vld [vmem:[%s17099_s2 + $0x1a88] ss:$16 sps:$4 sm:$0xff]   ;;  %v15620_v21 = vld [vmem:[%s17099_s2 + $0x1aa4] ss:$16 sps:$4 sm:$0xff]  }
 0x3ab   : > { %10630 = vmatpush1.bf16.msra.mxu0 %v15528_v41  ;;  %11655 = vmatpush1.bf16.msra.mxu1 %v15531_v42  ;;  %v15623_v41 = vld [vmem:[%s17099_s2 + $0x1aac] ss:$16 sps:$4 sm:$0xff]   ;;  %v15618_v42 = vld [vmem:[%s17099_s2 + $0x1aa0] ss:$16 sps:$4 sm:$0xff]  }
 0x3ac   : > { %10631 = vmatprep.subr.bf16.mxu0 %v15536_v44  ;;  %11656 = vmatprep.subr.bf16.mxu1 %v15539_v45  ;;  %v15621_v44 = vld [vmem:[%s17099_s2 + $0x1aa8] ss:$16 sps:$4 sm:$0xff]   ;;  %v15626_v45 = vld [vmem:[%s17099_s2 + $0x1ac4] ss:$16 sps:$4 sm:$0xff]  }
 0x3af   : > { %10632 = vmatpush1.bf16.msra.mxu0 %v15534_v46  ;;  %11657 = vmatpush1.bf16.msra.mxu1 %v15537_v47  ;;  %v15629_v46 = vld [vmem:[%s17099_s2 + $0x1acc] ss:$16 sps:$4 sm:$0xff]   ;;  %v15624_v47 = vld [vmem:[%s17099_s2 + $0x1ac0] ss:$16 sps:$4 sm:$0xff]  }
 0x3b0   : > { %10633 = vmatprep.subr.bf16.mxu0 %v15542_v50  ;;  %11658 = vmatprep.subr.bf16.mxu1 %v15545_v51  ;;  %v15627_v50 = vld [vmem:[%s17099_s2 + $0x1ac8] ss:$16 sps:$4 sm:$0xff]   ;;  %v15632_v51 = vld [vmem:[%s17099_s2 + $0x1ae4] ss:$16 sps:$4 sm:$0xff]  }
 0x3b3   : > { %10634 = vmatpush1.bf16.msra.mxu0 %v15540_v53  ;;  %11659 = vmatpush1.bf16.msra.mxu1 %v15543_v54  ;;  %v15635_v53 = vld [vmem:[%s17099_s2 + $0x1aec] ss:$16 sps:$4 sm:$0xff]   ;;  %v15630_v54 = vld [vmem:[%s17099_s2 + $0x1ae0] ss:$16 sps:$4 sm:$0xff]  }
 0x3b4   : > { %10635 = vmatprep.subr.bf16.mxu0 %v15548_v55  ;;  %11660 = vmatprep.subr.bf16.mxu1 %v15551_v38  ;;  %v15633_v55 = vld [vmem:[%s17099_s2 + $0x1ae8] ss:$16 sps:$4 sm:$0xff]   ;;  %v15638_v38 = vld [vmem:[%s17099_s2 + $0x1b04] ss:$16 sps:$4 sm:$0xff]  }
 0x3b7   : > { %10636 = vmatpush1.bf16.msra.mxu0 %v15546_v56  ;;  %11661 = vmatpush1.bf16.msra.mxu1 %v15549_v57  ;;  %v15641_v56 = vld [vmem:[%s17099_s2 + $0x1b0c] ss:$16 sps:$4 sm:$0xff]   ;;  %v15636_v57 = vld [vmem:[%s17099_s2 + $0x1b00] ss:$16 sps:$4 sm:$0xff]  }
 0x3b8   : > { %10637 = vmatprep.subr.bf16.mxu0 %v15554_v58  ;;  %11662 = vmatprep.subr.bf16.mxu1 %v15557_v48  ;;  %v15639_v58 = vld [vmem:[%s17099_s2 + $0x1b08] ss:$16 sps:$4 sm:$0xff]   ;;  %v15644_v48 = vld [vmem:[%s17099_s2 + $0x1b24] ss:$16 sps:$4 sm:$0xff]  }
 0x3bb   : > { %10638 = vmatpush1.bf16.msra.mxu0 %v15552_v59  ;;  %11663 = vmatpush1.bf16.msra.mxu1 %v15555_v61  ;;  %v15647_v59 = vld [vmem:[%s17099_s2 + $0x1b2c] ss:$16 sps:$4 sm:$0xff]   ;;  %v15642_v61 = vld [vmem:[%s17099_s2 + $0x1b20] ss:$16 sps:$4 sm:$0xff]  }
 0x3bc   : > { %10639 = vmatprep.subr.bf16.mxu0 %v15560_v62  ;;  %11664 = vmatprep.subr.bf16.mxu1 %v15563_v0  ;;  %v15645_v62 = vld [vmem:[%s17099_s2 + $0x1b28] ss:$16 sps:$4 sm:$0xff]   ;;  %v15650_v0 = vld [vmem:[%s17099_s2 + $0x1b44] ss:$16 sps:$4 sm:$0xff]  }
 0x3bf   : > { %10640 = vmatpush1.bf16.msra.mxu0 %v15558_v1  ;;  %11665 = vmatpush1.bf16.msra.mxu1 %v15561_v35  ;;  %v15653_v1 = vld [vmem:[%s17099_s2 + $0x1b4c] ss:$16 sps:$4 sm:$0xff]   ;;  %v15648_v35 = vld [vmem:[%s17099_s2 + $0x1b40] ss:$16 sps:$4 sm:$0xff]  }
 0x3c0   : > { %10641 = vmatprep.subr.bf16.mxu0 %v15566_v2  ;;  %11666 = vmatprep.subr.bf16.mxu1 %v15569_v3  ;;  %v15651_v2 = vld [vmem:[%s17099_s2 + $0x1b48] ss:$16 sps:$4 sm:$0xff]   ;;  %v15656_v3 = vld [vmem:[%s17099_s2 + $0x1b64] ss:$16 sps:$4 sm:$0xff]  }
 0x3c3   : > { %10642 = vmatpush1.bf16.msra.mxu0 %v15564_v4  ;;  %11667 = vmatpush1.bf16.msra.mxu1 %v15567_v5  ;;  %v15659_v4 = vld [vmem:[%s17099_s2 + $0x1b6c] ss:$16 sps:$4 sm:$0xff]   ;;  %v15654_v5 = vld [vmem:[%s17099_s2 + $0x1b60] ss:$16 sps:$4 sm:$0xff]  }
 0x3c4   : > { %10643 = vmatprep.subr.bf16.mxu0 %v15572_v6  ;;  %11668 = vmatprep.subr.bf16.mxu1 %v15575_v7  ;;  %v15657_v6 = vld [vmem:[%s17099_s2 + $0x1b68] ss:$16 sps:$4 sm:$0xff]   ;;  %v15662_v7 = vld [vmem:[%s17099_s2 + $0x1b84] ss:$16 sps:$4 sm:$0xff]  }
 0x3c7   : > { %10644 = vmatpush1.bf16.msra.mxu0 %v15570_v9  ;;  %11669 = vmatpush1.bf16.msra.mxu1 %v15573_v11  ;;  %v15665_v9 = vld [vmem:[%s17099_s2 + $0x1b8c] ss:$16 sps:$4 sm:$0xff]   ;;  %v15660_v11 = vld [vmem:[%s17099_s2 + $0x1b80] ss:$16 sps:$4 sm:$0xff]  }
 0x3c8   : > { %10645 = vmatprep.subr.bf16.mxu0 %v15578_v12  ;;  %11670 = vmatprep.subr.bf16.mxu1 %v15581_v14  ;;  %v15663_v12 = vld [vmem:[%s17099_s2 + $0x1b88] ss:$16 sps:$4 sm:$0xff]   ;;  %v15668_v14 = vld [vmem:[%s17099_s2 + $0x1ba4] ss:$16 sps:$4 sm:$0xff]  }
 0x3cb   : > { %10646 = vmatpush1.bf16.msra.mxu0 %v15576_v63  ;;  %11671 = vmatpush1.bf16.msra.mxu1 %v15579_v16  ;;  %v15671_v63 = vld [vmem:[%s17099_s2 + $0x1bac] ss:$16 sps:$4 sm:$0xff]   ;;  %v15666_v16 = vld [vmem:[%s17099_s2 + $0x1ba0] ss:$16 sps:$4 sm:$0xff]  }
 0x3cc   : > { %10647 = vmatprep.subr.bf16.mxu0 %v15584_v52  ;;  %11672 = vmatprep.subr.bf16.mxu1 %v15587_v17  ;;  %v15669_v52 = vld [vmem:[%s17099_s2 + $0x1ba8] ss:$16 sps:$4 sm:$0xff]   ;;  %v15674_v17 = vld [vmem:[%s17099_s2 + $0x1bc4] ss:$16 sps:$4 sm:$0xff]  }
 0x3cf   : > { %10648 = vmatpush1.bf16.msra.mxu0 %v15582_v8  ;;  %11673 = vmatpush1.bf16.msra.mxu1 %v15585_v18  ;;  %v15677_v8 = vld [vmem:[%s17099_s2 + $0x1bcc] ss:$16 sps:$4 sm:$0xff]   ;;  %v2075_v18 = vcombine.high %v18014_v60, %v18014_v60  ;;  %v15678_v60 = vld [vmem:[%s17099_s2 + $0x1be0] ss:$16 sps:$4 sm:$0xff]  }
 0x3d0   : > { %10658 = vmatprep.subr.bf16.mxu0 %v15590_v19  ;;  %11683 = vmatprep.subr.bf16.mxu1 %v15593_v13  ;;  %v15672_v19 = vld [vmem:[%s17099_s2 + $0x1bc0] ss:$16 sps:$4 sm:$0xff]   ;;  %v15675_v13 = vld [vmem:[%s17099_s2 + $0x1bc8] ss:$16 sps:$4 sm:$0xff]  }
 0x3d2   : > { %10650 = vmatmul.mubr.bf16.vlgmr.msra.gmra.mrb[0].mxu0 %v18103_v22  ;;  %11675 = vmatmul.mubr.bf16.vlgmr.msra.gmra.mrb[0].mxu1 %v18103_v22 }
 0x3d3   : > { %10659 = vmatpush1.bf16.msra.mxu0 %v15588_v23  ;;  %11684 = vmatpush1.bf16.msra.mxu1 %v15591_v24  ;;  %v15680_v23 = vld [vmem:[%s17099_s2 + $0x1be4] ss:$16 sps:$4 sm:$0xff]   ;;  %v15683_v24 = vld [vmem:[%s17099_s2 + $0x1bec] ss:$16 sps:$4 sm:$0xff]  }
 0x3d4   : > { %10660 = vmatprep.subr.bf16.mxu0 %v15596_v26  ;;  %11685 = vmatprep.subr.bf16.mxu1 %v15599_v27  ;;  %v18172_v26 = vrot.slane %v2075_v18, %v17166_v49  ;;  %v15681_v27 = vld [vmem:[%s17099_s2 + $0x1be8] ss:$16 sps:$4 sm:$0xff]  }
 0x3d5   : > { %10690 = vmatprep.mubr.bf16.mxu0 %v2122_v28  ;;  %11715 = vmatprep.mubr.bf16.mxu1 %v2122_v28  ;;  %v15686_v28 = vld [vmem:[%s17099_s2 + $0x1c04] ss:$16 sps:$4 sm:$0xff]   ;;  %v15759_v18 = vld [vmem:[%s17099_s2 + $0x1d88] ss:$16 sps:$4 sm:$0xff]  }
 0x3d7   : > { %10661 = vmatpush1.bf16.msra.mxu0 %v15594_v10  ;;  %11686 = vmatpush1.bf16.msra.mxu1 %v15597_v29  ;;  %v15689_v10 = vld [vmem:[%s17099_s2 + $0x1c0c] ss:$16 sps:$4 sm:$0xff]   ;;  %v2091_v29 = vcombine.high %v18172_v26, %v18172_v26 }
 0x3d8   : > { %10662 = vmatprep.subr.bf16.mxu0 %v15602_v30  ;;  %11687 = vmatprep.subr.bf16.mxu1 %v15605_v15  ;;  %v2120_v30 = vcombine.high %v18103_v22, %v18103_v22  ;;  %v15684_v15 = vld [vmem:[%s17099_s2 + $0x1c00] ss:$16 sps:$4 sm:$0xff]  }
 0x3d9   : > { %v15690_v22 = vld [vmem:[%s17099_s2 + $0x1c20] ss:$16 sps:$4 sm:$0xff]  }
 0x3db   : > { %10663 = vmatpush1.bf16.msra.mxu0 %v15600_v20  ;;  %11688 = vmatpush1.bf16.msra.mxu1 %v15603_v31  ;;  %v15687_v20 = vld [vmem:[%s17099_s2 + $0x1c08] ss:$16 sps:$4 sm:$0xff]   ;;  %v15692_v31 = vld [vmem:[%s17099_s2 + $0x1c24] ss:$16 sps:$4 sm:$0xff]  }
 0x3dc   : > { %10664 = vmatprep.subr.bf16.mxu0 %v15608_v32  ;;  %11689 = vmatprep.subr.bf16.mxu1 %v15611_v33  ;;  %v15695_v32 = vld [vmem:[%s17099_s2 + $0x1c2c] ss:$16 sps:$4 sm:$0xff]   ;;  %v18187_v33 = vrot.slane %v2091_v29, %v17166_v49  ;;  %v15776_v29 = vld [vmem:[%s17099_s2 + $0x1de4] ss:$16 sps:$4 sm:$0xff]  }
 0x3df   : > { %10665 = vmatpush1.bf16.msra.mxu0 %v15606_v25  ;;  %11690 = vmatpush1.bf16.msra.mxu1 %v15609_v34  ;;  %v15693_v25 = vld [vmem:[%s17099_s2 + $0x1c28] ss:$16 sps:$4 sm:$0xff]   ;;  %v15698_v34 = vld [vmem:[%s17099_s2 + $0x1c44] ss:$16 sps:$4 sm:$0xff]  }
 0x3e0   : > { %10666 = vmatprep.subr.bf16.mxu0 %v15614_v36  ;;  %11691 = vmatprep.subr.bf16.mxu1 %v15617_v37  ;;  %v15701_v36 = vld [vmem:[%s17099_s2 + $0x1c4c] ss:$16 sps:$4 sm:$0xff]   ;;  %v15696_v37 = vld [vmem:[%s17099_s2 + $0x1c40] ss:$16 sps:$4 sm:$0xff]  }
 0x3e3   : > { %10667 = vmatpush1.bf16.msra.mxu0 %v15612_v39  ;;  %11692 = vmatpush1.bf16.msra.mxu1 %v15615_v40  ;;  %v15699_v39 = vld [vmem:[%s17099_s2 + $0x1c48] ss:$16 sps:$4 sm:$0xff]   ;;  %v15704_v40 = vld [vmem:[%s17099_s2 + $0x1c64] ss:$16 sps:$4 sm:$0xff]  }
 0x3e4   : > { %10668 = vmatprep.subr.bf16.mxu0 %v15620_v21  ;;  %11693 = vmatprep.subr.bf16.mxu1 %v15623_v41  ;;  %v15707_v21 = vld [vmem:[%s17099_s2 + $0x1c6c] ss:$16 sps:$4 sm:$0xff]   ;;  %v15702_v41 = vld [vmem:[%s17099_s2 + $0x1c60] ss:$16 sps:$4 sm:$0xff]  }
 0x3e7   : > { %10669 = vmatpush1.bf16.msra.mxu0 %v15618_v42  ;;  %11694 = vmatpush1.bf16.msra.mxu1 %v15621_v44  ;;  %v15705_v42 = vld [vmem:[%s17099_s2 + $0x1c68] ss:$16 sps:$4 sm:$0xff]   ;;  %v15710_v44 = vld [vmem:[%s17099_s2 + $0x1c84] ss:$16 sps:$4 sm:$0xff]  }
 0x3e8   : > { %10670 = vmatprep.subr.bf16.mxu0 %v15626_v45  ;;  %11695 = vmatprep.subr.bf16.mxu1 %v15629_v46  ;;  %v15713_v45 = vld [vmem:[%s17099_s2 + $0x1c8c] ss:$16 sps:$4 sm:$0xff]   ;;  %v15708_v46 = vld [vmem:[%s17099_s2 + $0x1c80] ss:$16 sps:$4 sm:$0xff]  }
 0x3eb   : > { %10671 = vmatpush1.bf16.msra.mxu0 %v15624_v47  ;;  %11696 = vmatpush1.bf16.msra.mxu1 %v15627_v50  ;;  %v15711_v47 = vld [vmem:[%s17099_s2 + $0x1c88] ss:$16 sps:$4 sm:$0xff]   ;;  %v15716_v50 = vld [vmem:[%s17099_s2 + $0x1ca4] ss:$16 sps:$4 sm:$0xff]  }
 0x3ec   : > { %10672 = vmatprep.subr.bf16.mxu0 %v15632_v51  ;;  %11697 = vmatprep.subr.bf16.mxu1 %v15635_v53  ;;  %v15719_v51 = vld [vmem:[%s17099_s2 + $0x1cac] ss:$16 sps:$4 sm:$0xff]   ;;  %v15714_v53 = vld [vmem:[%s17099_s2 + $0x1ca0] ss:$16 sps:$4 sm:$0xff]  }
 0x3ef   : > { %10673 = vmatpush1.bf16.msra.mxu0 %v15630_v54  ;;  %11698 = vmatpush1.bf16.msra.mxu1 %v15633_v55  ;;  %v15717_v54 = vld [vmem:[%s17099_s2 + $0x1ca8] ss:$16 sps:$4 sm:$0xff]   ;;  %v15722_v55 = vld [vmem:[%s17099_s2 + $0x1cc4] ss:$16 sps:$4 sm:$0xff]  }
 0x3f0   : > { %10674 = vmatprep.subr.bf16.mxu0 %v15638_v38  ;;  %11699 = vmatprep.subr.bf16.mxu1 %v15641_v56  ;;  %v15725_v38 = vld [vmem:[%s17099_s2 + $0x1ccc] ss:$16 sps:$4 sm:$0xff]   ;;  %v15720_v56 = vld [vmem:[%s17099_s2 + $0x1cc0] ss:$16 sps:$4 sm:$0xff]  }
 0x3f3   : > { %10675 = vmatpush1.bf16.msra.mxu0 %v15636_v57  ;;  %11700 = vmatpush1.bf16.msra.mxu1 %v15639_v58  ;;  %v15723_v57 = vld [vmem:[%s17099_s2 + $0x1cc8] ss:$16 sps:$4 sm:$0xff]   ;;  %v15728_v58 = vld [vmem:[%s17099_s2 + $0x1ce4] ss:$16 sps:$4 sm:$0xff]  }
 0x3f4   : > { %10676 = vmatprep.subr.bf16.mxu0 %v15644_v48  ;;  %11701 = vmatprep.subr.bf16.mxu1 %v15647_v59  ;;  %v15731_v48 = vld [vmem:[%s17099_s2 + $0x1cec] ss:$16 sps:$4 sm:$0xff]   ;;  %v15726_v59 = vld [vmem:[%s17099_s2 + $0x1ce0] ss:$16 sps:$4 sm:$0xff]  }
 0x3f7   : > { %10677 = vmatpush1.bf16.msra.mxu0 %v15642_v61  ;;  %11702 = vmatpush1.bf16.msra.mxu1 %v15645_v62  ;;  %v15729_v61 = vld [vmem:[%s17099_s2 + $0x1ce8] ss:$16 sps:$4 sm:$0xff]   ;;  %v15734_v62 = vld [vmem:[%s17099_s2 + $0x1d04] ss:$16 sps:$4 sm:$0xff]  }
 0x3f8   : > { %10678 = vmatprep.subr.bf16.mxu0 %v15650_v0  ;;  %11703 = vmatprep.subr.bf16.mxu1 %v15653_v1  ;;  %v15737_v0 = vld [vmem:[%s17099_s2 + $0x1d0c] ss:$16 sps:$4 sm:$0xff]   ;;  %v15732_v1 = vld [vmem:[%s17099_s2 + $0x1d00] ss:$16 sps:$4 sm:$0xff]  }
 0x3fb   : > { %10679 = vmatpush1.bf16.msra.mxu0 %v15648_v35  ;;  %11704 = vmatpush1.bf16.msra.mxu1 %v15651_v2  ;;  %v15735_v35 = vld [vmem:[%s17099_s2 + $0x1d08] ss:$16 sps:$4 sm:$0xff]   ;;  %v15740_v2 = vld [vmem:[%s17099_s2 + $0x1d24] ss:$16 sps:$4 sm:$0xff]  }
 0x3fc   : > { %10680 = vmatprep.subr.bf16.mxu0 %v15656_v3  ;;  %11705 = vmatprep.subr.bf16.mxu1 %v15659_v4  ;;  %v15743_v3 = vld [vmem:[%s17099_s2 + $0x1d2c] ss:$16 sps:$4 sm:$0xff]   ;;  %v15738_v4 = vld [vmem:[%s17099_s2 + $0x1d20] ss:$16 sps:$4 sm:$0xff]  }
 0x3ff   : > { %10681 = vmatpush1.bf16.msra.mxu0 %v15654_v5  ;;  %11706 = vmatpush1.bf16.msra.mxu1 %v15657_v6  ;;  %v15741_v5 = vld [vmem:[%s17099_s2 + $0x1d28] ss:$16 sps:$4 sm:$0xff]   ;;  %v15746_v6 = vld [vmem:[%s17099_s2 + $0x1d44] ss:$16 sps:$4 sm:$0xff]  }
 0x400   : > { %10682 = vmatprep.subr.bf16.mxu0 %v15662_v7  ;;  %11707 = vmatprep.subr.bf16.mxu1 %v15665_v9  ;;  %v15749_v7 = vld [vmem:[%s17099_s2 + $0x1d4c] ss:$16 sps:$4 sm:$0xff]   ;;  %v15744_v9 = vld [vmem:[%s17099_s2 + $0x1d40] ss:$16 sps:$4 sm:$0xff]  }
 0x403   : > { %10683 = vmatpush1.bf16.msra.mxu0 %v15660_v11  ;;  %11708 = vmatpush1.bf16.msra.mxu1 %v15663_v12  ;;  %v15747_v11 = vld [vmem:[%s17099_s2 + $0x1d48] ss:$16 sps:$4 sm:$0xff]   ;;  %v15752_v12 = vld [vmem:[%s17099_s2 + $0x1d64] ss:$16 sps:$4 sm:$0xff]  }
 0x404   : > { %10684 = vmatprep.subr.bf16.mxu0 %v15668_v14  ;;  %11709 = vmatprep.subr.bf16.mxu1 %v15671_v63  ;;  %v15755_v14 = vld [vmem:[%s17099_s2 + $0x1d6c] ss:$16 sps:$4 sm:$0xff]   ;;  %v15750_v63 = vld [vmem:[%s17099_s2 + $0x1d60] ss:$16 sps:$4 sm:$0xff]  }
 0x407   : > { %10685 = vmatpush1.bf16.msra.mxu0 %v15666_v16  ;;  %11710 = vmatpush1.bf16.msra.mxu1 %v15669_v52  ;;  %v15753_v16 = vld [vmem:[%s17099_s2 + $0x1d68] ss:$16 sps:$4 sm:$0xff]   ;;  %v15758_v52 = vld [vmem:[%s17099_s2 + $0x1d84] ss:$16 sps:$4 sm:$0xff]  }
 0x408   : > { %10686 = vmatprep.subr.bf16.mxu0 %v15674_v17  ;;  %11711 = vmatprep.subr.bf16.mxu1 %v15677_v8  ;;  %v15761_v17 = vld [vmem:[%s17099_s2 + $0x1d8c] ss:$16 sps:$4 sm:$0xff]   ;;  %v15756_v8 = vld [vmem:[%s17099_s2 + $0x1d80] ss:$16 sps:$4 sm:$0xff]  }
 0x40b   : > { %10687 = vmatpush1.bf16.msra.mxu0 %v15672_v19  ;;  %11712 = vmatpush1.bf16.msra.mxu1 %v15675_v13  ;;  %v15764_v19 = vld [vmem:[%s17099_s2 + $0x1da4] ss:$16 sps:$4 sm:$0xff]   ;;  %v15767_v13 = vld [vmem:[%s17099_s2 + $0x1dac] ss:$16 sps:$4 sm:$0xff]  }
 0x40c   : > { %10688 = vmatprep.subr.bf16.mxu0 %v15680_v23  ;;  %11713 = vmatprep.subr.bf16.mxu1 %v15683_v24  ;;  %v15762_v23 = vld [vmem:[%s17099_s2 + $0x1da0] ss:$16 sps:$4 sm:$0xff]   ;;  %v15765_v24 = vld [vmem:[%s17099_s2 + $0x1da8] ss:$16 sps:$4 sm:$0xff]  }
 0x40f   : > { %10689 = vmatpush1.bf16.msra.mxu0 %v15678_v60  ;;  %11714 = vmatpush1.bf16.msra.mxu1 %v15681_v27  ;;  %v15770_v60 = vld [vmem:[%s17099_s2 + $0x1dc4] ss:$16 sps:$4 sm:$0xff]   ;;  %v15773_v27 = vld [vmem:[%s17099_s2 + $0x1dcc] ss:$16 sps:$4 sm:$0xff]  }
 0x410   : > { %10699 = vmatprep.subr.bf16.mxu0 %v15686_v28  ;;  %11724 = vmatprep.subr.bf16.mxu1 %v15689_v10  ;;  %v15768_v28 = vld [vmem:[%s17099_s2 + $0x1dc0] ss:$16 sps:$4 sm:$0xff]   ;;  %v15771_v10 = vld [vmem:[%s17099_s2 + $0x1dc8] ss:$16 sps:$4 sm:$0xff]  }
 0x412   : > { %10691 = vmatmul.mubr.bf16.vlgmr.msra.gmra.mrb[0].mxu0 %v2120_v30  ;;  %11716 = vmatmul.mubr.bf16.vlgmr.msra.gmra.mrb[0].mxu1 %v2120_v30  ;;  %v15779_v30 = vld [vmem:[%s17099_s2 + $0x1dec] ss:$16 sps:$4 sm:$0xff]  }
 0x413   : > { %10700 = vmatpush1.bf16.msra.mxu0 %v15684_v15  ;;  %11725 = vmatpush1.bf16.msra.mxu1 %v15687_v20  ;;  %v15774_v15 = vld [vmem:[%s17099_s2 + $0x1de0] ss:$16 sps:$4 sm:$0xff]   ;;  %v15777_v20 = vld [vmem:[%s17099_s2 + $0x1de8] ss:$16 sps:$4 sm:$0xff]  }
 0x414   : > { %10701 = vmatprep.subr.bf16.mxu0 %v15692_v31  ;;  %11726 = vmatprep.subr.bf16.mxu1 %v15695_v32  ;;  %v15783_v31 = vld [vmem:[%s17099_s2 + $0x1e04] ss:$16 sps:$4 sm:$0xff]   ;;  %v15786_v32 = vld [vmem:[%s17099_s2 + $0x1e0c] ss:$16 sps:$4 sm:$0xff]  }
 0x415   : > { %10731 = vmatprep.mubr.bf16.mxu0 %v18187_v33  ;;  %11756 = vmatprep.mubr.bf16.mxu1 %v18187_v33 }
 0x417   : > { %10702 = vmatpush1.bf16.msra.mxu0 %v15690_v22  ;;  %11727 = vmatpush1.bf16.msra.mxu1 %v15693_v25  ;;  %v18253_v22 = vrot.slane %v18172_v26, %v17166_v49  ;;  %v15781_v25 = vld [vmem:[%s17099_s2 + $0x1e00] ss:$16 sps:$4 sm:$0xff]  }
 0x418   : > { %10703 = vmatprep.subr.bf16.mxu0 %v15698_v34  ;;  %11728 = vmatprep.subr.bf16.mxu1 %v15701_v36  ;;  %v15784_v34 = vld [vmem:[%s17099_s2 + $0x1e08] ss:$16 sps:$4 sm:$0xff]   ;;  %v15789_v36 = vld [vmem:[%s17099_s2 + $0x1e24] ss:$16 sps:$4 sm:$0xff]   ;;  %v15787_v26 = vld [vmem:[%s17099_s2 + $0x1e20] ss:$16 sps:$4 sm:$0xff]  }
 0x41b   : > { %10704 = vmatpush1.bf16.msra.mxu0 %v15696_v37  ;;  %11729 = vmatpush1.bf16.msra.mxu1 %v15699_v39  ;;  %v15792_v37 = vld [vmem:[%s17099_s2 + $0x1e2c] ss:$16 sps:$4 sm:$0xff]   ;;  %v2123_v39 = vcombine.high %v18187_v33, %v18187_v33  ;;  %v15793_v33 = vld [vmem:[%s17099_s2 + $0x1e40] ss:$16 sps:$4 sm:$0xff]  }
 0x41c   : > { %10705 = vmatprep.subr.bf16.mxu0 %v15704_v40  ;;  %11730 = vmatprep.subr.bf16.mxu1 %v15707_v21  ;;  %v15790_v40 = vld [vmem:[%s17099_s2 + $0x1e28] ss:$16 sps:$4 sm:$0xff]   ;;  %v15795_v21 = vld [vmem:[%s17099_s2 + $0x1e44] ss:$16 sps:$4 sm:$0xff]  }
 0x41f   : > { %10706 = vmatpush1.bf16.msra.mxu0 %v15702_v41  ;;  %11731 = vmatpush1.bf16.msra.mxu1 %v15705_v42  ;;  %v15798_v41 = vld [vmem:[%s17099_s2 + $0x1e4c] ss:$16 sps:$4 sm:$0xff]   ;;  %v15796_v42 = vld [vmem:[%s17099_s2 + $0x1e48] ss:$16 sps:$4 sm:$0xff]  }
 0x420   : > { %10707 = vmatprep.subr.bf16.mxu0 %v15710_v44  ;;  %11732 = vmatprep.subr.bf16.mxu1 %v15713_v45  ;;  %v15801_v44 = vld [vmem:[%s17099_s2 + $0x1e64] ss:$16 sps:$4 sm:$0xff]   ;;  %v15804_v45 = vld [vmem:[%s17099_s2 + $0x1e6c] ss:$16 sps:$4 sm:$0xff]  }
 0x423   : > { %10708 = vmatpush1.bf16.msra.mxu0 %v15708_v46  ;;  %11733 = vmatpush1.bf16.msra.mxu1 %v15711_v47  ;;  %v15799_v46 = vld [vmem:[%s17099_s2 + $0x1e60] ss:$16 sps:$4 sm:$0xff]   ;;  %v15802_v47 = vld [vmem:[%s17099_s2 + $0x1e68] ss:$16 sps:$4 sm:$0xff]  }
 0x424   : > { %10709 = vmatprep.subr.bf16.mxu0 %v15716_v50  ;;  %11734 = vmatprep.subr.bf16.mxu1 %v15719_v51  ;;  %v15807_v50 = vld [vmem:[%s17099_s2 + $0x1e84] ss:$16 sps:$4 sm:$0xff]   ;;  %v15810_v51 = vld [vmem:[%s17099_s2 + $0x1e8c] ss:$16 sps:$4 sm:$0xff]  }
 0x427   : > { %10710 = vmatpush1.bf16.msra.mxu0 %v15714_v53  ;;  %11735 = vmatpush1.bf16.msra.mxu1 %v15717_v54  ;;  %v15805_v53 = vld [vmem:[%s17099_s2 + $0x1e80] ss:$16 sps:$4 sm:$0xff]   ;;  %v15808_v54 = vld [vmem:[%s17099_s2 + $0x1e88] ss:$16 sps:$4 sm:$0xff]  }
 0x428   : > { %10711 = vmatprep.subr.bf16.mxu0 %v15722_v55  ;;  %11736 = vmatprep.subr.bf16.mxu1 %v15725_v38  ;;  %v15813_v55 = vld [vmem:[%s17099_s2 + $0x1ea4] ss:$16 sps:$4 sm:$0xff]   ;;  %v15816_v38 = vld [vmem:[%s17099_s2 + $0x1eac] ss:$16 sps:$4 sm:$0xff]  }
 0x42b   : > { %10712 = vmatpush1.bf16.msra.mxu0 %v15720_v56  ;;  %11737 = vmatpush1.bf16.msra.mxu1 %v15723_v57  ;;  %v15811_v56 = vld [vmem:[%s17099_s2 + $0x1ea0] ss:$16 sps:$4 sm:$0xff]   ;;  %v15814_v57 = vld [vmem:[%s17099_s2 + $0x1ea8] ss:$16 sps:$4 sm:$0xff]  }
 0x42c   : > { %10713 = vmatprep.subr.bf16.mxu0 %v15728_v58  ;;  %11738 = vmatprep.subr.bf16.mxu1 %v15731_v48  ;;  %v15819_v58 = vld [vmem:[%s17099_s2 + $0x1ec4] ss:$16 sps:$4 sm:$0xff]   ;;  %v15822_v48 = vld [vmem:[%s17099_s2 + $0x1ecc] ss:$16 sps:$4 sm:$0xff]  }
 0x42f   : > { %10714 = vmatpush1.bf16.msra.mxu0 %v15726_v59  ;;  %11739 = vmatpush1.bf16.msra.mxu1 %v15729_v61  ;;  %v15817_v59 = vld [vmem:[%s17099_s2 + $0x1ec0] ss:$16 sps:$4 sm:$0xff]   ;;  %v15820_v61 = vld [vmem:[%s17099_s2 + $0x1ec8] ss:$16 sps:$4 sm:$0xff]  }
 0x430   : > { %10715 = vmatprep.subr.bf16.mxu0 %v15734_v62  ;;  %11740 = vmatprep.subr.bf16.mxu1 %v15737_v0  ;;  %v15825_v62 = vld [vmem:[%s17099_s2 + $0x1ee4] ss:$16 sps:$4 sm:$0xff]   ;;  %v15828_v0 = vld [vmem:[%s17099_s2 + $0x1eec] ss:$16 sps:$4 sm:$0xff]  }
 0x433   : > { %10716 = vmatpush1.bf16.msra.mxu0 %v15732_v1  ;;  %11741 = vmatpush1.bf16.msra.mxu1 %v15735_v35  ;;  %v15823_v1 = vld [vmem:[%s17099_s2 + $0x1ee0] ss:$16 sps:$4 sm:$0xff]   ;;  %v15826_v35 = vld [vmem:[%s17099_s2 + $0x1ee8] ss:$16 sps:$4 sm:$0xff]  }
 0x434   : > { %10717 = vmatprep.subr.bf16.mxu0 %v15740_v2  ;;  %11742 = vmatprep.subr.bf16.mxu1 %v15743_v3  ;;  %v15831_v2 = vld [vmem:[%s17099_s2 + $0x1f04] ss:$16 sps:$4 sm:$0xff]   ;;  %v15834_v3 = vld [vmem:[%s17099_s2 + $0x1f0c] ss:$16 sps:$4 sm:$0xff]  }
 0x437   : > { %10718 = vmatpush1.bf16.msra.mxu0 %v15738_v4  ;;  %11743 = vmatpush1.bf16.msra.mxu1 %v15741_v5  ;;  %v15829_v4 = vld [vmem:[%s17099_s2 + $0x1f00] ss:$16 sps:$4 sm:$0xff]   ;;  %v15832_v5 = vld [vmem:[%s17099_s2 + $0x1f08] ss:$16 sps:$4 sm:$0xff]  }
 0x438   : > { %10719 = vmatprep.subr.bf16.mxu0 %v15746_v6  ;;  %11744 = vmatprep.subr.bf16.mxu1 %v15749_v7  ;;  %v15837_v6 = vld [vmem:[%s17099_s2 + $0x1f24] ss:$16 sps:$4 sm:$0xff]   ;;  %v15840_v7 = vld [vmem:[%s17099_s2 + $0x1f2c] ss:$16 sps:$4 sm:$0xff]  }
 0x43b   : > { %10720 = vmatpush1.bf16.msra.mxu0 %v15744_v9  ;;  %11745 = vmatpush1.bf16.msra.mxu1 %v15747_v11  ;;  %v15835_v9 = vld [vmem:[%s17099_s2 + $0x1f20] ss:$16 sps:$4 sm:$0xff]   ;;  %v15838_v11 = vld [vmem:[%s17099_s2 + $0x1f28] ss:$16 sps:$4 sm:$0xff]  }
 0x43c   : > { %10721 = vmatprep.subr.bf16.mxu0 %v15752_v12  ;;  %11746 = vmatprep.subr.bf16.mxu1 %v15755_v14  ;;  %v15843_v12 = vld [vmem:[%s17099_s2 + $0x1f44] ss:$16 sps:$4 sm:$0xff]   ;;  %v15846_v14 = vld [vmem:[%s17099_s2 + $0x1f4c] ss:$16 sps:$4 sm:$0xff]  }
 0x43f   : > { %10722 = vmatpush1.bf16.msra.mxu0 %v15750_v63  ;;  %11747 = vmatpush1.bf16.msra.mxu1 %v15753_v16  ;;  %v15841_v63 = vld [vmem:[%s17099_s2 + $0x1f40] ss:$16 sps:$4 sm:$0xff]   ;;  %v15844_v16 = vld [vmem:[%s17099_s2 + $0x1f48] ss:$16 sps:$4 sm:$0xff]  }
 0x440   : > { %10723 = vmatprep.subr.bf16.mxu0 %v15758_v52  ;;  %11748 = vmatprep.subr.bf16.mxu1 %v15761_v17  ;;  %v15849_v52 = vld [vmem:[%s17099_s2 + $0x1f64] ss:$16 sps:$4 sm:$0xff]   ;;  %v15852_v17 = vld [vmem:[%s17099_s2 + $0x1f6c] ss:$16 sps:$4 sm:$0xff]  }
 0x443   : > { %10724 = vmatpush1.bf16.msra.mxu0 %v15756_v8  ;;  %11749 = vmatpush1.bf16.msra.mxu1 %v15759_v18  ;;  %v15847_v8 = vld [vmem:[%s17099_s2 + $0x1f60] ss:$16 sps:$4 sm:$0xff]   ;;  %v15850_v18 = vld [vmem:[%s17099_s2 + $0x1f68] ss:$16 sps:$4 sm:$0xff]  }
 0x444   : > { %10725 = vmatprep.subr.bf16.mxu0 %v15764_v19  ;;  %11750 = vmatprep.subr.bf16.mxu1 %v15767_v13  ;;  %v15855_v19 = vld [vmem:[%s17099_s2 + $0x1f84] ss:$16 sps:$4 sm:$0xff]   ;;  %v15858_v13 = vld [vmem:[%s17099_s2 + $0x1f8c] ss:$16 sps:$4 sm:$0xff]  }
 0x447   : > { %10726 = vmatpush1.bf16.msra.mxu0 %v15762_v23  ;;  %11751 = vmatpush1.bf16.msra.mxu1 %v15765_v24  ;;  %v15853_v23 = vld [vmem:[%s17099_s2 + $0x1f80] ss:$16 sps:$4 sm:$0xff]   ;;  %v15856_v24 = vld [vmem:[%s17099_s2 + $0x1f88] ss:$16 sps:$4 sm:$0xff]  }
 0x448   : > { %10727 = vmatprep.subr.bf16.mxu0 %v15770_v60  ;;  %11752 = vmatprep.subr.bf16.mxu1 %v15773_v27  ;;  %v15861_v60 = vld [vmem:[%s17099_s2 + $0x1fa4] ss:$16 sps:$4 sm:$0xff]   ;;  %v15864_v27 = vld [vmem:[%s17099_s2 + $0x1fac] ss:$16 sps:$4 sm:$0xff]  }
 0x44b   : > { %10728 = vmatpush1.bf16.msra.mxu0 %v15768_v28  ;;  %11753 = vmatpush1.bf16.msra.mxu1 %v15771_v10  ;;  %v15859_v28 = vld [vmem:[%s17099_s2 + $0x1fa0] ss:$16 sps:$4 sm:$0xff]   ;;  %v15862_v10 = vld [vmem:[%s17099_s2 + $0x1fa8] ss:$16 sps:$4 sm:$0xff]  }
 0x44c   : > { %10729 = vmatprep.subr.bf16.mxu0 %v15776_v29  ;;  %11754 = vmatprep.subr.bf16.mxu1 %v15779_v30  ;;  %v15867_v29 = vld [vmem:[%s17099_s2 + $0x1fc4] ss:$16 sps:$4 sm:$0xff]   ;;  %v15870_v30 = vld [vmem:[%s17099_s2 + $0x1fcc] ss:$16 sps:$4 sm:$0xff]  }
 0x44f   : > { %10730 = vmatpush1.bf16.msra.mxu0 %v15774_v15  ;;  %11755 = vmatpush1.bf16.msra.mxu1 %v15777_v20  ;;  %v18318_v15 = vld [vmem:[%s19030_s0 + $0x20] sm:$0xff] }
 0x450   : > { %10740 = vmatprep.subr.bf16.mxu0 %v15783_v31  ;;  %11765 = vmatprep.subr.bf16.mxu1 %v15786_v32  ;;  %v15865_v20 = vld [vmem:[%s17099_s2 + $0x1fc0] ss:$16 sps:$4 sm:$0xff]   ;;  %v15868_v31 = vld [vmem:[%s17099_s2 + $0x1fc8] ss:$16 sps:$4 sm:$0xff]   ;;  %v15873_v32 = vld [vmem:[%s17099_s2 + $0x1fe4] ss:$16 sps:$4 sm:$0xff]  }
 0x452   : > { %10732 = vmatmul.mubr.bf16.vlgmr.msra.gmra.mrb[0].mxu0 %v18253_v22  ;;  %11757 = vmatmul.mubr.bf16.vlgmr.msra.gmra.mrb[0].mxu1 %v18253_v22 }
 0x453   : > { %10741 = vmatpush1.bf16.msra.mxu0 %v15781_v25  ;;  %11766 = vmatpush1.bf16.msra.mxu1 %v15784_v34  ;;  %v15876_v25 = vld [vmem:[%s17099_s2 + $0x1fec] ss:$16 sps:$4 sm:$0xff]   ;;  %v18326_v34 = vrot.slane %v18318_v15, %v17166_v49 }
 0x454   : > { %10742 = vmatprep.subr.bf16.mxu0 %v15789_v36  ;;  %11767 = vmatprep.subr.bf16.mxu1 %v15792_v37  ;;  %v15871_v36 = vld [vmem:[%s17099_s2 + $0x1fe0] ss:$16 sps:$4 sm:$0xff]   ;;  %v15874_v37 = vld [vmem:[%s17099_s2 + $0x1fe8] ss:$16 sps:$4 sm:$0xff]  }
 0x455   : > { %10772 = vmatprep.mubr.bf16.mxu0 %v2123_v39  ;;  %11797 = vmatprep.mubr.bf16.mxu1 %v2123_v39  ;;  %v15879_v39 = vld [vmem:[%s17099_s2 + $0x2004] ss:$16 sps:$4 sm:$0xff]  }
 0x457   : > { %10743 = vmatpush1.bf16.msra.mxu0 %v15787_v26  ;;  %11768 = vmatpush1.bf16.msra.mxu1 %v15790_v40  ;;  %v15882_v26 = vld [vmem:[%s17099_s2 + $0x200c] ss:$16 sps:$4 sm:$0xff]   ;;  %v2139_v40 = vcombine.high %v18326_v34, %v18326_v34 }
 0x458   : > { %10744 = vmatprep.subr.bf16.mxu0 %v15795_v21  ;;  %11769 = vmatprep.subr.bf16.mxu1 %v15798_v41  ;;  %v2121_v21 = vcombine.high %v18253_v22, %v18253_v22  ;;  %v15877_v41 = vld [vmem:[%s17099_s2 + $0x2000] ss:$16 sps:$4 sm:$0xff]  }
 0x459   : > { %v15883_v22 = vld [vmem:[%s17099_s2 + $0x2020] ss:$16 sps:$4 sm:$0xff]  }
 0x45b   : > { %10745 = vmatpush1.bf16.msra.mxu0 %v15793_v33  ;;  %11770 = vmatpush1.bf16.msra.mxu1 %v15796_v42  ;;  %v15880_v33 = vld [vmem:[%s17099_s2 + $0x2008] ss:$16 sps:$4 sm:$0xff]   ;;  %v15885_v42 = vld [vmem:[%s17099_s2 + $0x2024] ss:$16 sps:$4 sm:$0xff]  }
 0x45c   : > { %10746 = vmatprep.subr.bf16.mxu0 %v15801_v44  ;;  %11771 = vmatprep.subr.bf16.mxu1 %v15804_v45  ;;  %v15888_v44 = vld [vmem:[%s17099_s2 + $0x202c] ss:$16 sps:$4 sm:$0xff]   ;;  %v18341_v45 = vrot.slane %v2139_v40, %v17166_v49  ;;  %v15964_v40 = vld [vmem:[%s17099_s2 + $0x21c8] ss:$16 sps:$4 sm:$0xff]  }
 0x45f   : > { %10747 = vmatpush1.bf16.msra.mxu0 %v15799_v46  ;;  %11772 = vmatpush1.bf16.msra.mxu1 %v15802_v47  ;;  %v15886_v46 = vld [vmem:[%s17099_s2 + $0x2028] ss:$16 sps:$4 sm:$0xff]   ;;  %v15891_v47 = vld [vmem:[%s17099_s2 + $0x2044] ss:$16 sps:$4 sm:$0xff]  }
 0x460   : > { %10748 = vmatprep.subr.bf16.mxu0 %v15807_v50  ;;  %11773 = vmatprep.subr.bf16.mxu1 %v15810_v51  ;;  %v15894_v50 = vld [vmem:[%s17099_s2 + $0x204c] ss:$16 sps:$4 sm:$0xff]   ;;  %v15889_v51 = vld [vmem:[%s17099_s2 + $0x2040] ss:$16 sps:$4 sm:$0xff]  }
 0x463   : > { %10749 = vmatpush1.bf16.msra.mxu0 %v15805_v53  ;;  %11774 = vmatpush1.bf16.msra.mxu1 %v15808_v54  ;;  %v15892_v53 = vld [vmem:[%s17099_s2 + $0x2048] ss:$16 sps:$4 sm:$0xff]   ;;  %v15897_v54 = vld [vmem:[%s17099_s2 + $0x2064] ss:$16 sps:$4 sm:$0xff]  }
 0x464   : > { %10750 = vmatprep.subr.bf16.mxu0 %v15813_v55  ;;  %11775 = vmatprep.subr.bf16.mxu1 %v15816_v38  ;;  %v15900_v55 = vld [vmem:[%s17099_s2 + $0x206c] ss:$16 sps:$4 sm:$0xff]   ;;  %v15895_v38 = vld [vmem:[%s17099_s2 + $0x2060] ss:$16 sps:$4 sm:$0xff]  }
 0x467   : > { %10751 = vmatpush1.bf16.msra.mxu0 %v15811_v56  ;;  %11776 = vmatpush1.bf16.msra.mxu1 %v15814_v57  ;;  %v15898_v56 = vld [vmem:[%s17099_s2 + $0x2068] ss:$16 sps:$4 sm:$0xff]   ;;  %v15903_v57 = vld [vmem:[%s17099_s2 + $0x2084] ss:$16 sps:$4 sm:$0xff]  }
 0x468   : > { %10752 = vmatprep.subr.bf16.mxu0 %v15819_v58  ;;  %11777 = vmatprep.subr.bf16.mxu1 %v15822_v48  ;;  %v15906_v58 = vld [vmem:[%s17099_s2 + $0x208c] ss:$16 sps:$4 sm:$0xff]   ;;  %v15901_v48 = vld [vmem:[%s17099_s2 + $0x2080] ss:$16 sps:$4 sm:$0xff]  }
 0x46b   : > { %10753 = vmatpush1.bf16.msra.mxu0 %v15817_v59  ;;  %11778 = vmatpush1.bf16.msra.mxu1 %v15820_v61  ;;  %v15904_v59 = vld [vmem:[%s17099_s2 + $0x2088] ss:$16 sps:$4 sm:$0xff]   ;;  %v15909_v61 = vld [vmem:[%s17099_s2 + $0x20a4] ss:$16 sps:$4 sm:$0xff]  }
 0x46c   : > { %10754 = vmatprep.subr.bf16.mxu0 %v15825_v62  ;;  %11779 = vmatprep.subr.bf16.mxu1 %v15828_v0  ;;  %v15912_v62 = vld [vmem:[%s17099_s2 + $0x20ac] ss:$16 sps:$4 sm:$0xff]   ;;  %v15907_v0 = vld [vmem:[%s17099_s2 + $0x20a0] ss:$16 sps:$4 sm:$0xff]  }
 0x46f   : > { %10755 = vmatpush1.bf16.msra.mxu0 %v15823_v1  ;;  %11780 = vmatpush1.bf16.msra.mxu1 %v15826_v35  ;;  %v15910_v1 = vld [vmem:[%s17099_s2 + $0x20a8] ss:$16 sps:$4 sm:$0xff]   ;;  %v15915_v35 = vld [vmem:[%s17099_s2 + $0x20c4] ss:$16 sps:$4 sm:$0xff]  }
 0x470   : > { %10756 = vmatprep.subr.bf16.mxu0 %v15831_v2  ;;  %11781 = vmatprep.subr.bf16.mxu1 %v15834_v3  ;;  %v15918_v2 = vld [vmem:[%s17099_s2 + $0x20cc] ss:$16 sps:$4 sm:$0xff]   ;;  %v15913_v3 = vld [vmem:[%s17099_s2 + $0x20c0] ss:$16 sps:$4 sm:$0xff]  }
 0x473   : > { %10757 = vmatpush1.bf16.msra.mxu0 %v15829_v4  ;;  %11782 = vmatpush1.bf16.msra.mxu1 %v15832_v5  ;;  %v15916_v4 = vld [vmem:[%s17099_s2 + $0x20c8] ss:$16 sps:$4 sm:$0xff]   ;;  %v15921_v5 = vld [vmem:[%s17099_s2 + $0x20e4] ss:$16 sps:$4 sm:$0xff]  }
 0x474   : > { %10758 = vmatprep.subr.bf16.mxu0 %v15837_v6  ;;  %11783 = vmatprep.subr.bf16.mxu1 %v15840_v7  ;;  %v15924_v6 = vld [vmem:[%s17099_s2 + $0x20ec] ss:$16 sps:$4 sm:$0xff]   ;;  %v15919_v7 = vld [vmem:[%s17099_s2 + $0x20e0] ss:$16 sps:$4 sm:$0xff]  }
 0x477   : > { %10759 = vmatpush1.bf16.msra.mxu0 %v15835_v9  ;;  %11784 = vmatpush1.bf16.msra.mxu1 %v15838_v11  ;;  %v15922_v9 = vld [vmem:[%s17099_s2 + $0x20e8] ss:$16 sps:$4 sm:$0xff]   ;;  %v15927_v11 = vld [vmem:[%s17099_s2 + $0x2104] ss:$16 sps:$4 sm:$0xff]  }
 0x478   : > { %10760 = vmatprep.subr.bf16.mxu0 %v15843_v12  ;;  %11785 = vmatprep.subr.bf16.mxu1 %v15846_v14  ;;  %v15930_v12 = vld [vmem:[%s17099_s2 + $0x210c] ss:$16 sps:$4 sm:$0xff]   ;;  %v15925_v14 = vld [vmem:[%s17099_s2 + $0x2100] ss:$16 sps:$4 sm:$0xff]  }
 0x47b   : > { %10761 = vmatpush1.bf16.msra.mxu0 %v15841_v63  ;;  %11786 = vmatpush1.bf16.msra.mxu1 %v15844_v16  ;;  %v15928_v63 = vld [vmem:[%s17099_s2 + $0x2108] ss:$16 sps:$4 sm:$0xff]   ;;  %v15933_v16 = vld [vmem:[%s17099_s2 + $0x2124] ss:$16 sps:$4 sm:$0xff]  }
 0x47c   : > { %10762 = vmatprep.subr.bf16.mxu0 %v15849_v52  ;;  %11787 = vmatprep.subr.bf16.mxu1 %v15852_v17  ;;  %v15936_v52 = vld [vmem:[%s17099_s2 + $0x212c] ss:$16 sps:$4 sm:$0xff]   ;;  %v15931_v17 = vld [vmem:[%s17099_s2 + $0x2120] ss:$16 sps:$4 sm:$0xff]  }
 0x47f   : > { %10763 = vmatpush1.bf16.msra.mxu0 %v15847_v8  ;;  %11788 = vmatpush1.bf16.msra.mxu1 %v15850_v18  ;;  %v15934_v8 = vld [vmem:[%s17099_s2 + $0x2128] ss:$16 sps:$4 sm:$0xff]   ;;  %v15939_v18 = vld [vmem:[%s17099_s2 + $0x2144] ss:$16 sps:$4 sm:$0xff]  }
 0x480   : > { %10764 = vmatprep.subr.bf16.mxu0 %v15855_v19  ;;  %11789 = vmatprep.subr.bf16.mxu1 %v15858_v13  ;;  %v15942_v19 = vld [vmem:[%s17099_s2 + $0x214c] ss:$16 sps:$4 sm:$0xff]   ;;  %v15937_v13 = vld [vmem:[%s17099_s2 + $0x2140] ss:$16 sps:$4 sm:$0xff]  }
 0x483   : > { %10765 = vmatpush1.bf16.msra.mxu0 %v15853_v23  ;;  %11790 = vmatpush1.bf16.msra.mxu1 %v15856_v24  ;;  %v15940_v23 = vld [vmem:[%s17099_s2 + $0x2148] ss:$16 sps:$4 sm:$0xff]   ;;  %v15945_v24 = vld [vmem:[%s17099_s2 + $0x2164] ss:$16 sps:$4 sm:$0xff]  }
 0x484   : > { %10766 = vmatprep.subr.bf16.mxu0 %v15861_v60  ;;  %11791 = vmatprep.subr.bf16.mxu1 %v15864_v27  ;;  %v15948_v60 = vld [vmem:[%s17099_s2 + $0x216c] ss:$16 sps:$4 sm:$0xff]   ;;  %v15943_v27 = vld [vmem:[%s17099_s2 + $0x2160] ss:$16 sps:$4 sm:$0xff]  }
 0x487   : > { %10767 = vmatpush1.bf16.msra.mxu0 %v15859_v28  ;;  %11792 = vmatpush1.bf16.msra.mxu1 %v15862_v10  ;;  %v15946_v28 = vld [vmem:[%s17099_s2 + $0x2168] ss:$16 sps:$4 sm:$0xff]   ;;  %v15951_v10 = vld [vmem:[%s17099_s2 + $0x2184] ss:$16 sps:$4 sm:$0xff]  }
 0x488   : > { %10768 = vmatprep.subr.bf16.mxu0 %v15867_v29  ;;  %11793 = vmatprep.subr.bf16.mxu1 %v15870_v30  ;;  %v15954_v29 = vld [vmem:[%s17099_s2 + $0x218c] ss:$16 sps:$4 sm:$0xff]   ;;  %v15949_v30 = vld [vmem:[%s17099_s2 + $0x2180] ss:$16 sps:$4 sm:$0xff]  }
 0x48b   : > { %10769 = vmatpush1.bf16.msra.mxu0 %v15865_v20  ;;  %11794 = vmatpush1.bf16.msra.mxu1 %v15868_v31  ;;  %v15952_v20 = vld [vmem:[%s17099_s2 + $0x2188] ss:$16 sps:$4 sm:$0xff]   ;;  %v15957_v31 = vld [vmem:[%s17099_s2 + $0x21a4] ss:$16 sps:$4 sm:$0xff]  }
 0x48c   : > { %10770 = vmatprep.subr.bf16.mxu0 %v15873_v32  ;;  %11795 = vmatprep.subr.bf16.mxu1 %v15876_v25  ;;  %v15960_v32 = vld [vmem:[%s17099_s2 + $0x21ac] ss:$16 sps:$4 sm:$0xff]   ;;  %v15955_v25 = vld [vmem:[%s17099_s2 + $0x21a0] ss:$16 sps:$4 sm:$0xff]  }
 0x48f   : > { %10771 = vmatpush1.bf16.msra.mxu0 %v15871_v36  ;;  %11796 = vmatpush1.bf16.msra.mxu1 %v15874_v37  ;;  %v15958_v36 = vld [vmem:[%s17099_s2 + $0x21a8] ss:$16 sps:$4 sm:$0xff]   ;;  %v15963_v37 = vld [vmem:[%s17099_s2 + $0x21c4] ss:$16 sps:$4 sm:$0xff]  }
 0x490   : > { %10781 = vmatprep.subr.bf16.mxu0 %v15879_v39  ;;  %11806 = vmatprep.subr.bf16.mxu1 %v15882_v26  ;;  %v15966_v39 = vld [vmem:[%s17099_s2 + $0x21cc] ss:$16 sps:$4 sm:$0xff]   ;;  %v15961_v26 = vld [vmem:[%s17099_s2 + $0x21c0] ss:$16 sps:$4 sm:$0xff]  }
 0x492   : > { %10773 = vmatmul.mubr.bf16.vlgmr.msra.gmra.mrb[0].mxu0 %v2121_v21  ;;  %11798 = vmatmul.mubr.bf16.vlgmr.msra.gmra.mrb[0].mxu1 %v2121_v21  ;;  %v15969_v21 = vld [vmem:[%s17099_s2 + $0x21e4] ss:$16 sps:$4 sm:$0xff]  }
 0x493   : > { %10782 = vmatpush1.bf16.msra.mxu0 %v15877_v41  ;;  %11807 = vmatpush1.bf16.msra.mxu1 %v15880_v33  ;;  %v15972_v41 = vld [vmem:[%s17099_s2 + $0x21ec] ss:$16 sps:$4 sm:$0xff]   ;;  %v15967_v33 = vld [vmem:[%s17099_s2 + $0x21e0] ss:$16 sps:$4 sm:$0xff]  }
 0x494   : > { %10783 = vmatprep.subr.bf16.mxu0 %v15885_v42  ;;  %11808 = vmatprep.subr.bf16.mxu1 %v15888_v44  ;;  %v15970_v42 = vld [vmem:[%s17099_s2 + $0x21e8] ss:$16 sps:$4 sm:$0xff]   ;;  %v15975_v44 = vld [vmem:[%s17099_s2 + $0x2204] ss:$16 sps:$4 sm:$0xff]  }
 0x495   : > { %10813 = vmatprep.mubr.bf16.mxu0 %v18341_v45  ;;  %11838 = vmatprep.mubr.bf16.mxu1 %v18341_v45 }
 0x497   : > { %10784 = vmatpush1.bf16.msra.mxu0 %v15883_v22  ;;  %11809 = vmatpush1.bf16.msra.mxu1 %v15886_v46  ;;  %v15978_v22 = vld [vmem:[%s17099_s2 + $0x220c] ss:$16 sps:$4 sm:$0xff]   ;;  %v18407_v46 = vrot.slane %v18326_v34, %v17166_v49  ;;  %v15979_v34 = vld [vmem:[%s17099_s2 + $0x2220] ss:$16 sps:$4 sm:$0xff]  }
 0x498   : > { %10785 = vmatprep.subr.bf16.mxu0 %v15891_v47  ;;  %11810 = vmatprep.subr.bf16.mxu1 %v15894_v50  ;;  %v15973_v47 = vld [vmem:[%s17099_s2 + $0x2200] ss:$16 sps:$4 sm:$0xff]   ;;  %v15976_v50 = vld [vmem:[%s17099_s2 + $0x2208] ss:$16 sps:$4 sm:$0xff]  }
 0x49b   : > { %10786 = vmatpush1.bf16.msra.mxu0 %v15889_v51  ;;  %11811 = vmatpush1.bf16.msra.mxu1 %v15892_v53  ;;  %v15981_v51 = vld [vmem:[%s17099_s2 + $0x2224] ss:$16 sps:$4 sm:$0xff]   ;;  %v15984_v53 = vld [vmem:[%s17099_s2 + $0x222c] ss:$16 sps:$4 sm:$0xff]  }
 0x49c   : > { %10787 = vmatprep.subr.bf16.mxu0 %v15897_v54  ;;  %11812 = vmatprep.subr.bf16.mxu1 %v15900_v55  ;;  %v2171_v54 = vcombine.high %v18341_v45, %v18341_v45  ;;  %v15982_v55 = vld [vmem:[%s17099_s2 + $0x2228] ss:$16 sps:$4 sm:$0xff]   ;;  %v15985_v45 = vld [vmem:[%s17099_s2 + $0x2240] ss:$16 sps:$4 sm:$0xff]  }
 0x49f   : > { %10788 = vmatpush1.bf16.msra.mxu0 %v15895_v38  ;;  %11813 = vmatpush1.bf16.msra.mxu1 %v15898_v56  ;;  %v15987_v38 = vld [vmem:[%s17099_s2 + $0x2244] ss:$16 sps:$4 sm:$0xff]   ;;  %v15990_v56 = vld [vmem:[%s17099_s2 + $0x224c] ss:$16 sps:$4 sm:$0xff]  }
 0x4a0   : > { %10789 = vmatprep.subr.bf16.mxu0 %v15903_v57  ;;  %11814 = vmatprep.subr.bf16.mxu1 %v15906_v58  ;;  %v15988_v57 = vld [vmem:[%s17099_s2 + $0x2248] ss:$16 sps:$4 sm:$0xff]   ;;  %v15993_v58 = vld [vmem:[%s17099_s2 + $0x2264] ss:$16 sps:$4 sm:$0xff]  }
 0x4a3   : > { %10790 = vmatpush1.bf16.msra.mxu0 %v15901_v48  ;;  %11815 = vmatpush1.bf16.msra.mxu1 %v15904_v59  ;;  %v15996_v48 = vld [vmem:[%s17099_s2 + $0x226c] ss:$16 sps:$4 sm:$0xff]   ;;  %v15991_v59 = vld [vmem:[%s17099_s2 + $0x2260] ss:$16 sps:$4 sm:$0xff]  }
 0x4a4   : > { %10791 = vmatprep.subr.bf16.mxu0 %v15909_v61  ;;  %11816 = vmatprep.subr.bf16.mxu1 %v15912_v62  ;;  %v15994_v61 = vld [vmem:[%s17099_s2 + $0x2268] ss:$16 sps:$4 sm:$0xff]   ;;  %v15999_v62 = vld [vmem:[%s17099_s2 + $0x2284] ss:$16 sps:$4 sm:$0xff]  }
 0x4a7   : > { %10792 = vmatpush1.bf16.msra.mxu0 %v15907_v0  ;;  %11817 = vmatpush1.bf16.msra.mxu1 %v15910_v1  ;;  %v16002_v0 = vld [vmem:[%s17099_s2 + $0x228c] ss:$16 sps:$4 sm:$0xff]   ;;  %v15997_v1 = vld [vmem:[%s17099_s2 + $0x2280] ss:$16 sps:$4 sm:$0xff]  }
 0x4a8   : > { %10793 = vmatprep.subr.bf16.mxu0 %v15915_v35  ;;  %11818 = vmatprep.subr.bf16.mxu1 %v15918_v2  ;;  %v16000_v35 = vld [vmem:[%s17099_s2 + $0x2288] ss:$16 sps:$4 sm:$0xff]   ;;  %v16005_v2 = vld [vmem:[%s17099_s2 + $0x22a4] ss:$16 sps:$4 sm:$0xff]  }
 0x4ab   : > { %10794 = vmatpush1.bf16.msra.mxu0 %v15913_v3  ;;  %11819 = vmatpush1.bf16.msra.mxu1 %v15916_v4  ;;  %v16008_v3 = vld [vmem:[%s17099_s2 + $0x22ac] ss:$16 sps:$4 sm:$0xff]   ;;  %v16003_v4 = vld [vmem:[%s17099_s2 + $0x22a0] ss:$16 sps:$4 sm:$0xff]  }
 0x4ac   : > { %10795 = vmatprep.subr.bf16.mxu0 %v15921_v5  ;;  %11820 = vmatprep.subr.bf16.mxu1 %v15924_v6  ;;  %v16006_v5 = vld [vmem:[%s17099_s2 + $0x22a8] ss:$16 sps:$4 sm:$0xff]   ;;  %v16011_v6 = vld [vmem:[%s17099_s2 + $0x22c4] ss:$16 sps:$4 sm:$0xff]  }
 0x4af   : > { %10796 = vmatpush1.bf16.msra.mxu0 %v15919_v7  ;;  %11821 = vmatpush1.bf16.msra.mxu1 %v15922_v9  ;;  %v16014_v7 = vld [vmem:[%s17099_s2 + $0x22cc] ss:$16 sps:$4 sm:$0xff]   ;;  %v16009_v9 = vld [vmem:[%s17099_s2 + $0x22c0] ss:$16 sps:$4 sm:$0xff]  }
 0x4b0   : > { %10797 = vmatprep.subr.bf16.mxu0 %v15927_v11  ;;  %11822 = vmatprep.subr.bf16.mxu1 %v15930_v12  ;;  %v16012_v11 = vld [vmem:[%s17099_s2 + $0x22c8] ss:$16 sps:$4 sm:$0xff]   ;;  %v16017_v12 = vld [vmem:[%s17099_s2 + $0x22e4] ss:$16 sps:$4 sm:$0xff]  }
 0x4b3   : > { %10798 = vmatpush1.bf16.msra.mxu0 %v15925_v14  ;;  %11823 = vmatpush1.bf16.msra.mxu1 %v15928_v63  ;;  %v16020_v14 = vld [vmem:[%s17099_s2 + $0x22ec] ss:$16 sps:$4 sm:$0xff]   ;;  %v16015_v63 = vld [vmem:[%s17099_s2 + $0x22e0] ss:$16 sps:$4 sm:$0xff]  }
 0x4b4   : > { %10799 = vmatprep.subr.bf16.mxu0 %v15933_v16  ;;  %11824 = vmatprep.subr.bf16.mxu1 %v15936_v52  ;;  %v16018_v16 = vld [vmem:[%s17099_s2 + $0x22e8] ss:$16 sps:$4 sm:$0xff]   ;;  %v16023_v52 = vld [vmem:[%s17099_s2 + $0x2304] ss:$16 sps:$4 sm:$0xff]  }
 0x4b7   : > { %10800 = vmatpush1.bf16.msra.mxu0 %v15931_v17  ;;  %11825 = vmatpush1.bf16.msra.mxu1 %v15934_v8  ;;  %v16026_v17 = vld [vmem:[%s17099_s2 + $0x230c] ss:$16 sps:$4 sm:$0xff]   ;;  %v16021_v8 = vld [vmem:[%s17099_s2 + $0x2300] ss:$16 sps:$4 sm:$0xff]  }
 0x4b8   : > { %10801 = vmatprep.subr.bf16.mxu0 %v15939_v18  ;;  %11826 = vmatprep.subr.bf16.mxu1 %v15942_v19  ;;  %v16024_v18 = vld [vmem:[%s17099_s2 + $0x2308] ss:$16 sps:$4 sm:$0xff]   ;;  %v16029_v19 = vld [vmem:[%s17099_s2 + $0x2324] ss:$16 sps:$4 sm:$0xff]  }
 0x4bb   : > { %10802 = vmatpush1.bf16.msra.mxu0 %v15937_v13  ;;  %11827 = vmatpush1.bf16.msra.mxu1 %v15940_v23  ;;  %v16032_v13 = vld [vmem:[%s17099_s2 + $0x232c] ss:$16 sps:$4 sm:$0xff]   ;;  %v16027_v23 = vld [vmem:[%s17099_s2 + $0x2320] ss:$16 sps:$4 sm:$0xff]  }
 0x4bc   : > { %10803 = vmatprep.subr.bf16.mxu0 %v15945_v24  ;;  %11828 = vmatprep.subr.bf16.mxu1 %v15948_v60  ;;  %v16030_v24 = vld [vmem:[%s17099_s2 + $0x2328] ss:$16 sps:$4 sm:$0xff]   ;;  %v16035_v60 = vld [vmem:[%s17099_s2 + $0x2344] ss:$16 sps:$4 sm:$0xff]  }
 0x4bf   : > { %10804 = vmatpush1.bf16.msra.mxu0 %v15943_v27  ;;  %11829 = vmatpush1.bf16.msra.mxu1 %v15946_v28  ;;  %v16038_v27 = vld [vmem:[%s17099_s2 + $0x234c] ss:$16 sps:$4 sm:$0xff]   ;;  %v16033_v28 = vld [vmem:[%s17099_s2 + $0x2340] ss:$16 sps:$4 sm:$0xff]  }
 0x4c0   : > { %10805 = vmatprep.subr.bf16.mxu0 %v15951_v10  ;;  %11830 = vmatprep.subr.bf16.mxu1 %v15954_v29  ;;  %v16036_v10 = vld [vmem:[%s17099_s2 + $0x2348] ss:$16 sps:$4 sm:$0xff]   ;;  %v16041_v29 = vld [vmem:[%s17099_s2 + $0x2364] ss:$16 sps:$4 sm:$0xff]  }
 0x4c3   : > { %10806 = vmatpush1.bf16.msra.mxu0 %v15949_v30  ;;  %11831 = vmatpush1.bf16.msra.mxu1 %v15952_v20  ;;  %v16044_v30 = vld [vmem:[%s17099_s2 + $0x236c] ss:$16 sps:$4 sm:$0xff]   ;;  %v16039_v20 = vld [vmem:[%s17099_s2 + $0x2360] ss:$16 sps:$4 sm:$0xff]  }
 0x4c4   : > { %10807 = vmatprep.subr.bf16.mxu0 %v15957_v31  ;;  %11832 = vmatprep.subr.bf16.mxu1 %v15960_v32  ;;  %v16042_v31 = vld [vmem:[%s17099_s2 + $0x2368] ss:$16 sps:$4 sm:$0xff]   ;;  %v16047_v32 = vld [vmem:[%s17099_s2 + $0x2384] ss:$16 sps:$4 sm:$0xff]  }
 0x4c7   : > { %10808 = vmatpush1.bf16.msra.mxu0 %v15955_v25  ;;  %11833 = vmatpush1.bf16.msra.mxu1 %v15958_v36  ;;  %v16050_v25 = vld [vmem:[%s17099_s2 + $0x238c] ss:$16 sps:$4 sm:$0xff]   ;;  %v16045_v36 = vld [vmem:[%s17099_s2 + $0x2380] ss:$16 sps:$4 sm:$0xff]  }
 0x4c8   : > { %10809 = vmatprep.subr.bf16.mxu0 %v15963_v37  ;;  %11834 = vmatprep.subr.bf16.mxu1 %v15966_v39  ;;  %v16048_v37 = vld [vmem:[%s17099_s2 + $0x2388] ss:$16 sps:$4 sm:$0xff]   ;;  %v16053_v39 = vld [vmem:[%s17099_s2 + $0x23a4] ss:$16 sps:$4 sm:$0xff]  }
 0x4cb   : > { %10810 = vmatpush1.bf16.msra.mxu0 %v15961_v26  ;;  %11835 = vmatpush1.bf16.msra.mxu1 %v15964_v40  ;;  %v16056_v26 = vld [vmem:[%s17099_s2 + $0x23ac] ss:$16 sps:$4 sm:$0xff]   ;;  %v16051_v40 = vld [vmem:[%s17099_s2 + $0x23a0] ss:$16 sps:$4 sm:$0xff]  }
 0x4cc   : > { %10811 = vmatprep.subr.bf16.mxu0 %v15969_v21  ;;  %11836 = vmatprep.subr.bf16.mxu1 %v15972_v41  ;;  %v16054_v21 = vld [vmem:[%s17099_s2 + $0x23a8] ss:$16 sps:$4 sm:$0xff]   ;;  %v16059_v41 = vld [vmem:[%s17099_s2 + $0x23c4] ss:$16 sps:$4 sm:$0xff]  }
 0x4cf   : > { %10812 = vmatpush1.bf16.msra.mxu0 %v15967_v33  ;;  %11837 = vmatpush1.bf16.msra.mxu1 %v15970_v42  ;;  %v16062_v33 = vld [vmem:[%s17099_s2 + $0x23cc] ss:$16 sps:$4 sm:$0xff]   ;;  %v2124_v42 = vcombine.high %v18318_v15, %v18318_v15  ;;  %v16063_v15 = vld [vmem:[%s17099_s2 + $0x23e0] ss:$16 sps:$4 sm:$0xff]  }
 0x4d0   : > { %10822 = vmatprep.subr.bf16.mxu0 %v15975_v44  ;;  %11847 = vmatprep.subr.bf16.mxu1 %v15978_v22  ;;  %v16057_v44 = vld [vmem:[%s17099_s2 + $0x23c0] ss:$16 sps:$4 sm:$0xff]   ;;  %v16060_v22 = vld [vmem:[%s17099_s2 + $0x23c8] ss:$16 sps:$4 sm:$0xff]  }
 0x4d2   : > { %10814 = vmatmul.mubr.bf16.vlgmr.msra.gmra.mrb[0].mxu0 %v18407_v46  ;;  %11839 = vmatmul.mubr.bf16.vlgmr.msra.gmra.mrb[0].mxu1 %v18407_v46 }
 0x4d3   : > { %10823 = vmatpush1.bf16.msra.mxu0 %v15973_v47  ;;  %11848 = vmatpush1.bf16.msra.mxu1 %v15976_v50  ;;  %v16065_v47 = vld [vmem:[%s17099_s2 + $0x23e4] ss:$16 sps:$4 sm:$0xff]   ;;  %v16068_v50 = vld [vmem:[%s17099_s2 + $0x23ec] ss:$16 sps:$4 sm:$0xff]  }
 0x4d4   : > { %10824 = vmatprep.subr.bf16.mxu0 %v15981_v51  ;;  %11849 = vmatprep.subr.bf16.mxu1 %v15984_v53  ;;  %v18476_v51 = vrot.slane %v2124_v42, %v17166_v49  ;;  %v16066_v53 = vld [vmem:[%s17099_s2 + $0x23e8] ss:$16 sps:$4 sm:$0xff]  }
 0x4d5   : > { %10854 = vmatprep.mubr.bf16.mxu0 %v2171_v54  ;;  %11879 = vmatprep.mubr.bf16.mxu1 %v2171_v54  ;;  %v16071_v54 = vld [vmem:[%s17099_s2 + $0x2404] ss:$16 sps:$4 sm:$0xff]   ;;  %v16144_v42 = vld [vmem:[%s17099_s2 + $0x2588] ss:$16 sps:$4 sm:$0xff]  }
 0x4d7   : > { %10825 = vmatpush1.bf16.msra.mxu0 %v15979_v34  ;;  %11850 = vmatpush1.bf16.msra.mxu1 %v15982_v55  ;;  %v16074_v34 = vld [vmem:[%s17099_s2 + $0x240c] ss:$16 sps:$4 sm:$0xff]   ;;  %v2140_v55 = vcombine.high %v18476_v51, %v18476_v51 }
 0x4d8   : > { %10826 = vmatprep.subr.bf16.mxu0 %v15987_v38  ;;  %11851 = vmatprep.subr.bf16.mxu1 %v15990_v56  ;;  %v2169_v38 = vcombine.high %v18407_v46, %v18407_v46  ;;  %v16069_v56 = vld [vmem:[%s17099_s2 + $0x2400] ss:$16 sps:$4 sm:$0xff]  }
 0x4d9   : > { %v16075_v46 = vld [vmem:[%s17099_s2 + $0x2420] ss:$16 sps:$4 sm:$0xff]  }
 0x4db   : > { %10827 = vmatpush1.bf16.msra.mxu0 %v15985_v45  ;;  %11852 = vmatpush1.bf16.msra.mxu1 %v15988_v57  ;;  %v16072_v45 = vld [vmem:[%s17099_s2 + $0x2408] ss:$16 sps:$4 sm:$0xff]   ;;  %v16077_v57 = vld [vmem:[%s17099_s2 + $0x2424] ss:$16 sps:$4 sm:$0xff]  }
 0x4dc   : > { %10828 = vmatprep.subr.bf16.mxu0 %v15993_v58  ;;  %11853 = vmatprep.subr.bf16.mxu1 %v15996_v48  ;;  %v16080_v58 = vld [vmem:[%s17099_s2 + $0x242c] ss:$16 sps:$4 sm:$0xff]   ;;  %v18491_v48 = vrot.slane %v2140_v55, %v17166_v49  ;;  %v16161_v55 = vld [vmem:[%s17099_s2 + $0x25e4] ss:$16 sps:$4 sm:$0xff]  }
 0x4df   : > { %10829 = vmatpush1.bf16.msra.mxu0 %v15991_v59  ;;  %11854 = vmatpush1.bf16.msra.mxu1 %v15994_v61  ;;  %v16078_v59 = vld [vmem:[%s17099_s2 + $0x2428] ss:$16 sps:$4 sm:$0xff]   ;;  %v16083_v61 = vld [vmem:[%s17099_s2 + $0x2444] ss:$16 sps:$4 sm:$0xff]  }
 0x4e0   : > { %10830 = vmatprep.subr.bf16.mxu0 %v15999_v62  ;;  %11855 = vmatprep.subr.bf16.mxu1 %v16002_v0  ;;  %v16086_v62 = vld [vmem:[%s17099_s2 + $0x244c] ss:$16 sps:$4 sm:$0xff]   ;;  %v16081_v0 = vld [vmem:[%s17099_s2 + $0x2440] ss:$16 sps:$4 sm:$0xff]  }
 0x4e3   : > { %10831 = vmatpush1.bf16.msra.mxu0 %v15997_v1  ;;  %11856 = vmatpush1.bf16.msra.mxu1 %v16000_v35  ;;  %v16084_v1 = vld [vmem:[%s17099_s2 + $0x2448] ss:$16 sps:$4 sm:$0xff]   ;;  %v16089_v35 = vld [vmem:[%s17099_s2 + $0x2464] ss:$16 sps:$4 sm:$0xff]  }
 0x4e4   : > { %10832 = vmatprep.subr.bf16.mxu0 %v16005_v2  ;;  %11857 = vmatprep.subr.bf16.mxu1 %v16008_v3  ;;  %v16092_v2 = vld [vmem:[%s17099_s2 + $0x246c] ss:$16 sps:$4 sm:$0xff]   ;;  %v16087_v3 = vld [vmem:[%s17099_s2 + $0x2460] ss:$16 sps:$4 sm:$0xff]  }
 0x4e7   : > { %10833 = vmatpush1.bf16.msra.mxu0 %v16003_v4  ;;  %11858 = vmatpush1.bf16.msra.mxu1 %v16006_v5  ;;  %v16090_v4 = vld [vmem:[%s17099_s2 + $0x2468] ss:$16 sps:$4 sm:$0xff]   ;;  %v16095_v5 = vld [vmem:[%s17099_s2 + $0x2484] ss:$16 sps:$4 sm:$0xff]  }
 0x4e8   : > { %10834 = vmatprep.subr.bf16.mxu0 %v16011_v6  ;;  %11859 = vmatprep.subr.bf16.mxu1 %v16014_v7  ;;  %v16098_v6 = vld [vmem:[%s17099_s2 + $0x248c] ss:$16 sps:$4 sm:$0xff]   ;;  %v16093_v7 = vld [vmem:[%s17099_s2 + $0x2480] ss:$16 sps:$4 sm:$0xff]  }
 0x4eb   : > { %10835 = vmatpush1.bf16.msra.mxu0 %v16009_v9  ;;  %11860 = vmatpush1.bf16.msra.mxu1 %v16012_v11  ;;  %v16096_v9 = vld [vmem:[%s17099_s2 + $0x2488] ss:$16 sps:$4 sm:$0xff]   ;;  %v16101_v11 = vld [vmem:[%s17099_s2 + $0x24a4] ss:$16 sps:$4 sm:$0xff]  }
 0x4ec   : > { %10836 = vmatprep.subr.bf16.mxu0 %v16017_v12  ;;  %11861 = vmatprep.subr.bf16.mxu1 %v16020_v14  ;;  %v16104_v12 = vld [vmem:[%s17099_s2 + $0x24ac] ss:$16 sps:$4 sm:$0xff]   ;;  %v16099_v14 = vld [vmem:[%s17099_s2 + $0x24a0] ss:$16 sps:$4 sm:$0xff]  }
 0x4ef   : > { %10837 = vmatpush1.bf16.msra.mxu0 %v16015_v63  ;;  %11862 = vmatpush1.bf16.msra.mxu1 %v16018_v16  ;;  %v16102_v63 = vld [vmem:[%s17099_s2 + $0x24a8] ss:$16 sps:$4 sm:$0xff]   ;;  %v16107_v16 = vld [vmem:[%s17099_s2 + $0x24c4] ss:$16 sps:$4 sm:$0xff]  }
 0x4f0   : > { %10838 = vmatprep.subr.bf16.mxu0 %v16023_v52  ;;  %11863 = vmatprep.subr.bf16.mxu1 %v16026_v17  ;;  %v16110_v52 = vld [vmem:[%s17099_s2 + $0x24cc] ss:$16 sps:$4 sm:$0xff]   ;;  %v16105_v17 = vld [vmem:[%s17099_s2 + $0x24c0] ss:$16 sps:$4 sm:$0xff]  }
 0x4f3   : > { %10839 = vmatpush1.bf16.msra.mxu0 %v16021_v8  ;;  %11864 = vmatpush1.bf16.msra.mxu1 %v16024_v18  ;;  %v16108_v8 = vld [vmem:[%s17099_s2 + $0x24c8] ss:$16 sps:$4 sm:$0xff]   ;;  %v16113_v18 = vld [vmem:[%s17099_s2 + $0x24e4] ss:$16 sps:$4 sm:$0xff]  }
 0x4f4   : > { %10840 = vmatprep.subr.bf16.mxu0 %v16029_v19  ;;  %11865 = vmatprep.subr.bf16.mxu1 %v16032_v13  ;;  %v16116_v19 = vld [vmem:[%s17099_s2 + $0x24ec] ss:$16 sps:$4 sm:$0xff]   ;;  %v16111_v13 = vld [vmem:[%s17099_s2 + $0x24e0] ss:$16 sps:$4 sm:$0xff]  }
 0x4f7   : > { %10841 = vmatpush1.bf16.msra.mxu0 %v16027_v23  ;;  %11866 = vmatpush1.bf16.msra.mxu1 %v16030_v24  ;;  %v16114_v23 = vld [vmem:[%s17099_s2 + $0x24e8] ss:$16 sps:$4 sm:$0xff]   ;;  %v16119_v24 = vld [vmem:[%s17099_s2 + $0x2504] ss:$16 sps:$4 sm:$0xff]  }
 0x4f8   : > { %10842 = vmatprep.subr.bf16.mxu0 %v16035_v60  ;;  %11867 = vmatprep.subr.bf16.mxu1 %v16038_v27  ;;  %v16122_v60 = vld [vmem:[%s17099_s2 + $0x250c] ss:$16 sps:$4 sm:$0xff]   ;;  %v16117_v27 = vld [vmem:[%s17099_s2 + $0x2500] ss:$16 sps:$4 sm:$0xff]  }
 0x4fb   : > { %10843 = vmatpush1.bf16.msra.mxu0 %v16033_v28  ;;  %11868 = vmatpush1.bf16.msra.mxu1 %v16036_v10  ;;  %v16120_v28 = vld [vmem:[%s17099_s2 + $0x2508] ss:$16 sps:$4 sm:$0xff]   ;;  %v16125_v10 = vld [vmem:[%s17099_s2 + $0x2524] ss:$16 sps:$4 sm:$0xff]  }
 0x4fc   : > { %10844 = vmatprep.subr.bf16.mxu0 %v16041_v29  ;;  %11869 = vmatprep.subr.bf16.mxu1 %v16044_v30  ;;  %v16128_v29 = vld [vmem:[%s17099_s2 + $0x252c] ss:$16 sps:$4 sm:$0xff]   ;;  %v16123_v30 = vld [vmem:[%s17099_s2 + $0x2520] ss:$16 sps:$4 sm:$0xff]  }
 0x4ff   : > { %10845 = vmatpush1.bf16.msra.mxu0 %v16039_v20  ;;  %11870 = vmatpush1.bf16.msra.mxu1 %v16042_v31  ;;  %v16126_v20 = vld [vmem:[%s17099_s2 + $0x2528] ss:$16 sps:$4 sm:$0xff]   ;;  %v16131_v31 = vld [vmem:[%s17099_s2 + $0x2544] ss:$16 sps:$4 sm:$0xff]  }
 0x500   : > { %10846 = vmatprep.subr.bf16.mxu0 %v16047_v32  ;;  %11871 = vmatprep.subr.bf16.mxu1 %v16050_v25  ;;  %v16134_v32 = vld [vmem:[%s17099_s2 + $0x254c] ss:$16 sps:$4 sm:$0xff]   ;;  %v16129_v25 = vld [vmem:[%s17099_s2 + $0x2540] ss:$16 sps:$4 sm:$0xff]  }
 0x503   : > { %10847 = vmatpush1.bf16.msra.mxu0 %v16045_v36  ;;  %11872 = vmatpush1.bf16.msra.mxu1 %v16048_v37  ;;  %v16132_v36 = vld [vmem:[%s17099_s2 + $0x2548] ss:$16 sps:$4 sm:$0xff]   ;;  %v16137_v37 = vld [vmem:[%s17099_s2 + $0x2564] ss:$16 sps:$4 sm:$0xff]  }
 0x504   : > { %10848 = vmatprep.subr.bf16.mxu0 %v16053_v39  ;;  %11873 = vmatprep.subr.bf16.mxu1 %v16056_v26  ;;  %v16140_v39 = vld [vmem:[%s17099_s2 + $0x256c] ss:$16 sps:$4 sm:$0xff]   ;;  %v16135_v26 = vld [vmem:[%s17099_s2 + $0x2560] ss:$16 sps:$4 sm:$0xff]  }
 0x507   : > { %10849 = vmatpush1.bf16.msra.mxu0 %v16051_v40  ;;  %11874 = vmatpush1.bf16.msra.mxu1 %v16054_v21  ;;  %v16138_v40 = vld [vmem:[%s17099_s2 + $0x2568] ss:$16 sps:$4 sm:$0xff]   ;;  %v16143_v21 = vld [vmem:[%s17099_s2 + $0x2584] ss:$16 sps:$4 sm:$0xff]  }
 0x508   : > { %10850 = vmatprep.subr.bf16.mxu0 %v16059_v41  ;;  %11875 = vmatprep.subr.bf16.mxu1 %v16062_v33  ;;  %v16146_v41 = vld [vmem:[%s17099_s2 + $0x258c] ss:$16 sps:$4 sm:$0xff]   ;;  %v16141_v33 = vld [vmem:[%s17099_s2 + $0x2580] ss:$16 sps:$4 sm:$0xff]  }
 0x50b   : > { %10851 = vmatpush1.bf16.msra.mxu0 %v16057_v44  ;;  %11876 = vmatpush1.bf16.msra.mxu1 %v16060_v22  ;;  %v16149_v44 = vld [vmem:[%s17099_s2 + $0x25a4] ss:$16 sps:$4 sm:$0xff]   ;;  %v16152_v22 = vld [vmem:[%s17099_s2 + $0x25ac] ss:$16 sps:$4 sm:$0xff]  }
 0x50c   : > { %10852 = vmatprep.subr.bf16.mxu0 %v16065_v47  ;;  %11877 = vmatprep.subr.bf16.mxu1 %v16068_v50  ;;  %v16147_v47 = vld [vmem:[%s17099_s2 + $0x25a0] ss:$16 sps:$4 sm:$0xff]   ;;  %v16150_v50 = vld [vmem:[%s17099_s2 + $0x25a8] ss:$16 sps:$4 sm:$0xff]  }
 0x50f   : > { %10853 = vmatpush1.bf16.msra.mxu0 %v16063_v15  ;;  %11878 = vmatpush1.bf16.msra.mxu1 %v16066_v53  ;;  %v16155_v15 = vld [vmem:[%s17099_s2 + $0x25c4] ss:$16 sps:$4 sm:$0xff]   ;;  %v16158_v53 = vld [vmem:[%s17099_s2 + $0x25cc] ss:$16 sps:$4 sm:$0xff]  }
 0x510   : > { %10863 = vmatprep.subr.bf16.mxu0 %v16071_v54  ;;  %11888 = vmatprep.subr.bf16.mxu1 %v16074_v34  ;;  %v16153_v54 = vld [vmem:[%s17099_s2 + $0x25c0] ss:$16 sps:$4 sm:$0xff]   ;;  %v16156_v34 = vld [vmem:[%s17099_s2 + $0x25c8] ss:$16 sps:$4 sm:$0xff]  }
 0x512   : > { %10855 = vmatmul.mubr.bf16.vlgmr.msra.gmra.mrb[0].mxu0 %v2169_v38  ;;  %11880 = vmatmul.mubr.bf16.vlgmr.msra.gmra.mrb[0].mxu1 %v2169_v38  ;;  %v16164_v38 = vld [vmem:[%s17099_s2 + $0x25ec] ss:$16 sps:$4 sm:$0xff]  }
 0x513   : > { %10864 = vmatpush1.bf16.msra.mxu0 %v16069_v56  ;;  %11889 = vmatpush1.bf16.msra.mxu1 %v16072_v45  ;;  %v16159_v56 = vld [vmem:[%s17099_s2 + $0x25e0] ss:$16 sps:$4 sm:$0xff]   ;;  %v16162_v45 = vld [vmem:[%s17099_s2 + $0x25e8] ss:$16 sps:$4 sm:$0xff]  }
 0x514   : > { %10865 = vmatprep.subr.bf16.mxu0 %v16077_v57  ;;  %11890 = vmatprep.subr.bf16.mxu1 %v16080_v58  ;;  %v16168_v57 = vld [vmem:[%s17099_s2 + $0x2604] ss:$16 sps:$4 sm:$0xff]   ;;  %v16171_v58 = vld [vmem:[%s17099_s2 + $0x260c] ss:$16 sps:$4 sm:$0xff]  }
 0x515   : > { %10895 = vmatprep.mubr.bf16.mxu0 %v18491_v48  ;;  %11920 = vmatprep.mubr.bf16.mxu1 %v18491_v48 }
 0x517   : > { %10866 = vmatpush1.bf16.msra.mxu0 %v16075_v46  ;;  %11891 = vmatpush1.bf16.msra.mxu1 %v16078_v59  ;;  %v18557_v46 = vrot.slane %v18476_v51, %v17166_v49  ;;  %v16166_v59 = vld [vmem:[%s17099_s2 + $0x2600] ss:$16 sps:$4 sm:$0xff]  }
 0x518   : > { %10867 = vmatprep.subr.bf16.mxu0 %v16083_v61  ;;  %11892 = vmatprep.subr.bf16.mxu1 %v16086_v62  ;;  %v16169_v61 = vld [vmem:[%s17099_s2 + $0x2608] ss:$16 sps:$4 sm:$0xff]   ;;  %v16174_v62 = vld [vmem:[%s17099_s2 + $0x2624] ss:$16 sps:$4 sm:$0xff]   ;;  %v16172_v51 = vld [vmem:[%s17099_s2 + $0x2620] ss:$16 sps:$4 sm:$0xff]  }
 0x51b   : > { %10868 = vmatpush1.bf16.msra.mxu0 %v16081_v0  ;;  %11893 = vmatpush1.bf16.msra.mxu1 %v16084_v1  ;;  %v16177_v0 = vld [vmem:[%s17099_s2 + $0x262c] ss:$16 sps:$4 sm:$0xff]   ;;  %v2172_v1 = vcombine.high %v18491_v48, %v18491_v48  ;;  %v16178_v48 = vld [vmem:[%s17099_s2 + $0x2640] ss:$16 sps:$4 sm:$0xff]  }
 0x51c   : > { %10869 = vmatprep.subr.bf16.mxu0 %v16089_v35  ;;  %11894 = vmatprep.subr.bf16.mxu1 %v16092_v2  ;;  %v16175_v35 = vld [vmem:[%s17099_s2 + $0x2628] ss:$16 sps:$4 sm:$0xff]   ;;  %v16180_v2 = vld [vmem:[%s17099_s2 + $0x2644] ss:$16 sps:$4 sm:$0xff]  }
 0x51f   : > { %10870 = vmatpush1.bf16.msra.mxu0 %v16087_v3  ;;  %11895 = vmatpush1.bf16.msra.mxu1 %v16090_v4  ;;  %v16183_v3 = vld [vmem:[%s17099_s2 + $0x264c] ss:$16 sps:$4 sm:$0xff]   ;;  %v16181_v4 = vld [vmem:[%s17099_s2 + $0x2648] ss:$16 sps:$4 sm:$0xff]  }
 0x520   : > { %10871 = vmatprep.subr.bf16.mxu0 %v16095_v5  ;;  %11896 = vmatprep.subr.bf16.mxu1 %v16098_v6  ;;  %v16186_v5 = vld [vmem:[%s17099_s2 + $0x2664] ss:$16 sps:$4 sm:$0xff]   ;;  %v16189_v6 = vld [vmem:[%s17099_s2 + $0x266c] ss:$16 sps:$4 sm:$0xff]  }
 0x523   : > { %10872 = vmatpush1.bf16.msra.mxu0 %v16093_v7  ;;  %11897 = vmatpush1.bf16.msra.mxu1 %v16096_v9  ;;  %v16184_v7 = vld [vmem:[%s17099_s2 + $0x2660] ss:$16 sps:$4 sm:$0xff]   ;;  %v16187_v9 = vld [vmem:[%s17099_s2 + $0x2668] ss:$16 sps:$4 sm:$0xff]  }
 0x524   : > { %10873 = vmatprep.subr.bf16.mxu0 %v16101_v11  ;;  %11898 = vmatprep.subr.bf16.mxu1 %v16104_v12  ;;  %v16192_v11 = vld [vmem:[%s17099_s2 + $0x2684] ss:$16 sps:$4 sm:$0xff]   ;;  %v16195_v12 = vld [vmem:[%s17099_s2 + $0x268c] ss:$16 sps:$4 sm:$0xff]  }
 0x527   : > { %10874 = vmatpush1.bf16.msra.mxu0 %v16099_v14  ;;  %11899 = vmatpush1.bf16.msra.mxu1 %v16102_v63  ;;  %v16190_v14 = vld [vmem:[%s17099_s2 + $0x2680] ss:$16 sps:$4 sm:$0xff]   ;;  %v16193_v63 = vld [vmem:[%s17099_s2 + $0x2688] ss:$16 sps:$4 sm:$0xff]  }
 0x528   : > { %10875 = vmatprep.subr.bf16.mxu0 %v16107_v16  ;;  %11900 = vmatprep.subr.bf16.mxu1 %v16110_v52  ;;  %v16198_v16 = vld [vmem:[%s17099_s2 + $0x26a4] ss:$16 sps:$4 sm:$0xff]   ;;  %v16201_v52 = vld [vmem:[%s17099_s2 + $0x26ac] ss:$16 sps:$4 sm:$0xff]  }
 0x52b   : > { %10876 = vmatpush1.bf16.msra.mxu0 %v16105_v17  ;;  %11901 = vmatpush1.bf16.msra.mxu1 %v16108_v8  ;;  %v16196_v17 = vld [vmem:[%s17099_s2 + $0x26a0] ss:$16 sps:$4 sm:$0xff]   ;;  %v16199_v8 = vld [vmem:[%s17099_s2 + $0x26a8] ss:$16 sps:$4 sm:$0xff]  }
 0x52c   : > { %10877 = vmatprep.subr.bf16.mxu0 %v16113_v18  ;;  %11902 = vmatprep.subr.bf16.mxu1 %v16116_v19  ;;  %v16204_v18 = vld [vmem:[%s17099_s2 + $0x26c4] ss:$16 sps:$4 sm:$0xff]   ;;  %v16207_v19 = vld [vmem:[%s17099_s2 + $0x26cc] ss:$16 sps:$4 sm:$0xff]  }
 0x52f   : > { %10878 = vmatpush1.bf16.msra.mxu0 %v16111_v13  ;;  %11903 = vmatpush1.bf16.msra.mxu1 %v16114_v23  ;;  %v16202_v13 = vld [vmem:[%s17099_s2 + $0x26c0] ss:$16 sps:$4 sm:$0xff]   ;;  %v16205_v23 = vld [vmem:[%s17099_s2 + $0x26c8] ss:$16 sps:$4 sm:$0xff]  }
 0x530   : > { %10879 = vmatprep.subr.bf16.mxu0 %v16119_v24  ;;  %11904 = vmatprep.subr.bf16.mxu1 %v16122_v60  ;;  %v16210_v24 = vld [vmem:[%s17099_s2 + $0x26e4] ss:$16 sps:$4 sm:$0xff]   ;;  %v16213_v60 = vld [vmem:[%s17099_s2 + $0x26ec] ss:$16 sps:$4 sm:$0xff]  }
 0x533   : > { %10880 = vmatpush1.bf16.msra.mxu0 %v16117_v27  ;;  %11905 = vmatpush1.bf16.msra.mxu1 %v16120_v28  ;;  %v16208_v27 = vld [vmem:[%s17099_s2 + $0x26e0] ss:$16 sps:$4 sm:$0xff]   ;;  %v16211_v28 = vld [vmem:[%s17099_s2 + $0x26e8] ss:$16 sps:$4 sm:$0xff]  }
 0x534   : > { %10881 = vmatprep.subr.bf16.mxu0 %v16125_v10  ;;  %11906 = vmatprep.subr.bf16.mxu1 %v16128_v29  ;;  %v16216_v10 = vld [vmem:[%s17099_s2 + $0x2704] ss:$16 sps:$4 sm:$0xff]   ;;  %v16219_v29 = vld [vmem:[%s17099_s2 + $0x270c] ss:$16 sps:$4 sm:$0xff]  }
 0x537   : > { %10882 = vmatpush1.bf16.msra.mxu0 %v16123_v30  ;;  %11907 = vmatpush1.bf16.msra.mxu1 %v16126_v20  ;;  %v16214_v30 = vld [vmem:[%s17099_s2 + $0x2700] ss:$16 sps:$4 sm:$0xff]   ;;  %v16217_v20 = vld [vmem:[%s17099_s2 + $0x2708] ss:$16 sps:$4 sm:$0xff]  }
 0x538   : > { %10883 = vmatprep.subr.bf16.mxu0 %v16131_v31  ;;  %11908 = vmatprep.subr.bf16.mxu1 %v16134_v32  ;;  %v16222_v31 = vld [vmem:[%s17099_s2 + $0x2724] ss:$16 sps:$4 sm:$0xff]   ;;  %v16225_v32 = vld [vmem:[%s17099_s2 + $0x272c] ss:$16 sps:$4 sm:$0xff]  }
 0x53b   : > { %10884 = vmatpush1.bf16.msra.mxu0 %v16129_v25  ;;  %11909 = vmatpush1.bf16.msra.mxu1 %v16132_v36  ;;  %v16220_v25 = vld [vmem:[%s17099_s2 + $0x2720] ss:$16 sps:$4 sm:$0xff]   ;;  %v16223_v36 = vld [vmem:[%s17099_s2 + $0x2728] ss:$16 sps:$4 sm:$0xff]  }
 0x53c   : > { %10885 = vmatprep.subr.bf16.mxu0 %v16137_v37  ;;  %11910 = vmatprep.subr.bf16.mxu1 %v16140_v39  ;;  %v16228_v37 = vld [vmem:[%s17099_s2 + $0x2744] ss:$16 sps:$4 sm:$0xff]   ;;  %v16231_v39 = vld [vmem:[%s17099_s2 + $0x274c] ss:$16 sps:$4 sm:$0xff]  }
 0x53f   : > { %10886 = vmatpush1.bf16.msra.mxu0 %v16135_v26  ;;  %11911 = vmatpush1.bf16.msra.mxu1 %v16138_v40  ;;  %v16226_v26 = vld [vmem:[%s17099_s2 + $0x2740] ss:$16 sps:$4 sm:$0xff]   ;;  %v16229_v40 = vld [vmem:[%s17099_s2 + $0x2748] ss:$16 sps:$4 sm:$0xff]  }
 0x540   : > { %10887 = vmatprep.subr.bf16.mxu0 %v16143_v21  ;;  %11912 = vmatprep.subr.bf16.mxu1 %v16146_v41  ;;  %v16234_v21 = vld [vmem:[%s17099_s2 + $0x2764] ss:$16 sps:$4 sm:$0xff]   ;;  %v16237_v41 = vld [vmem:[%s17099_s2 + $0x276c] ss:$16 sps:$4 sm:$0xff]  }
 0x543   : > { %10888 = vmatpush1.bf16.msra.mxu0 %v16141_v33  ;;  %11913 = vmatpush1.bf16.msra.mxu1 %v16144_v42  ;;  %v16232_v33 = vld [vmem:[%s17099_s2 + $0x2760] ss:$16 sps:$4 sm:$0xff]   ;;  %v16235_v42 = vld [vmem:[%s17099_s2 + $0x2768] ss:$16 sps:$4 sm:$0xff]  }
 0x544   : > { %10889 = vmatprep.subr.bf16.mxu0 %v16149_v44  ;;  %11914 = vmatprep.subr.bf16.mxu1 %v16152_v22  ;;  %v16240_v44 = vld [vmem:[%s17099_s2 + $0x2784] ss:$16 sps:$4 sm:$0xff]   ;;  %v16243_v22 = vld [vmem:[%s17099_s2 + $0x278c] ss:$16 sps:$4 sm:$0xff]  }
 0x547   : > { %10890 = vmatpush1.bf16.msra.mxu0 %v16147_v47  ;;  %11915 = vmatpush1.bf16.msra.mxu1 %v16150_v50  ;;  %v16238_v47 = vld [vmem:[%s17099_s2 + $0x2780] ss:$16 sps:$4 sm:$0xff]   ;;  %v16241_v50 = vld [vmem:[%s17099_s2 + $0x2788] ss:$16 sps:$4 sm:$0xff]  }
 0x548   : > { %10891 = vmatprep.subr.bf16.mxu0 %v16155_v15  ;;  %11916 = vmatprep.subr.bf16.mxu1 %v16158_v53  ;;  %v16246_v15 = vld [vmem:[%s17099_s2 + $0x27a4] ss:$16 sps:$4 sm:$0xff]   ;;  %v16249_v53 = vld [vmem:[%s17099_s2 + $0x27ac] ss:$16 sps:$4 sm:$0xff]  }
 0x54b   : > { %10892 = vmatpush1.bf16.msra.mxu0 %v16153_v54  ;;  %11917 = vmatpush1.bf16.msra.mxu1 %v16156_v34  ;;  %v16244_v54 = vld [vmem:[%s17099_s2 + $0x27a0] ss:$16 sps:$4 sm:$0xff]   ;;  %v16247_v34 = vld [vmem:[%s17099_s2 + $0x27a8] ss:$16 sps:$4 sm:$0xff]  }
 0x54c   : > { %10893 = vmatprep.subr.bf16.mxu0 %v16161_v55  ;;  %11918 = vmatprep.subr.bf16.mxu1 %v16164_v38  ;;  %v16252_v55 = vld [vmem:[%s17099_s2 + $0x27c4] ss:$16 sps:$4 sm:$0xff]   ;;  %v16255_v38 = vld [vmem:[%s17099_s2 + $0x27cc] ss:$16 sps:$4 sm:$0xff]  }
 0x54f   : > { %10894 = vmatpush1.bf16.msra.mxu0 %v16159_v56  ;;  %11919 = vmatpush1.bf16.msra.mxu1 %v16162_v45  ;;  %v18622_v56 = vld [vmem:[%s19030_s0 + $0x28] sm:$0xff]  ;;  %v16250_v45 = vld [vmem:[%s17099_s2 + $0x27c0] ss:$16 sps:$4 sm:$0xff]  }
 0x550   : > { %10904 = vmatprep.subr.bf16.mxu0 %v16168_v57  ;;  %11929 = vmatprep.subr.bf16.mxu1 %v16171_v58  ;;  %v16253_v57 = vld [vmem:[%s17099_s2 + $0x27c8] ss:$16 sps:$4 sm:$0xff]   ;;  %v16258_v58 = vld [vmem:[%s17099_s2 + $0x27e4] ss:$16 sps:$4 sm:$0xff]  }
 0x552   : > { %10896 = vmatmul.mubr.bf16.vlgmr.msra.gmra.mrb[0].mxu0 %v18557_v46  ;;  %11921 = vmatmul.mubr.bf16.vlgmr.msra.gmra.mrb[0].mxu1 %v18557_v46 }
 0x553   : > { %10905 = vmatpush1.bf16.msra.mxu0 %v16166_v59  ;;  %11930 = vmatpush1.bf16.msra.mxu1 %v16169_v61  ;;  %v16261_v59 = vld [vmem:[%s17099_s2 + $0x27ec] ss:$16 sps:$4 sm:$0xff]   ;;  %v18630_v61 = vrot.slane %v18622_v56, %v17166_v49 }
 0x554   : > { %10906 = vmatprep.subr.bf16.mxu0 %v16174_v62  ;;  %11931 = vmatprep.subr.bf16.mxu1 %v16177_v0  ;;  %v16256_v62 = vld [vmem:[%s17099_s2 + $0x27e0] ss:$16 sps:$4 sm:$0xff]   ;;  %v16259_v0 = vld [vmem:[%s17099_s2 + $0x27e8] ss:$16 sps:$4 sm:$0xff]  }
 0x555   : > { %10936 = vmatprep.mubr.bf16.mxu0 %v2172_v1  ;;  %11961 = vmatprep.mubr.bf16.mxu1 %v2172_v1  ;;  %v16264_v1 = vld [vmem:[%s17099_s2 + $0x2804] ss:$16 sps:$4 sm:$0xff]  }
 0x557   : > { %10907 = vmatpush1.bf16.msra.mxu0 %v16172_v51  ;;  %11932 = vmatpush1.bf16.msra.mxu1 %v16175_v35  ;;  %v16267_v51 = vld [vmem:[%s17099_s2 + $0x280c] ss:$16 sps:$4 sm:$0xff]   ;;  %v2188_v35 = vcombine.high %v18630_v61, %v18630_v61 }
 0x558   : > { %10908 = vmatprep.subr.bf16.mxu0 %v16180_v2  ;;  %11933 = vmatprep.subr.bf16.mxu1 %v16183_v3  ;;  %v2170_v2 = vcombine.high %v18557_v46, %v18557_v46  ;;  %v16262_v3 = vld [vmem:[%s17099_s2 + $0x2800] ss:$16 sps:$4 sm:$0xff]  }
 0x559   : > { %v16268_v46 = vld [vmem:[%s17099_s2 + $0x2820] ss:$16 sps:$4 sm:$0xff]  }
 0x55b   : > { %10909 = vmatpush1.bf16.msra.mxu0 %v16178_v48  ;;  %11934 = vmatpush1.bf16.msra.mxu1 %v16181_v4  ;;  %v16265_v48 = vld [vmem:[%s17099_s2 + $0x2808] ss:$16 sps:$4 sm:$0xff]   ;;  %v16270_v4 = vld [vmem:[%s17099_s2 + $0x2824] ss:$16 sps:$4 sm:$0xff]  }
 0x55c   : > { %10910 = vmatprep.subr.bf16.mxu0 %v16186_v5  ;;  %11935 = vmatprep.subr.bf16.mxu1 %v16189_v6  ;;  %v16273_v5 = vld [vmem:[%s17099_s2 + $0x282c] ss:$16 sps:$4 sm:$0xff]   ;;  %v18645_v6 = vrot.slane %v2188_v35, %v17166_v49  ;;  %v16349_v35 = vld [vmem:[%s17099_s2 + $0x29c8] ss:$16 sps:$4 sm:$0xff]  }
 0x55f   : > { %10911 = vmatpush1.bf16.msra.mxu0 %v16184_v7  ;;  %11936 = vmatpush1.bf16.msra.mxu1 %v16187_v9  ;;  %v16271_v7 = vld [vmem:[%s17099_s2 + $0x2828] ss:$16 sps:$4 sm:$0xff]   ;;  %v16276_v9 = vld [vmem:[%s17099_s2 + $0x2844] ss:$16 sps:$4 sm:$0xff]  }
 0x560   : > { %10912 = vmatprep.subr.bf16.mxu0 %v16192_v11  ;;  %11937 = vmatprep.subr.bf16.mxu1 %v16195_v12  ;;  %v16279_v11 = vld [vmem:[%s17099_s2 + $0x284c] ss:$16 sps:$4 sm:$0xff]   ;;  %v16274_v12 = vld [vmem:[%s17099_s2 + $0x2840] ss:$16 sps:$4 sm:$0xff]  }
 0x563   : > { %10913 = vmatpush1.bf16.msra.mxu0 %v16190_v14  ;;  %11938 = vmatpush1.bf16.msra.mxu1 %v16193_v63  ;;  %v16277_v14 = vld [vmem:[%s17099_s2 + $0x2848] ss:$16 sps:$4 sm:$0xff]   ;;  %v16282_v63 = vld [vmem:[%s17099_s2 + $0x2864] ss:$16 sps:$4 sm:$0xff]  }
 0x564   : > { %10914 = vmatprep.subr.bf16.mxu0 %v16198_v16  ;;  %11939 = vmatprep.subr.bf16.mxu1 %v16201_v52  ;;  %v16285_v16 = vld [vmem:[%s17099_s2 + $0x286c] ss:$16 sps:$4 sm:$0xff]   ;;  %v16280_v52 = vld [vmem:[%s17099_s2 + $0x2860] ss:$16 sps:$4 sm:$0xff]  }
 0x567   : > { %10915 = vmatpush1.bf16.msra.mxu0 %v16196_v17  ;;  %11940 = vmatpush1.bf16.msra.mxu1 %v16199_v8  ;;  %v16283_v17 = vld [vmem:[%s17099_s2 + $0x2868] ss:$16 sps:$4 sm:$0xff]   ;;  %v16288_v8 = vld [vmem:[%s17099_s2 + $0x2884] ss:$16 sps:$4 sm:$0xff]  }
 0x568   : > { %10916 = vmatprep.subr.bf16.mxu0 %v16204_v18  ;;  %11941 = vmatprep.subr.bf16.mxu1 %v16207_v19  ;;  %v16291_v18 = vld [vmem:[%s17099_s2 + $0x288c] ss:$16 sps:$4 sm:$0xff]   ;;  %v16286_v19 = vld [vmem:[%s17099_s2 + $0x2880] ss:$16 sps:$4 sm:$0xff]  }
 0x56b   : > { %10917 = vmatpush1.bf16.msra.mxu0 %v16202_v13  ;;  %11942 = vmatpush1.bf16.msra.mxu1 %v16205_v23  ;;  %v16289_v13 = vld [vmem:[%s17099_s2 + $0x2888] ss:$16 sps:$4 sm:$0xff]   ;;  %v16294_v23 = vld [vmem:[%s17099_s2 + $0x28a4] ss:$16 sps:$4 sm:$0xff]  }
 0x56c   : > { %10918 = vmatprep.subr.bf16.mxu0 %v16210_v24  ;;  %11943 = vmatprep.subr.bf16.mxu1 %v16213_v60  ;;  %v16297_v24 = vld [vmem:[%s17099_s2 + $0x28ac] ss:$16 sps:$4 sm:$0xff]   ;;  %v16292_v60 = vld [vmem:[%s17099_s2 + $0x28a0] ss:$16 sps:$4 sm:$0xff]  }
 0x56f   : > { %10919 = vmatpush1.bf16.msra.mxu0 %v16208_v27  ;;  %11944 = vmatpush1.bf16.msra.mxu1 %v16211_v28  ;;  %v16295_v27 = vld [vmem:[%s17099_s2 + $0x28a8] ss:$16 sps:$4 sm:$0xff]   ;;  %v16300_v28 = vld [vmem:[%s17099_s2 + $0x28c4] ss:$16 sps:$4 sm:$0xff]  }
 0x570   : > { %10920 = vmatprep.subr.bf16.mxu0 %v16216_v10  ;;  %11945 = vmatprep.subr.bf16.mxu1 %v16219_v29  ;;  %v16303_v10 = vld [vmem:[%s17099_s2 + $0x28cc] ss:$16 sps:$4 sm:$0xff]   ;;  %v16298_v29 = vld [vmem:[%s17099_s2 + $0x28c0] ss:$16 sps:$4 sm:$0xff]  }
 0x573   : > { %10921 = vmatpush1.bf16.msra.mxu0 %v16214_v30  ;;  %11946 = vmatpush1.bf16.msra.mxu1 %v16217_v20  ;;  %v16301_v30 = vld [vmem:[%s17099_s2 + $0x28c8] ss:$16 sps:$4 sm:$0xff]   ;;  %v16306_v20 = vld [vmem:[%s17099_s2 + $0x28e4] ss:$16 sps:$4 sm:$0xff]  }
 0x574   : > { %10922 = vmatprep.subr.bf16.mxu0 %v16222_v31  ;;  %11947 = vmatprep.subr.bf16.mxu1 %v16225_v32  ;;  %v16309_v31 = vld [vmem:[%s17099_s2 + $0x28ec] ss:$16 sps:$4 sm:$0xff]   ;;  %v16304_v32 = vld [vmem:[%s17099_s2 + $0x28e0] ss:$16 sps:$4 sm:$0xff]  }
 0x577   : > { %10923 = vmatpush1.bf16.msra.mxu0 %v16220_v25  ;;  %11948 = vmatpush1.bf16.msra.mxu1 %v16223_v36  ;;  %v16307_v25 = vld [vmem:[%s17099_s2 + $0x28e8] ss:$16 sps:$4 sm:$0xff]   ;;  %v16312_v36 = vld [vmem:[%s17099_s2 + $0x2904] ss:$16 sps:$4 sm:$0xff]  }
 0x578   : > { %10924 = vmatprep.subr.bf16.mxu0 %v16228_v37  ;;  %11949 = vmatprep.subr.bf16.mxu1 %v16231_v39  ;;  %v16315_v37 = vld [vmem:[%s17099_s2 + $0x290c] ss:$16 sps:$4 sm:$0xff]   ;;  %v16310_v39 = vld [vmem:[%s17099_s2 + $0x2900] ss:$16 sps:$4 sm:$0xff]  }
 0x57b   : > { %10925 = vmatpush1.bf16.msra.mxu0 %v16226_v26  ;;  %11950 = vmatpush1.bf16.msra.mxu1 %v16229_v40  ;;  %v16313_v26 = vld [vmem:[%s17099_s2 + $0x2908] ss:$16 sps:$4 sm:$0xff]   ;;  %v16318_v40 = vld [vmem:[%s17099_s2 + $0x2924] ss:$16 sps:$4 sm:$0xff]  }
 0x57c   : > { %10926 = vmatprep.subr.bf16.mxu0 %v16234_v21  ;;  %11951 = vmatprep.subr.bf16.mxu1 %v16237_v41  ;;  %v16321_v21 = vld [vmem:[%s17099_s2 + $0x292c] ss:$16 sps:$4 sm:$0xff]   ;;  %v16316_v41 = vld [vmem:[%s17099_s2 + $0x2920] ss:$16 sps:$4 sm:$0xff]  }
 0x57f   : > { %10927 = vmatpush1.bf16.msra.mxu0 %v16232_v33  ;;  %11952 = vmatpush1.bf16.msra.mxu1 %v16235_v42  ;;  %v16319_v33 = vld [vmem:[%s17099_s2 + $0x2928] ss:$16 sps:$4 sm:$0xff]   ;;  %v16324_v42 = vld [vmem:[%s17099_s2 + $0x2944] ss:$16 sps:$4 sm:$0xff]  }
 0x580   : > { %10928 = vmatprep.subr.bf16.mxu0 %v16240_v44  ;;  %11953 = vmatprep.subr.bf16.mxu1 %v16243_v22  ;;  %v16327_v44 = vld [vmem:[%s17099_s2 + $0x294c] ss:$16 sps:$4 sm:$0xff]   ;;  %v16322_v22 = vld [vmem:[%s17099_s2 + $0x2940] ss:$16 sps:$4 sm:$0xff]  }
 0x583   : > { %10929 = vmatpush1.bf16.msra.mxu0 %v16238_v47  ;;  %11954 = vmatpush1.bf16.msra.mxu1 %v16241_v50  ;;  %v16325_v47 = vld [vmem:[%s17099_s2 + $0x2948] ss:$16 sps:$4 sm:$0xff]   ;;  %v16330_v50 = vld [vmem:[%s17099_s2 + $0x2964] ss:$16 sps:$4 sm:$0xff]  }
 0x584   : > { %10930 = vmatprep.subr.bf16.mxu0 %v16246_v15  ;;  %11955 = vmatprep.subr.bf16.mxu1 %v16249_v53  ;;  %v16333_v15 = vld [vmem:[%s17099_s2 + $0x296c] ss:$16 sps:$4 sm:$0xff]   ;;  %v16328_v53 = vld [vmem:[%s17099_s2 + $0x2960] ss:$16 sps:$4 sm:$0xff]  }
 0x587   : > { %10931 = vmatpush1.bf16.msra.mxu0 %v16244_v54  ;;  %11956 = vmatpush1.bf16.msra.mxu1 %v16247_v34  ;;  %v16331_v54 = vld [vmem:[%s17099_s2 + $0x2968] ss:$16 sps:$4 sm:$0xff]   ;;  %v16336_v34 = vld [vmem:[%s17099_s2 + $0x2984] ss:$16 sps:$4 sm:$0xff]  }
 0x588   : > { %10932 = vmatprep.subr.bf16.mxu0 %v16252_v55  ;;  %11957 = vmatprep.subr.bf16.mxu1 %v16255_v38  ;;  %v16339_v55 = vld [vmem:[%s17099_s2 + $0x298c] ss:$16 sps:$4 sm:$0xff]   ;;  %v16334_v38 = vld [vmem:[%s17099_s2 + $0x2980] ss:$16 sps:$4 sm:$0xff]  }
 0x58b   : > { %10933 = vmatpush1.bf16.msra.mxu0 %v16250_v45  ;;  %11958 = vmatpush1.bf16.msra.mxu1 %v16253_v57  ;;  %v16337_v45 = vld [vmem:[%s17099_s2 + $0x2988] ss:$16 sps:$4 sm:$0xff]   ;;  %v16342_v57 = vld [vmem:[%s17099_s2 + $0x29a4] ss:$16 sps:$4 sm:$0xff]  }
 0x58c   : > { %10934 = vmatprep.subr.bf16.mxu0 %v16258_v58  ;;  %11959 = vmatprep.subr.bf16.mxu1 %v16261_v59  ;;  %v16345_v58 = vld [vmem:[%s17099_s2 + $0x29ac] ss:$16 sps:$4 sm:$0xff]   ;;  %v16340_v59 = vld [vmem:[%s17099_s2 + $0x29a0] ss:$16 sps:$4 sm:$0xff]  }
 0x58f   : > { %10935 = vmatpush1.bf16.msra.mxu0 %v16256_v62  ;;  %11960 = vmatpush1.bf16.msra.mxu1 %v16259_v0  ;;  %v16343_v62 = vld [vmem:[%s17099_s2 + $0x29a8] ss:$16 sps:$4 sm:$0xff]   ;;  %v16348_v0 = vld [vmem:[%s17099_s2 + $0x29c4] ss:$16 sps:$4 sm:$0xff]  }
 0x590   : > { %10945 = vmatprep.subr.bf16.mxu0 %v16264_v1  ;;  %11970 = vmatprep.subr.bf16.mxu1 %v16267_v51  ;;  %v16351_v1 = vld [vmem:[%s17099_s2 + $0x29cc] ss:$16 sps:$4 sm:$0xff]   ;;  %v16346_v51 = vld [vmem:[%s17099_s2 + $0x29c0] ss:$16 sps:$4 sm:$0xff]  }
 0x592   : > { %10937 = vmatmul.mubr.bf16.vlgmr.msra.gmra.mrb[0].mxu0 %v2170_v2  ;;  %11962 = vmatmul.mubr.bf16.vlgmr.msra.gmra.mrb[0].mxu1 %v2170_v2  ;;  %v16354_v2 = vld [vmem:[%s17099_s2 + $0x29e4] ss:$16 sps:$4 sm:$0xff]  }
 0x593   : > { %10946 = vmatpush1.bf16.msra.mxu0 %v16262_v3  ;;  %11971 = vmatpush1.bf16.msra.mxu1 %v16265_v48  ;;  %v16357_v3 = vld [vmem:[%s17099_s2 + $0x29ec] ss:$16 sps:$4 sm:$0xff]   ;;  %v16352_v48 = vld [vmem:[%s17099_s2 + $0x29e0] ss:$16 sps:$4 sm:$0xff]  }
 0x594   : > { %10947 = vmatprep.subr.bf16.mxu0 %v16270_v4  ;;  %11972 = vmatprep.subr.bf16.mxu1 %v16273_v5  ;;  %v16355_v4 = vld [vmem:[%s17099_s2 + $0x29e8] ss:$16 sps:$4 sm:$0xff]   ;;  %v16360_v5 = vld [vmem:[%s17099_s2 + $0x2a04] ss:$16 sps:$4 sm:$0xff]  }
 0x595   : > { %10977 = vmatprep.mubr.bf16.mxu0 %v18645_v6  ;;  %12002 = vmatprep.mubr.bf16.mxu1 %v18645_v6 }
 0x597   : > { %10948 = vmatpush1.bf16.msra.mxu0 %v16268_v46  ;;  %11973 = vmatpush1.bf16.msra.mxu1 %v16271_v7  ;;  %v16363_v46 = vld [vmem:[%s17099_s2 + $0x2a0c] ss:$16 sps:$4 sm:$0xff]   ;;  %v18711_v7 = vrot.slane %v18630_v61, %v17166_v49  ;;  %v16364_v61 = vld [vmem:[%s17099_s2 + $0x2a20] ss:$16 sps:$4 sm:$0xff]  }
 0x598   : > { %10949 = vmatprep.subr.bf16.mxu0 %v16276_v9  ;;  %11974 = vmatprep.subr.bf16.mxu1 %v16279_v11  ;;  %v16358_v9 = vld [vmem:[%s17099_s2 + $0x2a00] ss:$16 sps:$4 sm:$0xff]   ;;  %v16361_v11 = vld [vmem:[%s17099_s2 + $0x2a08] ss:$16 sps:$4 sm:$0xff]  }
 0x59b   : > { %10950 = vmatpush1.bf16.msra.mxu0 %v16274_v12  ;;  %11975 = vmatpush1.bf16.msra.mxu1 %v16277_v14  ;;  %v16366_v12 = vld [vmem:[%s17099_s2 + $0x2a24] ss:$16 sps:$4 sm:$0xff]   ;;  %v16369_v14 = vld [vmem:[%s17099_s2 + $0x2a2c] ss:$16 sps:$4 sm:$0xff]  }
 0x59c   : > { %10951 = vmatprep.subr.bf16.mxu0 %v16282_v63  ;;  %11976 = vmatprep.subr.bf16.mxu1 %v16285_v16  ;;  %v2220_v63 = vcombine.high %v18645_v6, %v18645_v6  ;;  %v16367_v16 = vld [vmem:[%s17099_s2 + $0x2a28] ss:$16 sps:$4 sm:$0xff]   ;;  %v16370_v6 = vld [vmem:[%s17099_s2 + $0x2a40] ss:$16 sps:$4 sm:$0xff]  }
 0x59f   : > { %10952 = vmatpush1.bf16.msra.mxu0 %v16280_v52  ;;  %11977 = vmatpush1.bf16.msra.mxu1 %v16283_v17  ;;  %v16372_v52 = vld [vmem:[%s17099_s2 + $0x2a44] ss:$16 sps:$4 sm:$0xff]   ;;  %v16375_v17 = vld [vmem:[%s17099_s2 + $0x2a4c] ss:$16 sps:$4 sm:$0xff]  }
 0x5a0   : > { %10953 = vmatprep.subr.bf16.mxu0 %v16288_v8  ;;  %11978 = vmatprep.subr.bf16.mxu1 %v16291_v18  ;;  %v16373_v8 = vld [vmem:[%s17099_s2 + $0x2a48] ss:$16 sps:$4 sm:$0xff]   ;;  %v16378_v18 = vld [vmem:[%s17099_s2 + $0x2a64] ss:$16 sps:$4 sm:$0xff]  }
 0x5a3   : > { %10954 = vmatpush1.bf16.msra.mxu0 %v16286_v19  ;;  %11979 = vmatpush1.bf16.msra.mxu1 %v16289_v13  ;;  %v16381_v19 = vld [vmem:[%s17099_s2 + $0x2a6c] ss:$16 sps:$4 sm:$0xff]   ;;  %v16376_v13 = vld [vmem:[%s17099_s2 + $0x2a60] ss:$16 sps:$4 sm:$0xff]  }
 0x5a4   : > { %10955 = vmatprep.subr.bf16.mxu0 %v16294_v23  ;;  %11980 = vmatprep.subr.bf16.mxu1 %v16297_v24  ;;  %v16379_v23 = vld [vmem:[%s17099_s2 + $0x2a68] ss:$16 sps:$4 sm:$0xff]   ;;  %v16384_v24 = vld [vmem:[%s17099_s2 + $0x2a84] ss:$16 sps:$4 sm:$0xff]  }
 0x5a7   : > { %10956 = vmatpush1.bf16.msra.mxu0 %v16292_v60  ;;  %11981 = vmatpush1.bf16.msra.mxu1 %v16295_v27  ;;  %v16387_v60 = vld [vmem:[%s17099_s2 + $0x2a8c] ss:$16 sps:$4 sm:$0xff]   ;;  %v16382_v27 = vld [vmem:[%s17099_s2 + $0x2a80] ss:$16 sps:$4 sm:$0xff]  }
 0x5a8   : > { %10957 = vmatprep.subr.bf16.mxu0 %v16300_v28  ;;  %11982 = vmatprep.subr.bf16.mxu1 %v16303_v10  ;;  %v16385_v28 = vld [vmem:[%s17099_s2 + $0x2a88] ss:$16 sps:$4 sm:$0xff]   ;;  %v16390_v10 = vld [vmem:[%s17099_s2 + $0x2aa4] ss:$16 sps:$4 sm:$0xff]  }
 0x5ab   : > { %10958 = vmatpush1.bf16.msra.mxu0 %v16298_v29  ;;  %11983 = vmatpush1.bf16.msra.mxu1 %v16301_v30  ;;  %v16393_v29 = vld [vmem:[%s17099_s2 + $0x2aac] ss:$16 sps:$4 sm:$0xff]   ;;  %v16388_v30 = vld [vmem:[%s17099_s2 + $0x2aa0] ss:$16 sps:$4 sm:$0xff]  }
 0x5ac   : > { %10959 = vmatprep.subr.bf16.mxu0 %v16306_v20  ;;  %11984 = vmatprep.subr.bf16.mxu1 %v16309_v31  ;;  %v16391_v20 = vld [vmem:[%s17099_s2 + $0x2aa8] ss:$16 sps:$4 sm:$0xff]   ;;  %v16396_v31 = vld [vmem:[%s17099_s2 + $0x2ac4] ss:$16 sps:$4 sm:$0xff]  }
 0x5af   : > { %10960 = vmatpush1.bf16.msra.mxu0 %v16304_v32  ;;  %11985 = vmatpush1.bf16.msra.mxu1 %v16307_v25  ;;  %v16399_v32 = vld [vmem:[%s17099_s2 + $0x2acc] ss:$16 sps:$4 sm:$0xff]   ;;  %v16394_v25 = vld [vmem:[%s17099_s2 + $0x2ac0] ss:$16 sps:$4 sm:$0xff]  }
 0x5b0   : > { %10961 = vmatprep.subr.bf16.mxu0 %v16312_v36  ;;  %11986 = vmatprep.subr.bf16.mxu1 %v16315_v37  ;;  %v16397_v36 = vld [vmem:[%s17099_s2 + $0x2ac8] ss:$16 sps:$4 sm:$0xff]   ;;  %v16402_v37 = vld [vmem:[%s17099_s2 + $0x2ae4] ss:$16 sps:$4 sm:$0xff]  }
 0x5b3   : > { %10962 = vmatpush1.bf16.msra.mxu0 %v16310_v39  ;;  %11987 = vmatpush1.bf16.msra.mxu1 %v16313_v26  ;;  %v16405_v39 = vld [vmem:[%s17099_s2 + $0x2aec] ss:$16 sps:$4 sm:$0xff]   ;;  %v16400_v26 = vld [vmem:[%s17099_s2 + $0x2ae0] ss:$16 sps:$4 sm:$0xff]  }
 0x5b4   : > { %10963 = vmatprep.subr.bf16.mxu0 %v16318_v40  ;;  %11988 = vmatprep.subr.bf16.mxu1 %v16321_v21  ;;  %v16403_v40 = vld [vmem:[%s17099_s2 + $0x2ae8] ss:$16 sps:$4 sm:$0xff]   ;;  %v16408_v21 = vld [vmem:[%s17099_s2 + $0x2b04] ss:$16 sps:$4 sm:$0xff]  }
 0x5b7   : > { %10964 = vmatpush1.bf16.msra.mxu0 %v16316_v41  ;;  %11989 = vmatpush1.bf16.msra.mxu1 %v16319_v33  ;;  %v16411_v41 = vld [vmem:[%s17099_s2 + $0x2b0c] ss:$16 sps:$4 sm:$0xff]   ;;  %v16406_v33 = vld [vmem:[%s17099_s2 + $0x2b00] ss:$16 sps:$4 sm:$0xff]  }
 0x5b8   : > { %10965 = vmatprep.subr.bf16.mxu0 %v16324_v42  ;;  %11990 = vmatprep.subr.bf16.mxu1 %v16327_v44  ;;  %v16409_v42 = vld [vmem:[%s17099_s2 + $0x2b08] ss:$16 sps:$4 sm:$0xff]   ;;  %v16414_v44 = vld [vmem:[%s17099_s2 + $0x2b24] ss:$16 sps:$4 sm:$0xff]  }
 0x5bb   : > { %10966 = vmatpush1.bf16.msra.mxu0 %v16322_v22  ;;  %11991 = vmatpush1.bf16.msra.mxu1 %v16325_v47  ;;  %v16417_v22 = vld [vmem:[%s17099_s2 + $0x2b2c] ss:$16 sps:$4 sm:$0xff]   ;;  %v16412_v47 = vld [vmem:[%s17099_s2 + $0x2b20] ss:$16 sps:$4 sm:$0xff]  }
 0x5bc   : > { %10967 = vmatprep.subr.bf16.mxu0 %v16330_v50  ;;  %11992 = vmatprep.subr.bf16.mxu1 %v16333_v15  ;;  %v16415_v50 = vld [vmem:[%s17099_s2 + $0x2b28] ss:$16 sps:$4 sm:$0xff]   ;;  %v16420_v15 = vld [vmem:[%s17099_s2 + $0x2b44] ss:$16 sps:$4 sm:$0xff]  }
 0x5bf   : > { %10968 = vmatpush1.bf16.msra.mxu0 %v16328_v53  ;;  %11993 = vmatpush1.bf16.msra.mxu1 %v16331_v54  ;;  %v16423_v53 = vld [vmem:[%s17099_s2 + $0x2b4c] ss:$16 sps:$4 sm:$0xff]   ;;  %v16418_v54 = vld [vmem:[%s17099_s2 + $0x2b40] ss:$16 sps:$4 sm:$0xff]  }
 0x5c0   : > { %10969 = vmatprep.subr.bf16.mxu0 %v16336_v34  ;;  %11994 = vmatprep.subr.bf16.mxu1 %v16339_v55  ;;  %v16421_v34 = vld [vmem:[%s17099_s2 + $0x2b48] ss:$16 sps:$4 sm:$0xff]   ;;  %v16426_v55 = vld [vmem:[%s17099_s2 + $0x2b64] ss:$16 sps:$4 sm:$0xff]  }
 0x5c3   : > { %10970 = vmatpush1.bf16.msra.mxu0 %v16334_v38  ;;  %11995 = vmatpush1.bf16.msra.mxu1 %v16337_v45  ;;  %v16429_v38 = vld [vmem:[%s17099_s2 + $0x2b6c] ss:$16 sps:$4 sm:$0xff]   ;;  %v16424_v45 = vld [vmem:[%s17099_s2 + $0x2b60] ss:$16 sps:$4 sm:$0xff]  }
 0x5c4   : > { %10971 = vmatprep.subr.bf16.mxu0 %v16342_v57  ;;  %11996 = vmatprep.subr.bf16.mxu1 %v16345_v58  ;;  %v16427_v57 = vld [vmem:[%s17099_s2 + $0x2b68] ss:$16 sps:$4 sm:$0xff]   ;;  %v16432_v58 = vld [vmem:[%s17099_s2 + $0x2b84] ss:$16 sps:$4 sm:$0xff]  }
 0x5c7   : > { %10972 = vmatpush1.bf16.msra.mxu0 %v16340_v59  ;;  %11997 = vmatpush1.bf16.msra.mxu1 %v16343_v62  ;;  %v16435_v59 = vld [vmem:[%s17099_s2 + $0x2b8c] ss:$16 sps:$4 sm:$0xff]   ;;  %v16430_v62 = vld [vmem:[%s17099_s2 + $0x2b80] ss:$16 sps:$4 sm:$0xff]  }
 0x5c8   : > { %10973 = vmatprep.subr.bf16.mxu0 %v16348_v0  ;;  %11998 = vmatprep.subr.bf16.mxu1 %v16351_v1  ;;  %v16433_v0 = vld [vmem:[%s17099_s2 + $0x2b88] ss:$16 sps:$4 sm:$0xff]   ;;  %v16438_v1 = vld [vmem:[%s17099_s2 + $0x2ba4] ss:$16 sps:$4 sm:$0xff]  }
 0x5cb   : > { %10974 = vmatpush1.bf16.msra.mxu0 %v16346_v51  ;;  %11999 = vmatpush1.bf16.msra.mxu1 %v16349_v35  ;;  %v16441_v51 = vld [vmem:[%s17099_s2 + $0x2bac] ss:$16 sps:$4 sm:$0xff]   ;;  %v16436_v35 = vld [vmem:[%s17099_s2 + $0x2ba0] ss:$16 sps:$4 sm:$0xff]  }
 0x5cc   : > { %10975 = vmatprep.subr.bf16.mxu0 %v16354_v2  ;;  %12000 = vmatprep.subr.bf16.mxu1 %v16357_v3  ;;  %v16439_v2 = vld [vmem:[%s17099_s2 + $0x2ba8] ss:$16 sps:$4 sm:$0xff]   ;;  %v16444_v3 = vld [vmem:[%s17099_s2 + $0x2bc4] ss:$16 sps:$4 sm:$0xff]  }
 0x5cf   : > { %10976 = vmatpush1.bf16.msra.mxu0 %v16352_v48  ;;  %12001 = vmatpush1.bf16.msra.mxu1 %v16355_v4  ;;  %v16447_v48 = vld [vmem:[%s17099_s2 + $0x2bcc] ss:$16 sps:$4 sm:$0xff]   ;;  %v2173_v4 = vcombine.high %v18622_v56, %v18622_v56  ;;  %v16448_v56 = vld [vmem:[%s17099_s2 + $0x2be0] ss:$16 sps:$4 sm:$0xff]  }
 0x5d0   : > { %10986 = vmatprep.subr.bf16.mxu0 %v16360_v5  ;;  %12011 = vmatprep.subr.bf16.mxu1 %v16363_v46  ;;  %v16442_v5 = vld [vmem:[%s17099_s2 + $0x2bc0] ss:$16 sps:$4 sm:$0xff]   ;;  %v16445_v46 = vld [vmem:[%s17099_s2 + $0x2bc8] ss:$16 sps:$4 sm:$0xff]  }
 0x5d2   : > { %10978 = vmatmul.mubr.bf16.vlgmr.msra.gmra.mrb[0].mxu0 %v18711_v7  ;;  %12003 = vmatmul.mubr.bf16.vlgmr.msra.gmra.mrb[0].mxu1 %v18711_v7 }
 0x5d3   : > { %10987 = vmatpush1.bf16.msra.mxu0 %v16358_v9  ;;  %12012 = vmatpush1.bf16.msra.mxu1 %v16361_v11  ;;  %v16450_v9 = vld [vmem:[%s17099_s2 + $0x2be4] ss:$16 sps:$4 sm:$0xff]   ;;  %v16453_v11 = vld [vmem:[%s17099_s2 + $0x2bec] ss:$16 sps:$4 sm:$0xff]  }
 0x5d4   : > { %10988 = vmatprep.subr.bf16.mxu0 %v16366_v12  ;;  %12013 = vmatprep.subr.bf16.mxu1 %v16369_v14  ;;  %v18780_v12 = vrot.slane %v2173_v4, %v17166_v49  ;;  %v16451_v14 = vld [vmem:[%s17099_s2 + $0x2be8] ss:$16 sps:$4 sm:$0xff]  }
 0x5d5   : > { %11018 = vmatprep.mubr.bf16.mxu0 %v2220_v63  ;;  %12043 = vmatprep.mubr.bf16.mxu1 %v2220_v63  ;;  %v16456_v63 = vld [vmem:[%s17099_s2 + $0x2c04] ss:$16 sps:$4 sm:$0xff]   ;;  %v16529_v4 = vld [vmem:[%s17099_s2 + $0x2d88] ss:$16 sps:$4 sm:$0xff]  }
 0x5d7   : > { %10989 = vmatpush1.bf16.msra.mxu0 %v16364_v61  ;;  %12014 = vmatpush1.bf16.msra.mxu1 %v16367_v16  ;;  %v16459_v61 = vld [vmem:[%s17099_s2 + $0x2c0c] ss:$16 sps:$4 sm:$0xff]   ;;  %v2189_v16 = vcombine.high %v18780_v12, %v18780_v12 }
 0x5d8   : > { %10990 = vmatprep.subr.bf16.mxu0 %v16372_v52  ;;  %12015 = vmatprep.subr.bf16.mxu1 %v16375_v17  ;;  %v2218_v52 = vcombine.high %v18711_v7, %v18711_v7  ;;  %v16454_v17 = vld [vmem:[%s17099_s2 + $0x2c00] ss:$16 sps:$4 sm:$0xff]  }
 0x5d9   : > { %v16460_v7 = vld [vmem:[%s17099_s2 + $0x2c20] ss:$16 sps:$4 sm:$0xff]  }
 0x5db   : > { %10991 = vmatpush1.bf16.msra.mxu0 %v16370_v6  ;;  %12016 = vmatpush1.bf16.msra.mxu1 %v16373_v8  ;;  %v16457_v6 = vld [vmem:[%s17099_s2 + $0x2c08] ss:$16 sps:$4 sm:$0xff]   ;;  %v16462_v8 = vld [vmem:[%s17099_s2 + $0x2c24] ss:$16 sps:$4 sm:$0xff]  }
 0x5dc   : > { %10992 = vmatprep.subr.bf16.mxu0 %v16378_v18  ;;  %12017 = vmatprep.subr.bf16.mxu1 %v16381_v19  ;;  %v16465_v18 = vld [vmem:[%s17099_s2 + $0x2c2c] ss:$16 sps:$4 sm:$0xff]   ;;  %v18795_v19 = vrot.slane %v2189_v16, %v17166_v49  ;;  %v16546_v16 = vld [vmem:[%s17099_s2 + $0x2de4] ss:$16 sps:$4 sm:$0xff]  }
 0x5df   : > { %10993 = vmatpush1.bf16.msra.mxu0 %v16376_v13  ;;  %12018 = vmatpush1.bf16.msra.mxu1 %v16379_v23  ;;  %v16463_v13 = vld [vmem:[%s17099_s2 + $0x2c28] ss:$16 sps:$4 sm:$0xff]   ;;  %v16468_v23 = vld [vmem:[%s17099_s2 + $0x2c44] ss:$16 sps:$4 sm:$0xff]  }
 0x5e0   : > { %10994 = vmatprep.subr.bf16.mxu0 %v16384_v24  ;;  %12019 = vmatprep.subr.bf16.mxu1 %v16387_v60  ;;  %v16471_v24 = vld [vmem:[%s17099_s2 + $0x2c4c] ss:$16 sps:$4 sm:$0xff]   ;;  %v16466_v60 = vld [vmem:[%s17099_s2 + $0x2c40] ss:$16 sps:$4 sm:$0xff]  }
 0x5e3   : > { %10995 = vmatpush1.bf16.msra.mxu0 %v16382_v27  ;;  %12020 = vmatpush1.bf16.msra.mxu1 %v16385_v28  ;;  %v16469_v27 = vld [vmem:[%s17099_s2 + $0x2c48] ss:$16 sps:$4 sm:$0xff]   ;;  %v16474_v28 = vld [vmem:[%s17099_s2 + $0x2c64] ss:$16 sps:$4 sm:$0xff]  }
 0x5e4   : > { %10996 = vmatprep.subr.bf16.mxu0 %v16390_v10  ;;  %12021 = vmatprep.subr.bf16.mxu1 %v16393_v29  ;;  %v16477_v10 = vld [vmem:[%s17099_s2 + $0x2c6c] ss:$16 sps:$4 sm:$0xff]   ;;  %v16472_v29 = vld [vmem:[%s17099_s2 + $0x2c60] ss:$16 sps:$4 sm:$0xff]  }
 0x5e7   : > { %10997 = vmatpush1.bf16.msra.mxu0 %v16388_v30  ;;  %12022 = vmatpush1.bf16.msra.mxu1 %v16391_v20  ;;  %v16475_v30 = vld [vmem:[%s17099_s2 + $0x2c68] ss:$16 sps:$4 sm:$0xff]   ;;  %v16480_v20 = vld [vmem:[%s17099_s2 + $0x2c84] ss:$16 sps:$4 sm:$0xff]  }
 0x5e8   : > { %10998 = vmatprep.subr.bf16.mxu0 %v16396_v31  ;;  %12023 = vmatprep.subr.bf16.mxu1 %v16399_v32  ;;  %v16483_v31 = vld [vmem:[%s17099_s2 + $0x2c8c] ss:$16 sps:$4 sm:$0xff]   ;;  %v16478_v32 = vld [vmem:[%s17099_s2 + $0x2c80] ss:$16 sps:$4 sm:$0xff]  }
 0x5eb   : > { %10999 = vmatpush1.bf16.msra.mxu0 %v16394_v25  ;;  %12024 = vmatpush1.bf16.msra.mxu1 %v16397_v36  ;;  %v16481_v25 = vld [vmem:[%s17099_s2 + $0x2c88] ss:$16 sps:$4 sm:$0xff]   ;;  %v16486_v36 = vld [vmem:[%s17099_s2 + $0x2ca4] ss:$16 sps:$4 sm:$0xff]  }
 0x5ec   : > { %11000 = vmatprep.subr.bf16.mxu0 %v16402_v37  ;;  %12025 = vmatprep.subr.bf16.mxu1 %v16405_v39  ;;  %v16489_v37 = vld [vmem:[%s17099_s2 + $0x2cac] ss:$16 sps:$4 sm:$0xff]   ;;  %v16484_v39 = vld [vmem:[%s17099_s2 + $0x2ca0] ss:$16 sps:$4 sm:$0xff]  }
 0x5ef   : > { %11001 = vmatpush1.bf16.msra.mxu0 %v16400_v26  ;;  %12026 = vmatpush1.bf16.msra.mxu1 %v16403_v40  ;;  %v16487_v26 = vld [vmem:[%s17099_s2 + $0x2ca8] ss:$16 sps:$4 sm:$0xff]   ;;  %v16492_v40 = vld [vmem:[%s17099_s2 + $0x2cc4] ss:$16 sps:$4 sm:$0xff]  }
 0x5f0   : > { %11002 = vmatprep.subr.bf16.mxu0 %v16408_v21  ;;  %12027 = vmatprep.subr.bf16.mxu1 %v16411_v41  ;;  %v16495_v21 = vld [vmem:[%s17099_s2 + $0x2ccc] ss:$16 sps:$4 sm:$0xff]   ;;  %v16490_v41 = vld [vmem:[%s17099_s2 + $0x2cc0] ss:$16 sps:$4 sm:$0xff]  }
 0x5f3   : > { %11003 = vmatpush1.bf16.msra.mxu0 %v16406_v33  ;;  %12028 = vmatpush1.bf16.msra.mxu1 %v16409_v42  ;;  %v16493_v33 = vld [vmem:[%s17099_s2 + $0x2cc8] ss:$16 sps:$4 sm:$0xff]   ;;  %v16498_v42 = vld [vmem:[%s17099_s2 + $0x2ce4] ss:$16 sps:$4 sm:$0xff]  }
 0x5f4   : > { %11004 = vmatprep.subr.bf16.mxu0 %v16414_v44  ;;  %12029 = vmatprep.subr.bf16.mxu1 %v16417_v22  ;;  %v16501_v44 = vld [vmem:[%s17099_s2 + $0x2cec] ss:$16 sps:$4 sm:$0xff]   ;;  %v16496_v22 = vld [vmem:[%s17099_s2 + $0x2ce0] ss:$16 sps:$4 sm:$0xff]  }
 0x5f7   : > { %11005 = vmatpush1.bf16.msra.mxu0 %v16412_v47  ;;  %12030 = vmatpush1.bf16.msra.mxu1 %v16415_v50  ;;  %v16499_v47 = vld [vmem:[%s17099_s2 + $0x2ce8] ss:$16 sps:$4 sm:$0xff]   ;;  %v16504_v50 = vld [vmem:[%s17099_s2 + $0x2d04] ss:$16 sps:$4 sm:$0xff]  }
 0x5f8   : > { %11006 = vmatprep.subr.bf16.mxu0 %v16420_v15  ;;  %12031 = vmatprep.subr.bf16.mxu1 %v16423_v53  ;;  %v16507_v15 = vld [vmem:[%s17099_s2 + $0x2d0c] ss:$16 sps:$4 sm:$0xff]   ;;  %v16502_v53 = vld [vmem:[%s17099_s2 + $0x2d00] ss:$16 sps:$4 sm:$0xff]  }
 0x5fb   : > { %11007 = vmatpush1.bf16.msra.mxu0 %v16418_v54  ;;  %12032 = vmatpush1.bf16.msra.mxu1 %v16421_v34  ;;  %v16505_v54 = vld [vmem:[%s17099_s2 + $0x2d08] ss:$16 sps:$4 sm:$0xff]   ;;  %v16510_v34 = vld [vmem:[%s17099_s2 + $0x2d24] ss:$16 sps:$4 sm:$0xff]  }
 0x5fc   : > { %11008 = vmatprep.subr.bf16.mxu0 %v16426_v55  ;;  %12033 = vmatprep.subr.bf16.mxu1 %v16429_v38  ;;  %v16513_v55 = vld [vmem:[%s17099_s2 + $0x2d2c] ss:$16 sps:$4 sm:$0xff]   ;;  %v16508_v38 = vld [vmem:[%s17099_s2 + $0x2d20] ss:$16 sps:$4 sm:$0xff]  }
 0x5ff   : > { %11009 = vmatpush1.bf16.msra.mxu0 %v16424_v45  ;;  %12034 = vmatpush1.bf16.msra.mxu1 %v16427_v57  ;;  %v16511_v45 = vld [vmem:[%s17099_s2 + $0x2d28] ss:$16 sps:$4 sm:$0xff]   ;;  %v16516_v57 = vld [vmem:[%s17099_s2 + $0x2d44] ss:$16 sps:$4 sm:$0xff]  }
 0x600   : > { %11010 = vmatprep.subr.bf16.mxu0 %v16432_v58  ;;  %12035 = vmatprep.subr.bf16.mxu1 %v16435_v59  ;;  %v16519_v58 = vld [vmem:[%s17099_s2 + $0x2d4c] ss:$16 sps:$4 sm:$0xff]   ;;  %v16514_v59 = vld [vmem:[%s17099_s2 + $0x2d40] ss:$16 sps:$4 sm:$0xff]  }
 0x603   : > { %11011 = vmatpush1.bf16.msra.mxu0 %v16430_v62  ;;  %12036 = vmatpush1.bf16.msra.mxu1 %v16433_v0  ;;  %v16517_v62 = vld [vmem:[%s17099_s2 + $0x2d48] ss:$16 sps:$4 sm:$0xff]   ;;  %v16522_v0 = vld [vmem:[%s17099_s2 + $0x2d64] ss:$16 sps:$4 sm:$0xff]  }
 0x604   : > { %11012 = vmatprep.subr.bf16.mxu0 %v16438_v1  ;;  %12037 = vmatprep.subr.bf16.mxu1 %v16441_v51  ;;  %v16525_v1 = vld [vmem:[%s17099_s2 + $0x2d6c] ss:$16 sps:$4 sm:$0xff]   ;;  %v16520_v51 = vld [vmem:[%s17099_s2 + $0x2d60] ss:$16 sps:$4 sm:$0xff]  }
 0x607   : > { %11013 = vmatpush1.bf16.msra.mxu0 %v16436_v35  ;;  %12038 = vmatpush1.bf16.msra.mxu1 %v16439_v2  ;;  %v16523_v35 = vld [vmem:[%s17099_s2 + $0x2d68] ss:$16 sps:$4 sm:$0xff]   ;;  %v16528_v2 = vld [vmem:[%s17099_s2 + $0x2d84] ss:$16 sps:$4 sm:$0xff]  }
 0x608   : > { %11014 = vmatprep.subr.bf16.mxu0 %v16444_v3  ;;  %12039 = vmatprep.subr.bf16.mxu1 %v16447_v48  ;;  %v16531_v3 = vld [vmem:[%s17099_s2 + $0x2d8c] ss:$16 sps:$4 sm:$0xff]   ;;  %v16526_v48 = vld [vmem:[%s17099_s2 + $0x2d80] ss:$16 sps:$4 sm:$0xff]  }
 0x60b   : > { %11015 = vmatpush1.bf16.msra.mxu0 %v16442_v5  ;;  %12040 = vmatpush1.bf16.msra.mxu1 %v16445_v46  ;;  %v16534_v5 = vld [vmem:[%s17099_s2 + $0x2da4] ss:$16 sps:$4 sm:$0xff]   ;;  %v16537_v46 = vld [vmem:[%s17099_s2 + $0x2dac] ss:$16 sps:$4 sm:$0xff]  }
 0x60c   : > { %11016 = vmatprep.subr.bf16.mxu0 %v16450_v9  ;;  %12041 = vmatprep.subr.bf16.mxu1 %v16453_v11  ;;  %v16532_v9 = vld [vmem:[%s17099_s2 + $0x2da0] ss:$16 sps:$4 sm:$0xff]   ;;  %v16535_v11 = vld [vmem:[%s17099_s2 + $0x2da8] ss:$16 sps:$4 sm:$0xff]  }
 0x60f   : > { %11017 = vmatpush1.bf16.msra.mxu0 %v16448_v56  ;;  %12042 = vmatpush1.bf16.msra.mxu1 %v16451_v14  ;;  %v16540_v56 = vld [vmem:[%s17099_s2 + $0x2dc4] ss:$16 sps:$4 sm:$0xff]   ;;  %v16543_v14 = vld [vmem:[%s17099_s2 + $0x2dcc] ss:$16 sps:$4 sm:$0xff]  }
 0x610   : > { %11027 = vmatprep.subr.bf16.mxu0 %v16456_v63  ;;  %12052 = vmatprep.subr.bf16.mxu1 %v16459_v61  ;;  %v16538_v63 = vld [vmem:[%s17099_s2 + $0x2dc0] ss:$16 sps:$4 sm:$0xff]   ;;  %v16541_v61 = vld [vmem:[%s17099_s2 + $0x2dc8] ss:$16 sps:$4 sm:$0xff]  }
 0x612   : > { %11019 = vmatmul.mubr.bf16.vlgmr.msra.gmra.mrb[0].mxu0 %v2218_v52  ;;  %12044 = vmatmul.mubr.bf16.vlgmr.msra.gmra.mrb[0].mxu1 %v2218_v52  ;;  %v16549_v52 = vld [vmem:[%s17099_s2 + $0x2dec] ss:$16 sps:$4 sm:$0xff]  }
 0x613   : > { %11028 = vmatpush1.bf16.msra.mxu0 %v16454_v17  ;;  %12053 = vmatpush1.bf16.msra.mxu1 %v16457_v6  ;;  %v16544_v17 = vld [vmem:[%s17099_s2 + $0x2de0] ss:$16 sps:$4 sm:$0xff]   ;;  %v16547_v6 = vld [vmem:[%s17099_s2 + $0x2de8] ss:$16 sps:$4 sm:$0xff]  }
 0x614   : > { %11029 = vmatprep.subr.bf16.mxu0 %v16462_v8  ;;  %12054 = vmatprep.subr.bf16.mxu1 %v16465_v18  ;;  %v16553_v8 = vld [vmem:[%s17099_s2 + $0x2e04] ss:$16 sps:$4 sm:$0xff]   ;;  %v16556_v18 = vld [vmem:[%s17099_s2 + $0x2e0c] ss:$16 sps:$4 sm:$0xff]  }
 0x615   : > { %11059 = vmatprep.mubr.bf16.mxu0 %v18795_v19  ;;  %12084 = vmatprep.mubr.bf16.mxu1 %v18795_v19 }
 0x617   : > { %11030 = vmatpush1.bf16.msra.mxu0 %v16460_v7  ;;  %12055 = vmatpush1.bf16.msra.mxu1 %v16463_v13  ;;  %v18861_v7 = vrot.slane %v18780_v12, %v17166_v49  ;;  %v16551_v13 = vld [vmem:[%s17099_s2 + $0x2e00] ss:$16 sps:$4 sm:$0xff]  }
 0x618   : > { %11031 = vmatprep.subr.bf16.mxu0 %v16468_v23  ;;  %12056 = vmatprep.subr.bf16.mxu1 %v16471_v24  ;;  %v16554_v23 = vld [vmem:[%s17099_s2 + $0x2e08] ss:$16 sps:$4 sm:$0xff]   ;;  %v16559_v24 = vld [vmem:[%s17099_s2 + $0x2e24] ss:$16 sps:$4 sm:$0xff]   ;;  %v16557_v12 = vld [vmem:[%s17099_s2 + $0x2e20] ss:$16 sps:$4 sm:$0xff]  }
 0x61b   : > { %11032 = vmatpush1.bf16.msra.mxu0 %v16466_v60  ;;  %12057 = vmatpush1.bf16.msra.mxu1 %v16469_v27  ;;  %v16562_v60 = vld [vmem:[%s17099_s2 + $0x2e2c] ss:$16 sps:$4 sm:$0xff]   ;;  %v2221_v27 = vcombine.high %v18795_v19, %v18795_v19  ;;  %v16563_v19 = vld [vmem:[%s17099_s2 + $0x2e40] ss:$16 sps:$4 sm:$0xff]  }
 0x61c   : > { %11033 = vmatprep.subr.bf16.mxu0 %v16474_v28  ;;  %12058 = vmatprep.subr.bf16.mxu1 %v16477_v10  ;;  %v16560_v28 = vld [vmem:[%s17099_s2 + $0x2e28] ss:$16 sps:$4 sm:$0xff]   ;;  %v16565_v10 = vld [vmem:[%s17099_s2 + $0x2e44] ss:$16 sps:$4 sm:$0xff]  }
 0x61f   : > { %11034 = vmatpush1.bf16.msra.mxu0 %v16472_v29  ;;  %12059 = vmatpush1.bf16.msra.mxu1 %v16475_v30  ;;  %v16568_v29 = vld [vmem:[%s17099_s2 + $0x2e4c] ss:$16 sps:$4 sm:$0xff]   ;;  %v16566_v30 = vld [vmem:[%s17099_s2 + $0x2e48] ss:$16 sps:$4 sm:$0xff]  }
 0x620   : > { %11035 = vmatprep.subr.bf16.mxu0 %v16480_v20  ;;  %12060 = vmatprep.subr.bf16.mxu1 %v16483_v31  ;;  %v16571_v20 = vld [vmem:[%s17099_s2 + $0x2e64] ss:$16 sps:$4 sm:$0xff]   ;;  %v16574_v31 = vld [vmem:[%s17099_s2 + $0x2e6c] ss:$16 sps:$4 sm:$0xff]  }
 0x623   : > { %11036 = vmatpush1.bf16.msra.mxu0 %v16478_v32  ;;  %12061 = vmatpush1.bf16.msra.mxu1 %v16481_v25  ;;  %v16569_v32 = vld [vmem:[%s17099_s2 + $0x2e60] ss:$16 sps:$4 sm:$0xff]   ;;  %v16572_v25 = vld [vmem:[%s17099_s2 + $0x2e68] ss:$16 sps:$4 sm:$0xff]  }
 0x624   : > { %11037 = vmatprep.subr.bf16.mxu0 %v16486_v36  ;;  %12062 = vmatprep.subr.bf16.mxu1 %v16489_v37  ;;  %v16577_v36 = vld [vmem:[%s17099_s2 + $0x2e84] ss:$16 sps:$4 sm:$0xff]   ;;  %v16580_v37 = vld [vmem:[%s17099_s2 + $0x2e8c] ss:$16 sps:$4 sm:$0xff]  }
 0x627   : > { %11038 = vmatpush1.bf16.msra.mxu0 %v16484_v39  ;;  %12063 = vmatpush1.bf16.msra.mxu1 %v16487_v26  ;;  %v16575_v39 = vld [vmem:[%s17099_s2 + $0x2e80] ss:$16 sps:$4 sm:$0xff]   ;;  %v16578_v26 = vld [vmem:[%s17099_s2 + $0x2e88] ss:$16 sps:$4 sm:$0xff]  }
 0x628   : > { %11039 = vmatprep.subr.bf16.mxu0 %v16492_v40  ;;  %12064 = vmatprep.subr.bf16.mxu1 %v16495_v21  ;;  %v16583_v40 = vld [vmem:[%s17099_s2 + $0x2ea4] ss:$16 sps:$4 sm:$0xff]   ;;  %v16586_v21 = vld [vmem:[%s17099_s2 + $0x2eac] ss:$16 sps:$4 sm:$0xff]  }
 0x62b   : > { %11040 = vmatpush1.bf16.msra.mxu0 %v16490_v41  ;;  %12065 = vmatpush1.bf16.msra.mxu1 %v16493_v33  ;;  %v16581_v41 = vld [vmem:[%s17099_s2 + $0x2ea0] ss:$16 sps:$4 sm:$0xff]   ;;  %v16584_v33 = vld [vmem:[%s17099_s2 + $0x2ea8] ss:$16 sps:$4 sm:$0xff]  }
 0x62c   : > { %11041 = vmatprep.subr.bf16.mxu0 %v16498_v42  ;;  %12066 = vmatprep.subr.bf16.mxu1 %v16501_v44  ;;  %v16589_v42 = vld [vmem:[%s17099_s2 + $0x2ec4] ss:$16 sps:$4 sm:$0xff]   ;;  %v16592_v44 = vld [vmem:[%s17099_s2 + $0x2ecc] ss:$16 sps:$4 sm:$0xff]  }
 0x62f   : > { %11042 = vmatpush1.bf16.msra.mxu0 %v16496_v22  ;;  %12067 = vmatpush1.bf16.msra.mxu1 %v16499_v47  ;;  %v16587_v22 = vld [vmem:[%s17099_s2 + $0x2ec0] ss:$16 sps:$4 sm:$0xff]   ;;  %v16590_v47 = vld [vmem:[%s17099_s2 + $0x2ec8] ss:$16 sps:$4 sm:$0xff]  }
 0x630   : > { %11043 = vmatprep.subr.bf16.mxu0 %v16504_v50  ;;  %12068 = vmatprep.subr.bf16.mxu1 %v16507_v15  ;;  %v16595_v50 = vld [vmem:[%s17099_s2 + $0x2ee4] ss:$16 sps:$4 sm:$0xff]   ;;  %v16598_v15 = vld [vmem:[%s17099_s2 + $0x2eec] ss:$16 sps:$4 sm:$0xff]  }
 0x633   : > { %11044 = vmatpush1.bf16.msra.mxu0 %v16502_v53  ;;  %12069 = vmatpush1.bf16.msra.mxu1 %v16505_v54  ;;  %v16593_v53 = vld [vmem:[%s17099_s2 + $0x2ee0] ss:$16 sps:$4 sm:$0xff]   ;;  %v16596_v54 = vld [vmem:[%s17099_s2 + $0x2ee8] ss:$16 sps:$4 sm:$0xff]  }
 0x634   : > { %11045 = vmatprep.subr.bf16.mxu0 %v16510_v34  ;;  %12070 = vmatprep.subr.bf16.mxu1 %v16513_v55  ;;  %v16601_v34 = vld [vmem:[%s17099_s2 + $0x2f04] ss:$16 sps:$4 sm:$0xff]   ;;  %v16604_v55 = vld [vmem:[%s17099_s2 + $0x2f0c] ss:$16 sps:$4 sm:$0xff]  }
 0x637   : > { %11046 = vmatpush1.bf16.msra.mxu0 %v16508_v38  ;;  %12071 = vmatpush1.bf16.msra.mxu1 %v16511_v45  ;;  %v16599_v38 = vld [vmem:[%s17099_s2 + $0x2f00] ss:$16 sps:$4 sm:$0xff]   ;;  %v16602_v45 = vld [vmem:[%s17099_s2 + $0x2f08] ss:$16 sps:$4 sm:$0xff]  }
 0x638   : > { %11047 = vmatprep.subr.bf16.mxu0 %v16516_v57  ;;  %12072 = vmatprep.subr.bf16.mxu1 %v16519_v58  ;;  %v16607_v57 = vld [vmem:[%s17099_s2 + $0x2f24] ss:$16 sps:$4 sm:$0xff]   ;;  %v16610_v58 = vld [vmem:[%s17099_s2 + $0x2f2c] ss:$16 sps:$4 sm:$0xff]  }
 0x63b   : > { %11048 = vmatpush1.bf16.msra.mxu0 %v16514_v59  ;;  %12073 = vmatpush1.bf16.msra.mxu1 %v16517_v62  ;;  %v16605_v59 = vld [vmem:[%s17099_s2 + $0x2f20] ss:$16 sps:$4 sm:$0xff]   ;;  %v16608_v62 = vld [vmem:[%s17099_s2 + $0x2f28] ss:$16 sps:$4 sm:$0xff]  }
 0x63c   : > { %11049 = vmatprep.subr.bf16.mxu0 %v16522_v0  ;;  %12074 = vmatprep.subr.bf16.mxu1 %v16525_v1  ;;  %v16613_v0 = vld [vmem:[%s17099_s2 + $0x2f44] ss:$16 sps:$4 sm:$0xff]   ;;  %v16616_v1 = vld [vmem:[%s17099_s2 + $0x2f4c] ss:$16 sps:$4 sm:$0xff]  }
 0x63f   : > { %11050 = vmatpush1.bf16.msra.mxu0 %v16520_v51  ;;  %12075 = vmatpush1.bf16.msra.mxu1 %v16523_v35  ;;  %v16611_v51 = vld [vmem:[%s17099_s2 + $0x2f40] ss:$16 sps:$4 sm:$0xff]   ;;  %v16614_v35 = vld [vmem:[%s17099_s2 + $0x2f48] ss:$16 sps:$4 sm:$0xff]  }
 0x640   : > { %11051 = vmatprep.subr.bf16.mxu0 %v16528_v2  ;;  %12076 = vmatprep.subr.bf16.mxu1 %v16531_v3  ;;  %v16619_v2 = vld [vmem:[%s17099_s2 + $0x2f64] ss:$16 sps:$4 sm:$0xff]   ;;  %v16622_v3 = vld [vmem:[%s17099_s2 + $0x2f6c] ss:$16 sps:$4 sm:$0xff]  }
 0x643   : > { %11052 = vmatpush1.bf16.msra.mxu0 %v16526_v48  ;;  %12077 = vmatpush1.bf16.msra.mxu1 %v16529_v4  ;;  %v16617_v48 = vld [vmem:[%s17099_s2 + $0x2f60] ss:$16 sps:$4 sm:$0xff]   ;;  %v16620_v4 = vld [vmem:[%s17099_s2 + $0x2f68] ss:$16 sps:$4 sm:$0xff]  }
 0x644   : > { %11053 = vmatprep.subr.bf16.mxu0 %v16534_v5  ;;  %12078 = vmatprep.subr.bf16.mxu1 %v16537_v46  ;;  %v16625_v5 = vld [vmem:[%s17099_s2 + $0x2f84] ss:$16 sps:$4 sm:$0xff]   ;;  %v16628_v46 = vld [vmem:[%s17099_s2 + $0x2f8c] ss:$16 sps:$4 sm:$0xff]  }
 0x647   : > { %11054 = vmatpush1.bf16.msra.mxu0 %v16532_v9  ;;  %12079 = vmatpush1.bf16.msra.mxu1 %v16535_v11  ;;  %v16623_v9 = vld [vmem:[%s17099_s2 + $0x2f80] ss:$16 sps:$4 sm:$0xff]   ;;  %v16626_v11 = vld [vmem:[%s17099_s2 + $0x2f88] ss:$16 sps:$4 sm:$0xff]  }
 0x648   : > { %11055 = vmatprep.subr.bf16.mxu0 %v16540_v56  ;;  %12080 = vmatprep.subr.bf16.mxu1 %v16543_v14  ;;  %v16631_v56 = vld [vmem:[%s17099_s2 + $0x2fa4] ss:$16 sps:$4 sm:$0xff]   ;;  %v16634_v14 = vld [vmem:[%s17099_s2 + $0x2fac] ss:$16 sps:$4 sm:$0xff]  }
 0x64b   : > { %11056 = vmatpush1.bf16.msra.mxu0 %v16538_v63  ;;  %12081 = vmatpush1.bf16.msra.mxu1 %v16541_v61  ;;  %v16629_v63 = vld [vmem:[%s17099_s2 + $0x2fa0] ss:$16 sps:$4 sm:$0xff]   ;;  %v16632_v61 = vld [vmem:[%s17099_s2 + $0x2fa8] ss:$16 sps:$4 sm:$0xff]  }
 0x64c   : > { %11057 = vmatprep.subr.bf16.mxu0 %v16546_v16  ;;  %12082 = vmatprep.subr.bf16.mxu1 %v16549_v52  ;;  %v16637_v16 = vld [vmem:[%s17099_s2 + $0x2fc4] ss:$16 sps:$4 sm:$0xff]   ;;  %v16640_v52 = vld [vmem:[%s17099_s2 + $0x2fcc] ss:$16 sps:$4 sm:$0xff]  }
 0x64f   : > { %11058 = vmatpush1.bf16.msra.mxu0 %v16544_v17  ;;  %12083 = vmatpush1.bf16.msra.mxu1 %v16547_v6  ;;  %v16635_v17 = vld [vmem:[%s17099_s2 + $0x2fc0] ss:$16 sps:$4 sm:$0xff]   ;;  %v16638_v6 = vld [vmem:[%s17099_s2 + $0x2fc8] ss:$16 sps:$4 sm:$0xff]  }
 0x650   : > { %11068 = vmatprep.subr.bf16.mxu0 %v16553_v8  ;;  %12093 = vmatprep.subr.bf16.mxu1 %v16556_v18  ;;  %v16643_v8 = vld [vmem:[%s17099_s2 + $0x2fe4] ss:$16 sps:$4 sm:$0xff]   ;;  %v16646_v18 = vld [vmem:[%s17099_s2 + $0x2fec] ss:$16 sps:$4 sm:$0xff]  }
 0x652   : > { %11060 = vmatmul.mubr.bf16.vlgmr.msra.gmra.mrb[0].mxu0 %v18861_v7  ;;  %12085 = vmatmul.mubr.bf16.vlgmr.msra.gmra.mrb[0].mxu1 %v18861_v7 }
 0x653   : > { %11069 = vmatpush1.bf16.msra.mxu0 %v16551_v13  ;;  %12094 = vmatpush1.bf16.msra.mxu1 %v16554_v23  ;;  %v16641_v13 = vld [vmem:[%s17099_s2 + $0x2fe0] ss:$16 sps:$4 sm:$0xff]   ;;  %v16644_v23 = vld [vmem:[%s17099_s2 + $0x2fe8] ss:$16 sps:$4 sm:$0xff]  }
 0x654   : > { %11070 = vmatprep.subr.bf16.mxu0 %v16559_v24  ;;  %12095 = vmatprep.subr.bf16.mxu1 %v16562_v60  ;;  %v16649_v24 = vld [vmem:[%s17099_s2 + $0x3004] ss:$16 sps:$4 sm:$0xff]   ;;  %v16652_v60 = vld [vmem:[%s17099_s2 + $0x300c] ss:$16 sps:$4 sm:$0xff]  }
 0x655   : > { %11100 = vmatprep.mubr.bf16.mxu0 %v2221_v27  ;;  %12125 = vmatprep.mubr.bf16.mxu1 %v2221_v27  ;;  %v2219_v27 = vcombine.high %v18861_v7, %v18861_v7  ;;  %v16656_v7 = vld [vmem:[%s17099_s2 + $0x3028] ss:$16 sps:$4 sm:$0xff]  }
 0x657   : > { %11071 = vmatpush1.bf16.msra.mxu0 %v16557_v12  ;;  %12096 = vmatpush1.bf16.msra.mxu1 %v16560_v28  ;;  %v16647_v12 = vld [vmem:[%s17099_s2 + $0x3000] ss:$16 sps:$4 sm:$0xff]   ;;  %v16650_v28 = vld [vmem:[%s17099_s2 + $0x3008] ss:$16 sps:$4 sm:$0xff]  }
 0x658   : > { %11072 = vmatprep.subr.bf16.mxu0 %v16565_v10  ;;  %12097 = vmatprep.subr.bf16.mxu1 %v16568_v29  ;;  %v16655_v10 = vld [vmem:[%s17099_s2 + $0x3024] ss:$16 sps:$4 sm:$0xff]   ;;  %v16658_v29 = vld [vmem:[%s17099_s2 + $0x302c] ss:$16 sps:$4 sm:$0xff]  }
 0x65b   : > { %11073 = vmatpush1.bf16.msra.mxu0 %v16563_v19  ;;  %12098 = vmatpush1.bf16.msra.mxu1 %v16566_v30  ;;  %v16653_v19 = vld [vmem:[%s17099_s2 + $0x3020] ss:$16 sps:$4 sm:$0xff]   ;;  %v16661_v30 = vld [vmem:[%s17099_s2 + $0x3044] ss:$16 sps:$4 sm:$0xff]  }
 0x65c   : > { %11074 = vmatprep.subr.bf16.mxu0 %v16571_v20  ;;  %12099 = vmatprep.subr.bf16.mxu1 %v16574_v31  ;;  %v16664_v20 = vld [vmem:[%s17099_s2 + $0x304c] ss:$16 sps:$4 sm:$0xff]   ;;  %v16883_v31 = vmov 0  }
 0x65f   : > { %11075 = vmatpush1.bf16.msra.mxu0 %v16569_v32  ;;  %12100 = vmatpush1.bf16.msra.mxu1 %v16572_v25  ;;  %v16659_v32 = vld [vmem:[%s17099_s2 + $0x3040] ss:$16 sps:$4 sm:$0xff]   ;;  %v16662_v25 = vld [vmem:[%s17099_s2 + $0x3048] ss:$16 sps:$4 sm:$0xff]  }
 0x660   : > { %11076 = vmatprep.subr.bf16.mxu0 %v16577_v36  ;;  %12101 = vmatprep.subr.bf16.mxu1 %v16580_v37  ;;  %v16667_v36 = vld [vmem:[%s17099_s2 + $0x3064] ss:$16 sps:$4 sm:$0xff]   ;;  %v16670_v37 = vld [vmem:[%s17099_s2 + $0x306c] ss:$16 sps:$4 sm:$0xff]  }
 0x663   : > { %11077 = vmatpush1.bf16.msra.mxu0 %v16575_v39  ;;  %12102 = vmatpush1.bf16.msra.mxu1 %v16578_v26  ;;  %v16665_v39 = vld [vmem:[%s17099_s2 + $0x3060] ss:$16 sps:$4 sm:$0xff]   ;;  %v16668_v26 = vld [vmem:[%s17099_s2 + $0x3068] ss:$16 sps:$4 sm:$0xff]  }
 0x664   : > { %11078 = vmatprep.subr.bf16.mxu0 %v16583_v40  ;;  %12103 = vmatprep.subr.bf16.mxu1 %v16586_v21  ;;  %v16673_v40 = vld [vmem:[%s17099_s2 + $0x3084] ss:$16 sps:$4 sm:$0xff]   ;;  %v16676_v21 = vld [vmem:[%s17099_s2 + $0x308c] ss:$16 sps:$4 sm:$0xff]  }
 0x667   : > { %11079 = vmatpush1.bf16.msra.mxu0 %v16581_v41  ;;  %12104 = vmatpush1.bf16.msra.mxu1 %v16584_v33  ;;  %v16671_v41 = vld [vmem:[%s17099_s2 + $0x3080] ss:$16 sps:$4 sm:$0xff]   ;;  %v16674_v33 = vld [vmem:[%s17099_s2 + $0x3088] ss:$16 sps:$4 sm:$0xff]  }
 0x668   : > { %11080 = vmatprep.subr.bf16.mxu0 %v16589_v42  ;;  %12105 = vmatprep.subr.bf16.mxu1 %v16592_v44  ;;  %v16679_v42 = vld [vmem:[%s17099_s2 + $0x30a4] ss:$16 sps:$4 sm:$0xff]   ;;  %v16682_v44 = vld [vmem:[%s17099_s2 + $0x30ac] ss:$16 sps:$4 sm:$0xff]  }
 0x66b   : > { %11081 = vmatpush1.bf16.msra.mxu0 %v16587_v22  ;;  %12106 = vmatpush1.bf16.msra.mxu1 %v16590_v47  ;;  %v16677_v22 = vld [vmem:[%s17099_s2 + $0x30a0] ss:$16 sps:$4 sm:$0xff]   ;;  %v16680_v47 = vld [vmem:[%s17099_s2 + $0x30a8] ss:$16 sps:$4 sm:$0xff]  }
 0x66c   : > { %11082 = vmatprep.subr.bf16.mxu0 %v16595_v50  ;;  %12107 = vmatprep.subr.bf16.mxu1 %v16598_v15  ;;  %v16685_v50 = vld [vmem:[%s17099_s2 + $0x30c4] ss:$16 sps:$4 sm:$0xff]   ;;  %v16688_v15 = vld [vmem:[%s17099_s2 + $0x30cc] ss:$16 sps:$4 sm:$0xff]  }
 0x66f   : > { %11083 = vmatpush1.bf16.msra.mxu0 %v16593_v53  ;;  %12108 = vmatpush1.bf16.msra.mxu1 %v16596_v54  ;;  %v16683_v53 = vld [vmem:[%s17099_s2 + $0x30c0] ss:$16 sps:$4 sm:$0xff]   ;;  %v16686_v54 = vld [vmem:[%s17099_s2 + $0x30c8] ss:$16 sps:$4 sm:$0xff]  }
 0x670   : > { %11084 = vmatprep.subr.bf16.mxu0 %v16601_v34  ;;  %12109 = vmatprep.subr.bf16.mxu1 %v16604_v55  ;;  %v16691_v34 = vld [vmem:[%s17099_s2 + $0x30e4] ss:$16 sps:$4 sm:$0xff]   ;;  %v16694_v55 = vld [vmem:[%s17099_s2 + $0x30ec] ss:$16 sps:$4 sm:$0xff]  }
 0x673   : > { %11085 = vmatpush1.bf16.msra.mxu0 %v16599_v38  ;;  %12110 = vmatpush1.bf16.msra.mxu1 %v16602_v45  ;;  %v16689_v38 = vld [vmem:[%s17099_s2 + $0x30e0] ss:$16 sps:$4 sm:$0xff]   ;;  %v16692_v45 = vld [vmem:[%s17099_s2 + $0x30e8] ss:$16 sps:$4 sm:$0xff]  }
 0x674   : > { %11086 = vmatprep.subr.bf16.mxu0 %v16607_v57  ;;  %12111 = vmatprep.subr.bf16.mxu1 %v16610_v58  ;;  %v12506_v57 = vld.sshfl [vmem:[%s19030_s0 + $0x30] sm:$0x1 pattern:$0x75316420] }
 0x675   : > { %v2235_v58 = vrot.slane %v12506_v57, %v17166_v49 }
 0x677   : > { %11087 = vmatpush1.bf16.msra.mxu0 %v16605_v59  ;;  %12112 = vmatpush1.bf16.msra.mxu1 %v16608_v62 }
 0x678   : > { %11088 = vmatprep.subr.bf16.mxu0 %v16613_v0  ;;  %12113 = vmatprep.subr.bf16.mxu1 %v16616_v1 }
 0x67b   : > { %11089 = vmatpush1.bf16.msra.mxu0 %v16611_v51  ;;  %12114 = vmatpush1.bf16.msra.mxu1 %v16614_v35 }
 0x67c   : > { %11090 = vmatprep.subr.bf16.mxu0 %v16619_v2  ;;  %12115 = vmatprep.subr.bf16.mxu1 %v16622_v3 }
 0x67f   : > { %11091 = vmatpush1.bf16.msra.mxu0 %v16617_v48  ;;  %12116 = vmatpush1.bf16.msra.mxu1 %v16620_v4 }
 0x680   : > { %11092 = vmatprep.subr.bf16.mxu0 %v16625_v5  ;;  %12117 = vmatprep.subr.bf16.mxu1 %v16628_v46 }
 0x683   : > { %11093 = vmatpush1.bf16.msra.mxu0 %v16623_v9  ;;  %12118 = vmatpush1.bf16.msra.mxu1 %v16626_v11 }
 0x684   : > { %11094 = vmatprep.subr.bf16.mxu0 %v16631_v56  ;;  %12119 = vmatprep.subr.bf16.mxu1 %v16634_v14 }
 0x687   : > { %11095 = vmatpush1.bf16.msra.mxu0 %v16629_v63  ;;  %12120 = vmatpush1.bf16.msra.mxu1 %v16632_v61 }
 0x688   : > { %11096 = vmatprep.subr.bf16.mxu0 %v16637_v16  ;;  %12121 = vmatprep.subr.bf16.mxu1 %v16640_v52 }
 0x68b   : > { %11097 = vmatpush1.bf16.msra.mxu0 %v16635_v17  ;;  %12122 = vmatpush1.bf16.msra.mxu1 %v16638_v6 }
 0x68c   : > { %11098 = vmatprep.subr.bf16.mxu0 %v16643_v8  ;;  %12123 = vmatprep.subr.bf16.mxu1 %v16646_v18 }
 0x68f   : > { %11099 = vmatpush1.bf16.msra.mxu0 %v16641_v13  ;;  %12124 = vmatpush1.bf16.msra.mxu1 %v16644_v23 }
 0x690   : > { %11109 = vmatprep.subr.bf16.mxu0 %v16649_v24  ;;  %12134 = vmatprep.subr.bf16.mxu1 %v16652_v60 }
 0x692   : > { %11101 = vmatmul.mubr.bf16.vlgmr.msra.gmra.mrb[0].mxu0 %v2219_v27  ;;  %12126 = vmatmul.mubr.bf16.vlgmr.msra.gmra.mrb[0].mxu1 %v2219_v27 }
 0x693   : > { %11110 = vmatpush1.bf16.msra.mxu0 %v16647_v12  ;;  %12135 = vmatpush1.bf16.msra.mxu1 %v16650_v28 }
 0x694   : > { %11111 = vmatprep.subr.bf16.mxu0 %v16655_v10  ;;  %12136 = vmatprep.subr.bf16.mxu1 %v16658_v29 }
 0x695   : > { %11141 = vmatprep.mubr.bf16.mxu0 %v16883_v31  ;;  %12166 = vmatprep.mubr.bf16.mxu1 %v16883_v31 }
 0x697   : > { %11112 = vmatpush1.bf16.msra.mxu0 %v16653_v19  ;;  %12137 = vmatpush1.bf16.msra.mxu1 %v16656_v7 }
 0x698   : > { %11113 = vmatprep.subr.bf16.mxu0 %v16661_v30  ;;  %12138 = vmatprep.subr.bf16.mxu1 %v16664_v20 }
 0x69b   : > { %11114 = vmatpush1.bf16.msra.mxu0 %v16659_v32  ;;  %12139 = vmatpush1.bf16.msra.mxu1 %v16662_v25 }
 0x69c   : > { %11115 = vmatprep.subr.bf16.mxu0 %v16667_v36  ;;  %12140 = vmatprep.subr.bf16.mxu1 %v16670_v37 }
 0x69f   : > { %11116 = vmatpush1.bf16.msra.mxu0 %v16665_v39  ;;  %12141 = vmatpush1.bf16.msra.mxu1 %v16668_v26 }
 0x6a0   : > { %11117 = vmatprep.subr.bf16.mxu0 %v16673_v40  ;;  %12142 = vmatprep.subr.bf16.mxu1 %v16676_v21 }
 0x6a3   : > { %11118 = vmatpush1.bf16.msra.mxu0 %v16671_v41  ;;  %12143 = vmatpush1.bf16.msra.mxu1 %v16674_v33 }
 0x6a4   : > { %11119 = vmatprep.subr.bf16.mxu0 %v16679_v42  ;;  %12144 = vmatprep.subr.bf16.mxu1 %v16682_v44 }
 0x6a7   : > { %11120 = vmatpush1.bf16.msra.mxu0 %v16677_v22  ;;  %12145 = vmatpush1.bf16.msra.mxu1 %v16680_v47 }
 0x6a8   : > { %11121 = vmatprep.subr.bf16.mxu0 %v16685_v50  ;;  %12146 = vmatprep.subr.bf16.mxu1 %v16688_v15 }
 0x6ab   : > { %11122 = vmatpush1.bf16.msra.mxu0 %v16683_v53  ;;  %12147 = vmatpush1.bf16.msra.mxu1 %v16686_v54 }
 0x6ac   : > { %11123 = vmatprep.subr.bf16.mxu0 %v16691_v34  ;;  %12148 = vmatprep.subr.bf16.mxu1 %v16694_v55 }
 0x6af   : > { %11124 = vmatpush1.bf16.msra.mxu0 %v16689_v38  ;;  %12149 = vmatpush1.bf16.msra.mxu1 %v16692_v45 }
 0x6b2   : > { %11142 = vmatmul.mubr.bf16.vlgmr.msra.gmra.mrb[0].mxu0 %v2235_v58  ;;  %12167 = vmatmul.mubr.bf16.vlgmr.msra.gmra.mrb[0].mxu1 %v2235_v58 }
 0x785   : > { %v11143_v59 = vpop.f32.mrb[0].mxu0  ;;  %v12168_v62 = vpop.f32.mrb[0].mxu1 }
 0x786   : > { %v12176_v0 = vsel %vm12175_vm0, %v11143_v59, 0.0  ;;  %v12190_v1 = vsel %vm12175_vm0, %v12168_v62, 0.0  ;;  %v11145_v51 = vpop.f32.mrb[1].mxu0  ;;  %v12170_v35 = vpop.f32.mrb[1].mxu1 }
 0x787   : > { %v12177_v2 = vrot.slane %v12176_v0, 4  ;;  %v12191_v3 = vrot.slane %v12190_v1, 4  ;;  %v12183_v48 = vsel %vm12175_vm0, %v11145_v51, 0.0  ;;  %v12197_v4 = vsel %vm12175_vm0, %v12170_v35, 0.0  ;;  %v11147_v49 = vpop.f32.mrb[2].mxu0  ;;  %v12172_v5 = vpop.f32.mrb[2].mxu1 }
 0x788   : > { %v12184_v46 = vrot.slane %v12183_v48, 4  ;;  %v12198_v9 = vrot.slane %v12197_v4, 4  ;;  %v11148_v11 = vpop.f32.mrb[3].mxu0  ;;  %v12173_v56 = vpop.f32.mrb[3].mxu1 }
 0x789   : > { %v12178_v14 = vadd.f32 %v12177_v2, %v12176_v0  ;;  %v12192_v63 = vadd.f32 %v12191_v3, %v12190_v1 }
 0x78a   : > { %v12185_v61 = vadd.f32 %v12184_v46, %v12183_v48  ;;  %v12199_v16 = vadd.f32 %v12198_v9, %v12197_v4 }
 0x78b   : > { %v12179_v52 = vrot.slane %v12178_v14, 2  ;;  %v12193_v17 = vrot.slane %v12192_v63, 2 }
 0x78c   : > { %v12186_v6 = vrot.slane %v12185_v61, 2  ;;  %v12200_v8 = vrot.slane %v12199_v16, 2 }
 0x78d   : > { %v12180_v18 = vadd.f32 %v12179_v52, %v12178_v14  ;;  %v12194_v13 = vadd.f32 %v12193_v17, %v12192_v63  ;;  %v12265_v17 = vsub.s32 0, %v17158_v43 }
 0x78e   : > { %v12187_v23 = vadd.f32 %v12186_v6, %v12185_v61  ;;  %v12201_v24 = vadd.f32 %v12200_v8, %v12199_v16  ;;  %v12261_v6 = vld [vmem:[%s286_s18] sm:$0xf]  ;;  %v12273_v8 = vsub.s32 2, %v17158_v43 }
 0x78f   : > { %v12181_v60 = vrot.slane %v12180_v18, 1  ;;  %v12195_v27 = vrot.slane %v12194_v13, 1 }
 0x790   : > { %v12188_v12 = vrot.slane %v12187_v23, 1  ;;  %v12202_v28 = vrot.slane %v12201_v24, 1 }
 0x791   : > { %v12182_v10 = vadd.f32 %v12181_v60, %v12180_v18  ;;  %v12196_v29 = vadd.f32 %v12195_v27, %v12194_v13  ;;  %v12269_v18 = vsub.s32 1, %v17158_v43  ;;  %v12287_v13 = vld [vmem:[%s295_s24] sm:$0xf]  ;;  %v12274_v27 = vrot.slane %v12261_v6, %v12273_v8 }
 0x792   : > { %v12189_v19 = vadd.f32 %v12188_v12, %v12187_v23  ;;  %v12203_v7 = vadd.f32 %v12202_v28, %v12201_v24  ;;  %v12277_v23 = vsub.s32 3, %v17158_v43  ;;  %v12266_v24 = vrot.slane %v12261_v6, %v12265_v17 }
 0x793   : > { %v12205_v30 = vmul.f32 0.5, %v12182_v10  ;;  %v12207_v20 = vmul.f32 0.5, %v12196_v29  ;;  %v12292_v10 = vrot.slane %v12287_v13, %v12265_v17  ;;  %v12270_v29 = vrot.slane %v12261_v6, %v12269_v18 }
 0x794   : > { %v12206_v31 = vmul.f32 0.5, %v12189_v19  ;;  %v12208_v32 = vmul.f32 0.5, %v12203_v7 }
 0x795   : > { %v12209_v25 = vsub.f32 %v11143_v59, %v12205_v30  ;;  %v12211_v36 = vsub.f32 %v12168_v62, %v12207_v20  ;;  %v12300_v30 = vrot.slane %v12287_v13, %v12273_v8  ;;  %v12278_v20 = vrot.slane %v12261_v6, %v12277_v23 }
 0x796   : > { %v18971_v37 = vsub.f32 %v11145_v51, %v12206_v31  ;;  %v18973_v39 = vsub.f32 %v12170_v35, %v12208_v32 }
 0x797   : > { %v12213_v26 = vmul.f32 %v12209_v25, %v12209_v25  ;;  %v12215_v40 = vmul.f32 %v12211_v36, %v12211_v36 }
 0x798   : > { %v12214_v21 = vmul.f32 %v18971_v37, %v18971_v37  ;;  %v12216_v41 = vmul.f32 %v18973_v39, %v18973_v39 }
 0x799   : > { %v12217_v33 = vsel %vm12175_vm0, %v12213_v26, 0.0  ;;  %v12231_v42 = vsel %vm12175_vm0, %v12215_v40, 0.0  ;;  %v12296_v40 = vrot.slane %v12287_v13, %v12269_v18 }
 0x79a   : > { %v12218_v44 = vrot.slane %v12217_v33, 4  ;;  %v12232_v22 = vrot.slane %v12231_v42, 4  ;;  %v12224_v47 = vsel %vm12175_vm0, %v12214_v21, 0.0  ;;  %v12238_v50 = vsel %vm12175_vm0, %v12216_v41, 0.0 }
 0x79b   : > { %v12225_v15 = vrot.slane %v12224_v47, 4  ;;  %v12239_v53 = vrot.slane %v12238_v50, 4  ;;  %v12304_v41 = vrot.slane %v12287_v13, %v12277_v23 }
 0x79c   : > { %v12219_v54 = vadd.f32 %v12218_v44, %v12217_v33  ;;  %v12233_v34 = vadd.f32 %v12232_v22, %v12231_v42  ;;  %v12321_v33 = vld [vmem:[%s304_s25] sm:$0xf] }
 0x79d   : > { %v12226_v55 = vadd.f32 %v12225_v15, %v12224_v47  ;;  %v12240_v38 = vadd.f32 %v12239_v53, %v12238_v50 }
 0x79e   : > { %v12220_v45 = vrot.slane %v12219_v54, 2  ;;  %v12234_v57 = vrot.slane %v12233_v34, 2 }
 0x79f   : > { %v12227_v58 = vrot.slane %v12226_v55, 2  ;;  %v12241_v59 = vrot.slane %v12240_v38, 2 }
 0x7a0   : > { %v12221_v62 = vadd.f32 %v12220_v45, %v12219_v54  ;;  %v12235_v0 = vadd.f32 %v12234_v57, %v12233_v34 }
 0x7a1   : > { %v12228_v1 = vadd.f32 %v12227_v58, %v12226_v55  ;;  %v12242_v51 = vadd.f32 %v12241_v59, %v12240_v38  ;;  %v12330_v55 = vrot.slane %v12321_v33, %v12269_v18 }
 0x7a2   : > { %v12222_v35 = vrot.slane %v12221_v62, 1  ;;  %v12236_v2 = vrot.slane %v12235_v0, 1 }
 0x7a3   : > { %v12229_v3 = vrot.slane %v12228_v1, 1  ;;  %v12243_v48 = vrot.slane %v12242_v51, 1 }
 0x7a4   : > { %v12223_v4 = vadd.f32 %v12222_v35, %v12221_v62  ;;  %v12237_v49 = vadd.f32 %v12236_v2, %v12235_v0 }
 0x7a5   : > { %v12230_v5 = vadd.f32 %v12229_v3, %v12228_v1  ;;  %v12244_v46 = vadd.f32 %v12243_v48, %v12242_v51 }
 0x7a6   : > { %v12245_v9 = vmul.f32 0.5, %v12223_v4  ;;  %v12247_v11 = vmul.f32 0.5, %v12237_v49 }
 0x7a7   : > { %v12246_v56 = vmul.f32 0.5, %v12230_v5  ;;  %v12248_v14 = vmul.f32 0.5, %v12244_v46 }
 0x7a8   : > { %v12249_v63 = vadd.f32 1e-05, %v12245_v9  ;;  %v12251_v61 = vadd.f32 1e-05, %v12247_v11 }
 0x7a9   : > { %v12250_v16 = vadd.f32 1e-05, %v12246_v56  ;;  %v12252_v52 = vadd.f32 1e-05, %v12248_v14 }
 0x7aa   : > { %16695 = vrsqrt.f32 %v12249_v63 }
 0x7ab   : > { %16697 = vrsqrt.f32 %v12251_v61 }
 0x7ac   : > { %16699 = vrsqrt.f32 %v12250_v16 }
 0x7ad   : > { %16701 = vrsqrt.f32 %v12252_v52 }
 0x7b4   : > { %v16696_v60 = vpop.eup %16695 }
 0x7b5   : > { %v16698_v12 = vpop.eup %16697  ;;  %v12257_v28 = vmul.f32 %v16696_v60, %v12209_v25 }
 0x7b6   : > { %v16700_v19 = vpop.eup %16699  ;;  %v12259_v7 = vmul.f32 %v16698_v12, %v12211_v36  ;;  %v12326_v36 = vrot.slane %v12321_v33, %v12265_v17 }
 0x7b7   : > { %v16702_v31 = vpop.eup %16701  ;;  %v12283_v32 = vmul.f32 %v12266_v24, %v12257_v28  ;;  %v12258_v26 = vmul.f32 %v16700_v19, %v18971_v37  ;;  %v12334_v37 = vrot.slane %v12321_v33, %v12273_v8 }
 0x7b8   : > { %v12285_v21 = vmul.f32 %v12274_v27, %v12259_v7  ;;  %v12260_v43 = vmul.f32 %v16702_v31, %v18973_v39  ;;  %v12338_v39 = vrot.slane %v12321_v33, %v12277_v23 }
 0x7b9   : > { %v12309_v42 = vadd.f32 %v12292_v10, %v12283_v32  ;;  %v12284_v44 = vmul.f32 %v12270_v29, %v12258_v26 }
 0x7ba   : > { %v12311_v25 = vadd.f32 %v12300_v30, %v12285_v21  ;;  %v12286_v22 = vmul.f32 %v12278_v20, %v12260_v43 }
 0x7bb   : > { %v12313_v47 = vmul.f32 0.1, %v12309_v42  ;;  %v12310_v50 = vadd.f32 %v12296_v40, %v12284_v44 }
 0x7bc   : > { %v12312_v15 = vadd.f32 %v12304_v41, %v12286_v22  ;;  %v12315_v53 = vmul.f32 0.1, %v12311_v25 }
 0x7bd   : > { %v12314_v54 = vmul.f32 0.1, %v12310_v50  ;;  %v12317_v34 = vmax.f32 %v12309_v42, %v12313_v47 }
 0x7be   : > { %v12316_v38 = vmul.f32 0.1, %v12312_v15  ;;  %v12319_v45 = vmax.f32 %v12311_v25, %v12315_v53 }
 0x7bf   : > { %v12318_v57 = vmax.f32 %v12310_v50, %v12314_v54  ;;  %v12343_v58 = vmul.f32 %v12326_v36, %v12317_v34 }
 0x7c0   : > { %v12320_v59 = vmax.f32 %v12312_v15, %v12316_v38  ;;  %v12345_v0 = vmul.f32 %v12334_v37, %v12319_v45 }
 0x7c1   : > { %v12344_v62 = vmul.f32 %v12330_v55, %v12318_v57  ;;  %v12347_v1 = vsel %vm12175_vm0, %v12343_v58, 0.0 }
 0x7c2   : > { %v12346_v51 = vmul.f32 %v12338_v39, %v12320_v59  ;;  %v12350_v3 = vsel %vm12175_vm0, %v12345_v0, 0.0 }
 0x7c3   : > { %v12348_v35 = vsel %vm12175_vm0, %v12344_v62, 0.0 }
 0x7c4   : > { %v12349_v2 = vadd.f32 %v12348_v35, %v12347_v1  ;;  %v12352_v4 = vsel %vm12175_vm0, %v12346_v51, 0.0 }
 0x7c6   : > { %v12351_v48 = vadd.f32 %v12350_v3, %v12349_v2 }
 0x7c8   : > { %v12353_v49 = vadd.f32 %v12352_v4, %v12351_v48 }
 0x7ca   : > { %12354 = vadd.xlane.f32.xlu0 %v12353_v49 }
 0x851   : > { %12359 = sbr.rel (%p14075_p13) target bundleno = 2137 (0x859), region = 60 }
 0x857   : > { %v12355_v5 = vpop.xlane.xlu0 %12354 }
 0x858   : > { %12361 = vst.msk [vmem:[%s19035_s5] sm:$0x3] %vm12360_vm1, %v12355_v5 }
 0x859 PF: > { %p14076_p7 = scmp.le.s32.totalorder %s16933_s22, 0 }
 0x85a   : > { %vm12368_vm2 = vcmask (!%p14076_p7), 1024  }
 0x85b   : > { %12365 = sbr.rel (%p14076_p7) target bundleno = 2147 (0x863), region = 64 }
 0x85f   : > { %v12366_v46 = vld [vmem:[%s19035_s5] sm:$0x3] (!%p14076_p7) }
 0x860   : > { %v12367_v9 = vadd.f32 (!%p14076_p7), %v12366_v46, %v12355_v5 }
 0x862   : > { %12369 = vst.msk [vmem:[%s19035_s5] sm:$0x3] %vm12368_vm2, %v12367_v9 }
 0x863 PF: > { %p14077_p3 = scmp.ne.s32.totalorder %s16933_s22, 1 }
 0x864   : > { %vm12381_vm3 = vcmask (!%p14077_p3), 1024  }
 0x865   : > { %12373 = sbr.rel (%p14077_p3) target bundleno = 2183 (0x887), region = 68 }
 0x869   : > { %v12374_v11 = vld [vmem:[%s19035_s5] sm:$0x3] (!%p14077_p3) }
 0x86a   : > { %v12375_v56 = vsub.f32 (!%p14077_p3), 0.0, %v12374_v11 }
 0x86c   : > { %v12376_v14 = vmul.f32 1.442695, %v12375_v56 }
 0x86e   : > { %16705 = vpow2.f32 %v12376_v14 }
 0x878   : > { %v16706_v63 = vpop.eup %16705 }
 0x879   : > { %v12378_v61 = vadd.f32 1.0, %v16706_v63 }
 0x87b   : > { %16707 = vrcp.f32 %v12378_v61 }
 0x885   : > { %v16708_v16 = vpop.eup %16707 }
 0x886   : > { %12382 = vst.msk [vmem:[%s19035_s5] sm:$0x3] %vm12381_vm3, %v16708_v16 }
 0x887 PF: > { %p21_p5 = scmp.ge.s32.totalorder %s16936_s23, 4   ;;  %s19051_s18 = smov %s16865_s19 }
 0x888   : > { %s19052_s19 = smov %s16869_s20  ;;  %s19053_s20 = smov %s16946_s26 }
 0x889   : > { %s19054_s21 = smov %s16936_s23  ;;  %23 = sbr.rel (!%p21_p5) target bundleno = 10 (0xa), region = 125 }
 0x890   :  { %12394 = vsyncpa [#allocation3], 1 }
 0x891   :  { %12396 = vsyncpa [#allocation3 + $0x1], 1 }
 0x892   :  { %12397 = vsyncpa [#allocation5], 1 }
 0x893   :  { %12399 = vsyncpa [#allocation5 + $0x1], 1 }
 0x894   :  { %12400 = vsyncpa [#allocation8], 1 }
 0x895   :  { %12402 = vsyncpa [#allocation8 + $0x1], 1 }

</bundles_post_ra>
